<compile_context>
chip_gen: v5e
topology: v5e:2x2
jax: 0.10.0
libtpu: 0.0.40
codegen_flags: <defaults>
</compile_context>

<pallas_src>
import functools

import jax
import jax.numpy as jnp
from jax import lax
from jax.experimental import pallas as pl
from jax.experimental.pallas import tpu as pltpu

EPS = 1e-5  # PyTorch BatchNorm2d default eps


def _im2col_conv(src_hwc, w_ref, pad_ref, col_ref, H, W, C):
    """3x3 SAME conv of one (H, W, C) image as a single im2col matmul (K = 9*C)."""
    # Zero only the 1-pixel halo frame (interior is fully overwritten below).  Done every grid
    # step so correctness does not depend on which core ran step 0 under "parallel" semantics.
    zrow = jnp.zeros((1, W + 2, C), jnp.float32)
    zcol = jnp.zeros((H + 2, 1, C), jnp.float32)
    pad_ref[0:1, :, :] = zrow
    pad_ref[H + 1:H + 2, :, :] = zrow
    pad_ref[:, 0:1, :] = zcol
    pad_ref[:, W + 1:W + 2, :] = zcol
    pad_ref[1:H + 1, 1:W + 1, :] = src_hwc

    HW = H * W
    for t in range(9):                      # build im2col LHS: tap t -> columns [t*C, (t+1)*C)
        dy, dx = divmod(t, 3)
        col_ref[:, t * C:(t + 1) * C] = pad_ref[dy:dy + H, dx:dx + W, :].reshape(HW, C)
    # One MXU matmul, default precision (bf16 passes), f32 accumulation.
    return jnp.dot(col_ref[...], w_ref[...], preferred_element_type=jnp.float32)


def _partial_stats(y):
    """Per-channel (sum, sum of squares) for one image -> (2, C)."""
    return jnp.concatenate([jnp.sum(y, axis=0, keepdims=True),
                            jnp.sum(y * y, axis=0, keepdims=True)], axis=0)


# ---------------- pass 1: conv1 (im1 folded into weights) + c0 pre-BN mask + nh0 + BN1 partials
def _conv1_kernel(x_ref, w1_ref, im1_ref, c0_ref,
                  nh0_ref, y1_ref, st1_ref,
                  pad_ref, col_ref, *, H, W, Cin, Cout):
    HW = H * W
    x = x_ref[0]                                         # (H, W, Cin)
    nh0_ref[0] = x.reshape(HW, Cin) * im1_ref[...]       # new_history[0] = x * input_mask1
    # conv1 reads raw x: im1 is folded into w1 (channel scaling commutes with zero padding).
    y = _im2col_conv(x, w1_ref, pad_ref, col_ref, H, W, Cin)
    y = y * c0_ref[...]                                  # pre-BN dynamic-channel mask
    y1_ref[0] = y
    st1_ref[0] = _partial_stats(y)                       # one-pass BN1 batch-stat contribution


# ---------------- pass 2: BN1 (batch affine) + mask + ReLU + im2 + conv2 + c1 + BN2 partials
def _bn_relu_conv2_kernel(y1_ref, w2_ref, aff1_ref, msk_ref,
                          nh1_ref, y2_ref, st2_ref,
                          pad_ref, col_ref, *, H, W, C):
    c0 = msk_ref[0:1, :]
    im2 = msk_ref[1:2, :]
    c1 = msk_ref[2:3, :]
    z = y1_ref[0] * aff1_ref[0:1, :] + aff1_ref[1:2, :]  # BN1 with batch stats (folded affine)
    z = jnp.maximum(z * c0, 0.0)                         # bn_channel_mask + ReLU
    ri2 = z * im2                                        # conv2 real_input
    nh1_ref[0] = ri2                                     # new_history[1]
    y = _im2col_conv(ri2.reshape(H, W, C), w2_ref, pad_ref, col_ref, H, W, C)
    y = y * c1                                           # pre-BN dynamic-channel mask
    y2_ref[0] = y
    st2_ref[0] = _partial_stats(y)                       # one-pass BN2 batch-stat contribution


# ---------------- pass 3: BN2 (batch affine) + mask + residual + ReLU
def _bn_residual_kernel(y2_ref, x_ref, aff2_ref, c1_ref, out_ref, *, H, W, C):
    HW = H * W
    z = y2_ref[0] * aff2_ref[0:1, :] + aff2_ref[1:2, :]  # BN2
    z = z * c1_ref[...]                                  # bn_channel_mask
    out_ref[0] = jnp.maximum(z + x_ref[0].reshape(HW, C), 0.0)


def _bn_affine(partial_stats, gamma, beta, count):
    """Fold training-mode BatchNorm (batch mean / biased var) into per-channel scale/shift."""
    s = jnp.sum(partial_stats, axis=0)                   # (2, C): [sum, sum of squares]
    mu = s[0] / count
    var = jnp.maximum(s[1] / count - mu * mu, 0.0)       # one-pass variance, clamp fp noise
    scale = gamma * lax.rsqrt(var + EPS)
    shift = beta - mu * scale
    return jnp.stack([scale, shift])                     # (2, C)


def basic_block_forward(x_nchw, params, masks):
    """BasicBlock.forward(x, history=None, signal=soft, mode_op=2). Returns (out, [nh0, nh1, None])."""
    N, Cin, H, W = x_nchw.shape
    Cout = params["w1"].shape[0]
    assert Cin == Cout, "no-downsample residual requires inplanes == planes"
    HW = H * W
    f32 = jnp.float32

    x_nhwc = jnp.transpose(x_nchw, (0, 2, 3, 1)).astype(f32)   # channels on the lane axis

    # PyTorch (Cout, Cin, 3, 3) -> im2col RHS (9*Cin, Cout); fold im1 into conv1's weights.
    w1_hwio = jnp.transpose(params["w1"], (2, 3, 1, 0)).astype(f32)        # (3,3,Cin,Cout)
    w1_mat = (w1_hwio * masks["im1"].reshape(1, 1, Cin, 1)).reshape(9 * Cin, Cout)
    w2_mat = jnp.transpose(params["w2"], (2, 3, 1, 0)).astype(f32).reshape(9 * Cout, Cout)

    im1 = masks["im1"].reshape(1, Cin).astype(f32)
    c0 = masks["c0"].reshape(1, Cout).astype(f32)
    c1 = masks["c1"].reshape(1, Cout).astype(f32)
    msk = jnp.stack([masks["c0"], masks["im2"], masks["c1"]]).astype(f32)  # (3, Cout)

    cparams = pltpu.CompilerParams(
        dimension_semantics=("parallel",),          # images are independent -> megacore on v7x
        vmem_limit_bytes=32 * 1024 * 1024)          # explicit budget valid on v5e/v6e/v7x

    full2d = lambda shape: pl.BlockSpec(shape, lambda b: (0, 0))
    per_img = lambda c: pl.BlockSpec((1, HW, c), lambda b: (b, 0, 0))
    per_img4 = pl.BlockSpec((1, H, W, Cin), lambda b: (b, 0, 0, 0))
    stats_spec = pl.BlockSpec((1, 2, Cout), lambda b: (b, 0, 0))

    # ---- pass 1
    nh0, y1, st1 = pl.pallas_call(
        functools.partial(_conv1_kernel, H=H, W=W, Cin=Cin, Cout=Cout),
        grid=(N,),
        in_specs=[per_img4, full2d((9 * Cin, Cout)), full2d((1, Cin)), full2d((1, Cout))],
        out_specs=(per_img(Cin), per_img(Cout), stats_spec),
        out_shape=(jax.ShapeDtypeStruct((N, HW, Cin), f32),
                   jax.ShapeDtypeStruct((N, HW, Cout), f32),
                   jax.ShapeDtypeStruct((N, 2, Cout), f32)),
        scratch_shapes=[pltpu.VMEM((H + 2, W + 2, Cin), f32),
                        pltpu.VMEM((HW, 9 * Cin), f32)],
        compiler_params=cparams,
    )(x_nhwc, w1_mat, im1, c0)

    aff1 = _bn_affine(st1, params["gamma1"].astype(f32), params["beta1"].astype(f32), N * HW)

    # ---- pass 2
    nh1, y2, st2 = pl.pallas_call(
        functools.partial(_bn_relu_conv2_kernel, H=H, W=W, C=Cout),
        grid=(N,),
        in_specs=[per_img(Cout), full2d((9 * Cout, Cout)), full2d((2, Cout)), full2d((3, Cout))],
        out_specs=(per_img(Cout), per_img(Cout), stats_spec),
        out_shape=(jax.ShapeDtypeStruct((N, HW, Cout), f32),
                   jax.ShapeDtypeStruct((N, HW, Cout), f32),
                   jax.ShapeDtypeStruct((N, 2, Cout), f32)),
        scratch_shapes=[pltpu.VMEM((H + 2, W + 2, Cout), f32),
                        pltpu.VMEM((HW, 9 * Cout), f32)],
        compiler_params=cparams,
    )(y1, w2_mat, aff1, msk)

    aff2 = _bn_affine(st2, params["gamma2"].astype(f32), params["beta2"].astype(f32), N * HW)

    # ---- pass 3
    out2d = pl.pallas_call(
        functools.partial(_bn_residual_kernel, H=H, W=W, C=Cout),
        grid=(N,),
        in_specs=[per_img(Cout), per_img4, full2d((2, Cout)), full2d((1, Cout))],
        out_specs=per_img(Cout),
        out_shape=jax.ShapeDtypeStruct((N, HW, Cout), f32),
        compiler_params=cparams,
    )(y2, x_nhwc, aff2, c1)

    def to_nchw(a2d, C):
        return jnp.transpose(a2d.reshape(N, H, W, C), (0, 3, 1, 2))

    return to_nchw(out2d, Cout), [to_nchw(nh0, Cin), to_nchw(nh1, Cout), None]


def ref_forward(x_nchw, params, masks):
    """Pure-JAX reference of the same forward (default TPU conv precision, like the kernel)."""
    x = jnp.transpose(x_nchw, (0, 2, 3, 1)).astype(jnp.float32)
    dn = ("NHWC", "HWIO", "NHWC")
    w1 = jnp.transpose(params["w1"], (2, 3, 1, 0))
    w2 = jnp.transpose(params["w2"], (2, 3, 1, 0))

    def bn(y, g, b):
        mu = jnp.mean(y, axis=(0, 1, 2), keepdims=True)
        var = jnp.mean((y - mu) ** 2, axis=(0, 1, 2), keepdims=True)
        return (y - mu) * lax.rsqrt(var + EPS) * g + b

    ri1 = x * masks["im1"]
    y = lax.conv_general_dilated(ri1, w1, (1, 1), "SAME", dimension_numbers=dn)
    y = y * masks["c0"]
    y = bn(y, params["gamma1"], params["beta1"]) * masks["c0"]
    y = jnp.maximum(y, 0.0)
    ri2 = y * masks["im2"]
    z = lax.conv_general_dilated(ri2, w2, (1, 1), "SAME", dimension_numbers=dn)
    z = z * masks["c1"]
    z = bn(z, params["gamma2"], params["beta2"]) * masks["c1"]
    z = jnp.maximum(z + x, 0.0)

    def to_nchw(a):
        return jnp.transpose(a, (0, 3, 1, 2))

    return to_nchw(z), to_nchw(ri1), to_nchw(ri2)


if __name__ == "__main__":
    key = jax.random.PRNGKey(0)
    N, C, H, W = 2, 8, 16, 16          # inplanes == planes == 8, stride=1
    planes = C
    k1, k2, k3, k4, k5, k6, k7 = jax.random.split(key, 7)
    x = jax.random.normal(k1, (N, C, H, W), jnp.float32)
    params = dict(
        w1=0.1 * jax.random.normal(k2, (planes, C, 3, 3), jnp.float32),
        w2=0.1 * jax.random.normal(k3, (planes, planes, 3, 3), jnp.float32),
        gamma1=1.0 + 0.1 * jax.random.normal(k4, (planes,), jnp.float32),
        beta1=0.1 * jax.random.normal(k5, (planes,), jnp.float32),
        gamma2=1.0 + 0.1 * jax.random.normal(k6, (planes,), jnp.float32),
        beta2=0.1 * jax.random.normal(k7, (planes,), jnp.float32),
    )

    # DHS channel masks: mask_book[i, :C*nf//64] = 1, mask = sum_i signal[i] * mask_book[i]
    num_filters_list = [64, 48, 32, 16]
    signal = jnp.array([0.5, 0.5, 0.0, 0.0], jnp.float32)   # soft gating signal

    def channel_mask(Cn):
        book = jnp.stack([(jnp.arange(Cn) < (Cn * nf) // 64).astype(jnp.float32)
                          for nf in num_filters_list])
        return jnp.sum(book * signal[:, None], axis=0)

    masks = dict(im1=channel_mask(C), c0=channel_mask(planes),
                 im2=channel_mask(planes), c1=channel_mask(planes))

    out, new_history = jax.jit(basic_block_forward)(x, params, masks)
    jax.block_until_ready(out)

    out_r, nh0_r, nh1_r = ref_forward(x, params, masks)
    # Both kernel and reference use default (bf16-class MXU) matmul precision -> 3e-2 tolerance.
    assert jnp.allclose(out, out_r, atol=3e-2, rtol=3e-2), "output mismatch"
    assert jnp.allclose(new_history[0], nh0_r, atol=3e-2, rtol=3e-2), "history[0] mismatch"
    assert jnp.allclose(new_history[1], nh1_r, atol=3e-2, rtol=3e-2), "history[1] mismatch"
    assert new_history[2] is None

    print("KERNEL_OK")
</pallas_src>

<mosaic_0001>
module attributes {stable_mosaic.version = 11 : i64} {
  func.func @_bn_relu_conv2_kernel(%arg0: i32, %arg1: memref<1x256x8xf32, #tpu.memory_space<vmem>>, %arg2: memref<72x8xf32, #tpu.memory_space<vmem>>, %arg3: memref<2x8xf32, #tpu.memory_space<vmem>>, %arg4: memref<3x8xf32, #tpu.memory_space<vmem>>, %arg5: memref<1x256x8xf32, #tpu.memory_space<vmem>>, %arg6: memref<1x256x8xf32, #tpu.memory_space<vmem>>, %arg7: memref<1x2x8xf32, #tpu.memory_space<vmem>>, %arg8: memref<18x18x8xf32, #tpu.memory_space<vmem>>, %arg9: memref<256x72xf32, #tpu.memory_space<vmem>>) attributes {dimension_semantics = [#tpu.dimension_semantics<parallel>], iteration_bounds = array<i64: 2>, scalar_prefetch = 0 : i64, scratch_operands = 2 : i64, tpu.core_type = #tpu.core_type<tc>, window_params = [{transform_indices = @transform_0, window_bounds = array<i64: 1, 256, 8>}, {pipeline_mode = #tpu.pipeline_mode<synchronous>, transform_indices = @transform_1, window_bounds = array<i64: 72, 8>}, {pipeline_mode = #tpu.pipeline_mode<synchronous>, transform_indices = @transform_2, window_bounds = array<i64: 2, 8>}, {pipeline_mode = #tpu.pipeline_mode<synchronous>, transform_indices = @transform_3, window_bounds = array<i64: 3, 8>}, {transform_indices = @transform_4, window_bounds = array<i64: 1, 256, 8>}, {transform_indices = @transform_5, window_bounds = array<i64: 1, 256, 8>}, {transform_indices = @transform_6, window_bounds = array<i64: 1, 2, 8>}]} {
    %c0 = arith.constant 0 : index
    %c0_0 = arith.constant 0 : index
    %0 = vector.load %arg4[%c0, %c0_0] : memref<3x8xf32, #tpu.memory_space<vmem>>, vector<1x8xf32>
    %c1 = arith.constant 1 : index
    %c0_1 = arith.constant 0 : index
    %1 = vector.load %arg4[%c1, %c0_1] : memref<3x8xf32, #tpu.memory_space<vmem>>, vector<1x8xf32>
    %c2 = arith.constant 2 : index
    %c0_2 = arith.constant 0 : index
    %2 = vector.load %arg4[%c2, %c0_2] : memref<3x8xf32, #tpu.memory_space<vmem>>, vector<1x8xf32>
    %c0_3 = arith.constant 0 : index
    %c0_4 = arith.constant 0 : index
    %c0_5 = arith.constant 0 : index
    %3 = vector.load %arg1[%c0_3, %c0_4, %c0_5] : memref<1x256x8xf32, #tpu.memory_space<vmem>>, vector<1x256x8xf32>
    %4 = vector.shape_cast %3 : vector<1x256x8xf32> to vector<256x8xf32>
    %c0_6 = arith.constant 0 : index
    %c0_7 = arith.constant 0 : index
    %5 = vector.load %arg3[%c0_6, %c0_7] : memref<2x8xf32, #tpu.memory_space<vmem>>, vector<1x8xf32>
    %6 = vector.broadcast %5 : vector<1x8xf32> to vector<256x8xf32>
    %7 = arith.mulf %4, %6 : vector<256x8xf32>
    %c1_8 = arith.constant 1 : index
    %c0_9 = arith.constant 0 : index
    %8 = vector.load %arg3[%c1_8, %c0_9] : memref<2x8xf32, #tpu.memory_space<vmem>>, vector<1x8xf32>
    %9 = vector.broadcast %8 : vector<1x8xf32> to vector<256x8xf32>
    %10 = arith.addf %7, %9 : vector<256x8xf32>
    %11 = vector.broadcast %0 : vector<1x8xf32> to vector<256x8xf32>
    %12 = arith.mulf %10, %11 : vector<256x8xf32>
    %cst = arith.constant 0.000000e+00 : f32
    %13 = vector.broadcast %cst : f32 to vector<256x8xf32>
    %14 = arith.maximumf %12, %13 : vector<256x8xf32>
    %15 = vector.broadcast %1 : vector<1x8xf32> to vector<256x8xf32>
    %16 = arith.mulf %14, %15 : vector<256x8xf32>
    %c0_10 = arith.constant 0 : index
    %c0_11 = arith.constant 0 : index
    %c0_12 = arith.constant 0 : index
    %17 = vector.load %arg5[%c0_10, %c0_11, %c0_12] : memref<1x256x8xf32, #tpu.memory_space<vmem>>, vector<1x256x8xf32>
    %18 = vector.shape_cast %17 : vector<1x256x8xf32> to vector<256x8xf32>
    %19 = vector.shape_cast %16 : vector<256x8xf32> to vector<1x256x8xf32>
    tpu.vector_store %arg5[%c0_10, %c0_11, %c0_12], %19 {strides = array<i32>} : memref<1x256x8xf32, #tpu.memory_space<vmem>>, vector<1x256x8xf32>,
    %20 = vector.shape_cast %16 : vector<256x8xf32> to vector<16x16x8xf32>
    %cst_13 = arith.constant 0.000000e+00 : f32
    %21 = vector.broadcast %cst_13 : f32 to vector<1x18x8xf32>
    %cst_14 = arith.constant 0.000000e+00 : f32
    %22 = vector.broadcast %cst_14 : f32 to vector<18x1x8xf32>
    %c0_15 = arith.constant 0 : index
    %c0_16 = arith.constant 0 : index
    %c0_17 = arith.constant 0 : index
    %23 = vector.load %arg8[%c0_15, %c0_16, %c0_17] : memref<18x18x8xf32, #tpu.memory_space<vmem>>, vector<1x18x8xf32>
    tpu.vector_store %arg8[%c0_15, %c0_16, %c0_17], %21 {strides = array<i32>} : memref<18x18x8xf32, #tpu.memory_space<vmem>>, vector<1x18x8xf32>,
    %c17 = arith.constant 17 : index
    %c0_18 = arith.constant 0 : index
    %c0_19 = arith.constant 0 : index
    %24 = vector.load %arg8[%c17, %c0_18, %c0_19] : memref<18x18x8xf32, #tpu.memory_space<vmem>>, vector<1x18x8xf32>
    tpu.vector_store %arg8[%c17, %c0_18, %c0_19], %21 {strides = array<i32>} : memref<18x18x8xf32, #tpu.memory_space<vmem>>, vector<1x18x8xf32>,
    %c0_20 = arith.constant 0 : index
    %c0_21 = arith.constant 0 : index
    %c0_22 = arith.constant 0 : index
    %25 = vector.load %arg8[%c0_20, %c0_21, %c0_22] : memref<18x18x8xf32, #tpu.memory_space<vmem>>, vector<18x1x8xf32>
    tpu.vector_store %arg8[%c0_20, %c0_21, %c0_22], %22 {strides = array<i32>} : memref<18x18x8xf32, #tpu.memory_space<vmem>>, vector<18x1x8xf32>,
    %c0_23 = arith.constant 0 : index
    %c17_24 = arith.constant 17 : index
    %c0_25 = arith.constant 0 : index
    %26 = vector.load %arg8[%c0_23, %c17_24, %c0_25] : memref<18x18x8xf32, #tpu.memory_space<vmem>>, vector<18x1x8xf32>
    tpu.vector_store %arg8[%c0_23, %c17_24, %c0_25], %22 {strides = array<i32>} : memref<18x18x8xf32, #tpu.memory_space<vmem>>, vector<18x1x8xf32>,
    %c1_26 = arith.constant 1 : index
    %c1_27 = arith.constant 1 : index
    %c0_28 = arith.constant 0 : index
    %27 = vector.load %arg8[%c1_26, %c1_27, %c0_28] : memref<18x18x8xf32, #tpu.memory_space<vmem>>, vector<16x16x8xf32>
    tpu.vector_store %arg8[%c1_26, %c1_27, %c0_28], %20 {strides = array<i32>} : memref<18x18x8xf32, #tpu.memory_space<vmem>>, vector<16x16x8xf32>,
    %c0_29 = arith.constant 0 : index
    %c0_30 = arith.constant 0 : index
    %c0_31 = arith.constant 0 : index
    %28 = vector.load %arg8[%c0_29, %c0_30, %c0_31] : memref<18x18x8xf32, #tpu.memory_space<vmem>>, vector<16x16x8xf32>
    %29 = vector.shape_cast %28 : vector<16x16x8xf32> to vector<256x8xf32>
    %c0_32 = arith.constant 0 : index
    %c0_33 = arith.constant 0 : index
    %30 = vector.load %arg9[%c0_32, %c0_33] : memref<256x72xf32, #tpu.memory_space<vmem>>, vector<256x8xf32>
    tpu.vector_store %arg9[%c0_32, %c0_33], %29 {strides = array<i32>} : memref<256x72xf32, #tpu.memory_space<vmem>>, vector<256x8xf32>,
    %c0_34 = arith.constant 0 : index
    %c1_35 = arith.constant 1 : index
    %c0_36 = arith.constant 0 : index
    %31 = vector.load %arg8[%c0_34, %c1_35, %c0_36] : memref<18x18x8xf32, #tpu.memory_space<vmem>>, vector<16x16x8xf32>
    %32 = vector.shape_cast %31 : vector<16x16x8xf32> to vector<256x8xf32>
    %c0_37 = arith.constant 0 : index
    %c8 = arith.constant 8 : index
    %33 = vector.load %arg9[%c0_37, %c8] : memref<256x72xf32, #tpu.memory_space<vmem>>, vector<256x8xf32>
    tpu.vector_store %arg9[%c0_37, %c8], %32 {strides = array<i32>} : memref<256x72xf32, #tpu.memory_space<vmem>>, vector<256x8xf32>,
    %c0_38 = arith.constant 0 : index
    %c2_39 = arith.constant 2 : index
    %c0_40 = arith.constant 0 : index
    %34 = vector.load %arg8[%c0_38, %c2_39, %c0_40] : memref<18x18x8xf32, #tpu.memory_space<vmem>>, vector<16x16x8xf32>
    %35 = vector.shape_cast %34 : vector<16x16x8xf32> to vector<256x8xf32>
    %c0_41 = arith.constant 0 : index
    %c16 = arith.constant 16 : index
    %36 = vector.load %arg9[%c0_41, %c16] : memref<256x72xf32, #tpu.memory_space<vmem>>, vector<256x8xf32>
    tpu.vector_store %arg9[%c0_41, %c16], %35 {strides = array<i32>} : memref<256x72xf32, #tpu.memory_space<vmem>>, vector<256x8xf32>,
    %c1_42 = arith.constant 1 : index
    %c0_43 = arith.constant 0 : index
    %c0_44 = arith.constant 0 : index
    %37 = vector.load %arg8[%c1_42, %c0_43, %c0_44] : memref<18x18x8xf32, #tpu.memory_space<vmem>>, vector<16x16x8xf32>
    %38 = vector.shape_cast %37 : vector<16x16x8xf32> to vector<256x8xf32>
    %c0_45 = arith.constant 0 : index
    %c24 = arith.constant 24 : index
    %39 = vector.load %arg9[%c0_45, %c24] : memref<256x72xf32, #tpu.memory_space<vmem>>, vector<256x8xf32>
    tpu.vector_store %arg9[%c0_45, %c24], %38 {strides = array<i32>} : memref<256x72xf32, #tpu.memory_space<vmem>>, vector<256x8xf32>,
    %c1_46 = arith.constant 1 : index
    %c1_47 = arith.constant 1 : index
    %c0_48 = arith.constant 0 : index
    %40 = vector.load %arg8[%c1_46, %c1_47, %c0_48] : memref<18x18x8xf32, #tpu.memory_space<vmem>>, vector<16x16x8xf32>
    %41 = vector.shape_cast %40 : vector<16x16x8xf32> to vector<256x8xf32>
    %c0_49 = arith.constant 0 : index
    %c32 = arith.constant 32 : index
    %42 = vector.load %arg9[%c0_49, %c32] : memref<256x72xf32, #tpu.memory_space<vmem>>, vector<256x8xf32>
    tpu.vector_store %arg9[%c0_49, %c32], %41 {strides = array<i32>} : memref<256x72xf32, #tpu.memory_space<vmem>>, vector<256x8xf32>,
    %c1_50 = arith.constant 1 : index
    %c2_51 = arith.constant 2 : index
    %c0_52 = arith.constant 0 : index
    %43 = vector.load %arg8[%c1_50, %c2_51, %c0_52] : memref<18x18x8xf32, #tpu.memory_space<vmem>>, vector<16x16x8xf32>
    %44 = vector.shape_cast %43 : vector<16x16x8xf32> to vector<256x8xf32>
    %c0_53 = arith.constant 0 : index
    %c40 = arith.constant 40 : index
    %45 = vector.load %arg9[%c0_53, %c40] : memref<256x72xf32, #tpu.memory_space<vmem>>, vector<256x8xf32>
    tpu.vector_store %arg9[%c0_53, %c40], %44 {strides = array<i32>} : memref<256x72xf32, #tpu.memory_space<vmem>>, vector<256x8xf32>,
    %c2_54 = arith.constant 2 : index
    %c0_55 = arith.constant 0 : index
    %c0_56 = arith.constant 0 : index
    %46 = vector.load %arg8[%c2_54, %c0_55, %c0_56] : memref<18x18x8xf32, #tpu.memory_space<vmem>>, vector<16x16x8xf32>
    %47 = vector.shape_cast %46 : vector<16x16x8xf32> to vector<256x8xf32>
    %c0_57 = arith.constant 0 : index
    %c48 = arith.constant 48 : index
    %48 = vector.load %arg9[%c0_57, %c48] : memref<256x72xf32, #tpu.memory_space<vmem>>, vector<256x8xf32>
    tpu.vector_store %arg9[%c0_57, %c48], %47 {strides = array<i32>} : memref<256x72xf32, #tpu.memory_space<vmem>>, vector<256x8xf32>,
    %c2_58 = arith.constant 2 : index
    %c1_59 = arith.constant 1 : index
    %c0_60 = arith.constant 0 : index
    %49 = vector.load %arg8[%c2_58, %c1_59, %c0_60] : memref<18x18x8xf32, #tpu.memory_space<vmem>>, vector<16x16x8xf32>
    %50 = vector.shape_cast %49 : vector<16x16x8xf32> to vector<256x8xf32>
    %c0_61 = arith.constant 0 : index
    %c56 = arith.constant 56 : index
    %51 = vector.load %arg9[%c0_61, %c56] : memref<256x72xf32, #tpu.memory_space<vmem>>, vector<256x8xf32>
    tpu.vector_store %arg9[%c0_61, %c56], %50 {strides = array<i32>} : memref<256x72xf32, #tpu.memory_space<vmem>>, vector<256x8xf32>,
    %c2_62 = arith.constant 2 : index
    %c2_63 = arith.constant 2 : index
    %c0_64 = arith.constant 0 : index
    %52 = vector.load %arg8[%c2_62, %c2_63, %c0_64] : memref<18x18x8xf32, #tpu.memory_space<vmem>>, vector<16x16x8xf32>
    %53 = vector.shape_cast %52 : vector<16x16x8xf32> to vector<256x8xf32>
    %c0_65 = arith.constant 0 : index
    %c64 = arith.constant 64 : index
    %54 = vector.load %arg9[%c0_65, %c64] : memref<256x72xf32, #tpu.memory_space<vmem>>, vector<256x8xf32>
    tpu.vector_store %arg9[%c0_65, %c64], %53 {strides = array<i32>} : memref<256x72xf32, #tpu.memory_space<vmem>>, vector<256x8xf32>,
    %c0_66 = arith.constant 0 : index
    %c0_67 = arith.constant 0 : index
    %55 = vector.load %arg9[%c0_66, %c0_67] : memref<256x72xf32, #tpu.memory_space<vmem>>, vector<256x72xf32>
    %c0_68 = arith.constant 0 : index
    %c0_69 = arith.constant 0 : index
    %56 = vector.load %arg2[%c0_68, %c0_69] : memref<72x8xf32, #tpu.memory_space<vmem>>, vector<72x8xf32>
    %cst_70 = arith.constant dense<0.000000e+00> : vector<256x8xf32>
    %57 = tpu.matmul %55, %56, %cst_70 {dimension_numbers = #tpu.dot_dimension_numbers<[1], [0], [0], [1], [0, 0, 1, 1], [], []>} : vector<256x72xf32>, vector<72x8xf32>, vector<256x8xf32> -> vector<256x8xf32>
    %58 = vector.broadcast %2 : vector<1x8xf32> to vector<256x8xf32>
    %59 = arith.mulf %57, %58 : vector<256x8xf32>
    %c0_71 = arith.constant 0 : index
    %c0_72 = arith.constant 0 : index
    %c0_73 = arith.constant 0 : index
    %60 = vector.load %arg6[%c0_71, %c0_72, %c0_73] : memref<1x256x8xf32, #tpu.memory_space<vmem>>, vector<1x256x8xf32>
    %61 = vector.shape_cast %60 : vector<1x256x8xf32> to vector<256x8xf32>
    %62 = vector.shape_cast %59 : vector<256x8xf32> to vector<1x256x8xf32>
    tpu.vector_store %arg6[%c0_71, %c0_72, %c0_73], %62 {strides = array<i32>} : memref<1x256x8xf32, #tpu.memory_space<vmem>>, vector<1x256x8xf32>,
    %cst_74 = arith.constant dense<0.000000e+00> : vector<8xf32>
    %63 = vector.multi_reduction <add>, %59, %cst_74 [0] : vector<256x8xf32> to vector<8xf32>
    %64 = vector.shape_cast %63 : vector<8xf32> to vector<1x8xf32>
    %65 = arith.mulf %59, %59 : vector<256x8xf32>
    %cst_75 = arith.constant dense<0.000000e+00> : vector<8xf32>
    %66 = vector.multi_reduction <add>, %65, %cst_75 [0] : vector<256x8xf32> to vector<8xf32>
    %67 = vector.shape_cast %66 : vector<8xf32> to vector<1x8xf32>
    %68 = tpu.concatenate %64, %67 in 0 : vector<1x8xf32>, vector<1x8xf32> -> vector<2x8xf32>
    %c0_76 = arith.constant 0 : index
    %c0_77 = arith.constant 0 : index
    %c0_78 = arith.constant 0 : index
    %69 = vector.load %arg7[%c0_76, %c0_77, %c0_78] : memref<1x2x8xf32, #tpu.memory_space<vmem>>, vector<1x2x8xf32>
    %70 = vector.shape_cast %69 : vector<1x2x8xf32> to vector<2x8xf32>
    %71 = vector.shape_cast %68 : vector<2x8xf32> to vector<1x2x8xf32>
    tpu.vector_store %arg7[%c0_76, %c0_77, %c0_78], %71 {strides = array<i32>} : memref<1x2x8xf32, #tpu.memory_space<vmem>>, vector<1x2x8xf32>,
    return
  }
  func.func @transform_0(%arg0: i32) -> (i32, i32, i32) {
    %c0_i32 = arith.constant 0 : i32
    %c0_i32_0 = arith.constant 0 : i32
    %c0_i32_1 = arith.constant 0 : i32
    return %arg0, %c0_i32, %c0_i32_0 : i32, i32, i32
  }
  func.func @transform_1(%arg0: i32) -> (i32, i32) {
    %c0_i32 = arith.constant 0 : i32
    %c0_i32_0 = arith.constant 0 : i32
    %c0_i32_1 = arith.constant 0 : i32
    return %c0_i32, %c0_i32_0 : i32, i32
  }
  func.func @transform_2(%arg0: i32) -> (i32, i32) {
    %c0_i32 = arith.constant 0 : i32
    %c0_i32_0 = arith.constant 0 : i32
    %c0_i32_1 = arith.constant 0 : i32
    return %c0_i32, %c0_i32_0 : i32, i32
  }
  func.func @transform_3(%arg0: i32) -> (i32, i32) {
    %c0_i32 = arith.constant 0 : i32
    %c0_i32_0 = arith.constant 0 : i32
    %c0_i32_1 = arith.constant 0 : i32
    return %c0_i32, %c0_i32_0 : i32, i32
  }
  func.func @transform_4(%arg0: i32) -> (i32, i32, i32) {
    %c0_i32 = arith.constant 0 : i32
    %c0_i32_0 = arith.constant 0 : i32
    %c0_i32_1 = arith.constant 0 : i32
    return %arg0, %c0_i32, %c0_i32_0 : i32, i32, i32
  }
  func.func @transform_5(%arg0: i32) -> (i32, i32, i32) {
    %c0_i32 = arith.constant 0 : i32
    %c0_i32_0 = arith.constant 0 : i32
    %c0_i32_1 = arith.constant 0 : i32
    return %arg0, %c0_i32, %c0_i32_0 : i32, i32, i32
  }
  func.func @transform_6(%arg0: i32) -> (i32, i32, i32) {
    %c0_i32 = arith.constant 0 : i32
    %c0_i32_0 = arith.constant 0 : i32
    %c0_i32_1 = arith.constant 0 : i32
    return %arg0, %c0_i32, %c0_i32_0 : i32, i32, i32
  }
}

module attributes {stable_mosaic.version = 11 : i64} {
  func.func @_conv1_kernel(%arg0: i32, %arg1: memref<1x16x16x8xf32, #tpu.memory_space<vmem>>, %arg2: memref<72x8xf32, #tpu.memory_space<vmem>>, %arg3: memref<1x8xf32, #tpu.memory_space<vmem>>, %arg4: memref<1x8xf32, #tpu.memory_space<vmem>>, %arg5: memref<1x256x8xf32, #tpu.memory_space<vmem>>, %arg6: memref<1x256x8xf32, #tpu.memory_space<vmem>>, %arg7: memref<1x2x8xf32, #tpu.memory_space<vmem>>, %arg8: memref<18x18x8xf32, #tpu.memory_space<vmem>>, %arg9: memref<256x72xf32, #tpu.memory_space<vmem>>) attributes {dimension_semantics = [#tpu.dimension_semantics<parallel>], iteration_bounds = array<i64: 2>, scalar_prefetch = 0 : i64, scratch_operands = 2 : i64, tpu.core_type = #tpu.core_type<tc>, window_params = [{transform_indices = @transform_0, window_bounds = array<i64: 1, 16, 16, 8>}, {pipeline_mode = #tpu.pipeline_mode<synchronous>, transform_indices = @transform_1, window_bounds = array<i64: 72, 8>}, {pipeline_mode = #tpu.pipeline_mode<synchronous>, transform_indices = @transform_2, window_bounds = array<i64: 1, 8>}, {pipeline_mode = #tpu.pipeline_mode<synchronous>, transform_indices = @transform_3, window_bounds = array<i64: 1, 8>}, {transform_indices = @transform_4, window_bounds = array<i64: 1, 256, 8>}, {transform_indices = @transform_5, window_bounds = array<i64: 1, 256, 8>}, {transform_indices = @transform_6, window_bounds = array<i64: 1, 2, 8>}]} {
    %c0 = arith.constant 0 : index
    %c0_0 = arith.constant 0 : index
    %c0_1 = arith.constant 0 : index
    %c0_2 = arith.constant 0 : index
    %0 = vector.load %arg1[%c0, %c0_0, %c0_1, %c0_2] : memref<1x16x16x8xf32, #tpu.memory_space<vmem>>, vector<1x16x16x8xf32>
    %1 = vector.shape_cast %0 : vector<1x16x16x8xf32> to vector<16x16x8xf32>
    %2 = vector.shape_cast %1 : vector<16x16x8xf32> to vector<256x8xf32>
    %c0_3 = arith.constant 0 : index
    %c0_4 = arith.constant 0 : index
    %3 = vector.load %arg3[%c0_3, %c0_4] : memref<1x8xf32, #tpu.memory_space<vmem>>, vector<1x8xf32>
    %4 = vector.broadcast %3 : vector<1x8xf32> to vector<256x8xf32>
    %5 = arith.mulf %2, %4 : vector<256x8xf32>
    %c0_5 = arith.constant 0 : index
    %c0_6 = arith.constant 0 : index
    %c0_7 = arith.constant 0 : index
    %6 = vector.load %arg5[%c0_5, %c0_6, %c0_7] : memref<1x256x8xf32, #tpu.memory_space<vmem>>, vector<1x256x8xf32>
    %7 = vector.shape_cast %6 : vector<1x256x8xf32> to vector<256x8xf32>
    %8 = vector.shape_cast %5 : vector<256x8xf32> to vector<1x256x8xf32>
    tpu.vector_store %arg5[%c0_5, %c0_6, %c0_7], %8 {strides = array<i32>} : memref<1x256x8xf32, #tpu.memory_space<vmem>>, vector<1x256x8xf32>,
    %cst = arith.constant 0.000000e+00 : f32
    %9 = vector.broadcast %cst : f32 to vector<1x18x8xf32>
    %cst_8 = arith.constant 0.000000e+00 : f32
    %10 = vector.broadcast %cst_8 : f32 to vector<18x1x8xf32>
    %c0_9 = arith.constant 0 : index
    %c0_10 = arith.constant 0 : index
    %c0_11 = arith.constant 0 : index
    %11 = vector.load %arg8[%c0_9, %c0_10, %c0_11] : memref<18x18x8xf32, #tpu.memory_space<vmem>>, vector<1x18x8xf32>
    tpu.vector_store %arg8[%c0_9, %c0_10, %c0_11], %9 {strides = array<i32>} : memref<18x18x8xf32, #tpu.memory_space<vmem>>, vector<1x18x8xf32>,
    %c17 = arith.constant 17 : index
    %c0_12 = arith.constant 0 : index
    %c0_13 = arith.constant 0 : index
    %12 = vector.load %arg8[%c17, %c0_12, %c0_13] : memref<18x18x8xf32, #tpu.memory_space<vmem>>, vector<1x18x8xf32>
    tpu.vector_store %arg8[%c17, %c0_12, %c0_13], %9 {strides = array<i32>} : memref<18x18x8xf32, #tpu.memory_space<vmem>>, vector<1x18x8xf32>,
    %c0_14 = arith.constant 0 : index
    %c0_15 = arith.constant 0 : index
    %c0_16 = arith.constant 0 : index
    %13 = vector.load %arg8[%c0_14, %c0_15, %c0_16] : memref<18x18x8xf32, #tpu.memory_space<vmem>>, vector<18x1x8xf32>
    tpu.vector_store %arg8[%c0_14, %c0_15, %c0_16], %10 {strides = array<i32>} : memref<18x18x8xf32, #tpu.memory_space<vmem>>, vector<18x1x8xf32>,
    %c0_17 = arith.constant 0 : index
    %c17_18 = arith.constant 17 : index
    %c0_19 = arith.constant 0 : index
    %14 = vector.load %arg8[%c0_17, %c17_18, %c0_19] : memref<18x18x8xf32, #tpu.memory_space<vmem>>, vector<18x1x8xf32>
    tpu.vector_store %arg8[%c0_17, %c17_18, %c0_19], %10 {strides = array<i32>} : memref<18x18x8xf32, #tpu.memory_space<vmem>>, vector<18x1x8xf32>,
    %c1 = arith.constant 1 : index
    %c1_20 = arith.constant 1 : index
    %c0_21 = arith.constant 0 : index
    %15 = vector.load %arg8[%c1, %c1_20, %c0_21] : memref<18x18x8xf32, #tpu.memory_space<vmem>>, vector<16x16x8xf32>
    tpu.vector_store %arg8[%c1, %c1_20, %c0_21], %1 {strides = array<i32>} : memref<18x18x8xf32, #tpu.memory_space<vmem>>, vector<16x16x8xf32>,
    %c0_22 = arith.constant 0 : index
    %c0_23 = arith.constant 0 : index
    %c0_24 = arith.constant 0 : index
    %16 = vector.load %arg8[%c0_22, %c0_23, %c0_24] : memref<18x18x8xf32, #tpu.memory_space<vmem>>, vector<16x16x8xf32>
    %17 = vector.shape_cast %16 : vector<16x16x8xf32> to vector<256x8xf32>
    %c0_25 = arith.constant 0 : index
    %c0_26 = arith.constant 0 : index
    %18 = vector.load %arg9[%c0_25, %c0_26] : memref<256x72xf32, #tpu.memory_space<vmem>>, vector<256x8xf32>
    tpu.vector_store %arg9[%c0_25, %c0_26], %17 {strides = array<i32>} : memref<256x72xf32, #tpu.memory_space<vmem>>, vector<256x8xf32>,
    %c0_27 = arith.constant 0 : index
    %c1_28 = arith.constant 1 : index
    %c0_29 = arith.constant 0 : index
    %19 = vector.load %arg8[%c0_27, %c1_28, %c0_29] : memref<18x18x8xf32, #tpu.memory_space<vmem>>, vector<16x16x8xf32>
    %20 = vector.shape_cast %19 : vector<16x16x8xf32> to vector<256x8xf32>
    %c0_30 = arith.constant 0 : index
    %c8 = arith.constant 8 : index
    %21 = vector.load %arg9[%c0_30, %c8] : memref<256x72xf32, #tpu.memory_space<vmem>>, vector<256x8xf32>
    tpu.vector_store %arg9[%c0_30, %c8], %20 {strides = array<i32>} : memref<256x72xf32, #tpu.memory_space<vmem>>, vector<256x8xf32>,
    %c0_31 = arith.constant 0 : index
    %c2 = arith.constant 2 : index
    %c0_32 = arith.constant 0 : index
    %22 = vector.load %arg8[%c0_31, %c2, %c0_32] : memref<18x18x8xf32, #tpu.memory_space<vmem>>, vector<16x16x8xf32>
    %23 = vector.shape_cast %22 : vector<16x16x8xf32> to vector<256x8xf32>
    %c0_33 = arith.constant 0 : index
    %c16 = arith.constant 16 : index
    %24 = vector.load %arg9[%c0_33, %c16] : memref<256x72xf32, #tpu.memory_space<vmem>>, vector<256x8xf32>
    tpu.vector_store %arg9[%c0_33, %c16], %23 {strides = array<i32>} : memref<256x72xf32, #tpu.memory_space<vmem>>, vector<256x8xf32>,
    %c1_34 = arith.constant 1 : index
    %c0_35 = arith.constant 0 : index
    %c0_36 = arith.constant 0 : index
    %25 = vector.load %arg8[%c1_34, %c0_35, %c0_36] : memref<18x18x8xf32, #tpu.memory_space<vmem>>, vector<16x16x8xf32>
    %26 = vector.shape_cast %25 : vector<16x16x8xf32> to vector<256x8xf32>
    %c0_37 = arith.constant 0 : index
    %c24 = arith.constant 24 : index
    %27 = vector.load %arg9[%c0_37, %c24] : memref<256x72xf32, #tpu.memory_space<vmem>>, vector<256x8xf32>
    tpu.vector_store %arg9[%c0_37, %c24], %26 {strides = array<i32>} : memref<256x72xf32, #tpu.memory_space<vmem>>, vector<256x8xf32>,
    %c1_38 = arith.constant 1 : index
    %c1_39 = arith.constant 1 : index
    %c0_40 = arith.constant 0 : index
    %28 = vector.load %arg8[%c1_38, %c1_39, %c0_40] : memref<18x18x8xf32, #tpu.memory_space<vmem>>, vector<16x16x8xf32>
    %29 = vector.shape_cast %28 : vector<16x16x8xf32> to vector<256x8xf32>
    %c0_41 = arith.constant 0 : index
    %c32 = arith.constant 32 : index
    %30 = vector.load %arg9[%c0_41, %c32] : memref<256x72xf32, #tpu.memory_space<vmem>>, vector<256x8xf32>
    tpu.vector_store %arg9[%c0_41, %c32], %29 {strides = array<i32>} : memref<256x72xf32, #tpu.memory_space<vmem>>, vector<256x8xf32>,
    %c1_42 = arith.constant 1 : index
    %c2_43 = arith.constant 2 : index
    %c0_44 = arith.constant 0 : index
    %31 = vector.load %arg8[%c1_42, %c2_43, %c0_44] : memref<18x18x8xf32, #tpu.memory_space<vmem>>, vector<16x16x8xf32>
    %32 = vector.shape_cast %31 : vector<16x16x8xf32> to vector<256x8xf32>
    %c0_45 = arith.constant 0 : index
    %c40 = arith.constant 40 : index
    %33 = vector.load %arg9[%c0_45, %c40] : memref<256x72xf32, #tpu.memory_space<vmem>>, vector<256x8xf32>
    tpu.vector_store %arg9[%c0_45, %c40], %32 {strides = array<i32>} : memref<256x72xf32, #tpu.memory_space<vmem>>, vector<256x8xf32>,
    %c2_46 = arith.constant 2 : index
    %c0_47 = arith.constant 0 : index
    %c0_48 = arith.constant 0 : index
    %34 = vector.load %arg8[%c2_46, %c0_47, %c0_48] : memref<18x18x8xf32, #tpu.memory_space<vmem>>, vector<16x16x8xf32>
    %35 = vector.shape_cast %34 : vector<16x16x8xf32> to vector<256x8xf32>
    %c0_49 = arith.constant 0 : index
    %c48 = arith.constant 48 : index
    %36 = vector.load %arg9[%c0_49, %c48] : memref<256x72xf32, #tpu.memory_space<vmem>>, vector<256x8xf32>
    tpu.vector_store %arg9[%c0_49, %c48], %35 {strides = array<i32>} : memref<256x72xf32, #tpu.memory_space<vmem>>, vector<256x8xf32>,
    %c2_50 = arith.constant 2 : index
    %c1_51 = arith.constant 1 : index
    %c0_52 = arith.constant 0 : index
    %37 = vector.load %arg8[%c2_50, %c1_51, %c0_52] : memref<18x18x8xf32, #tpu.memory_space<vmem>>, vector<16x16x8xf32>
    %38 = vector.shape_cast %37 : vector<16x16x8xf32> to vector<256x8xf32>
    %c0_53 = arith.constant 0 : index
    %c56 = arith.constant 56 : index
    %39 = vector.load %arg9[%c0_53, %c56] : memref<256x72xf32, #tpu.memory_space<vmem>>, vector<256x8xf32>
    tpu.vector_store %arg9[%c0_53, %c56], %38 {strides = array<i32>} : memref<256x72xf32, #tpu.memory_space<vmem>>, vector<256x8xf32>,
    %c2_54 = arith.constant 2 : index
    %c2_55 = arith.constant 2 : index
    %c0_56 = arith.constant 0 : index
    %40 = vector.load %arg8[%c2_54, %c2_55, %c0_56] : memref<18x18x8xf32, #tpu.memory_space<vmem>>, vector<16x16x8xf32>
    %41 = vector.shape_cast %40 : vector<16x16x8xf32> to vector<256x8xf32>
    %c0_57 = arith.constant 0 : index
    %c64 = arith.constant 64 : index
    %42 = vector.load %arg9[%c0_57, %c64] : memref<256x72xf32, #tpu.memory_space<vmem>>, vector<256x8xf32>
    tpu.vector_store %arg9[%c0_57, %c64], %41 {strides = array<i32>} : memref<256x72xf32, #tpu.memory_space<vmem>>, vector<256x8xf32>,
    %c0_58 = arith.constant 0 : index
    %c0_59 = arith.constant 0 : index
    %43 = vector.load %arg9[%c0_58, %c0_59] : memref<256x72xf32, #tpu.memory_space<vmem>>, vector<256x72xf32>
    %c0_60 = arith.constant 0 : index
    %c0_61 = arith.constant 0 : index
    %44 = vector.load %arg2[%c0_60, %c0_61] : memref<72x8xf32, #tpu.memory_space<vmem>>, vector<72x8xf32>
    %cst_62 = arith.constant dense<0.000000e+00> : vector<256x8xf32>
    %45 = tpu.matmul %43, %44, %cst_62 {dimension_numbers = #tpu.dot_dimension_numbers<[1], [0], [0], [1], [0, 0, 1, 1], [], []>} : vector<256x72xf32>, vector<72x8xf32>, vector<256x8xf32> -> vector<256x8xf32>
    %c0_63 = arith.constant 0 : index
    %c0_64 = arith.constant 0 : index
    %46 = vector.load %arg4[%c0_63, %c0_64] : memref<1x8xf32, #tpu.memory_space<vmem>>, vector<1x8xf32>
    %47 = vector.broadcast %46 : vector<1x8xf32> to vector<256x8xf32>
    %48 = arith.mulf %45, %47 : vector<256x8xf32>
    %c0_65 = arith.constant 0 : index
    %c0_66 = arith.constant 0 : index
    %c0_67 = arith.constant 0 : index
    %49 = vector.load %arg6[%c0_65, %c0_66, %c0_67] : memref<1x256x8xf32, #tpu.memory_space<vmem>>, vector<1x256x8xf32>
    %50 = vector.shape_cast %49 : vector<1x256x8xf32> to vector<256x8xf32>
    %51 = vector.shape_cast %48 : vector<256x8xf32> to vector<1x256x8xf32>
    tpu.vector_store %arg6[%c0_65, %c0_66, %c0_67], %51 {strides = array<i32>} : memref<1x256x8xf32, #tpu.memory_space<vmem>>, vector<1x256x8xf32>,
    %cst_68 = arith.constant dense<0.000000e+00> : vector<8xf32>
    %52 = vector.multi_reduction <add>, %48, %cst_68 [0] : vector<256x8xf32> to vector<8xf32>
    %53 = vector.shape_cast %52 : vector<8xf32> to vector<1x8xf32>
    %54 = arith.mulf %48, %48 : vector<256x8xf32>
    %cst_69 = arith.constant dense<0.000000e+00> : vector<8xf32>
    %55 = vector.multi_reduction <add>, %54, %cst_69 [0] : vector<256x8xf32> to vector<8xf32>
    %56 = vector.shape_cast %55 : vector<8xf32> to vector<1x8xf32>
    %57 = tpu.concatenate %53, %56 in 0 : vector<1x8xf32>, vector<1x8xf32> -> vector<2x8xf32>
    %c0_70 = arith.constant 0 : index
    %c0_71 = arith.constant 0 : index
    %c0_72 = arith.constant 0 : index
    %58 = vector.load %arg7[%c0_70, %c0_71, %c0_72] : memref<1x2x8xf32, #tpu.memory_space<vmem>>, vector<1x2x8xf32>
    %59 = vector.shape_cast %58 : vector<1x2x8xf32> to vector<2x8xf32>
    %60 = vector.shape_cast %57 : vector<2x8xf32> to vector<1x2x8xf32>
    tpu.vector_store %arg7[%c0_70, %c0_71, %c0_72], %60 {strides = array<i32>} : memref<1x2x8xf32, #tpu.memory_space<vmem>>, vector<1x2x8xf32>,
    return
  }
  func.func @transform_0(%arg0: i32) -> (i32, i32, i32, i32) {
    %c0_i32 = arith.constant 0 : i32
    %c0_i32_0 = arith.constant 0 : i32
    %c0_i32_1 = arith.constant 0 : i32
    %c0_i32_2 = arith.constant 0 : i32
    return %arg0, %c0_i32, %c0_i32_0, %c0_i32_1 : i32, i32, i32, i32
  }
  func.func @transform_1(%arg0: i32) -> (i32, i32) {
    %c0_i32 = arith.constant 0 : i32
    %c0_i32_0 = arith.constant 0 : i32
    %c0_i32_1 = arith.constant 0 : i32
    return %c0_i32, %c0_i32_0 : i32, i32
  }
  func.func @transform_2(%arg0: i32) -> (i32, i32) {
    %c0_i32 = arith.constant 0 : i32
    %c0_i32_0 = arith.constant 0 : i32
    %c0_i32_1 = arith.constant 0 : i32
    return %c0_i32, %c0_i32_0 : i32, i32
  }
  func.func @transform_3(%arg0: i32) -> (i32, i32) {
    %c0_i32 = arith.constant 0 : i32
    %c0_i32_0 = arith.constant 0 : i32
    %c0_i32_1 = arith.constant 0 : i32
    return %c0_i32, %c0_i32_0 : i32, i32
  }
  func.func @transform_4(%arg0: i32) -> (i32, i32, i32) {
    %c0_i32 = arith.constant 0 : i32
    %c0_i32_0 = arith.constant 0 : i32
    %c0_i32_1 = arith.constant 0 : i32
    return %arg0, %c0_i32, %c0_i32_0 : i32, i32, i32
  }
  func.func @transform_5(%arg0: i32) -> (i32, i32, i32) {
    %c0_i32 = arith.constant 0 : i32
    %c0_i32_0 = arith.constant 0 : i32
    %c0_i32_1 = arith.constant 0 : i32
    return %arg0, %c0_i32, %c0_i32_0 : i32, i32, i32
  }
  func.func @transform_6(%arg0: i32) -> (i32, i32, i32) {
    %c0_i32 = arith.constant 0 : i32
    %c0_i32_0 = arith.constant 0 : i32
    %c0_i32_1 = arith.constant 0 : i32
    return %arg0, %c0_i32, %c0_i32_0 : i32, i32, i32
  }
}

module attributes {stable_mosaic.version = 11 : i64} {
  func.func @_bn_residual_kernel(%arg0: i32, %arg1: memref<1x256x8xf32, #tpu.memory_space<vmem>>, %arg2: memref<1x16x16x8xf32, #tpu.memory_space<vmem>>, %arg3: memref<2x8xf32, #tpu.memory_space<vmem>>, %arg4: memref<1x8xf32, #tpu.memory_space<vmem>>, %arg5: memref<1x256x8xf32, #tpu.memory_space<vmem>>) attributes {dimension_semantics = [#tpu.dimension_semantics<parallel>], iteration_bounds = array<i64: 2>, scalar_prefetch = 0 : i64, scratch_operands = 0 : i64, tpu.core_type = #tpu.core_type<tc>, window_params = [{transform_indices = @transform_0, window_bounds = array<i64: 1, 256, 8>}, {transform_indices = @transform_1, window_bounds = array<i64: 1, 16, 16, 8>}, {pipeline_mode = #tpu.pipeline_mode<synchronous>, transform_indices = @transform_2, window_bounds = array<i64: 2, 8>}, {pipeline_mode = #tpu.pipeline_mode<synchronous>, transform_indices = @transform_3, window_bounds = array<i64: 1, 8>}, {transform_indices = @transform_4, window_bounds = array<i64: 1, 256, 8>}]} {
    %c0 = arith.constant 0 : index
    %c0_0 = arith.constant 0 : index
    %c0_1 = arith.constant 0 : index
    %0 = vector.load %arg1[%c0, %c0_0, %c0_1] : memref<1x256x8xf32, #tpu.memory_space<vmem>>, vector<1x256x8xf32>
    %1 = vector.shape_cast %0 : vector<1x256x8xf32> to vector<256x8xf32>
    %c0_2 = arith.constant 0 : index
    %c0_3 = arith.constant 0 : index
    %2 = vector.load %arg3[%c0_2, %c0_3] : memref<2x8xf32, #tpu.memory_space<vmem>>, vector<1x8xf32>
    %3 = vector.broadcast %2 : vector<1x8xf32> to vector<256x8xf32>
    %4 = arith.mulf %1, %3 : vector<256x8xf32>
    %c1 = arith.constant 1 : index
    %c0_4 = arith.constant 0 : index
    %5 = vector.load %arg3[%c1, %c0_4] : memref<2x8xf32, #tpu.memory_space<vmem>>, vector<1x8xf32>
    %6 = vector.broadcast %5 : vector<1x8xf32> to vector<256x8xf32>
    %7 = arith.addf %4, %6 : vector<256x8xf32>
    %c0_5 = arith.constant 0 : index
    %c0_6 = arith.constant 0 : index
    %8 = vector.load %arg4[%c0_5, %c0_6] : memref<1x8xf32, #tpu.memory_space<vmem>>, vector<1x8xf32>
    %9 = vector.broadcast %8 : vector<1x8xf32> to vector<256x8xf32>
    %10 = arith.mulf %7, %9 : vector<256x8xf32>
    %c0_7 = arith.constant 0 : index
    %c0_8 = arith.constant 0 : index
    %c0_9 = arith.constant 0 : index
    %c0_10 = arith.constant 0 : index
    %11 = vector.load %arg2[%c0_7, %c0_8, %c0_9, %c0_10] : memref<1x16x16x8xf32, #tpu.memory_space<vmem>>, vector<1x16x16x8xf32>
    %12 = vector.shape_cast %11 : vector<1x16x16x8xf32> to vector<16x16x8xf32>
    %13 = vector.shape_cast %12 : vector<16x16x8xf32> to vector<256x8xf32>
    %14 = arith.addf %10, %13 : vector<256x8xf32>
    %cst = arith.constant 0.000000e+00 : f32
    %15 = vector.broadcast %cst : f32 to vector<256x8xf32>
    %16 = arith.maximumf %14, %15 : vector<256x8xf32>
    %c0_11 = arith.constant 0 : index
    %c0_12 = arith.constant 0 : index
    %c0_13 = arith.constant 0 : index
    %17 = vector.load %arg5[%c0_11, %c0_12, %c0_13] : memref<1x256x8xf32, #tpu.memory_space<vmem>>, vector<1x256x8xf32>
    %18 = vector.shape_cast %17 : vector<1x256x8xf32> to vector<256x8xf32>
    %19 = vector.shape_cast %16 : vector<256x8xf32> to vector<1x256x8xf32>
    tpu.vector_store %arg5[%c0_11, %c0_12, %c0_13], %19 {strides = array<i32>} : memref<1x256x8xf32, #tpu.memory_space<vmem>>, vector<1x256x8xf32>,
    return
  }
  func.func @transform_0(%arg0: i32) -> (i32, i32, i32) {
    %c0_i32 = arith.constant 0 : i32
    %c0_i32_0 = arith.constant 0 : i32
    %c0_i32_1 = arith.constant 0 : i32
    return %arg0, %c0_i32, %c0_i32_0 : i32, i32, i32
  }
  func.func @transform_1(%arg0: i32) -> (i32, i32, i32, i32) {
    %c0_i32 = arith.constant 0 : i32
    %c0_i32_0 = arith.constant 0 : i32
    %c0_i32_1 = arith.constant 0 : i32
    %c0_i32_2 = arith.constant 0 : i32
    return %arg0, %c0_i32, %c0_i32_0, %c0_i32_1 : i32, i32, i32, i32
  }
  func.func @transform_2(%arg0: i32) -> (i32, i32) {
    %c0_i32 = arith.constant 0 : i32
    %c0_i32_0 = arith.constant 0 : i32
    %c0_i32_1 = arith.constant 0 : i32
    return %c0_i32, %c0_i32_0 : i32, i32
  }
  func.func @transform_3(%arg0: i32) -> (i32, i32) {
    %c0_i32 = arith.constant 0 : i32
    %c0_i32_0 = arith.constant 0 : i32
    %c0_i32_1 = arith.constant 0 : i32
    return %c0_i32, %c0_i32_0 : i32, i32
  }
  func.func @transform_4(%arg0: i32) -> (i32, i32, i32) {
    %c0_i32 = arith.constant 0 : i32
    %c0_i32_0 = arith.constant 0 : i32
    %c0_i32_1 = arith.constant 0 : i32
    return %arg0, %c0_i32, %c0_i32_0 : i32, i32, i32
  }
}

</mosaic_0001>

<bundles_post_ra>
// kernel: basic_block_forward.5
= control target key start
LH: loop header
LB: loop body
LE: loop exit
PB: predicated region body
PF: predicated region fallthrough
CT: control target
= control target key end

     0   :  { %s610_s15 = smov 0   ;;  %s880_s0 = inlined_call_operand.vmem [shape: f32[2,256,8], index: 0, kind: input, shape index: {}]   ;;  %s881_s1 = inlined_call_operand.vmem [shape: f32[2,16,16,8], index: 1, kind: input, shape index: {}]   ;;  %s882_s2 = inlined_call_operand.vmem [shape: f32[2,8], index: 2, kind: input, shape index: {}]   ;;  %s883_s3 = inlined_call_operand.vmem [shape: f32[1,8], index: 3, kind: input, shape index: {}]   ;;  %s884_s4 = inlined_call_operand.vmem [shape: f32[2,256,8], index: 4, kind: output, shape index: {}]  }
   0x1 LB: > { %s550_s16 = sadd.s32 4294967295, %s583_s15   ;;  %p554_p0 = scmp.ge.s32.totalorder %s583_s15, 1  ;;  %s583_s15 = sphi %s610_s15, %s14_s15  }
   0x2   : > { %p172_p1 = scmp.lt.s32.totalorder %s583_s15, 3 }
   0x4   : > { %p173_p2 = pnand %p554_p0, %p172_p1 }
   0x5   : > { %p203_p3 = scmp.lt.s32.totalorder (!%p173_p2), %s550_s16, 1 }
   0x6   : > { %176 = sbr.rel (%p173_p2) target bundleno = 61 (0x3d), region = 36 }
   0xb   : > { %s886_s16 = smov (!%p203_p3, %s550_s16), 1  ;;  %v621_v0 = vld [vmem:[%s882_s2] ss:$0 sm:$0xff]  ;;  %v634_v1 = vld [vmem:[%s882_s2 + $0x1] ss:$0 sm:$0xff]  ;;  %vm450_vm0 = vcmask 64512  }
   0xc   : > { %s623_s19 = sshll.u32 %s886_s16, 8  ;;  %v648_v5 = vld [vmem:[%s883_s3] ss:$0 sm:$0xff] }
   0xd   : > { %s629_s22 = scalar_lea.vmem %s880_s0, %s623_s19  ;;  %s640_s27 = scalar_lea.vmem %s881_s1, %s623_s19 }
   0xe   : > { %v218_v2 = vld [vmem:[%s629_s22] sm:$0xff]  ;;  %v219_v3 = vld [vmem:[%s629_s22 + $0x8] sm:$0xff]  ;;  %v220_v7 = vld [vmem:[%s629_s22 + $0x10] sm:$0xff]  ;;  %s684_s6 = scalar_lea.vmem %s884_s4, %s623_s19 }
   0xf   : > { %v252_v4 = vmul.f32 %v621_v0, %v218_v2  ;;  %v253_v6 = vmul.f32 %v621_v0, %v219_v3  ;;  %v254_v8 = vmul.f32 %v621_v0, %v220_v7  ;;  %v221_v9 = vld [vmem:[%s629_s22 + $0x18] sm:$0xff]  ;;  %v222_v10 = vld [vmem:[%s629_s22 + $0x20] sm:$0xff]  ;;  %v223_v16 = vld [vmem:[%s629_s22 + $0x28] sm:$0xff] }
  0x10   : > { %v354_v12 = vld [vmem:[%s640_s27] sm:$0xff]  ;;  %v255_v14 = vmul.f32 %v621_v0, %v221_v9  ;;  %v256_v15 = vmul.f32 %v621_v0, %v222_v10  ;;  %v355_v17 = vld [vmem:[%s640_s27 + $0x8] sm:$0xff]  ;;  %v257_v19 = vmul.f32 %v621_v0, %v223_v16  ;;  %v224_v20 = vld [vmem:[%s629_s22 + $0x30] sm:$0xff] }
  0x11   : > { %v286_v11 = vadd.f32 %v634_v1, %v252_v4  ;;  %v287_v13 = vadd.f32 %v634_v1, %v253_v6  ;;  %v288_v18 = vadd.f32 %v634_v1, %v254_v8  ;;  %v225_v21 = vld [vmem:[%s629_s22 + $0x38] sm:$0xff]  ;;  %v356_v24 = vld [vmem:[%s640_s27 + $0x10] sm:$0xff]  ;;  %v358_v29 = vld [vmem:[%s640_s27 + $0x20] sm:$0xff]  ;;  %v258_v31 = vmul.f32 %v621_v0, %v224_v20 }
  0x12   : > { %v289_v25 = vadd.f32 %v634_v1, %v255_v14  ;;  %v290_v26 = vadd.f32 %v634_v1, %v256_v15  ;;  %v357_v28 = vld [vmem:[%s640_s27 + $0x18] sm:$0xff]  ;;  %v291_v30 = vadd.f32 %v634_v1, %v257_v19  ;;  %v259_v32 = vmul.f32 %v621_v0, %v225_v21  ;;  %v359_v37 = vld [vmem:[%s640_s27 + $0x28] sm:$0xff]  ;;  %v226_v42 = vld [vmem:[%s629_s22 + $0x40] sm:$0xff] }
  0x13   : > { %v322_v22 = vmul.f32 %v648_v5, %v286_v11  ;;  %v323_v23 = vmul.f32 %v648_v5, %v287_v13  ;;  %v324_v27 = vmul.f32 %v648_v5, %v288_v18  ;;  %v292_v40 = vadd.f32 %v634_v1, %v258_v31  ;;  %v227_v43 = vld [vmem:[%s629_s22 + $0x48] sm:$0xff]  ;;  %v360_v48 = vld [vmem:[%s640_s27 + $0x30] sm:$0xff]  ;;  %v361_v49 = vld [vmem:[%s640_s27 + $0x38] sm:$0xff] }
  0x14   : > { %v325_v35 = vmul.f32 %v648_v5, %v289_v25  ;;  %v326_v36 = vmul.f32 %v648_v5, %v290_v26  ;;  %v327_v39 = vmul.f32 %v648_v5, %v291_v30  ;;  %v293_v41 = vadd.f32 %v634_v1, %v259_v32  ;;  %v228_v50 = vld [vmem:[%s629_s22 + $0x50] sm:$0xff]  ;;  %v229_v55 = vld [vmem:[%s629_s22 + $0x58] sm:$0xff]  ;;  %v230_v56 = vld [vmem:[%s629_s22 + $0x60] sm:$0xff] }
  0x15   : > { %v386_v33 = vadd.f32 %v354_v12, %v322_v22  ;;  %v387_v34 = vadd.f32 %v355_v17, %v323_v23  ;;  %v388_v38 = vadd.f32 %v356_v24, %v324_v27  ;;  %v328_v53 = vmul.f32 %v648_v5, %v292_v40  ;;  %v231_v61 = vld [vmem:[%s629_s22 + $0x68] sm:$0xff]  ;;  %v232_v9 = vld [vmem:[%s629_s22 + $0x70] sm:$0xff]  ;;  %v233_v10 = vld [vmem:[%s629_s22 + $0x78] sm:$0xff] }
  0x16   : > { %v389_v46 = vadd.f32 %v357_v28, %v325_v35  ;;  %v390_v47 = vadd.f32 %v358_v29, %v326_v36  ;;  %v391_v52 = vadd.f32 %v359_v37, %v327_v39  ;;  %v329_v54 = vmul.f32 %v648_v5, %v293_v41  ;;  %v362_v13 = vld [vmem:[%s640_s27 + $0x40] sm:$0xff]  ;;  %v363_v14 = vld [vmem:[%s640_s27 + $0x48] sm:$0xff]  ;;  %v364_v19 = vld [vmem:[%s640_s27 + $0x50] sm:$0xff] }
  0x17   : > { %v418_v44 = vmax.f32 %v386_v33, 0.0  ;;  %v419_v45 = vmax.f32 %v387_v34, 0.0  ;;  %v420_v51 = vmax.f32 %v388_v38, 0.0  ;;  %v260_v59 = vmul.f32 %v621_v0, %v226_v42  ;;  %v365_v23 = vld [vmem:[%s640_s27 + $0x58] sm:$0xff]  ;;  %v366_v24 = vld [vmem:[%s640_s27 + $0x60] sm:$0xff]  ;;  %v367_v32 = vld [vmem:[%s640_s27 + $0x68] sm:$0xff] }
  0x18   : > { %v421_v57 = vmax.f32 %v389_v46, 0.0  ;;  %v422_v58 = vmax.f32 %v390_v47, 0.0  ;;  %v261_v60 = vmul.f32 %v621_v0, %v227_v43  ;;  %v423_v62 = vmax.f32 %v391_v52, 0.0  ;;  %v234_v37 = vld [vmem:[%s629_s22 + $0x80] sm:$0xff]  ;;  %v235_v38 = vld [vmem:[%s629_s22 + $0x88] sm:$0xff]  ;;  %v368_v43 = vld [vmem:[%s640_s27 + $0x70] sm:$0xff] }
  0x19   : > { %451 = vst.msk [vmem:[%s684_s6] sm:$0xff] %vm450_vm0, %v418_v44  ;;  %v392_v63 = vadd.f32 %v360_v48, %v328_v53  ;;  %v393_v2 = vadd.f32 %v361_v49, %v329_v54  ;;  %v262_v3 = vmul.f32 %v621_v0, %v228_v50  ;;  %v294_v4 = vadd.f32 %v634_v1, %v260_v59  ;;  %v369_v44 = vld [vmem:[%s640_s27 + $0x78] sm:$0xff] }
  0x1a   : > { %452 = vst.msk [vmem:[%s684_s6 + $0x8] sm:$0xff] %vm450_vm0, %v419_v45  ;;  %v295_v6 = vadd.f32 %v634_v1, %v261_v60  ;;  %v263_v7 = vmul.f32 %v621_v0, %v229_v55  ;;  %v264_v8 = vmul.f32 %v621_v0, %v230_v56  ;;  %v265_v16 = vmul.f32 %v621_v0, %v231_v61  ;;  %v236_v45 = vld [vmem:[%s629_s22 + $0x90] sm:$0xff]  ;;  %v237_v50 = vld [vmem:[%s629_s22 + $0x98] sm:$0xff]  ;;  %v239_v56 = vld [vmem:[%s629_s22 + $0xa8] sm:$0xff] }
  0x1b   : > { %453 = vst.msk [vmem:[%s684_s6 + $0x10] sm:$0xff] %vm450_vm0, %v420_v51  ;;  %v424_v11 = vmax.f32 %v392_v63, 0.0  ;;  %v425_v12 = vmax.f32 %v393_v2, 0.0  ;;  %v296_v15 = vadd.f32 %v634_v1, %v262_v3  ;;  %v330_v17 = vmul.f32 %v648_v5, %v294_v4  ;;  %v238_v51 = vld [vmem:[%s629_s22 + $0xa0] sm:$0xff]  ;;  %v240_v3 = vld [vmem:[%s629_s22 + $0xb0] sm:$0xff]  ;;  %v241_v4 = vld [vmem:[%s629_s22 + $0xb8] sm:$0xff] }
  0x1c   : > { %454 = vst.msk [vmem:[%s684_s6 + $0x18] sm:$0xff] %vm450_vm0, %v421_v57  ;;  %v331_v18 = vmul.f32 %v648_v5, %v295_v6  ;;  %v297_v20 = vadd.f32 %v634_v1, %v263_v7  ;;  %v298_v21 = vadd.f32 %v634_v1, %v264_v8  ;;  %v299_v25 = vadd.f32 %v634_v1, %v265_v16  ;;  %v370_v8 = vld [vmem:[%s640_s27 + $0x80] sm:$0xff] }
  0x1d   : > { %455 = vst.msk [vmem:[%s684_s6 + $0x20] sm:$0xff] %vm450_vm0, %v422_v58  ;;  %v332_v22 = vmul.f32 %v648_v5, %v296_v15  ;;  %v266_v26 = vmul.f32 %v621_v0, %v232_v9  ;;  %v267_v27 = vmul.f32 %v621_v0, %v233_v10  ;;  %v394_v28 = vadd.f32 %v362_v13, %v330_v17  ;;  %v371_v9 = vld [vmem:[%s640_s27 + $0x88] sm:$0xff] }
  0x1e   : > { %456 = vst.msk [vmem:[%s684_s6 + $0x28] sm:$0xff] %vm450_vm0, %v423_v62  ;;  %v395_v29 = vadd.f32 %v363_v14, %v331_v18  ;;  %v333_v30 = vmul.f32 %v648_v5, %v297_v20  ;;  %v334_v31 = vmul.f32 %v648_v5, %v298_v21  ;;  %v335_v34 = vmul.f32 %v648_v5, %v299_v25  ;;  %v372_v14 = vld [vmem:[%s640_s27 + $0x90] sm:$0xff]  ;;  %v373_v18 = vld [vmem:[%s640_s27 + $0x98] sm:$0xff] }
  0x1f   : > { %457 = vst.msk [vmem:[%s684_s6 + $0x30] sm:$0xff] %vm450_vm0, %v424_v11  ;;  %v396_v33 = vadd.f32 %v364_v19, %v332_v22  ;;  %v300_v35 = vadd.f32 %v634_v1, %v266_v26  ;;  %v301_v36 = vadd.f32 %v634_v1, %v267_v27  ;;  %v426_v39 = vmax.f32 %v394_v28, 0.0  ;;  %v374_v19 = vld [vmem:[%s640_s27 + $0xa0] sm:$0xff]  ;;  %v375_v27 = vld [vmem:[%s640_s27 + $0xa8] sm:$0xff] }
  0x20   : > { %458 = vst.msk [vmem:[%s684_s6 + $0x38] sm:$0xff] %vm450_vm0, %v425_v12  ;;  %v427_v40 = vmax.f32 %v395_v29, 0.0  ;;  %v397_v41 = vadd.f32 %v365_v23, %v333_v30  ;;  %v398_v42 = vadd.f32 %v366_v24, %v334_v31  ;;  %v399_v47 = vadd.f32 %v367_v32, %v335_v34  ;;  %v242_v32 = vld [vmem:[%s629_s22 + $0xc0] sm:$0xff] }
  0x21   : > { %v428_v46 = vmax.f32 %v396_v33, 0.0  ;;  %v336_v48 = vmul.f32 %v648_v5, %v300_v35  ;;  %v337_v49 = vmul.f32 %v648_v5, %v301_v36  ;;  %459 = vst.msk [vmem:[%s684_s6 + $0x40] sm:$0xff] %vm450_vm0, %v426_v39  ;;  %v268_v54 = vmul.f32 %v621_v0, %v234_v37  ;;  %v243_v33 = vld [vmem:[%s629_s22 + $0xc8] sm:$0xff]  ;;  %v377_v39 = vld [vmem:[%s640_s27 + $0xb8] sm:$0xff] }
  0x22   : > { %v429_v52 = vmax.f32 %v397_v41, 0.0  ;;  %v430_v53 = vmax.f32 %v398_v42, 0.0  ;;  %v269_v55 = vmul.f32 %v621_v0, %v235_v38  ;;  %460 = vst.msk [vmem:[%s684_s6 + $0x48] sm:$0xff] %vm450_vm0, %v427_v40  ;;  %v431_v57 = vmax.f32 %v399_v47, 0.0  ;;  %v376_v38 = vld [vmem:[%s640_s27 + $0xb0] sm:$0xff] }
  0x23   : > { %v400_v58 = vadd.f32 %v368_v43, %v336_v48  ;;  %v401_v59 = vadd.f32 %v369_v44, %v337_v49  ;;  %v270_v60 = vmul.f32 %v621_v0, %v236_v45  ;;  %461 = vst.msk [vmem:[%s684_s6 + $0x50] sm:$0xff] %vm450_vm0, %v428_v46  ;;  %v302_v61 = vadd.f32 %v634_v1, %v268_v54  ;;  %v244_v40 = vld [vmem:[%s629_s22 + $0xd0] sm:$0xff]  ;;  %v245_v45 = vld [vmem:[%s629_s22 + $0xd8] sm:$0xff]  ;;  %v246_v46 = vld [vmem:[%s629_s22 + $0xe0] sm:$0xff] }
  0x24   : > { %v303_v62 = vadd.f32 %v634_v1, %v269_v55  ;;  %v271_v63 = vmul.f32 %v621_v0, %v237_v50  ;;  %v272_v2 = vmul.f32 %v621_v0, %v238_v51  ;;  %462 = vst.msk [vmem:[%s684_s6 + $0x58] sm:$0xff] %vm450_vm0, %v429_v52  ;;  %v273_v11 = vmul.f32 %v621_v0, %v239_v56  ;;  %v247_v51 = vld [vmem:[%s629_s22 + $0xe8] sm:$0xff] }
  0x25   : > { %v432_v6 = vmax.f32 %v400_v58, 0.0  ;;  %v433_v7 = vmax.f32 %v401_v59, 0.0  ;;  %v304_v10 = vadd.f32 %v634_v1, %v270_v60  ;;  %463 = vst.msk [vmem:[%s684_s6 + $0x60] sm:$0xff] %vm450_vm0, %v430_v53  ;;  %v338_v12 = vmul.f32 %v648_v5, %v302_v61  ;;  %v248_v60 = vld [vmem:[%s629_s22 + $0xf0] sm:$0xff]  ;;  %v249_v61 = vld [vmem:[%s629_s22 + $0xf8] sm:$0xff] }
  0x26   : > { %v339_v13 = vmul.f32 %v648_v5, %v303_v62  ;;  %v305_v15 = vadd.f32 %v634_v1, %v271_v63  ;;  %v306_v16 = vadd.f32 %v634_v1, %v272_v2  ;;  %464 = vst.msk [vmem:[%s684_s6 + $0x68] sm:$0xff] %vm450_vm0, %v431_v57  ;;  %v307_v20 = vadd.f32 %v634_v1, %v273_v11  ;;  %v378_v2 = vld [vmem:[%s640_s27 + $0xc0] sm:$0xff] }
  0x27   : > { %v340_v17 = vmul.f32 %v648_v5, %v304_v10  ;;  %v274_v21 = vmul.f32 %v621_v0, %v240_v3  ;;  %v275_v22 = vmul.f32 %v621_v0, %v241_v4  ;;  %465 = vst.msk [vmem:[%s684_s6 + $0x70] sm:$0xff] %vm450_vm0, %v432_v6  ;;  %v402_v23 = vadd.f32 %v370_v8, %v338_v12  ;;  %v379_v3 = vld [vmem:[%s640_s27 + $0xc8] sm:$0xff] }
  0x28   : > { %v403_v24 = vadd.f32 %v371_v9, %v339_v13  ;;  %v341_v25 = vmul.f32 %v648_v5, %v305_v15  ;;  %v342_v26 = vmul.f32 %v648_v5, %v306_v16  ;;  %466 = vst.msk [vmem:[%s684_s6 + $0x78] sm:$0xff] %vm450_vm0, %v433_v7  ;;  %v343_v29 = vmul.f32 %v648_v5, %v307_v20  ;;  %v380_v9 = vld [vmem:[%s640_s27 + $0xd0] sm:$0xff]  ;;  %v381_v13 = vld [vmem:[%s640_s27 + $0xd8] sm:$0xff] }
  0x29   : > { %v404_v28 = vadd.f32 %v372_v14, %v340_v17  ;;  %v308_v30 = vadd.f32 %v634_v1, %v274_v21  ;;  %v309_v31 = vadd.f32 %v634_v1, %v275_v22  ;;  %v434_v34 = vmax.f32 %v402_v23, 0.0  ;;  %v382_v14 = vld [vmem:[%s640_s27 + $0xe0] sm:$0xff]  ;;  %v383_v22 = vld [vmem:[%s640_s27 + $0xe8] sm:$0xff] }
  0x2a   : > { %v435_v35 = vmax.f32 %v403_v24, 0.0  ;;  %v405_v36 = vadd.f32 %v373_v18, %v341_v25  ;;  %v406_v37 = vadd.f32 %v374_v19, %v342_v26  ;;  %v407_v42 = vadd.f32 %v375_v27, %v343_v29 }
  0x2b   : > { %v436_v41 = vmax.f32 %v404_v28, 0.0  ;;  %v344_v43 = vmul.f32 %v648_v5, %v308_v30  ;;  %v345_v44 = vmul.f32 %v648_v5, %v309_v31  ;;  %467 = vst.msk [vmem:[%s684_s6 + $0x80] sm:$0xff] %vm450_vm0, %v434_v34  ;;  %v276_v49 = vmul.f32 %v621_v0, %v242_v32  ;;  %v384_v30 = vld [vmem:[%s640_s27 + $0xf0] sm:$0xff]  ;;  %v385_v31 = vld [vmem:[%s640_s27 + $0xf8] sm:$0xff] }
  0x2c   : > { %v437_v47 = vmax.f32 %v405_v36, 0.0  ;;  %v438_v48 = vmax.f32 %v406_v37, 0.0  ;;  %v277_v50 = vmul.f32 %v621_v0, %v243_v33  ;;  %468 = vst.msk [vmem:[%s684_s6 + $0x88] sm:$0xff] %vm450_vm0, %v435_v35  ;;  %v439_v52 = vmax.f32 %v407_v42, 0.0 }
  0x2d   : > { %v408_v53 = vadd.f32 %v376_v38, %v344_v43  ;;  %v409_v54 = vadd.f32 %v377_v39, %v345_v44  ;;  %v278_v55 = vmul.f32 %v621_v0, %v244_v40  ;;  %469 = vst.msk [vmem:[%s684_s6 + $0x90] sm:$0xff] %vm450_vm0, %v436_v41  ;;  %v310_v56 = vadd.f32 %v634_v1, %v276_v49 }
  0x2e   : > { %v311_v57 = vadd.f32 %v634_v1, %v277_v50  ;;  %v279_v58 = vmul.f32 %v621_v0, %v245_v45  ;;  %v280_v59 = vmul.f32 %v621_v0, %v246_v46  ;;  %470 = vst.msk [vmem:[%s684_s6 + $0x98] sm:$0xff] %vm450_vm0, %v437_v47  ;;  %v281_v6 = vmul.f32 %v621_v0, %v247_v51 }
  0x2f   : > { %v440_v62 = vmax.f32 %v408_v53, 0.0  ;;  %v441_v63 = vmax.f32 %v409_v54, 0.0  ;;  %v312_v4 = vadd.f32 %v634_v1, %v278_v55  ;;  %471 = vst.msk [vmem:[%s684_s6 + $0xa0] sm:$0xff] %vm450_vm0, %v438_v48  ;;  %v346_v7 = vmul.f32 %v648_v5, %v310_v56 }
  0x30   : > { %v347_v8 = vmul.f32 %v648_v5, %v311_v57  ;;  %v313_v10 = vadd.f32 %v634_v1, %v279_v58  ;;  %v314_v11 = vadd.f32 %v634_v1, %v280_v59  ;;  %472 = vst.msk [vmem:[%s684_s6 + $0xa8] sm:$0xff] %vm450_vm0, %v439_v52  ;;  %v315_v15 = vadd.f32 %v634_v1, %v281_v6 }
  0x31   : > { %v348_v12 = vmul.f32 %v648_v5, %v312_v4  ;;  %v282_v16 = vmul.f32 %v621_v0, %v248_v60  ;;  %v283_v17 = vmul.f32 %v621_v0, %v249_v61  ;;  %473 = vst.msk [vmem:[%s684_s6 + $0xb0] sm:$0xff] %vm450_vm0, %v440_v62  ;;  %v410_v18 = vadd.f32 %v378_v2, %v346_v7 }
  0x32   : > { %v411_v19 = vadd.f32 %v379_v3, %v347_v8  ;;  %v349_v20 = vmul.f32 %v648_v5, %v313_v10  ;;  %v350_v21 = vmul.f32 %v648_v5, %v314_v11  ;;  %474 = vst.msk [vmem:[%s684_s6 + $0xb8] sm:$0xff] %vm450_vm0, %v441_v63  ;;  %v351_v24 = vmul.f32 %v648_v5, %v315_v15 }
  0x33   : > { %v412_v23 = vadd.f32 %v380_v9, %v348_v12  ;;  %v316_v0 = vadd.f32 %v634_v1, %v282_v16  ;;  %v317_v25 = vadd.f32 %v634_v1, %v283_v17  ;;  %v442_v26 = vmax.f32 %v410_v18, 0.0 }
  0x34   : > { %v443_v27 = vmax.f32 %v411_v19, 0.0  ;;  %v413_v28 = vadd.f32 %v381_v13, %v349_v20  ;;  %v414_v29 = vadd.f32 %v382_v14, %v350_v21  ;;  %v415_v33 = vadd.f32 %v383_v22, %v351_v24 }
  0x35   : > { %v444_v32 = vmax.f32 %v412_v23, 0.0  ;;  %v352_v34 = vmul.f32 %v648_v5, %v316_v0  ;;  %v353_v35 = vmul.f32 %v648_v5, %v317_v25  ;;  %475 = vst.msk [vmem:[%s684_s6 + $0xc0] sm:$0xff] %vm450_vm0, %v442_v26 }
  0x36   : > { %v445_v1 = vmax.f32 %v413_v28, 0.0  ;;  %v446_v36 = vmax.f32 %v414_v29, 0.0  ;;  %476 = vst.msk [vmem:[%s684_s6 + $0xc8] sm:$0xff] %vm450_vm0, %v443_v27  ;;  %v447_v37 = vmax.f32 %v415_v33, 0.0 }
  0x37   : > { %v416_v38 = vadd.f32 %v384_v30, %v352_v34  ;;  %v417_v39 = vadd.f32 %v385_v31, %v353_v35  ;;  %477 = vst.msk [vmem:[%s684_s6 + $0xd0] sm:$0xff] %vm450_vm0, %v444_v32 }
  0x38   : > { %478 = vst.msk [vmem:[%s684_s6 + $0xd8] sm:$0xff] %vm450_vm0, %v445_v1 }
  0x39   : > { %v448_v40 = vmax.f32 %v416_v38, 0.0  ;;  %v449_v41 = vmax.f32 %v417_v39, 0.0  ;;  %479 = vst.msk [vmem:[%s684_s6 + $0xe0] sm:$0xff] %vm450_vm0, %v446_v36 }
  0x3a   : > { %480 = vst.msk [vmem:[%s684_s6 + $0xe8] sm:$0xff] %vm450_vm0, %v447_v37 }
  0x3b   : > { %481 = vst.msk [vmem:[%s684_s6 + $0xf0] sm:$0xff] %vm450_vm0, %v448_v40 }
  0x3c   : > { %482 = vst.msk [vmem:[%s684_s6 + $0xf8] sm:$0xff] %vm450_vm0, %v449_v41 }
  0x3d PF: > { %s14_s15 = sadd.s32 1, %s583_s15  }
  0x3e   : > { %p11_p4 = scmp.ge.s32.totalorder %s14_s15, 4  }
  0x40   :  { %13 = sbr.rel (!%p11_p4) target bundleno = 1 (0x1), region = 69 }

// kernel: basic_block_forward.3
= control target key start
LH: loop header
LB: loop body
LE: loop exit
PB: predicated region body
PF: predicated region fallthrough
CT: control target
= control target key end

     0   :  { %s2821_s21 = smov 0   ;;  %s4314_s0 = inlined_call_operand.vmem [shape: f32[2,16,16,8], index: 0, kind: input, shape index: {}]   ;;  %s4315_s1 = inlined_call_operand.vmem [shape: f32[72,8], index: 1, kind: input, shape index: {}]   ;;  %s4316_s2 = inlined_call_operand.vmem [shape: f32[1,8], index: 2, kind: input, shape index: {}]   ;;  %s4317_s3 = inlined_call_operand.vmem [shape: f32[1,8], index: 3, kind: input, shape index: {}]   ;;  %s4318_s4 = inlined_call_operand.vmem [shape: f32[2,256,8], index: 4, kind: output, shape index: {0}]   ;;  %s4319_s5 = inlined_call_operand.vmem [shape: f32[2,256,8], index: 5, kind: output, shape index: {1}]   ;;  %s4320_s6 = inlined_call_operand.vmem [shape: f32[2,2,8], index: 6, kind: output, shape index: {2}]  }
   0x1 LB: > { %s2674_s22 = sadd.s32 4294967295, %s2775_s21   ;;  %p2678_p0 = scmp.ge.s32.totalorder %s2775_s21, 1  ;;  %s2775_s21 = sphi %s2821_s21, %s17_s21  }
   0x2   : > { %p217_p1 = scmp.lt.s32.totalorder %s2775_s21, 3 }
   0x4   : > { %p218_p2 = pnand %p2678_p0, %p217_p1 }
   0x6   : > { %221 = sbr.rel (%p218_p2) target bundleno = 1008 (0x3f0), region = 36 }
   0xb   : > { %vm343_vm0 = vcmask 64512   ;;  %v2777_v0 = vmov 0.0   ;;  %vm384_vm1 = vcmask 57344   ;;  %s2778_s23 = smov 8   ;;  %p256_p3 = scmp.lt.s32.totalorder %s2674_s22, 1  ;;  %vm378_vm2 = vcmask 58368  }
   0xc   : > { %376 = vst.msk [vmem:[#allocation2] sm:$0xff] %vm343_vm0, %v2777_v0  ;;  %v2910_v2 = vld [vmem:[%s4316_s2] ss:$0 sm:$0xff]  ;;  %vm678_vm3 = vcmask 130112   ;;  %s2779_s9 = smov 16   ;;  %s2780_s10 = smov 24  }
   0xd   : > { %377 = vst.msk [vmem:[#allocation2 + $0x8] sm:$0xff] %vm343_vm0, %v2777_v0  ;;  %s4409_s22 = smov (!%p256_p3, %s2674_s22), 1  ;;  %vm871_vm4 = vcmask 195712   ;;  %s2781_s11 = smov 32   ;;  %vm1064_vm5 = vcmask 261312   ;;  %vm1257_vm6 = vcmask 326912  }
   0xe   : > { %385 = vst.msk [vmem:[#allocation2] sm:$0x1] %vm384_vm1, %v2777_v0  ;;  %s2893_s24 = sshll.u32 %s4409_s22, 8  ;;  %s2782_s12 = smov 40   ;;  %vm1450_vm7 = vcmask 392512   ;;  %vm1644_vm8 = vcmask 458112  }
   0xf   : > { %381 = vst.msk [vmem:[#allocation2 + $0x198] sm:$0xff] %vm343_vm0, %v2777_v0  ;;  %s2905_s27 = scalar_lea.vmem %s4314_s0, %s2893_s24  ;;  %s2928_s8 = scalar_lea.vmem %s4318_s4, %s2893_s24  ;;  %vm1837_vm9 = vcmask 523712   ;;  %vm2030_vm10 = vcmask 589312   ;;  %vm2104_vm11 = vcmask 588800   ;;  %vm2552_vm12 = vcmask 1040384  }
  0x10   : > { %382 = vst.msk [vmem:[#allocation2 + $0x1a0] sm:$0xff] %vm343_vm0, %v2777_v0  ;;  %v275_v3 = vld [vmem:[%s2905_s27] sm:$0xff]  ;;  %v276_v5 = vld [vmem:[%s2905_s27 + $0x8] sm:$0xff]  ;;  %v282_v12 = vld [vmem:[%s2905_s27 + $0x38] sm:$0xff]  ;;  %s2783_s13 = smov 48   ;;  %s2784_s14 = smov 64  }
  0x11   : > { %386 = vst.msk [vmem:[#allocation2 + $0x18] sm:$0x1] %vm384_vm1, %v2777_v0  ;;  %v311_v4 = vmul.f32 %v2910_v2, %v275_v3  ;;  %v312_v6 = vmul.f32 %v2910_v2, %v276_v5  ;;  %v279_v7 = vld [vmem:[%s2905_s27 + $0x20] sm:$0xff]  ;;  %v280_v9 = vld [vmem:[%s2905_s27 + $0x28] sm:$0xff]  ;;  %v318_v13 = vmul.f32 %v2910_v2, %v282_v12  ;;  %v277_v15 = vld [vmem:[%s2905_s27 + $0x10] sm:$0xff]  ;;  %s2785_s15 = smov 56  }
  0x12   : > { %387 = vst.msk [vmem:[#allocation2 + $0x30] sm:$0x1] %vm384_vm1, %v2777_v0  ;;  %v315_v8 = vmul.f32 %v2910_v2, %v279_v7  ;;  %v316_v11 = vmul.f32 %v2910_v2, %v280_v9  ;;  %v313_v16 = vmul.f32 %v2910_v2, %v277_v15  ;;  %v283_v17 = vld [vmem:[%s2905_s27 + $0x40] sm:$0xff]  ;;  %v285_v20 = vld [vmem:[%s2905_s27 + $0x50] sm:$0xff]  ;;  %v278_v23 = vld [vmem:[%s2905_s27 + $0x18] sm:$0xff] }
  0x13   : > { %388 = vst.msk [vmem:[#allocation2 + $0x48] sm:$0x1] %vm384_vm1, %v2777_v0  ;;  %v319_v18 = vmul.f32 %v2910_v2, %v283_v17  ;;  %v321_v21 = vmul.f32 %v2910_v2, %v285_v20  ;;  %v314_v24 = vmul.f32 %v2910_v2, %v278_v23  ;;  %v286_v25 = vld [vmem:[%s2905_s27 + $0x58] sm:$0xff]  ;;  %v288_v27 = vld [vmem:[%s2905_s27 + $0x68] sm:$0xff]  ;;  %v281_v31 = vld [vmem:[%s2905_s27 + $0x30] sm:$0xff] }
  0x14   : > { %v518_v1 = vld [vmem:[#allocation2 + $0x1] sm:$0xff]  ;;  %389 = vst.msk [vmem:[#allocation2 + $0x60] sm:$0x1] %vm384_vm1, %v2777_v0  ;;  %v322_v26 = vmul.f32 %v2910_v2, %v286_v25  ;;  %v324_v29 = vmul.f32 %v2910_v2, %v288_v27  ;;  %v317_v32 = vmul.f32 %v2910_v2, %v281_v31  ;;  %v289_v34 = vld [vmem:[%s2905_s27 + $0x70] sm:$0xff]  ;;  %v294_v45 = vld [vmem:[%s2905_s27 + $0x98] sm:$0xff] }
  0x15   : > { %582 = vrot.lane.b32.xlu0 %v518_v1, %s2778_s23  ;;  %390 = vst.msk [vmem:[#allocation2 + $0x78] sm:$0x1] %vm384_vm1, %v2777_v0  ;;  %v325_v35 = vmul.f32 %v2910_v2, %v289_v34  ;;  %v291_v36 = vld [vmem:[%s2905_s27 + $0x80] sm:$0xff]  ;;  %v284_v38 = vld [vmem:[%s2905_s27 + $0x48] sm:$0xff]  ;;  %v330_v46 = vmul.f32 %v2910_v2, %v294_v45  ;;  %v297_v53 = vld [vmem:[%s2905_s27 + $0xb0] sm:$0xff] }
  0x16   : > { %391 = vst.msk [vmem:[#allocation2 + $0x90] sm:$0x1] %vm384_vm1, %v2777_v0  ;;  %v327_v37 = vmul.f32 %v2910_v2, %v291_v36  ;;  %v320_v41 = vmul.f32 %v2910_v2, %v284_v38  ;;  %v292_v42 = vld [vmem:[%s2905_s27 + $0x88] sm:$0xff]  ;;  %v287_v47 = vld [vmem:[%s2905_s27 + $0x60] sm:$0xff]  ;;  %v333_v54 = vmul.f32 %v2910_v2, %v297_v53  ;;  %v290_v56 = vld [vmem:[%s2905_s27 + $0x78] sm:$0xff] }
  0x17   : > { %392 = vst.msk [vmem:[#allocation2 + $0xa8] sm:$0x1] %vm384_vm1, %v2777_v0  ;;  %v328_v43 = vmul.f32 %v2910_v2, %v292_v42  ;;  %v323_v48 = vmul.f32 %v2910_v2, %v287_v47  ;;  %v295_v50 = vld [vmem:[%s2905_s27 + $0xa0] sm:$0xff]  ;;  %v326_v57 = vmul.f32 %v2910_v2, %v290_v56  ;;  %v298_v58 = vld [vmem:[%s2905_s27 + $0xb8] sm:$0xff]  ;;  %v300_v61 = vld [vmem:[%s2905_s27 + $0xc8] sm:$0xff] }
  0x18   : > { %393 = vst.msk [vmem:[#allocation2 + $0xc0] sm:$0x1] %vm384_vm1, %v2777_v0  ;;  %v331_v52 = vmul.f32 %v2910_v2, %v295_v50  ;;  %v334_v59 = vmul.f32 %v2910_v2, %v298_v58  ;;  %v336_v63 = vmul.f32 %v2910_v2, %v300_v61 }
  0x19   : > { %394 = vst.msk [vmem:[#allocation2 + $0xd8] sm:$0x1] %vm384_vm1, %v2777_v0 }
  0x1a   : > { %395 = vst.msk [vmem:[#allocation2 + $0xf0] sm:$0x1] %vm384_vm1, %v2777_v0 }
  0x1b   : > { %396 = vst.msk [vmem:[#allocation2 + $0x108] sm:$0x1] %vm384_vm1, %v2777_v0 }
  0x1c   : > { %397 = vst.msk [vmem:[#allocation2 + $0x120] sm:$0x1] %vm384_vm1, %v2777_v0 }
  0x1d   : > { %398 = vst.msk [vmem:[#allocation2 + $0x138] sm:$0x1] %vm384_vm1, %v2777_v0 }
  0x1e   : > { %399 = vst.msk [vmem:[#allocation2 + $0x150] sm:$0x1] %vm384_vm1, %v2777_v0 }
  0x1f   : > { %400 = vst.msk [vmem:[#allocation2 + $0x168] sm:$0x1] %vm384_vm1, %v2777_v0 }
  0x20   : > { %401 = vst.msk [vmem:[#allocation2 + $0x180] sm:$0x1] %vm384_vm1, %v2777_v0 }
  0x21   : > { %404 = vst.msk [vmem:[#allocation2 + $0x29] sm:$0x1] %vm384_vm1, %v2777_v0 }
  0x22   : > { %405 = vst.msk [vmem:[#allocation2 + $0x41] sm:$0x1] %vm384_vm1, %v2777_v0 }
  0x23   : > { %406 = vst.msk [vmem:[#allocation2 + $0x59] sm:$0x1] %vm384_vm1, %v2777_v0 }
  0x24   : > { %407 = vst.msk [vmem:[#allocation2 + $0x71] sm:$0x1] %vm384_vm1, %v2777_v0 }
  0x25   : > { %408 = vst.msk [vmem:[#allocation2 + $0x89] sm:$0x1] %vm384_vm1, %v2777_v0 }
  0x26   : > { %409 = vst.msk [vmem:[#allocation2 + $0xa1] sm:$0x1] %vm384_vm1, %v2777_v0 }
  0x27   : > { %410 = vst.msk [vmem:[#allocation2 + $0xb9] sm:$0x1] %vm384_vm1, %v2777_v0 }
  0x28   : > { %411 = vst.msk [vmem:[#allocation2 + $0xd1] sm:$0x1] %vm384_vm1, %v2777_v0 }
  0x29   : > { %412 = vst.msk [vmem:[#allocation2 + $0xe9] sm:$0x1] %vm384_vm1, %v2777_v0 }
  0x2a   : > { %413 = vst.msk [vmem:[#allocation2 + $0x101] sm:$0x1] %vm384_vm1, %v2777_v0 }
  0x2b   : > { %414 = vst.msk [vmem:[#allocation2 + $0x119] sm:$0x1] %vm384_vm1, %v2777_v0 }
  0x2c   : > { %415 = vst.msk [vmem:[#allocation2 + $0x131] sm:$0x1] %vm384_vm1, %v2777_v0 }
  0x2d   : > { %416 = vst.msk [vmem:[#allocation2 + $0x149] sm:$0x1] %vm384_vm1, %v2777_v0 }
  0x2e   : > { %417 = vst.msk [vmem:[#allocation2 + $0x161] sm:$0x1] %vm384_vm1, %v2777_v0 }
  0x2f   : > { %418 = vst.msk [vmem:[#allocation2 + $0x179] sm:$0x1] %vm384_vm1, %v2777_v0 }
  0x30   : > { %419 = vst.msk [vmem:[#allocation2 + $0x191] sm:$0x1] %vm384_vm1, %v2777_v0 }
  0x31   : > { %422 = vst.msk [vmem:[#allocation2 + $0x19] sm:$0xff] %vm343_vm0, %v275_v3 }
  0x32   : > { %344 = vst.msk [vmem:[%s2928_s8] sm:$0xff] %vm343_vm0, %v311_v4  ;;  %v301_v4 = vld [vmem:[%s2905_s27 + $0xd0] sm:$0xff] }
  0x33   : > { %402 = vst.msk [vmem:[#allocation2 + $0x198] sm:$0x1] %vm384_vm1, %v2777_v0 }
  0x34   : > { %379 = vst.msk [vmem:[#allocation2 + $0x10] sm:$0x3] %vm378_vm2, %v2777_v0 }
  0x35   : > { %383 = vst.msk [vmem:[#allocation2 + $0x1a8] sm:$0x3] %vm378_vm2, %v2777_v0 }
  0x36   : > { %403 = vst.msk [vmem:[#allocation2 + $0x11] sm:$0x1] %vm384_vm1, %v2777_v0 }
  0x37   : > { %345 = vst.msk [vmem:[%s2928_s8 + $0x8] sm:$0xff] %vm343_vm0, %v312_v6  ;;  %v303_v6 = vld [vmem:[%s2905_s27 + $0xe0] sm:$0xff] }
  0x38   : > { %v2950_v10 = vld [vmem:[#allocation2 + $0x19] sm:$0xff]  ;;  %423 = vst.msk [vmem:[#allocation2 + $0x21] sm:$0xff] %vm343_vm0, %v276_v5  ;;  %v337_v5 = vmul.f32 %v2910_v2, %v301_v4 }
  0x39   : > { %586 = vrot.lane.b32.xlu1 %v2950_v10, %s2778_s23  ;;  %420 = vst.msk [vmem:[#allocation2 + $0x1a9] sm:$0x1] %vm384_vm1, %v2777_v0  ;;  %v293_v0 = vld [vmem:[%s2905_s27 + $0x90] sm:$0xff] }
  0x3a   : > { %426 = vst.msk [vmem:[#allocation2 + $0x49] sm:$0xff] %vm343_vm0, %v279_v7  ;;  %v329_v1 = vmul.f32 %v2910_v2, %v293_v0  ;;  %v339_v7 = vmul.f32 %v2910_v2, %v303_v6 }
  0x3b   : > { %v519_v14 = vld [vmem:[#allocation2 + $0x9] sm:$0xff]  ;;  %348 = vst.msk [vmem:[%s2928_s8 + $0x20] sm:$0xff] %vm343_vm0, %v315_v8 }
  0x3c   : > { %584 = vrot.lane.b32.xlu0 %v519_v14, %s2778_s23  ;;  %349 = vst.msk [vmem:[%s2928_s8 + $0x28] sm:$0xff] %vm343_vm0, %v316_v11 }
  0x3d   : > { %427 = vst.msk [vmem:[#allocation2 + $0x51] sm:$0xff] %vm343_vm0, %v280_v9  ;;  %v296_v9 = vld [vmem:[%s2905_s27 + $0xa8] sm:$0xff] }
  0x3e   : > { %351 = vst.msk [vmem:[%s2928_s8 + $0x38] sm:$0xff] %vm343_vm0, %v318_v13  ;;  %v304_v13 = vld [vmem:[%s2905_s27 + $0xe8] sm:$0xff] }
  0x3f   : > { %v2973_v19 = vld [vmem:[#allocation2 + $0x21] sm:$0xff]  ;;  %429 = vst.msk [vmem:[#allocation2 + $0x69] sm:$0xff] %vm343_vm0, %v282_v12  ;;  %v332_v12 = vmul.f32 %v2910_v2, %v296_v9  ;;  %v340_v14 = vmul.f32 %v2910_v2, %v304_v13 }
  0x40   : > { %424 = vst.msk [vmem:[#allocation2 + $0x31] sm:$0xff] %vm343_vm0, %v277_v15 }
  0x41   : > { %588 = vrot.lane.b32.xlu1 %v2973_v19, %s2778_s23  ;;  %v2981_v22 = vld [vmem:[#allocation2 + $0x49] sm:$0xff]  ;;  %346 = vst.msk [vmem:[%s2928_s8 + $0x10] sm:$0xff] %vm343_vm0, %v313_v16  ;;  %v299_v16 = vld [vmem:[%s2905_s27 + $0xc0] sm:$0xff] }
  0x42   : > { %352 = vst.msk [vmem:[%s2928_s8 + $0x40] sm:$0xff] %vm343_vm0, %v319_v18 }
  0x43   : > { %430 = vst.msk [vmem:[#allocation2 + $0x79] sm:$0xff] %vm343_vm0, %v283_v17  ;;  %v335_v17 = vmul.f32 %v2910_v2, %v299_v16 }
  0x44   : > { %594 = vrot.lane.b32.xlu0 %v2981_v22, %s2778_s23  ;;  %354 = vst.msk [vmem:[%s2928_s8 + $0x50] sm:$0xff] %vm343_vm0, %v321_v21  ;;  %v525_v28 = vld [vmem:[#allocation2 + $0x51] sm:$0xff] }
  0x45   : > { %432 = vst.msk [vmem:[#allocation2 + $0x91] sm:$0xff] %vm343_vm0, %v285_v20  ;;  %v302_v20 = vld [vmem:[%s2905_s27 + $0xd8] sm:$0xff] }
  0x46   : > { %347 = vst.msk [vmem:[%s2928_s8 + $0x18] sm:$0xff] %vm343_vm0, %v314_v24  ;;  %v3011_v33 = vld [vmem:[#allocation2 + $0x69] sm:$0xff]  ;;  %v338_v24 = vmul.f32 %v2910_v2, %v302_v20 }
  0x47   : > { %v3001_v30 = vld [vmem:[#allocation2 + $0x31] sm:$0xff]  ;;  %425 = vst.msk [vmem:[#allocation2 + $0x39] sm:$0xff] %vm343_vm0, %v278_v23 }
  0x48   : > { %590 = vrot.lane.b32.xlu2 %v3001_v30, %s2778_s23  ;;  %355 = vst.msk [vmem:[%s2928_s8 + $0x58] sm:$0xff] %vm343_vm0, %v322_v26 }
  0x49   : > { %596 = vrot.lane.b32.xlu1 %v525_v28, %s2778_s23  ;;  %433 = vst.msk [vmem:[#allocation2 + $0x99] sm:$0xff] %vm343_vm0, %v286_v25 }
  0x4a   : > { %357 = vst.msk [vmem:[%s2928_s8 + $0x68] sm:$0xff] %vm343_vm0, %v324_v29  ;;  %v3027_v39 = vld [vmem:[#allocation2 + $0x79] sm:$0xff] }
  0x4b   : > { %435 = vst.msk [vmem:[#allocation2 + $0xb1] sm:$0xff] %vm343_vm0, %v288_v27 }
  0x4c   : > { %600 = vrot.lane.b32.xlu0 %v3011_v33, %s2778_s23  ;;  %350 = vst.msk [vmem:[%s2928_s8 + $0x30] sm:$0xff] %vm343_vm0, %v317_v32  ;;  %v3043_v44 = vld [vmem:[#allocation2 + $0x91] sm:$0xff]  ;;  %v454_v32 = vld [vmem:[#allocation2] sm:$0xff] }
  0x4d   : > { %428 = vst.msk [vmem:[#allocation2 + $0x61] sm:$0xff] %vm343_vm0, %v281_v31 }
  0x4e   : > { %v3029_v40 = vld [vmem:[#allocation2 + $0x39] sm:$0xff]  ;;  %358 = vst.msk [vmem:[%s2928_s8 + $0x70] sm:$0xff] %vm343_vm0, %v325_v35 }
  0x4f   : > { %436 = vst.msk [vmem:[#allocation2 + $0xc1] sm:$0xff] %vm343_vm0, %v289_v34  ;;  %v3196_v34 = vld [vmem:[#allocation2 + $0x30] sm:$0xff] }
  0x50   : > { %592 = vrot.lane.b32.xlu2 %v3029_v40, %s2778_s23  ;;  %360 = vst.msk [vmem:[%s2928_s8 + $0x80] sm:$0xff] %vm343_vm0, %v327_v37  ;;  %v3061_v51 = vld [vmem:[#allocation2 + $0x99] sm:$0xff] }
  0x51   : > { %602 = vrot.lane.b32.xlu1 %v3027_v39, %s2778_s23  ;;  %438 = vst.msk [vmem:[#allocation2 + $0xd9] sm:$0xff] %vm343_vm0, %v291_v36 }
  0x52   : > { %353 = vst.msk [vmem:[%s2928_s8 + $0x48] sm:$0xff] %vm343_vm0, %v320_v41  ;;  %v3075_v55 = vld [vmem:[#allocation2 + $0xb1] sm:$0xff] }
  0x53   : > { %431 = vst.msk [vmem:[#allocation2 + $0x81] sm:$0xff] %vm343_vm0, %v284_v38  ;;  %v712_v38 = vld [vmem:[#allocation2 + $0xa] sm:$0xff]  ;;  %v3210_v41 = vld [vmem:[#allocation2 + $0x18] sm:$0xff] }
  0x54   : > { %606 = vrot.lane.b32.xlu0 %v3043_v44, %s2778_s23  ;;  %361 = vst.msk [vmem:[%s2928_s8 + $0x88] sm:$0xff] %vm343_vm0, %v328_v43  ;;  %v3057_v49 = vld [vmem:[#allocation2 + $0x61] sm:$0xff] }
  0x55   : > { %439 = vst.msk [vmem:[#allocation2 + $0xe1] sm:$0xff] %vm343_vm0, %v292_v42  ;;  %v455_v42 = vld [vmem:[#allocation2 + $0x8] sm:$0xff] }
  0x56   : > { %363 = vst.msk [vmem:[%s2928_s8 + $0x98] sm:$0xff] %vm343_vm0, %v330_v46  ;;  %v3093_v62 = vld [vmem:[#allocation2 + $0xc1] sm:$0xff]  ;;  %v3220_v46 = vld [vmem:[#allocation2 + $0x38] sm:$0xff] }
  0x57   : > { %441 = vst.msk [vmem:[#allocation2 + $0xf9] sm:$0xff] %vm343_vm0, %v294_v45  ;;  %v3218_v45 = vld [vmem:[#allocation2 + $0x1a] sm:$0xff] }
  0x58   : > { %598 = vrot.lane.b32.xlu2 %v3057_v49, %s2778_s23  ;;  %356 = vst.msk [vmem:[%s2928_s8 + $0x60] sm:$0xff] %vm343_vm0, %v323_v48  ;;  %v3107_v3 = vld [vmem:[#allocation2 + $0xd9] sm:$0xff] }
  0x59   : > { %608 = vrot.lane.b32.xlu1 %v3061_v51, %s2778_s23  ;;  %434 = vst.msk [vmem:[#allocation2 + $0xa9] sm:$0xff] %vm343_vm0, %v287_v47  ;;  %v3228_v47 = vld [vmem:[#allocation2 + $0x32] sm:$0xff]  ;;  %v3230_v48 = vld [vmem:[#allocation2 + $0x20] sm:$0xff] }
  0x5a   : > { %364 = vst.msk [vmem:[%s2928_s8 + $0xa0] sm:$0xff] %vm343_vm0, %v331_v52  ;;  %v3089_v60 = vld [vmem:[#allocation2 + $0x81] sm:$0xff] }
  0x5b   : > { %442 = vst.msk [vmem:[#allocation2 + $0x109] sm:$0xff] %vm343_vm0, %v295_v50  ;;  %v711_v50 = vld [vmem:[#allocation2 + $0x2] sm:$0xff] }
  0x5c   : > { %612 = vrot.lane.b32.xlu0 %v3075_v55, %s2778_s23  ;;  %366 = vst.msk [vmem:[%s2928_s8 + $0xb0] sm:$0xff] %vm343_vm0, %v333_v54  ;;  %v3125_v11 = vld [vmem:[#allocation2 + $0xe1] sm:$0xff] }
  0x5d   : > { %444 = vst.msk [vmem:[#allocation2 + $0x121] sm:$0xff] %vm343_vm0, %v297_v53  ;;  %v3236_v52 = vld [vmem:[#allocation2 + $0x48] sm:$0xff]  ;;  %v3238_v53 = vld [vmem:[#allocation2 + $0x3a] sm:$0xff] }
  0x5e   : > { %359 = vst.msk [vmem:[%s2928_s8 + $0x78] sm:$0xff] %vm343_vm0, %v326_v57  ;;  %v3139_v15 = vld [vmem:[#allocation2 + $0xf9] sm:$0xff]  ;;  %v3251_v57 = vld [vmem:[#allocation2 + $0x50] sm:$0xff] }
  0x5f   : > { %437 = vst.msk [vmem:[#allocation2 + $0xc9] sm:$0xff] %vm343_vm0, %v290_v56  ;;  %v3242_v54 = vld [vmem:[#allocation2 + $0x60] sm:$0xff]  ;;  %v3249_v56 = vld [vmem:[#allocation2 + $0x52] sm:$0xff] }
  0x60   : > { %604 = vrot.lane.b32.xlu2 %v3089_v60, %s2778_s23  ;;  %367 = vst.msk [vmem:[%s2928_s8 + $0xb8] sm:$0xff] %vm343_vm0, %v334_v59  ;;  %v3121_v8 = vld [vmem:[#allocation2 + $0xa9] sm:$0xff] }
  0x61   : > { %614 = vrot.lane.b32.xlu1 %v3093_v62, %s2778_s23  ;;  %445 = vst.msk [vmem:[#allocation2 + $0x129] sm:$0xff] %vm343_vm0, %v298_v58  ;;  %v3257_v58 = vld [vmem:[#allocation2 + $0x68] sm:$0xff] }
  0x62   : > { %369 = vst.msk [vmem:[%s2928_s8 + $0xc8] sm:$0xff] %vm343_vm0, %v336_v63  ;;  %v3155_v21 = vld [vmem:[#allocation2 + $0x109] sm:$0xff]  ;;  %v3265_v63 = vld [vmem:[#allocation2 + $0x80] sm:$0xff] }
  0x63   : > { %447 = vst.msk [vmem:[#allocation2 + $0x141] sm:$0xff] %vm343_vm0, %v300_v61  ;;  %v3259_v59 = vld [vmem:[#allocation2 + $0x22] sm:$0xff] }
  0x64   : > { %618 = vrot.lane.b32.xlu0 %v3107_v3, %s2778_s23  ;;  %362 = vst.msk [vmem:[%s2928_s8 + $0x90] sm:$0xff] %vm343_vm0, %v329_v1  ;;  %v3165_v23 = vld [vmem:[#allocation2 + $0x121] sm:$0xff] }
  0x65   : > { %440 = vst.msk [vmem:[#allocation2 + $0xf1] sm:$0xff] %vm343_vm0, %v293_v0  ;;  %v3263_v61 = vld [vmem:[#allocation2 + $0x62] sm:$0xff]  ;;  %v3273_v0 = vld [vmem:[#allocation2 + $0x7a] sm:$0xff] }
  0x66   : > { %370 = vst.msk [vmem:[%s2928_s8 + $0xd0] sm:$0xff] %vm343_vm0, %v337_v5  ;;  %v3151_v18 = vld [vmem:[#allocation2 + $0xc9] sm:$0xff] }
  0x67   : > { %448 = vst.msk [vmem:[#allocation2 + $0x151] sm:$0xff] %vm343_vm0, %v301_v4  ;;  %v3276_v4 = vld [vmem:[#allocation2 + $0x78] sm:$0xff]  ;;  %v3282_v5 = vld [vmem:[#allocation2 + $0x90] sm:$0xff] }
  0x68   : > { %610 = vrot.lane.b32.xlu2 %v3121_v8, %s2778_s23  ;;  %372 = vst.msk [vmem:[%s2928_s8 + $0xe0] sm:$0xff] %vm343_vm0, %v339_v7  ;;  %v3172_v26 = vld [vmem:[#allocation2 + $0x129] sm:$0xff] }
  0x69   : > { %620 = vrot.lane.b32.xlu1 %v3125_v11, %s2778_s23  ;;  %450 = vst.msk [vmem:[#allocation2 + $0x169] sm:$0xff] %vm343_vm0, %v303_v6  ;;  %v3284_v6 = vld [vmem:[#allocation2 + $0x4a] sm:$0xff]  ;;  %v3288_v7 = vld [vmem:[#allocation2 + $0x82] sm:$0xff] }
  0x6a   : > { %365 = vst.msk [vmem:[%s2928_s8 + $0xa8] sm:$0xff] %vm343_vm0, %v332_v12  ;;  %v3180_v27 = vld [vmem:[#allocation2 + $0x141] sm:$0xff] }
  0x6b   : > { %443 = vst.msk [vmem:[#allocation2 + $0x111] sm:$0xff] %vm343_vm0, %v296_v9  ;;  %v3290_v9 = vld [vmem:[#allocation2 + $0xa8] sm:$0xff]  ;;  %v3298_v12 = vld [vmem:[#allocation2 + $0x9a] sm:$0xff] }
  0x6c   : > { %624 = vrot.lane.b32.xlu0 %v3139_v15, %s2778_s23  ;;  %373 = vst.msk [vmem:[%s2928_s8 + $0xe8] sm:$0xff] %vm343_vm0, %v340_v14  ;;  %v3170_v25 = vld [vmem:[#allocation2 + $0xf1] sm:$0xff] }
  0x6d   : > { %451 = vst.msk [vmem:[#allocation2 + $0x171] sm:$0xff] %vm343_vm0, %v304_v13 }
  0x6e   : > { %368 = vst.msk [vmem:[%s2928_s8 + $0xc0] sm:$0xff] %vm343_vm0, %v335_v17  ;;  %v3186_v29 = vld [vmem:[#allocation2 + $0x151] sm:$0xff] }
  0x6f   : > { %446 = vst.msk [vmem:[#allocation2 + $0x139] sm:$0xff] %vm343_vm0, %v299_v16  ;;  %v3301_v16 = vld [vmem:[#allocation2 + $0x98] sm:$0xff]  ;;  %v3306_v17 = vld [vmem:[#allocation2 + $0xb0] sm:$0xff] }
  0x70   : > { %616 = vrot.lane.b32.xlu2 %v3151_v18, %s2778_s23  ;;  %449 = vst.msk [vmem:[#allocation2 + $0x159] sm:$0xff] %vm343_vm0, %v302_v20  ;;  %v3192_v31 = vld [vmem:[#allocation2 + $0x169] sm:$0xff] }
  0x71   : > { %626 = vrot.lane.b32.xlu1 %v3155_v21, %s2778_s23  ;;  %371 = vst.msk [vmem:[%s2928_s8 + $0xd8] sm:$0xff] %vm343_vm0, %v338_v24  ;;  %v3308_v20 = vld [vmem:[#allocation2 + $0x6a] sm:$0xff] }
  0x72   : > { %v3184_v28 = vld [vmem:[#allocation2 + $0x111] sm:$0xff]  ;;  %4350 = vst [vmem:[#allocation4_spill] sm:$0xff] %v3186_v29 }
  0x73   : > { %4351 = vst [vmem:[#allocation5_spill] sm:$0xff] %v3192_v31 }
  0x74   : > { %630 = vrot.lane.b32.xlu0 %v3165_v23, %s2778_s23  ;;  %486 = vst.msk [vmem:[#allocation3] sm:$0xff] %vm343_vm0, %v454_v32  ;;  %v3201_v36 = vld [vmem:[#allocation2 + $0x171] sm:$0xff] }
  0x75   : > { %4352 = vst [vmem:[#allocation6_spill] sm:$0xff] %v3201_v36  ;;  %v3312_v32 = vld [vmem:[#allocation2 + $0xaa] sm:$0xff] }
  0x76   : > { %v3198_v35 = vld [vmem:[#allocation2 + $0x139] sm:$0xff]  ;;  %490 = vst.msk [vmem:[#allocation3 + $0x20] sm:$0xff] %vm343_vm0, %v3196_v34 }
  0x77   : > { %488 = vst.msk [vmem:[#allocation3 + $0x10] sm:$0xff] %vm343_vm0, %v3210_v41  ;;  %v3215_v43 = vld [vmem:[#allocation2 + $0x159] sm:$0xff] }
  0x78   : > { %622 = vrot.lane.b32.xlu2 %v3170_v25, %s2778_s23  ;;  %487 = vst.msk [vmem:[#allocation3 + $0x8] sm:$0xff] %vm343_vm0, %v455_v42 }
  0x79   : > { %632 = vrot.lane.b32.xlu1 %v3172_v26, %s2778_s23  ;;  %4353 = vst [vmem:[#allocation7_spill] sm:$0xff] %v3218_v45 }
  0x7a   : > { %491 = vst.msk [vmem:[#allocation3 + $0x28] sm:$0xff] %vm343_vm0, %v3220_v46 }
  0x7b   : > { %4354 = vst [vmem:[#allocation8_spill] sm:$0xff] %v3228_v47 }
  0x7c   : > { %636 = vrot.lane.b32.xlu0 %v3180_v27, %s2778_s23  ;;  %489 = vst.msk [vmem:[#allocation3 + $0x18] sm:$0xff] %vm343_vm0, %v3230_v48 }
  0x7d   : > { %4355 = vst [vmem:[#allocation9_spill] sm:$0xff] %v3238_v53 }
  0x7e   : > { %492 = vst.msk [vmem:[#allocation3 + $0x30] sm:$0xff] %vm343_vm0, %v3236_v52 }
  0x7f   : > { %494 = vst.msk [vmem:[#allocation3 + $0x40] sm:$0xff] %vm343_vm0, %v3242_v54 }
  0x80   : > { %628 = vrot.lane.b32.xlu2 %v3184_v28, %s2778_s23  ;;  %4356 = vst [vmem:[#allocation10_spill] sm:$0xff] %v3249_v56 }
  0x81   : > { %638 = vrot.lane.b32.xlu1 %v3186_v29, %s2778_s23  ;;  %493 = vst.msk [vmem:[#allocation3 + $0x38] sm:$0xff] %vm343_vm0, %v3251_v57  ;;  %v3457_v29 = vld [vmem:[#allocation2 + $0x170] sm:$0xff] }
  0x82   : > { %4357 = vst [vmem:[#allocation11_spill] sm:$0xff] %v3259_v59 }
  0x83   : > { %495 = vst.msk [vmem:[#allocation3 + $0x48] sm:$0xff] %vm343_vm0, %v3257_v58 }
  0x84   : > { %642 = vrot.lane.b32.xlu0 %v3192_v31, %s2778_s23  ;;  %4358 = vst [vmem:[#allocation12_spill] sm:$0xff] %v3263_v61  ;;  %v3461_v31 = vld [vmem:[#allocation2 + $0x142] sm:$0xff] }
  0x85   : > { %497 = vst.msk [vmem:[#allocation3 + $0x58] sm:$0xff] %vm343_vm0, %v3265_v63 }
  0x86   : > { %4359 = vst [vmem:[#allocation13_spill] sm:$0xff] %v3273_v0 }
  0x87   : > { %v583_v37 = vpop.permute.xlu0 %582  ;;  %496 = vst.msk [vmem:[#allocation3 + $0x50] sm:$0xff] %vm343_vm0, %v3276_v4 }
  0x88   : > { %634 = vrot.lane.b32.xlu2 %v3198_v35, %s2778_s23  ;;  %679 = vst.msk [vmem:[#allocation3] sm:$0xff] %vm678_vm3, %v583_v37  ;;  %v3317_v37 = vld [vmem:[#allocation2 + $0xc8] sm:$0xff] }
  0x89   : > { %644 = vrot.lane.b32.xlu1 %v3201_v36, %s2778_s23  ;;  %4360 = vst [vmem:[#allocation14_spill] sm:$0xff] %v3284_v6  ;;  %v3436_v36 = vld [vmem:[#allocation2 + $0x150] sm:$0xff] }
  0x8a   : > { %498 = vst.msk [vmem:[#allocation3 + $0x60] sm:$0xff] %vm343_vm0, %v3282_v5 }
  0x8b   : > { %4361 = vst [vmem:[#allocation15_spill] sm:$0xff] %v3288_v7 }
  0x8c   : > { %777 = vrot.lane.b32.xlu0 %v712_v38, %s2779_s9  ;;  %500 = vst.msk [vmem:[#allocation3 + $0x70] sm:$0xff] %vm343_vm0, %v3290_v9  ;;  %v3325_v38 = vld [vmem:[#allocation2 + $0xc2] sm:$0xff] }
  0x8d   : > { %4362 = vst [vmem:[#allocation16_spill] sm:$0xff] %v3298_v12 }
  0x8e   : > { %4363 = vst [vmem:[#allocation17_spill] sm:$0xff] %v3308_v20 }
  0x8f   : > { %499 = vst.msk [vmem:[#allocation3 + $0x68] sm:$0xff] %vm343_vm0, %v3301_v16 }
  0x90   : > { %640 = vrot.lane.b32.xlu2 %v3215_v43, %s2778_s23  ;;  %4364 = vst [vmem:[#allocation18_spill] sm:$0xff] %v3312_v32  ;;  %s4003_s23 = scalar_lea.vmem %s4319_s5, %s2893_s24  ;;  %s2685_s24 = sshll.u32 %s4409_s22, 1 }
  0x91   : > { %779 = vrot.lane.b32.xlu1 %v3218_v45, %s2779_s9  ;;  %501 = vst.msk [vmem:[#allocation3 + $0x78] sm:$0xff] %vm343_vm0, %v3306_v17  ;;  %v3409_v45 = vld [vmem:[#allocation2 + $0x128] sm:$0xff] }
  0x92   : > { %503 = vst.msk [vmem:[#allocation3 + $0x88] sm:$0xff] %vm343_vm0, %v3317_v37 }
  0x93   : > { %4365 = vst [vmem:[#allocation19_spill] sm:$0xff] %v3325_v38 }
  0x94   : > { %783 = vrot.lane.b32.xlu0 %v3228_v47, %s2779_s9  ;;  %511 = vst.msk [vmem:[#allocation3 + $0xc8] sm:$0xff] %vm343_vm0, %v3409_v45 }
  0x95   : > { %514 = vst.msk [vmem:[#allocation3 + $0xe0] sm:$0xff] %vm343_vm0, %v3436_v36 }
  0x96   : > { %517 = vst.msk [vmem:[#allocation3 + $0xf8] sm:$0xff] %vm343_vm0, %v3457_v29 }
  0x98   : > { %775 = vrot.lane.b32.xlu2 %v711_v50, %s2779_s9 }
  0x99   : > { %785 = vrot.lane.b32.xlu1 %v3238_v53, %s2779_s9  ;;  %v3382_v53 = vld [vmem:[#allocation2 + $0x108] sm:$0xff] }
  0x9a   : > { %508 = vst.msk [vmem:[#allocation3 + $0xb0] sm:$0xff] %vm343_vm0, %v3382_v53 }
  0x9c   : > { %789 = vrot.lane.b32.xlu0 %v3249_v56, %s2779_s9 }
  0xa0   : > { %781 = vrot.lane.b32.xlu2 %v3259_v59, %s2779_s9  ;;  %v3447_v59 = vld [vmem:[#allocation2 + $0x15a] sm:$0xff] }
  0xa1   : > { %791 = vrot.lane.b32.xlu1 %v3263_v61, %s2779_s9  ;;  %v3362_v61 = vld [vmem:[#allocation2 + $0xb2] sm:$0xff]  ;;  %4378 = vst [vmem:[#allocation32_spill] sm:$0xff] %v3447_v59 }
  0xa2   : > { %v591_v1 = vpop.permute.xlu2 %590  ;;  %4369 = vst [vmem:[#allocation23_spill] sm:$0xff] %v3362_v61 }
  0xa3   : > { %683 = vst.msk [vmem:[#allocation3 + $0x20] sm:$0xff] %vm678_vm3, %v591_v1  ;;  %v3328_v1 = vld [vmem:[#allocation2 + $0xc0] sm:$0xff] }
  0xa4   : > { %795 = vrot.lane.b32.xlu0 %v3273_v0, %s2779_s9  ;;  %502 = vst.msk [vmem:[#allocation3 + $0x80] sm:$0xff] %vm343_vm0, %v3328_v1 }
  0xa8   : > { %787 = vrot.lane.b32.xlu2 %v3284_v6, %s2779_s9  ;;  %v3420_v6 = vld [vmem:[#allocation2 + $0x13a] sm:$0xff] }
  0xa9   : > { %797 = vrot.lane.b32.xlu1 %v3288_v7, %s2779_s9  ;;  %4376 = vst [vmem:[#allocation30_spill] sm:$0xff] %v3420_v6 }
  0xaa   : > { %v593_v13 = vpop.permute.xlu2 %592 }
  0xab   : > { %v587_v14 = vpop.permute.xlu1 %586  ;;  %684 = vst.msk [vmem:[#allocation3 + $0x28] sm:$0xff] %vm678_vm3, %v593_v13  ;;  %v3333_v13 = vld [vmem:[#allocation2 + $0xd8] sm:$0xff] }
  0xac   : > { %801 = vrot.lane.b32.xlu0 %v3298_v12, %s2779_s9  ;;  %681 = vst.msk [vmem:[#allocation3 + $0x10] sm:$0xff] %vm678_vm3, %v587_v14  ;;  %v3335_v14 = vld [vmem:[#allocation2 + $0x92] sm:$0xff]  ;;  %v3355_v12 = vld [vmem:[#allocation2 + $0xe0] sm:$0xff] }
  0xad   : > { %4366 = vst [vmem:[#allocation20_spill] sm:$0xff] %v3335_v14 }
  0xae   : > { %v585_v24 = vpop.permute.xlu0 %584  ;;  %504 = vst.msk [vmem:[#allocation3 + $0x90] sm:$0xff] %vm343_vm0, %v3333_v13 }
  0xaf   : > { %680 = vst.msk [vmem:[#allocation3 + $0x8] sm:$0xff] %vm678_vm3, %v585_v24 }
  0xb0   : > { %793 = vrot.lane.b32.xlu2 %v3308_v20, %s2779_s9  ;;  %505 = vst.msk [vmem:[#allocation3 + $0x98] sm:$0xff] %vm343_vm0, %v3355_v12  ;;  %v3393_v20 = vld [vmem:[#allocation2 + $0x112] sm:$0xff] }
  0xb1   : > { %803 = vrot.lane.b32.xlu1 %v3312_v32, %s2779_s9  ;;  %v3339_v32 = vld [vmem:[#allocation2 + $0xca] sm:$0xff]  ;;  %4373 = vst [vmem:[#allocation27_spill] sm:$0xff] %v3393_v20 }
  0xb2   : > { %v599_v42 = vpop.permute.xlu2 %598  ;;  %4367 = vst [vmem:[#allocation21_spill] sm:$0xff] %v3339_v32 }
  0xb3   : > { %v589_v50 = vpop.permute.xlu1 %588  ;;  %687 = vst.msk [vmem:[#allocation3 + $0x40] sm:$0xff] %vm678_vm3, %v599_v42  ;;  %v3344_v42 = vld [vmem:[#allocation2 + $0xf0] sm:$0xff] }
  0xb4   : > { %807 = vrot.lane.b32.xlu0 %v3325_v38, %s2779_s9  ;;  %682 = vst.msk [vmem:[#allocation3 + $0x18] sm:$0xff] %vm678_vm3, %v589_v50  ;;  %v3352_v50 = vld [vmem:[#allocation2 + $0xe2] sm:$0xff] }
  0xb5   : > { %506 = vst.msk [vmem:[#allocation3 + $0xa0] sm:$0xff] %vm343_vm0, %v3344_v42 }
  0xb6   : > { %v595_v24 = vpop.permute.xlu0 %594  ;;  %4368 = vst [vmem:[#allocation22_spill] sm:$0xff] %v3352_v50 }
  0xb7   : > { %685 = vst.msk [vmem:[#allocation3 + $0x30] sm:$0xff] %vm678_vm3, %v595_v24  ;;  %v3360_v24 = vld [vmem:[#allocation2 + $0xf8] sm:$0xff] }
  0xb8   : > { %799 = vrot.lane.b32.xlu2 %v3335_v14, %s2779_s9  ;;  %v3366_v14 = vld [vmem:[#allocation2 + $0xf2] sm:$0xff]  ;;  %507 = vst.msk [vmem:[#allocation3 + $0xa8] sm:$0xff] %vm343_vm0, %v3360_v24 }
  0xb9   : > { %809 = vrot.lane.b32.xlu1 %v3339_v32, %s2779_s9  ;;  %4370 = vst [vmem:[#allocation24_spill] sm:$0xff] %v3366_v14 }
  0xba   : > { %v605_v38 = vpop.permute.xlu2 %604 }
  0xbb   : > { %v597_v7 = vpop.permute.xlu1 %596  ;;  %690 = vst.msk [vmem:[#allocation3 + $0x58] sm:$0xff] %vm678_vm3, %v605_v38  ;;  %v3371_v38 = vld [vmem:[#allocation2 + $0x110] sm:$0xff] }
  0xbc   : > { %813 = vrot.lane.b32.xlu0 %v3352_v50, %s2779_s9  ;;  %686 = vst.msk [vmem:[#allocation3 + $0x38] sm:$0xff] %vm678_vm3, %v597_v7  ;;  %v3379_v7 = vld [vmem:[#allocation2 + $0x10a] sm:$0xff] }
  0xbd   : > { %509 = vst.msk [vmem:[#allocation3 + $0xb8] sm:$0xff] %vm343_vm0, %v3371_v38 }
  0xbe   : > { %v601_v32 = vpop.permute.xlu0 %600  ;;  %4371 = vst [vmem:[#allocation25_spill] sm:$0xff] %v3379_v7 }
  0xbf   : > { %688 = vst.msk [vmem:[#allocation3 + $0x48] sm:$0xff] %vm678_vm3, %v601_v32  ;;  %v3387_v32 = vld [vmem:[#allocation2 + $0x120] sm:$0xff] }
  0xc0   : > { %805 = vrot.lane.b32.xlu2 %v3362_v61, %s2779_s9  ;;  %v3389_v61 = vld [vmem:[#allocation2 + $0xda] sm:$0xff]  ;;  %510 = vst.msk [vmem:[#allocation3 + $0xc0] sm:$0xff] %vm343_vm0, %v3387_v32 }
  0xc1   : > { %815 = vrot.lane.b32.xlu1 %v3366_v14, %s2779_s9  ;;  %4372 = vst [vmem:[#allocation26_spill] sm:$0xff] %v3389_v61 }
  0xc2   : > { %v611_v50 = vpop.permute.xlu2 %610 }
  0xc3   : > { %v603_v0 = vpop.permute.xlu1 %602  ;;  %693 = vst.msk [vmem:[#allocation3 + $0x70] sm:$0xff] %vm678_vm3, %v611_v50  ;;  %v3398_v50 = vld [vmem:[#allocation2 + $0x138] sm:$0xff] }
  0xc4   : > { %819 = vrot.lane.b32.xlu0 %v3379_v7, %s2779_s9  ;;  %689 = vst.msk [vmem:[#allocation3 + $0x50] sm:$0xff] %vm678_vm3, %v603_v0  ;;  %v3406_v0 = vld [vmem:[#allocation2 + $0x12a] sm:$0xff] }
  0xc5   : > { %512 = vst.msk [vmem:[#allocation3 + $0xd0] sm:$0xff] %vm343_vm0, %v3398_v50 }
  0xc6   : > { %v607_v14 = vpop.permute.xlu0 %606  ;;  %4374 = vst [vmem:[#allocation28_spill] sm:$0xff] %v3406_v0 }
  0xc7   : > { %691 = vst.msk [vmem:[#allocation3 + $0x60] sm:$0xff] %vm678_vm3, %v607_v14  ;;  %v3414_v14 = vld [vmem:[#allocation2 + $0x140] sm:$0xff] }
  0xc8   : > { %811 = vrot.lane.b32.xlu2 %v3389_v61, %s2779_s9  ;;  %v3416_v61 = vld [vmem:[#allocation2 + $0xfa] sm:$0xff]  ;;  %513 = vst.msk [vmem:[#allocation3 + $0xd8] sm:$0xff] %vm343_vm0, %v3414_v14 }
  0xc9   : > { %821 = vrot.lane.b32.xlu1 %v3393_v20, %s2779_s9  ;;  %4375 = vst [vmem:[#allocation29_spill] sm:$0xff] %v3416_v61 }
  0xca   : > { %v617_v7 = vpop.permute.xlu2 %616 }
  0xcb   : > { %v609_v56 = vpop.permute.xlu1 %608  ;;  %696 = vst.msk [vmem:[#allocation3 + $0x88] sm:$0xff] %vm678_vm3, %v617_v7  ;;  %v3425_v7 = vld [vmem:[#allocation2 + $0x158] sm:$0xff] }
  0xcc   : > { %825 = vrot.lane.b32.xlu0 %v3406_v0, %s2779_s9  ;;  %692 = vst.msk [vmem:[#allocation3 + $0x68] sm:$0xff] %vm678_vm3, %v609_v56  ;;  %v3433_v56 = vld [vmem:[#allocation2 + $0x152] sm:$0xff] }
  0xcd   : > { %515 = vst.msk [vmem:[#allocation3 + $0xe8] sm:$0xff] %vm343_vm0, %v3425_v7 }
  0xce   : > { %v613_v20 = vpop.permute.xlu0 %612  ;;  %4377 = vst [vmem:[#allocation31_spill] sm:$0xff] %v3433_v56 }
  0xcf   : > { %694 = vst.msk [vmem:[#allocation3 + $0x78] sm:$0xff] %vm678_vm3, %v613_v20  ;;  %v3441_v20 = vld [vmem:[#allocation2 + $0x168] sm:$0xff] }
  0xd0   : > { %817 = vrot.lane.b32.xlu2 %v3416_v61, %s2779_s9  ;;  %v3443_v61 = vld [vmem:[#allocation2 + $0x122] sm:$0xff]  ;;  %516 = vst.msk [vmem:[#allocation3 + $0xf0] sm:$0xff] %vm343_vm0, %v3441_v20 }
  0xd1   : > { %827 = vrot.lane.b32.xlu1 %v3420_v6, %s2779_s9 }
  0xd2   : > { %v623_v0 = vpop.permute.xlu2 %622 }
  0xd3   : > { %v615_v47 = vpop.permute.xlu1 %614  ;;  %699 = vst.msk [vmem:[#allocation3 + $0xa0] sm:$0xff] %vm678_vm3, %v623_v0 }
  0xd4   : > { %831 = vrot.lane.b32.xlu0 %v3433_v56, %s2779_s9  ;;  %695 = vst.msk [vmem:[#allocation3 + $0x80] sm:$0xff] %vm678_vm3, %v615_v47  ;;  %v742_v47 = vld [vmem:[#allocation2 + $0x172] sm:$0xff] }
  0xd6   : > { %v619_v6 = vpop.permute.xlu0 %618 }
  0xd7   : > { %697 = vst.msk [vmem:[#allocation3 + $0x90] sm:$0xff] %vm678_vm3, %v619_v6 }
  0xd8   : > { %823 = vrot.lane.b32.xlu2 %v3443_v61, %s2779_s9 }
  0xd9   : > { %833 = vrot.lane.b32.xlu1 %v3447_v59, %s2779_s9 }
  0xda   : > { %v629_v0 = vpop.permute.xlu2 %628 }
  0xdb   : > { %v621_v56 = vpop.permute.xlu1 %620  ;;  %702 = vst.msk [vmem:[#allocation3 + $0xb8] sm:$0xff] %vm678_vm3, %v629_v0 }
  0xdc   : > { %837 = vrot.lane.b32.xlu0 %v742_v47, %s2779_s9  ;;  %698 = vst.msk [vmem:[#allocation3 + $0x98] sm:$0xff] %vm678_vm3, %v621_v56  ;;  %v3474_v56 = vld [vmem:[#allocation2 + $0x16a] sm:$0xff] }
  0xde   : > { %v625_v6 = vpop.permute.xlu0 %624 }
  0xdf   : > { %700 = vst.msk [vmem:[#allocation3 + $0xa8] sm:$0xff] %vm678_vm3, %v625_v6 }
  0xe0   : > { %829 = vrot.lane.b32.xlu2 %v3461_v31, %s2779_s9 }
  0xe1   : > { %968 = vrot.lane.b32.xlu1 %v3210_v41, %s2780_s10 }
  0xe2   : > { %v635_v0 = vpop.permute.xlu2 %634 }
  0xe3   : > { %v627_v59 = vpop.permute.xlu1 %626  ;;  %705 = vst.msk [vmem:[#allocation3 + $0xd0] sm:$0xff] %vm678_vm3, %v635_v0 }
  0xe4   : > { %972 = vrot.lane.b32.xlu0 %v3196_v34, %s2780_s10  ;;  %701 = vst.msk [vmem:[#allocation3 + $0xb0] sm:$0xff] %vm678_vm3, %v627_v59 }
  0xe6   : > { %v631_v47 = vpop.permute.xlu0 %630 }
  0xe7   : > { %703 = vst.msk [vmem:[#allocation3 + $0xc0] sm:$0xff] %vm678_vm3, %v631_v47 }
  0xe8   : > { %835 = vrot.lane.b32.xlu2 %v3474_v56, %s2779_s9 }
  0xe9   : > { %974 = vrot.lane.b32.xlu1 %v3220_v46, %s2780_s10 }
  0xea   : > { %v641_v41 = vpop.permute.xlu2 %640 }
  0xeb   : > { %v633_v6 = vpop.permute.xlu1 %632  ;;  %708 = vst.msk [vmem:[#allocation3 + $0xe8] sm:$0xff] %vm678_vm3, %v641_v41  ;;  %v306_v41 = vld [vmem:[%s2905_s27 + $0xf8] sm:$0xff] }
  0xec   : > { %978 = vrot.lane.b32.xlu0 %v3251_v57, %s2780_s10  ;;  %704 = vst.msk [vmem:[#allocation3 + $0xc8] sm:$0xff] %vm678_vm3, %v633_v6 }
  0xed   : > { %453 = vst.msk [vmem:[#allocation2 + $0x189] sm:$0xff] %vm343_vm0, %v306_v41 }
  0xee   : > { %v637_v34 = vpop.permute.xlu0 %636 }
  0xef   : > { %706 = vst.msk [vmem:[#allocation3 + $0xd8] sm:$0xff] %vm678_vm3, %v637_v34 }
  0xf0   : > { %970 = vrot.lane.b32.xlu2 %v3230_v48, %s2780_s10 }
  0xf1   : > { %980 = vrot.lane.b32.xlu1 %v3242_v54, %s2780_s10 }
  0xf2   : > { %v776_v46 = vpop.permute.xlu2 %775 }
  0xf3   : > { %v639_v59 = vpop.permute.xlu1 %638  ;;  %872 = vst.msk [vmem:[#allocation3] sm:$0xff] %vm871_vm4, %v776_v46 }
  0xf4   : > { %984 = vrot.lane.b32.xlu0 %v3276_v4, %s2780_s10  ;;  %707 = vst.msk [vmem:[#allocation3 + $0xe0] sm:$0xff] %vm678_vm3, %v639_v59 }
  0xf6   : > { %v643_v57 = vpop.permute.xlu0 %642 }
  0xf7   : > { %709 = vst.msk [vmem:[#allocation3 + $0xf0] sm:$0xff] %vm678_vm3, %v643_v57 }
  0xf8   : > { %976 = vrot.lane.b32.xlu2 %v3236_v52, %s2780_s10 }
  0xf9   : > { %986 = vrot.lane.b32.xlu1 %v3265_v63, %s2780_s10 }
  0xfa   : > { %v782_v48 = vpop.permute.xlu2 %781 }
  0xfb   : > { %v645_v54 = vpop.permute.xlu1 %644  ;;  %875 = vst.msk [vmem:[#allocation3 + $0x18] sm:$0xff] %vm871_vm4, %v782_v48 }
  0xfc   : > { %990 = vrot.lane.b32.xlu0 %v3301_v16, %s2780_s10  ;;  %710 = vst.msk [vmem:[#allocation3 + $0xf8] sm:$0xff] %vm678_vm3, %v645_v54 }
  0xfe   : > { %v778_v4 = vpop.permute.xlu0 %777 }
  0xff   : > { %873 = vst.msk [vmem:[#allocation3 + $0x8] sm:$0xff] %vm871_vm4, %v778_v4 }
 0x100   : > { %982 = vrot.lane.b32.xlu2 %v3257_v58, %s2780_s10  ;;  %v305_v58 = vld [vmem:[%s2905_s27 + $0xf0] sm:$0xff] }
 0x101   : > { %992 = vrot.lane.b32.xlu1 %v3290_v9, %s2780_s10  ;;  %452 = vst.msk [vmem:[#allocation2 + $0x181] sm:$0xff] %vm343_vm0, %v305_v58 }
 0x102   : > { %v788_v52 = vpop.permute.xlu2 %787 }
 0x103   : > { %v780_v63 = vpop.permute.xlu1 %779  ;;  %878 = vst.msk [vmem:[#allocation3 + $0x30] sm:$0xff] %vm871_vm4, %v788_v52 }
 0x104   : > { %996 = vrot.lane.b32.xlu0 %v3328_v1, %s2780_s10  ;;  %874 = vst.msk [vmem:[#allocation3 + $0x10] sm:$0xff] %vm871_vm4, %v780_v63  ;;  %v1128_v63 = vld [vmem:[#allocation2 + $0x189] sm:$0xff] }
 0x106   : > { %v784_v16 = vpop.permute.xlu0 %783 }
 0x107   : > { %876 = vst.msk [vmem:[#allocation3 + $0x20] sm:$0xff] %vm871_vm4, %v784_v16  ;;  %v4380_v16 = vld [vmem:[#allocation4_spill] sm:$0xff] }
 0x108   : > { %988 = vrot.lane.b32.xlu2 %v3282_v5, %s2780_s10  ;;  %v341_v5 = vmul.f32 %v2910_v2, %v305_v58  ;;  %v934_v34 = vld [vmem:[#allocation2 + $0x180] sm:$0xff] }
 0x109   : > { %998 = vrot.lane.b32.xlu1 %v3317_v37, %s2780_s10  ;;  %v1127_v4 = vld [vmem:[#allocation2 + $0x181] sm:$0xff] }
 0x10a   : > { %v794_v9 = vpop.permute.xlu2 %793  ;;  %374 = vst.msk [vmem:[%s2928_s8 + $0xf0] sm:$0xff] %vm343_vm0, %v341_v5  ;;  %v4383_v5 = vld [vmem:[#allocation8_spill] sm:$0xff] }
 0x10b   : > { %v786_v0 = vpop.permute.xlu1 %785  ;;  %881 = vst.msk [vmem:[#allocation3 + $0x48] sm:$0xff] %vm871_vm4, %v794_v9  ;;  %v4381_v9 = vld [vmem:[#allocation11_spill] sm:$0xff] }
 0x10c   : > { %1002 = vrot.lane.b32.xlu0 %v3355_v12, %s2780_s10  ;;  %877 = vst.msk [vmem:[#allocation3 + $0x28] sm:$0xff] %vm871_vm4, %v786_v0 }
 0x10e   : > { %v790_v1 = vpop.permute.xlu0 %789 }
 0x10f   : > { %879 = vst.msk [vmem:[#allocation3 + $0x38] sm:$0xff] %vm871_vm4, %v790_v1  ;;  %v4382_v1 = vld [vmem:[#allocation6_spill] sm:$0xff] }
 0x110   : > { %994 = vrot.lane.b32.xlu2 %v3306_v17, %s2780_s10 }
 0x111   : > { %1004 = vrot.lane.b32.xlu1 %v3344_v42, %s2780_s10 }
 0x112   : > { %v800_v37 = vpop.permute.xlu2 %799 }
 0x113   : > { %v792_v47 = vpop.permute.xlu1 %791  ;;  %884 = vst.msk [vmem:[#allocation3 + $0x60] sm:$0xff] %vm871_vm4, %v800_v37 }
 0x114   : > { %1008 = vrot.lane.b32.xlu0 %v3382_v53, %s2780_s10  ;;  %880 = vst.msk [vmem:[#allocation3 + $0x40] sm:$0xff] %vm871_vm4, %v792_v47 }
 0x116   : > { %v796_v12 = vpop.permute.xlu0 %795 }
 0x117   : > { %882 = vst.msk [vmem:[#allocation3 + $0x50] sm:$0xff] %vm871_vm4, %v796_v12  ;;  %v4384_v12 = vld [vmem:[#allocation14_spill] sm:$0xff] }
 0x118   : > { %1000 = vrot.lane.b32.xlu2 %v3333_v13, %s2780_s10 }
 0x119   : > { %1010 = vrot.lane.b32.xlu1 %v3371_v38, %s2780_s10 }
 0x11a   : > { %v806_v17 = vpop.permute.xlu2 %805 }
 0x11b   : > { %v798_v42 = vpop.permute.xlu1 %797  ;;  %887 = vst.msk [vmem:[#allocation3 + $0x78] sm:$0xff] %vm871_vm4, %v806_v17 }
 0x11c   : > { %1014 = vrot.lane.b32.xlu0 %v3409_v45, %s2780_s10  ;;  %883 = vst.msk [vmem:[#allocation3 + $0x58] sm:$0xff] %vm871_vm4, %v798_v42  ;;  %v342_v45 = vmul.f32 %v2910_v2, %v306_v41  ;;  %v4385_v42 = vld [vmem:[#allocation7_spill] sm:$0xff]  ;;  %v4386_v41 = vld [vmem:[#allocation10_spill] sm:$0xff] }
 0x11e   : > { %v802_v53 = vpop.permute.xlu0 %801  ;;  %375 = vst.msk [vmem:[%s2928_s8 + $0xf8] sm:$0xff] %vm343_vm0, %v342_v45 }
 0x11f   : > { %885 = vst.msk [vmem:[#allocation3 + $0x68] sm:$0xff] %vm871_vm4, %v802_v53 }
 0x120   : > { %1006 = vrot.lane.b32.xlu2 %v3360_v24, %s2780_s10 }
 0x121   : > { %1016 = vrot.lane.b32.xlu1 %v3398_v50, %s2780_s10 }
 0x122   : > { %v812_v13 = vpop.permute.xlu2 %811 }
 0x123   : > { %v804_v38 = vpop.permute.xlu1 %803  ;;  %890 = vst.msk [vmem:[#allocation3 + $0x90] sm:$0xff] %vm871_vm4, %v812_v13 }
 0x124   : > { %1020 = vrot.lane.b32.xlu0 %v3436_v36, %s2780_s10  ;;  %886 = vst.msk [vmem:[#allocation3 + $0x70] sm:$0xff] %vm871_vm4, %v804_v38  ;;  %v4387_v38 = vld [vmem:[#allocation17_spill] sm:$0xff] }
 0x126   : > { %v808_v6 = vpop.permute.xlu0 %807 }
 0x127   : > { %888 = vst.msk [vmem:[#allocation3 + $0x80] sm:$0xff] %vm871_vm4, %v808_v6  ;;  %v4388_v6 = vld [vmem:[#allocation9_spill] sm:$0xff] }
 0x128   : > { %1012 = vrot.lane.b32.xlu2 %v3387_v32, %s2780_s10 }
 0x129   : > { %1022 = vrot.lane.b32.xlu1 %v3425_v7, %s2780_s10 }
 0x12a   : > { %v818_v24 = vpop.permute.xlu2 %817 }
 0x12b   : > { %v810_v50 = vpop.permute.xlu1 %809  ;;  %893 = vst.msk [vmem:[#allocation3 + $0xa8] sm:$0xff] %vm871_vm4, %v818_v24  ;;  %v4389_v24 = vld [vmem:[#allocation13_spill] sm:$0xff] }
 0x12c   : > { %1026 = vrot.lane.b32.xlu0 %v3457_v29, %s2780_s10  ;;  %889 = vst.msk [vmem:[#allocation3 + $0x88] sm:$0xff] %vm871_vm4, %v810_v50 }
 0x12e   : > { %v814_v2 = vpop.permute.xlu0 %813 }
 0x12f   : > { %891 = vst.msk [vmem:[#allocation3 + $0x98] sm:$0xff] %vm871_vm4, %v814_v2 }
 0x130   : > { %1018 = vrot.lane.b32.xlu2 %v3414_v14, %s2780_s10 }
 0x131   : > { %1028 = vrot.lane.b32.xlu1 %v934_v34, %s2780_s10  ;;  %v4390_v34 = vld [vmem:[#allocation20_spill] sm:$0xff] }
 0x132   : > { %v824_v32 = vpop.permute.xlu2 %823 }
 0x133   : > { %v816_v7 = vpop.permute.xlu1 %815  ;;  %896 = vst.msk [vmem:[#allocation3 + $0xc0] sm:$0xff] %vm871_vm4, %v824_v32 }
 0x134   : > { %1161 = vrot.lane.b32.xlu0 %v2950_v10, %s2781_s11  ;;  %892 = vst.msk [vmem:[#allocation3 + $0xa0] sm:$0xff] %vm871_vm4, %v816_v7  ;;  %v935_v10 = vld [vmem:[#allocation2 + $0x188] sm:$0xff]  ;;  %v4391_v7 = vld [vmem:[#allocation12_spill] sm:$0xff] }
 0x136   : > { %v820_v29 = vpop.permute.xlu0 %819 }
 0x137   : > { %894 = vst.msk [vmem:[#allocation3 + $0xb0] sm:$0xff] %vm871_vm4, %v820_v29  ;;  %v4392_v29 = vld [vmem:[#allocation16_spill] sm:$0xff] }
 0x138   : > { %1024 = vrot.lane.b32.xlu2 %v3441_v20, %s2780_s10 }
 0x139   : > { %1163 = vrot.lane.b32.xlu1 %v2973_v19, %s2781_s11 }
 0x13a   : > { %v830_v14 = vpop.permute.xlu2 %829 }
 0x13b   : > { %v822_v46 = vpop.permute.xlu1 %821  ;;  %899 = vst.msk [vmem:[#allocation3 + $0xd8] sm:$0xff] %vm871_vm4, %v830_v14 }
 0x13c   : > { %1167 = vrot.lane.b32.xlu0 %v3029_v40, %s2781_s11  ;;  %895 = vst.msk [vmem:[#allocation3 + $0xb8] sm:$0xff] %vm871_vm4, %v822_v46 }
 0x13e   : > { %v826_v59 = vpop.permute.xlu0 %825 }
 0x13f   : > { %897 = vst.msk [vmem:[#allocation3 + $0xc8] sm:$0xff] %vm871_vm4, %v826_v59 }
 0x140   : > { %1030 = vrot.lane.b32.xlu2 %v935_v10, %s2780_s10  ;;  %v4393_v10 = vld [vmem:[#allocation23_spill] sm:$0xff] }
 0x141   : > { %1169 = vrot.lane.b32.xlu1 %v2981_v22, %s2781_s11 }
 0x142   : > { %v836_v20 = vpop.permute.xlu2 %835 }
 0x143   : > { %v828_v19 = vpop.permute.xlu1 %827  ;;  %902 = vst.msk [vmem:[#allocation3 + $0xf0] sm:$0xff] %vm871_vm4, %v836_v20  ;;  %v4394_v20 = vld [vmem:[#allocation15_spill] sm:$0xff] }
 0x144   : > { %1173 = vrot.lane.b32.xlu0 %v3057_v49, %s2781_s11  ;;  %898 = vst.msk [vmem:[#allocation3 + $0xd0] sm:$0xff] %vm871_vm4, %v828_v19  ;;  %v3601_v49 = vld [vmem:[#allocation2 + $0x51] sm:$0xff]  ;;  %v4395_v19 = vld [vmem:[#allocation19_spill] sm:$0xff] }
 0x146   : > { %v832_v40 = vpop.permute.xlu0 %831 }
 0x147   : > { %900 = vst.msk [vmem:[#allocation3 + $0xe0] sm:$0xff] %vm871_vm4, %v832_v40 }
 0x148   : > { %1165 = vrot.lane.b32.xlu2 %v3001_v30, %s2781_s11 }
 0x149   : > { %1175 = vrot.lane.b32.xlu1 %v3011_v33, %s2781_s11 }
 0x14a   : > { %v971_v22 = vpop.permute.xlu2 %970 }
 0x14b   : > { %v834_v57 = vpop.permute.xlu1 %833  ;;  %1066 = vst.msk [vmem:[#allocation3 + $0x8] sm:$0xff] %vm1064_vm5, %v971_v22 }
 0x14c   : > { %1179 = vrot.lane.b32.xlu0 %v3089_v60, %s2781_s11  ;;  %901 = vst.msk [vmem:[#allocation3 + $0xe8] sm:$0xff] %vm871_vm4, %v834_v57  ;;  %v4396_v57 = vld [vmem:[#allocation26_spill] sm:$0xff] }
 0x14e   : > { %v838_v48 = vpop.permute.xlu0 %837 }
 0x14f   : > { %903 = vst.msk [vmem:[#allocation3 + $0xf8] sm:$0xff] %vm871_vm4, %v838_v48 }
 0x150   : > { %1171 = vrot.lane.b32.xlu2 %v3601_v49, %s2781_s11 }
 0x151   : > { %1181 = vrot.lane.b32.xlu1 %v3043_v44, %s2781_s11 }
 0x152   : > { %v977_v30 = vpop.permute.xlu2 %976 }
 0x153   : > { %v969_v33 = vpop.permute.xlu1 %968  ;;  %1069 = vst.msk [vmem:[#allocation3 + $0x20] sm:$0xff] %vm1064_vm5, %v977_v30  ;;  %v4397_v30 = vld [vmem:[#allocation18_spill] sm:$0xff] }
 0x154   : > { %1185 = vrot.lane.b32.xlu0 %v3121_v8, %s2781_s11  ;;  %1065 = vst.msk [vmem:[#allocation3] sm:$0xff] %vm1064_vm5, %v969_v33  ;;  %v4398_v33 = vld [vmem:[#allocation22_spill] sm:$0xff] }
 0x156   : > { %v973_v60 = vpop.permute.xlu0 %972 }
 0x157   : > { %1067 = vst.msk [vmem:[#allocation3 + $0x10] sm:$0xff] %vm1064_vm5, %v973_v60 }
 0x158   : > { %1177 = vrot.lane.b32.xlu2 %v3027_v39, %s2781_s11 }
 0x159   : > { %1187 = vrot.lane.b32.xlu1 %v3075_v55, %s2781_s11 }
 0x15a   : > { %v983_v54 = vpop.permute.xlu2 %982 }
 0x15b   : > { %v975_v44 = vpop.permute.xlu1 %974  ;;  %1072 = vst.msk [vmem:[#allocation3 + $0x38] sm:$0xff] %vm1064_vm5, %v983_v54 }
 0x15c   : > { %1191 = vrot.lane.b32.xlu0 %v3151_v18, %s2781_s11  ;;  %1068 = vst.msk [vmem:[#allocation3 + $0x18] sm:$0xff] %vm1064_vm5, %v975_v44  ;;  %v4399_v44 = vld [vmem:[#allocation29_spill] sm:$0xff] }
 0x15e   : > { %v979_v8 = vpop.permute.xlu0 %978 }
 0x15f   : > { %1070 = vst.msk [vmem:[#allocation3 + $0x28] sm:$0xff] %vm1064_vm5, %v979_v8 }
 0x160   : > { %1183 = vrot.lane.b32.xlu2 %v3061_v51, %s2781_s11 }
 0x161   : > { %1193 = vrot.lane.b32.xlu1 %v3107_v3, %s2781_s11 }
 0x162   : > { %v989_v39 = vpop.permute.xlu2 %988 }
 0x163   : > { %v981_v55 = vpop.permute.xlu1 %980  ;;  %1075 = vst.msk [vmem:[#allocation3 + $0x50] sm:$0xff] %vm1064_vm5, %v989_v39  ;;  %v4400_v39 = vld [vmem:[#allocation21_spill] sm:$0xff] }
 0x164   : > { %1197 = vrot.lane.b32.xlu0 %v3170_v25, %s2781_s11  ;;  %1071 = vst.msk [vmem:[#allocation3 + $0x30] sm:$0xff] %vm1064_vm5, %v981_v55  ;;  %v4401_v55 = vld [vmem:[#allocation25_spill] sm:$0xff] }
 0x166   : > { %v985_v18 = vpop.permute.xlu0 %984 }
 0x167   : > { %1073 = vst.msk [vmem:[#allocation3 + $0x40] sm:$0xff] %vm1064_vm5, %v985_v18 }
 0x168   : > { %1189 = vrot.lane.b32.xlu2 %v3093_v62, %s2781_s11 }
 0x169   : > { %1199 = vrot.lane.b32.xlu1 %v3139_v15, %s2781_s11 }
 0x16a   : > { %v995_v51 = vpop.permute.xlu2 %994 }
 0x16b   : > { %v987_v3 = vpop.permute.xlu1 %986  ;;  %1078 = vst.msk [vmem:[#allocation3 + $0x68] sm:$0xff] %vm1064_vm5, %v995_v51 }
 0x16c   : > { %1203 = vrot.lane.b32.xlu0 %v3184_v28, %s2781_s11  ;;  %1074 = vst.msk [vmem:[#allocation3 + $0x48] sm:$0xff] %vm1064_vm5, %v987_v3 }
 0x16e   : > { %v991_v25 = vpop.permute.xlu0 %990 }
 0x16f   : > { %1076 = vst.msk [vmem:[#allocation3 + $0x58] sm:$0xff] %vm1064_vm5, %v991_v25  ;;  %v4402_v25 = vld [vmem:[#allocation24_spill] sm:$0xff] }
 0x170   : > { %1195 = vrot.lane.b32.xlu2 %v3125_v11, %s2781_s11 }
 0x171   : > { %1205 = vrot.lane.b32.xlu1 %v3165_v23, %s2781_s11 }
 0x172   : > { %v1001_v62 = vpop.permute.xlu2 %1000 }
 0x173   : > { %v993_v15 = vpop.permute.xlu1 %992  ;;  %1081 = vst.msk [vmem:[#allocation3 + $0x80] sm:$0xff] %vm1064_vm5, %v1001_v62  ;;  %v4403_v62 = vld [vmem:[#allocation28_spill] sm:$0xff] }
 0x174   : > { %1209 = vrot.lane.b32.xlu0 %v3198_v35, %s2781_s11  ;;  %1077 = vst.msk [vmem:[#allocation3 + $0x60] sm:$0xff] %vm1064_vm5, %v993_v15 }
 0x176   : > { %v997_v28 = vpop.permute.xlu0 %996 }
 0x177   : > { %1079 = vst.msk [vmem:[#allocation3 + $0x70] sm:$0xff] %vm1064_vm5, %v997_v28 }
 0x178   : > { %1201 = vrot.lane.b32.xlu2 %v3155_v21, %s2781_s11  ;;  %v4379_v21 = vld [vmem:[#allocation5_spill] sm:$0xff] }
 0x179   : > { %1211 = vrot.lane.b32.xlu1 %v3180_v27, %s2781_s11 }
 0x17a   : > { %v1007_v11 = vpop.permute.xlu2 %1006 }
 0x17b   : > { %v999_v23 = vpop.permute.xlu1 %998  ;;  %1084 = vst.msk [vmem:[#allocation3 + $0x98] sm:$0xff] %vm1064_vm5, %v1007_v11  ;;  %v4404_v11 = vld [vmem:[#allocation27_spill] sm:$0xff] }
 0x17c   : > { %1215 = vrot.lane.b32.xlu0 %v3215_v43, %s2781_s11  ;;  %1080 = vst.msk [vmem:[#allocation3 + $0x78] sm:$0xff] %vm1064_vm5, %v999_v23  ;;  %v4405_v23 = vld [vmem:[#allocation31_spill] sm:$0xff] }
 0x17e   : > { %v1003_v35 = vpop.permute.xlu0 %1002 }
 0x17f   : > { %1082 = vst.msk [vmem:[#allocation3 + $0x88] sm:$0xff] %vm1064_vm5, %v1003_v35 }
 0x180   : > { %1207 = vrot.lane.b32.xlu2 %v3172_v26, %s2781_s11 }
 0x181   : > { %1217 = vrot.lane.b32.xlu1 %v4379_v21, %s2781_s11 }
 0x182   : > { %v1013_v27 = vpop.permute.xlu2 %1012 }
 0x183   : > { %v1005_v52 = vpop.permute.xlu1 %1004  ;;  %1087 = vst.msk [vmem:[#allocation3 + $0xb0] sm:$0xff] %vm1064_vm5, %v1013_v27  ;;  %v4406_v27 = vld [vmem:[#allocation30_spill] sm:$0xff] }
 0x184   : > { %1221 = vrot.lane.b32.xlu0 %v1127_v4, %s2781_s11  ;;  %1083 = vst.msk [vmem:[#allocation3 + $0x90] sm:$0xff] %vm1064_vm5, %v1005_v52  ;;  %v1484_v4 = vld [vmem:[#allocation2 + $0x30] sm:$0xff] }
 0x185   : > { %v1870_v52 = vld [vmem:[#allocation2 + $0x32] sm:$0xff] }
 0x186   : > { %v1009_v43 = vpop.permute.xlu0 %1008 }
 0x187   : > { %1085 = vst.msk [vmem:[#allocation3 + $0xa0] sm:$0xff] %vm1064_vm5, %v1009_v43 }
 0x188   : > { %1213 = vrot.lane.b32.xlu2 %v4380_v16, %s2781_s11  ;;  %v1485_v16 = vld [vmem:[#allocation2 + $0x38] sm:$0xff] }
 0x189   : > { %1223 = vrot.lane.b32.xlu1 %v1128_v63, %s2781_s11 }
 0x18a   : > { %v1019_v26 = vpop.permute.xlu2 %1018 }
 0x18b   : > { %v1011_v58 = vpop.permute.xlu1 %1010  ;;  %1090 = vst.msk [vmem:[#allocation3 + $0xc8] sm:$0xff] %vm1064_vm5, %v1019_v26  ;;  %v4407_v26 = vld [vmem:[#allocation32_spill] sm:$0xff] }
 0x18c   : > { %1356 = vrot.lane.b32.xlu0 %v4381_v9, %s2782_s12  ;;  %1086 = vst.msk [vmem:[#allocation3 + $0xa8] sm:$0xff] %vm1064_vm5, %v1011_v58  ;;  %v1871_v58 = vld [vmem:[#allocation2 + $0x3a] sm:$0xff] }
 0x18e   : > { %v1015_v0 = vpop.permute.xlu0 %1014 }
 0x18f   : > { %1088 = vst.msk [vmem:[#allocation3 + $0xb8] sm:$0xff] %vm1064_vm5, %v1015_v0 }
 0x190   : > { %1219 = vrot.lane.b32.xlu2 %v4382_v1, %s2781_s11  ;;  %v1677_v1 = vld [vmem:[#allocation2 + $0x31] sm:$0xff] }
 0x191   : > { %1358 = vrot.lane.b32.xlu1 %v4383_v5, %s2782_s12 }
 0x192   : > { %v1025_v37 = vpop.permute.xlu2 %1024 }
 0x193   : > { %v1017_v47 = vpop.permute.xlu1 %1016  ;;  %1093 = vst.msk [vmem:[#allocation3 + $0xe0] sm:$0xff] %vm1064_vm5, %v1025_v37  ;;  %v1486_v37 = vld [vmem:[#allocation2 + $0x48] sm:$0xff] }
 0x194   : > { %1362 = vrot.lane.b32.xlu0 %v4384_v12, %s2782_s12  ;;  %1089 = vst.msk [vmem:[#allocation3 + $0xc0] sm:$0xff] %vm1064_vm5, %v1017_v47  ;;  %v1679_v47 = vld [vmem:[#allocation2 + $0x49] sm:$0xff] }
 0x196   : > { %v1021_v17 = vpop.permute.xlu0 %1020 }
 0x197   : > { %1091 = vst.msk [vmem:[#allocation3 + $0xd0] sm:$0xff] %vm1064_vm5, %v1021_v17 }
 0x198   : > { %1354 = vrot.lane.b32.xlu2 %v4385_v42, %s2782_s12  ;;  %v1678_v42 = vld [vmem:[#allocation2 + $0x39] sm:$0xff] }
 0x199   : > { %1364 = vrot.lane.b32.xlu1 %v4386_v41, %s2782_s12 }
 0x19a   : > { %v1031_v53 = vpop.permute.xlu2 %1030 }
 0x19b   : > { %v1023_v13 = vpop.permute.xlu1 %1022  ;;  %1096 = vst.msk [vmem:[#allocation3 + $0xf8] sm:$0xff] %vm1064_vm5, %v1031_v53  ;;  %v1685_v53 = vld [vmem:[#allocation2 + $0x91] sm:$0xff] }
 0x19c   : > { %1368 = vrot.lane.b32.xlu0 %v4387_v38, %s2782_s12  ;;  %1092 = vst.msk [vmem:[#allocation3 + $0xd8] sm:$0xff] %vm1064_vm5, %v1023_v13  ;;  %v1878_v13 = vld [vmem:[#allocation2 + $0x92] sm:$0xff] }
 0x19e   : > { %v1027_v45 = vpop.permute.xlu0 %1026 }
 0x19f   : > { %1094 = vst.msk [vmem:[#allocation3 + $0xe8] sm:$0xff] %vm1064_vm5, %v1027_v45 }
 0x1a0   : > { %1360 = vrot.lane.b32.xlu2 %v4388_v6, %s2782_s12  ;;  %v1492_v6 = vld [vmem:[#allocation2 + $0x90] sm:$0xff] }
 0x1a1   : > { %1370 = vrot.lane.b32.xlu1 %v4389_v24, %s2782_s12 }
 0x1a2   : > { %v1166_v50 = vpop.permute.xlu2 %1165 }
 0x1a3   : > { %v1029_v2 = vpop.permute.xlu1 %1028  ;;  %1260 = vst.msk [vmem:[#allocation3 + $0x10] sm:$0xff] %vm1257_vm6, %v1166_v50  ;;  %v1487_v50 = vld [vmem:[#allocation2 + $0x50] sm:$0xff] }
 0x1a4   : > { %1374 = vrot.lane.b32.xlu0 %v4390_v34, %s2782_s12  ;;  %1095 = vst.msk [vmem:[#allocation3 + $0xf0] sm:$0xff] %vm1064_vm5, %v1029_v2 }
 0x1a6   : > { %v1162_v32 = vpop.permute.xlu0 %1161 }
 0x1a7   : > { %1258 = vst.msk [vmem:[#allocation3] sm:$0xff] %vm1257_vm6, %v1162_v32  ;;  %v1872_v32 = vld [vmem:[#allocation2 + $0x4a] sm:$0xff] }
 0x1a8   : > { %1366 = vrot.lane.b32.xlu2 %v4391_v7, %s2782_s12 }
 0x1a9   : > { %1376 = vrot.lane.b32.xlu1 %v4392_v29, %s2782_s12  ;;  %v1686_v29 = vld [vmem:[#allocation2 + $0x99] sm:$0xff] }
 0x1aa   : > { %v1172_v14 = vpop.permute.xlu2 %1171 }
 0x1ab   : > { %v1164_v46 = vpop.permute.xlu1 %1163  ;;  %1263 = vst.msk [vmem:[#allocation3 + $0x28] sm:$0xff] %vm1257_vm6, %v1172_v14  ;;  %v1873_v14 = vld [vmem:[#allocation2 + $0x52] sm:$0xff] }
 0x1ac   : > { %1380 = vrot.lane.b32.xlu0 %v4393_v10, %s2782_s12  ;;  %1259 = vst.msk [vmem:[#allocation3 + $0x8] sm:$0xff] %vm1257_vm6, %v1164_v46 }
 0x1ae   : > { %v1168_v59 = vpop.permute.xlu0 %1167 }
 0x1af   : > { %1261 = vst.msk [vmem:[#allocation3 + $0x18] sm:$0xff] %vm1257_vm6, %v1168_v59 }
 0x1b0   : > { %1372 = vrot.lane.b32.xlu2 %v4394_v20, %s2782_s12  ;;  %v1879_v20 = vld [vmem:[#allocation2 + $0x9a] sm:$0xff] }
 0x1b1   : > { %1382 = vrot.lane.b32.xlu1 %v4395_v19, %s2782_s12  ;;  %v1886_v19 = vld [vmem:[#allocation2 + $0xf2] sm:$0xff] }
 0x1b2   : > { %v1178_v40 = vpop.permute.xlu2 %1177 }
 0x1b3   : > { %v1170_v22 = vpop.permute.xlu1 %1169  ;;  %1266 = vst.msk [vmem:[#allocation3 + $0x40] sm:$0xff] %vm1257_vm6, %v1178_v40 }
 0x1b4   : > { %1386 = vrot.lane.b32.xlu0 %v4396_v57, %s2782_s12  ;;  %1262 = vst.msk [vmem:[#allocation3 + $0x20] sm:$0xff] %vm1257_vm6, %v1170_v22  ;;  %v1500_v57 = vld [vmem:[#allocation2 + $0xf0] sm:$0xff] }
 0x1b6   : > { %v1174_v48 = vpop.permute.xlu0 %1173 }
 0x1b7   : > { %1264 = vst.msk [vmem:[#allocation3 + $0x30] sm:$0xff] %vm1257_vm6, %v1174_v48 }
 0x1b8   : > { %1378 = vrot.lane.b32.xlu2 %v4397_v30, %s2782_s12  ;;  %v1488_v30 = vld [vmem:[#allocation2 + $0x60] sm:$0xff] }
 0x1b9   : > { %1388 = vrot.lane.b32.xlu1 %v4398_v33, %s2782_s12  ;;  %v1681_v33 = vld [vmem:[#allocation2 + $0x61] sm:$0xff] }
 0x1ba   : > { %v1184_v60 = vpop.permute.xlu2 %1183 }
 0x1bb   : > { %v1176_v54 = vpop.permute.xlu1 %1175  ;;  %1269 = vst.msk [vmem:[#allocation3 + $0x58] sm:$0xff] %vm1257_vm6, %v1184_v60 }
 0x1bc   : > { %1392 = vrot.lane.b32.xlu0 %v4399_v44, %s2782_s12  ;;  %1265 = vst.msk [vmem:[#allocation3 + $0x38] sm:$0xff] %vm1257_vm6, %v1176_v54  ;;  %v1693_v44 = vld [vmem:[#allocation2 + $0xf1] sm:$0xff] }
 0x1be   : > { %v1180_v8 = vpop.permute.xlu0 %1179 }
 0x1bf   : > { %1267 = vst.msk [vmem:[#allocation3 + $0x48] sm:$0xff] %vm1257_vm6, %v1180_v8 }
 0x1c0   : > { %1384 = vrot.lane.b32.xlu2 %v4400_v39, %s2782_s12  ;;  %v1687_v39 = vld [vmem:[#allocation2 + $0xa9] sm:$0xff] }
 0x1c1   : > { %1394 = vrot.lane.b32.xlu1 %v4401_v55, %s2782_s12  ;;  %v1874_v55 = vld [vmem:[#allocation2 + $0x62] sm:$0xff] }
 0x1c2   : > { %v1190_v18 = vpop.permute.xlu2 %1189 }
 0x1c3   : > { %v1182_v51 = vpop.permute.xlu1 %1181  ;;  %1272 = vst.msk [vmem:[#allocation3 + $0x70] sm:$0xff] %vm1257_vm6, %v1190_v18 }
 0x1c4   : > { %1398 = vrot.lane.b32.xlu0 %v3443_v61, %s2782_s12  ;;  %1268 = vst.msk [vmem:[#allocation3 + $0x50] sm:$0xff] %vm1257_vm6, %v1182_v51 }
 0x1c6   : > { %v1186_v3 = vpop.permute.xlu0 %1185 }
 0x1c7   : > { %1270 = vst.msk [vmem:[#allocation3 + $0x60] sm:$0xff] %vm1257_vm6, %v1186_v3  ;;  %v1494_v3 = vld [vmem:[#allocation2 + $0xa8] sm:$0xff] }
 0x1c8   : > { %1390 = vrot.lane.b32.xlu2 %v4402_v25, %s2782_s12 }
 0x1c9   : > { %1400 = vrot.lane.b32.xlu1 %v4403_v62, %s2782_s12  ;;  %v1880_v62 = vld [vmem:[#allocation2 + $0xaa] sm:$0xff] }
 0x1ca   : > { %v1196_v15 = vpop.permute.xlu2 %1195 }
 0x1cb   : > { %v1188_v28 = vpop.permute.xlu1 %1187  ;;  %1275 = vst.msk [vmem:[#allocation3 + $0x88] sm:$0xff] %vm1257_vm6, %v1196_v15  ;;  %v1887_v15 = vld [vmem:[#allocation2 + $0xfa] sm:$0xff] }
 0x1cc   : > { %1404 = vrot.lane.b32.xlu0 %v3461_v31, %s2782_s12  ;;  %1271 = vst.msk [vmem:[#allocation3 + $0x68] sm:$0xff] %vm1257_vm6, %v1188_v28 }
 0x1ce   : > { %v1192_v61 = vpop.permute.xlu0 %1191 }
 0x1cf   : > { %1273 = vst.msk [vmem:[#allocation3 + $0x78] sm:$0xff] %vm1257_vm6, %v1192_v61 }
 0x1d0   : > { %1396 = vrot.lane.b32.xlu2 %v4404_v11, %s2782_s12  ;;  %v2103_v11 = vld [vmem:[%s4315_s1 + $0x40] sm:$0xff] }
 0x1d1   : > { %1406 = vrot.lane.b32.xlu1 %v4405_v23, %s2782_s12  ;;  %v1501_v23 = vld [vmem:[#allocation2 + $0xf8] sm:$0xff]  ;;  %2208 = vmatpush.msra.mxu0 %v2103_v11 }
 0x1d2   : > { %v1202_v35 = vpop.permute.xlu2 %1201  ;;  %2723 = vmatpush.msra.mxu1 %v2103_v11  ;;  %2724 = vmatpush.msra.mxu2 %v2103_v11 }
 0x1d3   : > { %v1194_v21 = vpop.permute.xlu1 %1193  ;;  %1278 = vst.msk [vmem:[#allocation3 + $0xa0] sm:$0xff] %vm1257_vm6, %v1202_v35  ;;  %2725 = vmatpush.msra.mxu3 %v2103_v11 }
 0x1d4   : > { %1410 = vrot.lane.b32.xlu0 %v3474_v56, %s2782_s12  ;;  %1274 = vst.msk [vmem:[#allocation3 + $0x80] sm:$0xff] %vm1257_vm6, %v1194_v21  ;;  %v1489_v21 = vld [vmem:[#allocation2 + $0x68] sm:$0xff] }
 0x1d6   : > { %v1198_v31 = vpop.permute.xlu0 %1197 }
 0x1d7   : > { %1276 = vst.msk [vmem:[#allocation3 + $0x90] sm:$0xff] %vm1257_vm6, %v1198_v31  ;;  %v2102_v31 = vld [vmem:[%s4315_s1 + $0x38] sm:$0xff] }
 0x1d8   : > { %1402 = vrot.lane.b32.xlu2 %v4406_v27, %s2782_s12  ;;  %2209 = vmatpush.msra.mxu0 %v2102_v31  ;;  %v1682_v27 = vld [vmem:[#allocation2 + $0x69] sm:$0xff] }
 0x1d9   : > { %1548 = vrot.lane.b32.xlu1 %v1484_v4, %s2783_s13  ;;  %v2101_v4 = vld [vmem:[%s4315_s1 + $0x30] sm:$0xff]  ;;  %2726 = vmatpush.msra.mxu1 %v2102_v31 }
 0x1da   : > { %v1208_v43 = vpop.permute.xlu2 %1207  ;;  %2210 = vmatpush.msra.mxu0 %v2101_v4  ;;  %2727 = vmatpush.msra.mxu2 %v2102_v31 }
 0x1db   : > { %v1200_v63 = vpop.permute.xlu1 %1199  ;;  %1281 = vst.msk [vmem:[#allocation3 + $0xb8] sm:$0xff] %vm1257_vm6, %v1208_v43  ;;  %2729 = vmatpush.msra.mxu1 %v2101_v4  ;;  %2728 = vmatpush.msra.mxu3 %v2102_v31  ;;  %v1690_v31 = vld [vmem:[#allocation2 + $0xc9] sm:$0xff] }
 0x1dc   : > { %1934 = vrot.lane.b32.xlu0 %v1870_v52, %s2784_s14  ;;  %1277 = vst.msk [vmem:[#allocation3 + $0x98] sm:$0xff] %vm1257_vm6, %v1200_v63  ;;  %v2100_v52 = vld [vmem:[%s4315_s1 + $0x28] sm:$0xff]  ;;  %2730 = vmatpush.msra.mxu2 %v2101_v4 }
 0x1dd   : > { %2211 = vmatpush.msra.mxu0 %v2100_v52  ;;  %2732 = vmatpush.msra.mxu1 %v2100_v52 }
 0x1de   : > { %v1204_v56 = vpop.permute.xlu0 %1203  ;;  %2731 = vmatpush.msra.mxu3 %v2101_v4  ;;  %2733 = vmatpush.msra.mxu2 %v2100_v52  ;;  %v1510_v4 = vld [vmem:[#allocation2 + $0x168] sm:$0xff] }
 0x1df   : > { %1279 = vst.msk [vmem:[#allocation3 + $0xa8] sm:$0xff] %vm1257_vm6, %v1204_v56  ;;  %v2099_v56 = vld [vmem:[%s4315_s1 + $0x20] sm:$0xff] }
 0x1e0   : > { %1408 = vrot.lane.b32.xlu2 %v4407_v26, %s2782_s12  ;;  %2212 = vmatpush.msra.mxu0 %v2099_v56 }
 0x1e1   : > { %1550 = vrot.lane.b32.xlu1 %v1485_v16, %s2783_s13  ;;  %v1694_v16 = vld [vmem:[#allocation2 + $0xf9] sm:$0xff]  ;;  %2735 = vmatpush.msra.mxu1 %v2099_v56 }
 0x1e2   : > { %v1214_v9 = vpop.permute.xlu2 %1213  ;;  %2736 = vmatpush.msra.mxu2 %v2099_v56  ;;  %2734 = vmatpush.msra.mxu3 %v2100_v52 }
 0x1e3   : > { %v1206_v0 = vpop.permute.xlu1 %1205  ;;  %1284 = vst.msk [vmem:[#allocation3 + $0xd0] sm:$0xff] %vm1257_vm6, %v1214_v9  ;;  %v2098_v9 = vld [vmem:[%s4315_s1 + $0x18] sm:$0xff] }
 0x1e4   : > { %1936 = vrot.lane.b32.xlu0 %v1871_v58, %s2784_s14  ;;  %1280 = vst.msk [vmem:[#allocation3 + $0xb0] sm:$0xff] %vm1257_vm6, %v1206_v0  ;;  %v1688_v58 = vld [vmem:[#allocation2 + $0xb1] sm:$0xff]  ;;  %2213 = vmatpush.msra.mxu0 %v2098_v9 }
 0x1e5   : > { %v2097_v0 = vld [vmem:[%s4315_s1 + $0x10] sm:$0xff]  ;;  %2738 = vmatpush.msra.mxu1 %v2098_v9  ;;  %2739 = vmatpush.msra.mxu2 %v2098_v9 }
 0x1e6   : > { %v1210_v5 = vpop.permute.xlu0 %1209  ;;  %2214 = vmatpush.msra.mxu0 %v2097_v0  ;;  %2737 = vmatpush.msra.mxu3 %v2099_v56  ;;  %v1877_v56 = vld [vmem:[#allocation2 + $0x82] sm:$0xff] }
 0x1e7   : > { %1282 = vst.msk [vmem:[#allocation3 + $0xc0] sm:$0xff] %vm1257_vm6, %v1210_v5  ;;  %2741 = vmatpush.msra.mxu1 %v2097_v0  ;;  %2742 = vmatpush.msra.mxu2 %v2097_v0 }
 0x1e8   : > { %1741 = vrot.lane.b32.xlu2 %v1677_v1, %s2785_s15  ;;  %v2096_v1 = vld [vmem:[%s4315_s1 + $0x8] sm:$0xff]  ;;  %2740 = vmatpush.msra.mxu3 %v2098_v9  ;;  %v1504_v9 = vld [vmem:[#allocation2 + $0x120] sm:$0xff] }
 0x1e9   : > { %1552 = vrot.lane.b32.xlu1 %v1486_v37, %s2783_s13  ;;  %2215 = vmatpush.msra.mxu0 %v2096_v1 }
 0x1ea   : > { %v1220_v12 = vpop.permute.xlu2 %1219  ;;  %2744 = vmatpush.msra.mxu1 %v2096_v1  ;;  %2745 = vmatpush.msra.mxu2 %v2096_v1 }
 0x1eb   : > { %v1212_v17 = vpop.permute.xlu1 %1211  ;;  %1287 = vst.msk [vmem:[#allocation3 + $0xe8] sm:$0xff] %vm1257_vm6, %v1220_v12  ;;  %v2095_v12 = vld [vmem:[%s4315_s1] sm:$0xff]  ;;  %2743 = vmatpush.msra.mxu3 %v2097_v0 }
 0x1ec   : > { %1745 = vrot.lane.b32.xlu0 %v1679_v47, %s2785_s15  ;;  %1283 = vst.msk [vmem:[#allocation3 + $0xc8] sm:$0xff] %vm1257_vm6, %v1212_v17  ;;  %v1495_v47 = vld [vmem:[#allocation2 + $0xb0] sm:$0xff]  ;;  %2216 = vmatpush.msra.mxu0 %v2095_v12 }
 0x1ed   : > { %2747 = vmatpush.msra.mxu1 %v2095_v12  ;;  %2748 = vmatpush.msra.mxu2 %v2095_v12 }
 0x1ee   : > { %v1216_v41 = vpop.permute.xlu0 %1215  ;;  %2746 = vmatpush.msra.mxu3 %v2096_v1 }
 0x1ef   : > { %1285 = vst.msk [vmem:[#allocation3 + $0xd8] sm:$0xff] %vm1257_vm6, %v1216_v41 }
 0x1f0   : > { %1743 = vrot.lane.b32.xlu2 %v1678_v42, %s2785_s15  ;;  %v1875_v42 = vld [vmem:[#allocation2 + $0x6a] sm:$0xff]  ;;  %2749 = vmatpush.msra.mxu3 %v2095_v12 }
 0x1f1   : > { %1757 = vrot.lane.b32.xlu1 %v1685_v53, %s2785_s15 }
 0x1f2   : > { %v1355_v38 = vpop.permute.xlu2 %1354 }
 0x1f3   : > { %v1218_v45 = vpop.permute.xlu1 %1217  ;;  %1451 = vst.msk [vmem:[#allocation3] sm:$0xff] %vm1450_vm7, %v1355_v38 }
 0x1f4   : > { %1950 = vrot.lane.b32.xlu0 %v1878_v13, %s2784_s14  ;;  %1286 = vst.msk [vmem:[#allocation3 + $0xe0] sm:$0xff] %vm1257_vm6, %v1218_v45  ;;  %v1502_v13 = vld [vmem:[#allocation2 + $0x108] sm:$0xff]  ;;  %v1701_v45 = vld [vmem:[#allocation2 + $0x151] sm:$0xff] }
 0x1f6   : > { %v1222_v24 = vpop.permute.xlu0 %1221 }
 0x1f7   : > { %1288 = vst.msk [vmem:[#allocation3 + $0xf0] sm:$0xff] %vm1257_vm6, %v1222_v24 }
 0x1f8   : > { %1564 = vrot.lane.b32.xlu2 %v1492_v6, %s2783_s13  ;;  %v1894_v6 = vld [vmem:[#allocation2 + $0x152] sm:$0xff] }
 0x1f9   : > { %1554 = vrot.lane.b32.xlu1 %v1487_v50, %s2783_s13 }
 0x1fa   : > { %v1361_v2 = vpop.permute.xlu2 %1360 }
 0x1fb   : > { %v1224_v34 = vpop.permute.xlu1 %1223  ;;  %1454 = vst.msk [vmem:[#allocation3 + $0x18] sm:$0xff] %vm1450_vm7, %v1361_v2  ;;  %v1881_v2 = vld [vmem:[#allocation2 + $0xb2] sm:$0xff] }
 0x1fc   : > { %1747 = vrot.lane.b32.xlu0 %v3601_v49, %s2785_s15  ;;  %1289 = vst.msk [vmem:[#allocation3 + $0xf8] sm:$0xff] %vm1257_vm6, %v1224_v34  ;;  %v1493_v49 = vld [vmem:[#allocation2 + $0x98] sm:$0xff] }
 0x1fe   : > { %v1357_v7 = vpop.permute.xlu0 %1356 }
 0x1ff   : > { %1452 = vst.msk [vmem:[#allocation3 + $0x8] sm:$0xff] %vm1450_vm7, %v1357_v7  ;;  %v1683_v7 = vld [vmem:[#allocation2 + $0x79] sm:$0xff] }
 0x200   : > { %1938 = vrot.lane.b32.xlu2 %v1872_v32, %s2784_s14  ;;  %v1490_v32 = vld [vmem:[#allocation2 + $0x78] sm:$0xff] }
 0x201   : > { %1759 = vrot.lane.b32.xlu1 %v1686_v29, %s2785_s15 }
 0x202   : > { %v1367_v46 = vpop.permute.xlu2 %1366 }
 0x203   : > { %v1359_v10 = vpop.permute.xlu1 %1358  ;;  %1457 = vst.msk [vmem:[#allocation3 + $0x30] sm:$0xff] %vm1450_vm7, %v1367_v46  ;;  %v1888_v46 = vld [vmem:[#allocation2 + $0x10a] sm:$0xff] }
 0x204   : > { %1940 = vrot.lane.b32.xlu0 %v1873_v14, %s2784_s14  ;;  %1453 = vst.msk [vmem:[#allocation3 + $0x10] sm:$0xff] %vm1450_vm7, %v1359_v10 }
 0x206   : > { %v1363_v59 = vpop.permute.xlu0 %1362 }
 0x207   : > { %1455 = vst.msk [vmem:[#allocation3 + $0x20] sm:$0xff] %vm1450_vm7, %v1363_v59  ;;  %v1509_v59 = vld [vmem:[#allocation2 + $0x158] sm:$0xff] }
 0x208   : > { %1566 = vrot.lane.b32.xlu2 %v1493_v49, %s2783_s13  ;;  %v1689_v49 = vld [vmem:[#allocation2 + $0xc1] sm:$0xff] }
 0x209   : > { %1952 = vrot.lane.b32.xlu1 %v1879_v20, %s2784_s14 }
 0x20a   : > { %v1373_v40 = vpop.permute.xlu2 %1372 }
 0x20b   : > { %v1365_v22 = vpop.permute.xlu1 %1364  ;;  %1460 = vst.msk [vmem:[#allocation3 + $0x48] sm:$0xff] %vm1450_vm7, %v1373_v40  ;;  %v1496_v40 = vld [vmem:[#allocation2 + $0xc0] sm:$0xff] }
 0x20c   : > { %1966 = vrot.lane.b32.xlu0 %v1886_v19, %s2784_s14  ;;  %1456 = vst.msk [vmem:[#allocation3 + $0x28] sm:$0xff] %vm1450_vm7, %v1365_v22 }
 0x20e   : > { %v1369_v48 = vpop.permute.xlu0 %1368 }
 0x20f   : > { %1458 = vst.msk [vmem:[#allocation3 + $0x38] sm:$0xff] %vm1450_vm7, %v1369_v48  ;;  %v1876_v48 = vld [vmem:[#allocation2 + $0x7a] sm:$0xff] }
 0x210   : > { %1580 = vrot.lane.b32.xlu2 %v1500_v57, %s2783_s13 }
 0x211   : > { %1556 = vrot.lane.b32.xlu1 %v1488_v30, %s2783_s13  ;;  %v1696_v30 = vld [vmem:[#allocation2 + $0x111] sm:$0xff] }
 0x212   : > { %v1379_v60 = vpop.permute.xlu2 %1378 }
 0x213   : > { %v1371_v54 = vpop.permute.xlu1 %1370  ;;  %1463 = vst.msk [vmem:[#allocation3 + $0x60] sm:$0xff] %vm1450_vm7, %v1379_v60 }
 0x214   : > { %1749 = vrot.lane.b32.xlu0 %v1681_v33, %s2785_s15  ;;  %1459 = vst.msk [vmem:[#allocation3 + $0x40] sm:$0xff] %vm1450_vm7, %v1371_v54  ;;  %v1503_v54 = vld [vmem:[#allocation2 + $0x110] sm:$0xff] }
 0x216   : > { %v1375_v8 = vpop.permute.xlu0 %1374 }
 0x217   : > { %1461 = vst.msk [vmem:[#allocation3 + $0x50] sm:$0xff] %vm1450_vm7, %v1375_v8 }
 0x218   : > { %1773 = vrot.lane.b32.xlu2 %v1693_v44, %s2785_s15 }
 0x219   : > { %1761 = vrot.lane.b32.xlu1 %v1687_v39, %s2785_s15  ;;  %v1702_v39 = vld [vmem:[#allocation2 + $0x159] sm:$0xff] }
 0x21a   : > { %v1385_v18 = vpop.permute.xlu2 %1384 }
 0x21b   : > { %v1377_v51 = vpop.permute.xlu1 %1376  ;;  %1466 = vst.msk [vmem:[#allocation3 + $0x78] sm:$0xff] %vm1450_vm7, %v1385_v18 }
 0x21c   : > { %1942 = vrot.lane.b32.xlu0 %v1874_v55, %s2784_s14  ;;  %1462 = vst.msk [vmem:[#allocation3 + $0x58] sm:$0xff] %vm1450_vm7, %v1377_v51  ;;  %v1895_v55 = vld [vmem:[#allocation2 + $0x15a] sm:$0xff] }
 0x21e   : > { %v1381_v25 = vpop.permute.xlu0 %1380 }
 0x21f   : > { %1464 = vst.msk [vmem:[#allocation3 + $0x68] sm:$0xff] %vm1450_vm7, %v1381_v25 }
 0x220   : > { %1568 = vrot.lane.b32.xlu2 %v1494_v3, %s2783_s13  ;;  %v1882_v3 = vld [vmem:[#allocation2 + $0xc2] sm:$0xff] }
 0x221   : > { %1954 = vrot.lane.b32.xlu1 %v1880_v62, %s2784_s14  ;;  %v1491_v62 = vld [vmem:[#allocation2 + $0x80] sm:$0xff] }
 0x222   : > { %v1391_v28 = vpop.permute.xlu2 %1390 }
 0x223   : > { %v1383_v61 = vpop.permute.xlu1 %1382  ;;  %1469 = vst.msk [vmem:[#allocation3 + $0x90] sm:$0xff] %vm1450_vm7, %v1391_v28  ;;  %v1684_v28 = vld [vmem:[#allocation2 + $0x81] sm:$0xff] }
 0x224   : > { %1968 = vrot.lane.b32.xlu0 %v1887_v15, %s2784_s14  ;;  %1465 = vst.msk [vmem:[#allocation3 + $0x70] sm:$0xff] %vm1450_vm7, %v1383_v61 }
 0x226   : > { %v1387_v35 = vpop.permute.xlu0 %1386 }
 0x227   : > { %1467 = vst.msk [vmem:[#allocation3 + $0x80] sm:$0xff] %vm1450_vm7, %v1387_v35 }
 0x228   : > { %1582 = vrot.lane.b32.xlu2 %v1501_v23, %s2783_s13  ;;  %v1889_v23 = vld [vmem:[#allocation2 + $0x112] sm:$0xff] }
 0x229   : > { %1558 = vrot.lane.b32.xlu1 %v1489_v21, %s2783_s13 }
 0x22a   : > { %v1397_v43 = vpop.permute.xlu2 %1396 }
 0x22b   : > { %v1389_v63 = vpop.permute.xlu1 %1388  ;;  %1472 = vst.msk [vmem:[#allocation3 + $0xa8] sm:$0xff] %vm1450_vm7, %v1397_v43  ;;  %v1497_v43 = vld [vmem:[#allocation2 + $0xc8] sm:$0xff] }
 0x22c   : > { %1751 = vrot.lane.b32.xlu0 %v1682_v27, %s2785_s15  ;;  %1468 = vst.msk [vmem:[#allocation3 + $0x88] sm:$0xff] %vm1450_vm7, %v1389_v63 }
 0x22e   : > { %v1393_v26 = vpop.permute.xlu0 %1392 }
 0x22f   : > { %1470 = vst.msk [vmem:[#allocation3 + $0x98] sm:$0xff] %vm1450_vm7, %v1393_v26 }
 0x230   : > { %1775 = vrot.lane.b32.xlu2 %v1694_v16, %s2785_s15  ;;  %v1697_v16 = vld [vmem:[#allocation2 + $0x121] sm:$0xff] }
 0x231   : > { %1763 = vrot.lane.b32.xlu1 %v1688_v58, %s2785_s15 }
 0x232   : > { %v1403_v5 = vpop.permute.xlu2 %1402 }
 0x233   : > { %v1395_v37 = vpop.permute.xlu1 %1394  ;;  %1475 = vst.msk [vmem:[#allocation3 + $0xc0] sm:$0xff] %vm1450_vm7, %v1403_v5  ;;  %v1703_v5 = vld [vmem:[#allocation2 + $0x169] sm:$0xff] }
 0x234   : > { %1596 = vrot.lane.b32.xlu0 %v3436_v36, %s2783_s13  ;;  %1471 = vst.msk [vmem:[#allocation3 + $0xa0] sm:$0xff] %vm1450_vm7, %v1395_v37  ;;  %v1695_v36 = vld [vmem:[#allocation2 + $0x109] sm:$0xff] }
 0x235   : > { %v1896_v37 = vld [vmem:[#allocation2 + $0x16a] sm:$0xff] }
 0x236   : > { %v1399_v17 = vpop.permute.xlu0 %1398 }
 0x237   : > { %1473 = vst.msk [vmem:[#allocation3 + $0xb0] sm:$0xff] %vm1450_vm7, %v1399_v17 }
 0x238   : > { %1570 = vrot.lane.b32.xlu2 %v1495_v47, %s2783_s13 }
 0x239   : > { %1944 = vrot.lane.b32.xlu1 %v1875_v42, %s2784_s14  ;;  %v1883_v42 = vld [vmem:[#allocation2 + $0xca] sm:$0xff] }
 0x23a   : > { %v1409_v41 = vpop.permute.xlu2 %1408 }
 0x23b   : > { %v1401_v53 = vpop.permute.xlu1 %1400  ;;  %1478 = vst.msk [vmem:[#allocation3 + $0xd8] sm:$0xff] %vm1450_vm7, %v1409_v41 }
 0x23c   : > { %1777 = vrot.lane.b32.xlu0 %v1695_v36, %s2785_s15  ;;  %1474 = vst.msk [vmem:[#allocation3 + $0xb8] sm:$0xff] %vm1450_vm7, %v1401_v53  ;;  %v1498_v53 = vld [vmem:[#allocation2 + $0xd8] sm:$0xff] }
 0x23e   : > { %v1405_v38 = vpop.permute.xlu0 %1404 }
 0x23f   : > { %1476 = vst.msk [vmem:[#allocation3 + $0xc8] sm:$0xff] %vm1450_vm7, %v1405_v38 }
 0x240   : > { %1584 = vrot.lane.b32.xlu2 %v1502_v13, %s2783_s13  ;;  %v1505_v13 = vld [vmem:[#allocation2 + $0x128] sm:$0xff] }
 0x241   : > { %1789 = vrot.lane.b32.xlu1 %v1701_v45, %s2785_s15 }
 0x242   : > { %v1742_v24 = vpop.permute.xlu2 %1741 }
 0x243   : > { %v1407_v50 = vpop.permute.xlu1 %1406 }
 0x244   : > { %1982 = vrot.lane.b32.xlu0 %v1894_v6, %s2784_s14  ;;  %1477 = vst.msk [vmem:[#allocation3 + $0xd0] sm:$0xff] %vm1450_vm7, %v1407_v50  ;;  %v1890_v6 = vld [vmem:[#allocation2 + $0x122] sm:$0xff]  ;;  %v1511_v50 = vld [vmem:[#allocation2 + $0x170] sm:$0xff] }
 0x246   : > { %v1411_v34 = vpop.permute.xlu0 %1410 }
 0x247   : > { %1479 = vst.msk [vmem:[#allocation3 + $0xe0] sm:$0xff] %vm1450_vm7, %v1411_v34 }
 0x248   : > { %1956 = vrot.lane.b32.xlu2 %v1881_v2, %s2784_s14  ;;  %v1698_v2 = vld [vmem:[#allocation2 + $0x129] sm:$0xff] }
 0x249   : > { %1560 = vrot.lane.b32.xlu1 %v1490_v32, %s2783_s13 }
 0x24a   : > { %v1744_v29 = vpop.permute.xlu2 %1743 }
 0x24b   : > { %v1549_v14 = vpop.permute.xlu1 %1548 }
 0x24c   : > { %1753 = vrot.lane.b32.xlu0 %v1683_v7, %s2785_s15  ;;  %1645 = vst.msk [vmem:[#allocation3] sm:$0xff] %vm1644_vm8, %v1549_v14  ;;  %v1691_v7 = vld [vmem:[#allocation2 + $0xd9] sm:$0xff] }
 0x24d   : > { %1838 = vst.msk [vmem:[#allocation3] sm:$0xff] %vm1837_vm9, %v1742_v24 }
 0x24e   : > { %v1935_v10 = vpop.permute.xlu0 %1934 }
 0x24f   : > { %2031 = vst.msk [vmem:[#allocation3] sm:$0xff] %vm2030_vm10, %v1935_v10  ;;  %v1897_v10 = vld [vmem:[#allocation2 + $0x172] sm:$0xff] }
 0x250   : > { %1970 = vrot.lane.b32.xlu2 %v1888_v46, %s2784_s14  ;;  %v1704_v46 = vld [vmem:[#allocation2 + $0x171] sm:$0xff] }
 0x251   : > { %1765 = vrot.lane.b32.xlu1 %v1689_v49, %s2785_s15 }
 0x252   : > { %v1565_v20 = vpop.permute.xlu2 %1564 }
 0x253   : > { %v1551_v19 = vpop.permute.xlu1 %1550  ;;  %1653 = vst.msk [vmem:[#allocation3 + $0x40] sm:$0xff] %vm1644_vm8, %v1565_v20 }
 0x254   : > { %1598 = vrot.lane.b32.xlu0 %v1509_v59, %s2783_s13  ;;  %1646 = vst.msk [vmem:[#allocation3 + $0x8] sm:$0xff] %vm1644_vm8, %v1551_v19  ;;  %v1884_v19 = vld [vmem:[#allocation2 + $0xda] sm:$0xff] }
 0x255   : > { %1839 = vst.msk [vmem:[#allocation3 + $0x8] sm:$0xff] %vm1837_vm9, %v1744_v29 }
 0x256   : > { %v1937_v22 = vpop.permute.xlu0 %1936  ;;  %v2063_v57 = vld [vmem:[#allocation3] sm:$0xff] }
 0x257   : > { %2032 = vst.msk [vmem:[#allocation3 + $0x8] sm:$0xff] %vm2030_vm10, %v1937_v22  ;;  %2686 = vmatmul.msk.f32.vlgmr.msra.gmra.mxu0 %vm2104_vm11, %v2063_v57  ;;  %v1499_v57 = vld [vmem:[#allocation2 + $0xe0] sm:$0xff] }
 0x258   : > { %1572 = vrot.lane.b32.xlu2 %v1496_v40, %s2783_s13 }
 0x259   : > { %1946 = vrot.lane.b32.xlu1 %v1876_v48, %s2784_s14  ;;  %v1506_v48 = vld [vmem:[#allocation2 + $0x138] sm:$0xff] }
 0x25a   : > { %v1939_v33 = vpop.permute.xlu2 %1938 }
 0x25b   : > { %v1553_v60 = vpop.permute.xlu1 %1552 }
 0x25c   : > { %1779 = vrot.lane.b32.xlu0 %v1696_v30, %s2785_s15  ;;  %1647 = vst.msk [vmem:[#allocation3 + $0x10] sm:$0xff] %vm1644_vm8, %v1553_v60  ;;  %v1891_v60 = vld [vmem:[#allocation2 + $0x12a] sm:$0xff] }
 0x25e   : > { %v1746_v44 = vpop.permute.xlu0 %1745  ;;  %v2064_v8 = vld [vmem:[#allocation3 + $0x8] sm:$0xff] }
 0x25f   : > { %1840 = vst.msk [vmem:[#allocation3 + $0x10] sm:$0xff] %vm1837_vm9, %v1746_v44  ;;  %2687 = vmatmul.msk.f32.gmra.mxu0 %vm2104_vm11, %v2064_v8  ;;  %v1512_v44 = vld [vmem:[#allocation2 + $0x180] sm:$0xff] }
 0x260   : > { %2033 = vst.msk [vmem:[#allocation3 + $0x10] sm:$0xff] %vm2030_vm10, %v1939_v33  ;;  %1586 = vrot.lane.b32.xlu2 %v1503_v54, %s2783_s13  ;;  %v1699_v8 = vld [vmem:[#allocation2 + $0x139] sm:$0xff] }
 0x261   : > { %1791 = vrot.lane.b32.xlu1 %v1702_v39, %s2785_s15 }
 0x262   : > { %v1567_v18 = vpop.permute.xlu2 %1566 }
 0x263   : > { %v1758_v51 = vpop.permute.xlu1 %1757  ;;  %1654 = vst.msk [vmem:[#allocation3 + $0x48] sm:$0xff] %vm1644_vm8, %v1567_v18 }
 0x264   : > { %1984 = vrot.lane.b32.xlu0 %v1895_v55, %s2784_s14  ;;  %1846 = vst.msk [vmem:[#allocation3 + $0x40] sm:$0xff] %vm1837_vm9, %v1758_v51  ;;  %v1692_v51 = vld [vmem:[#allocation2 + $0xe1] sm:$0xff] }
 0x266   : > { %v1951_v25 = vpop.permute.xlu0 %1950 }
 0x267   : > { %2039 = vst.msk [vmem:[#allocation3 + $0x40] sm:$0xff] %vm2030_vm10, %v1951_v25  ;;  %v2065_v15 = vld [vmem:[#allocation3 + $0x10] sm:$0xff] }
 0x268   : > { %2688 = vmatmul.msk.f32.gmra.mxu0 %vm2104_vm11, %v2065_v15  ;;  %1958 = vrot.lane.b32.xlu2 %v1882_v3, %s2784_s14  ;;  %v1705_v25 = vld [vmem:[#allocation2 + $0x181] sm:$0xff] }
 0x269   : > { %1562 = vrot.lane.b32.xlu1 %v1491_v62, %s2783_s13  ;;  %v3961_v62 = vld [vmem:[#allocation2 + $0x182] sm:$0xff] }
 0x26a   : > { %v1581_v61 = vpop.permute.xlu2 %1580 }
 0x26b   : > { %v1555_v11 = vpop.permute.xlu1 %1554  ;;  %1661 = vst.msk [vmem:[#allocation3 + $0x80] sm:$0xff] %vm1644_vm8, %v1581_v61 }
 0x26c   : > { %1755 = vrot.lane.b32.xlu0 %v1684_v28, %s2785_s15  ;;  %1648 = vst.msk [vmem:[#allocation3 + $0x18] sm:$0xff] %vm1644_vm8, %v1555_v11  ;;  %v1885_v11 = vld [vmem:[#allocation2 + $0xe2] sm:$0xff] }
 0x26e   : > { %v1748_v35 = vpop.permute.xlu0 %1747  ;;  %v2071_v21 = vld [vmem:[#allocation3 + $0x40] sm:$0xff] }
 0x26f   : > { %1841 = vst.msk [vmem:[#allocation3 + $0x18] sm:$0xff] %vm1837_vm9, %v1748_v35  ;;  %2694 = vmatmul.msk.f32.vlgmr.msra.gmra.mxu1 %vm2104_vm11, %v2071_v21  ;;  %v1513_v21 = vld [vmem:[#allocation2 + $0x188] sm:$0xff] }
 0x270   : > { %1972 = vrot.lane.b32.xlu2 %v1889_v23, %s2784_s14 }
 0x271   : > { %1767 = vrot.lane.b32.xlu1 %v1690_v31, %s2785_s15 }
 0x272   : > { %v1774_v27 = vpop.permute.xlu2 %1773 }
 0x273   : > { %v1760_v52 = vpop.permute.xlu1 %1759  ;;  %1854 = vst.msk [vmem:[#allocation3 + $0x80] sm:$0xff] %vm1837_vm9, %v1774_v27  ;;  %v1892_v27 = vld [vmem:[#allocation2 + $0x13a] sm:$0xff] }
 0x274   : > { %1600 = vrot.lane.b32.xlu0 %v1510_v4, %s2783_s13  ;;  %1847 = vst.msk [vmem:[#allocation3 + $0x48] sm:$0xff] %vm1837_vm9, %v1760_v52 }
 0x276   : > { %v1941_v63 = vpop.permute.xlu0 %1940 }
 0x277   : > { %2034 = vst.msk [vmem:[#allocation3 + $0x18] sm:$0xff] %vm2030_vm10, %v1941_v63  ;;  %v1700_v63 = vld [vmem:[#allocation2 + $0x141] sm:$0xff] }
 0x278   : > { %1574 = vrot.lane.b32.xlu2 %v1497_v43, %s2783_s13 }
 0x279   : > { %1948 = vrot.lane.b32.xlu1 %v1877_v56, %s2784_s14  ;;  %v1893_v56 = vld [vmem:[#allocation2 + $0x142] sm:$0xff] }
 0x27a   : > { %v1569_v26 = vpop.permute.xlu2 %1568 }
 0x27b   : > { %v1953_v58 = vpop.permute.xlu1 %1952  ;;  %1655 = vst.msk [vmem:[#allocation3 + $0x50] sm:$0xff] %vm1644_vm8, %v1569_v26 }
 0x27c   : > { %1781 = vrot.lane.b32.xlu0 %v1697_v16, %s2785_s15  ;;  %2040 = vst.msk [vmem:[#allocation3 + $0x48] sm:$0xff] %vm2030_vm10, %v1953_v58  ;;  %v1507_v58 = vld [vmem:[#allocation2 + $0x140] sm:$0xff] }
 0x27e   : > { %v1967_v0 = vpop.permute.xlu0 %1966  ;;  %v2066_v1 = vld [vmem:[#allocation3 + $0x18] sm:$0xff] }
 0x27f   : > { %2047 = vst.msk [vmem:[#allocation3 + $0x80] sm:$0xff] %vm2030_vm10, %v1967_v0  ;;  %2689 = vmatmul.msk.f32.gmra.mxu0 %vm2104_vm11, %v2066_v1  ;;  %v1899_v0 = vld [vmem:[#allocation2 + $0x18a] sm:$0xff]  ;;  %v1514_v1 = vld [vmem:[#allocation2 + $0x198] sm:$0xff] }
 0x280   : > { %1588 = vrot.lane.b32.xlu2 %v1504_v9, %s2783_s13 }
 0x281   : > { %1793 = vrot.lane.b32.xlu1 %v1703_v5, %s2785_s15 }
 0x282   : > { %v1583_v47 = vpop.permute.xlu2 %1582 }
 0x283   : > { %v1557_v12 = vpop.permute.xlu1 %1556  ;;  %v2072_v17 = vld [vmem:[#allocation3 + $0x48] sm:$0xff]  ;;  %1662 = vst.msk [vmem:[#allocation3 + $0x88] sm:$0xff] %vm1644_vm8, %v1583_v47 }
 0x284   : > { %1986 = vrot.lane.b32.xlu0 %v1896_v37, %s2784_s14  ;;  %1649 = vst.msk [vmem:[#allocation3 + $0x20] sm:$0xff] %vm1644_vm8, %v1557_v12  ;;  %2695 = vmatmul.msk.f32.gmra.mxu1 %vm2104_vm11, %v2072_v17  ;;  %v1706_v12 = vld [vmem:[#allocation2 + $0x189] sm:$0xff] }
 0x286   : > { %v1750_v36 = vpop.permute.xlu0 %1749  ;;  %v2079_v41 = vld [vmem:[#allocation3 + $0x80] sm:$0xff] }
 0x287   : > { %1842 = vst.msk [vmem:[#allocation3 + $0x20] sm:$0xff] %vm1837_vm9, %v1750_v36  ;;  %2702 = vmatmul.msk.f32.vlgmr.msra.gmra.mxu2 %vm2104_vm11, %v2079_v41  ;;  %v3995_v36 = vld [vmem:[%s4317_s3] ss:$0 sm:$0xff] }
 0x288   : > { %1960 = vrot.lane.b32.xlu2 %v1883_v42, %s2784_s14  ;;  %v1707_v42 = vld [vmem:[#allocation2 + $0x199] sm:$0xff] }
 0x289   : > { %1576 = vrot.lane.b32.xlu1 %v1498_v53, %s2783_s13 }
 0x28a   : > { %v1776_v38 = vpop.permute.xlu2 %1775 }
 0x28b   : > { %v1762_v45 = vpop.permute.xlu1 %1761  ;;  %1855 = vst.msk [vmem:[#allocation3 + $0x88] sm:$0xff] %vm1837_vm9, %v1776_v38 }
 0x28c   : > { %1590 = vrot.lane.b32.xlu0 %v1505_v13, %s2783_s13  ;;  %1848 = vst.msk [vmem:[#allocation3 + $0x50] sm:$0xff] %vm1837_vm9, %v1762_v45 }
 0x28e   : > { %v1943_v24 = vpop.permute.xlu0 %1942 }
 0x28f   : > { %2035 = vst.msk [vmem:[#allocation3 + $0x20] sm:$0xff] %vm2030_vm10, %v1943_v24  ;;  %v1515_v24 = vld [vmem:[#allocation2 + $0x1a0] sm:$0xff] }
 0x290   : > { %1974 = vrot.lane.b32.xlu2 %v1890_v6, %s2784_s14 }
 0x291   : > { %1602 = vrot.lane.b32.xlu1 %v1511_v50, %s2783_s13 }
 0x292   : > { %v1571_v34 = vpop.permute.xlu2 %1570 }
 0x293   : > { %v1955_v32 = vpop.permute.xlu1 %1954  ;;  %1656 = vst.msk [vmem:[#allocation3 + $0x58] sm:$0xff] %vm1644_vm8, %v1571_v34 }
 0x294   : > { %1783 = vrot.lane.b32.xlu0 %v1698_v2, %s2785_s15  ;;  %2041 = vst.msk [vmem:[#allocation3 + $0x50] sm:$0xff] %vm2030_vm10, %v1955_v32  ;;  %v1901_v2 = vld [vmem:[#allocation2 + $0x1a2] sm:$0xff] }
 0x296   : > { %v1969_v29 = vpop.permute.xlu0 %1968  ;;  %v2067_v14 = vld [vmem:[#allocation3 + $0x20] sm:$0xff] }
 0x297   : > { %2048 = vst.msk [vmem:[#allocation3 + $0x88] sm:$0xff] %vm2030_vm10, %v1969_v29  ;;  %2690 = vmatmul.msk.f32.gmra.mxu0 %vm2104_vm11, %v2067_v14 }
 0x298   : > { %1769 = vrot.lane.b32.xlu2 %v1691_v7, %s2785_s15 }
 0x299   : > { %1795 = vrot.lane.b32.xlu1 %v1704_v46, %s2785_s15  ;;  %v1900_v46 = vld [vmem:[#allocation2 + $0x19a] sm:$0xff] }
 0x29a   : > { %v1585_v49 = vpop.permute.xlu2 %1584 }
 0x29b   : > { %v1559_v59 = vpop.permute.xlu1 %1558  ;;  %v2073_v20 = vld [vmem:[#allocation3 + $0x50] sm:$0xff]  ;;  %1663 = vst.msk [vmem:[#allocation3 + $0x90] sm:$0xff] %vm1644_vm8, %v1585_v49 }
 0x29c   : > { %1988 = vrot.lane.b32.xlu0 %v1897_v10, %s2784_s14  ;;  %1650 = vst.msk [vmem:[#allocation3 + $0x28] sm:$0xff] %vm1644_vm8, %v1559_v59  ;;  %2696 = vmatmul.msk.f32.gmra.mxu1 %vm2104_vm11, %v2073_v20 }
 0x29e   : > { %v1752_v40 = vpop.permute.xlu0 %1751  ;;  %v2080_v22 = vld [vmem:[#allocation3 + $0x88] sm:$0xff] }
 0x29f   : > { %1843 = vst.msk [vmem:[#allocation3 + $0x28] sm:$0xff] %vm1837_vm9, %v1752_v40  ;;  %2703 = vmatmul.msk.f32.gmra.mxu2 %vm2104_vm11, %v2080_v22 }
 0x2a0   : > { %1962 = vrot.lane.b32.xlu2 %v1884_v19, %s2784_s14 }
 0x2a1   : > { %1578 = vrot.lane.b32.xlu1 %v1499_v57, %s2783_s13 }
 0x2a2   : > { %v1957_v30 = vpop.permute.xlu2 %1956 }
 0x2a3   : > { %v1764_v33 = vpop.permute.xlu1 %1763 }
 0x2a4   : > { %1592 = vrot.lane.b32.xlu0 %v1506_v48, %s2783_s13  ;;  %1849 = vst.msk [vmem:[#allocation3 + $0x58] sm:$0xff] %vm1837_vm9, %v1764_v33 }
 0x2a5   : > { %2042 = vst.msk [vmem:[#allocation3 + $0x58] sm:$0xff] %vm2030_vm10, %v1957_v30 }
 0x2a6   : > { %v1597_v54 = vpop.permute.xlu0 %1596 }
 0x2a7   : > { %1669 = vst.msk [vmem:[#allocation3 + $0xc0] sm:$0xff] %vm1644_vm8, %v1597_v54  ;;  %v1708_v54 = vld [vmem:[#allocation2 + $0x1a1] sm:$0xff] }
 0x2a8   : > { %1976 = vrot.lane.b32.xlu2 %v1891_v60, %s2784_s14 }
 0x2a9   : > { %1604 = vrot.lane.b32.xlu1 %v1512_v44, %s2783_s13 }
 0x2aa   : > { %v1971_v39 = vpop.permute.xlu2 %1970 }
 0x2ab   : > { %v1945_v55 = vpop.permute.xlu1 %1944 }
 0x2ac   : > { %1785 = vrot.lane.b32.xlu0 %v1699_v8, %s2785_s15  ;;  %2036 = vst.msk [vmem:[#allocation3 + $0x28] sm:$0xff] %vm2030_vm10, %v1945_v55  ;;  %v2074_v18 = vld [vmem:[#allocation3 + $0x58] sm:$0xff] }
 0x2ad   : > { %2697 = vmatmul.msk.f32.gmra.mxu1 %vm2104_vm11, %v2074_v18 }
 0x2ae   : > { %v1778_v3 = vpop.permute.xlu0 %1777 }
 0x2af   : > { %1856 = vst.msk [vmem:[#allocation3 + $0x90] sm:$0xff] %vm1837_vm9, %v1778_v3 }
 0x2b0   : > { %2049 = vst.msk [vmem:[#allocation3 + $0x90] sm:$0xff] %vm2030_vm10, %v1971_v39  ;;  %1771 = vrot.lane.b32.xlu2 %v1692_v51, %s2785_s15 }
 0x2b1   : > { %1797 = vrot.lane.b32.xlu1 %v1705_v25, %s2785_s15 }
 0x2b2   : > { %v1573_v15 = vpop.permute.xlu2 %1572 }
 0x2b3   : > { %v1790_v28 = vpop.permute.xlu1 %1789  ;;  %v2068_v61 = vld [vmem:[#allocation3 + $0x28] sm:$0xff]  ;;  %1657 = vst.msk [vmem:[#allocation3 + $0x60] sm:$0xff] %vm1644_vm8, %v1573_v15 }
 0x2b4   : > { %1990 = vrot.lane.b32.xlu0 %v3961_v62, %s2784_s14  ;;  %1862 = vst.msk [vmem:[#allocation3 + $0xc0] sm:$0xff] %vm1837_vm9, %v1790_v28  ;;  %2691 = vmatmul.msk.f32.gmra.mxu0 %vm2104_vm11, %v2068_v61 }
 0x2b6   : > { %v1983_v23 = vpop.permute.xlu0 %1982 }
 0x2b7   : > { %2055 = vst.msk [vmem:[#allocation3 + $0xc0] sm:$0xff] %vm2030_vm10, %v1983_v23  ;;  %v2081_v35 = vld [vmem:[#allocation3 + $0x90] sm:$0xff] }
 0x2b8   : > { %1964 = vrot.lane.b32.xlu2 %v1885_v11, %s2784_s14  ;;  %2704 = vmatmul.msk.f32.gmra.mxu2 %vm2104_vm11, %v2081_v35 }
 0x2b9   : > { %1412 = vrot.lane.b32.xlu1 %v1897_v10, %s2782_s12 }
 0x2ba   : > { %v1587_v31 = vpop.permute.xlu2 %1586 }
 0x2bb   : > { %v1561_v4 = vpop.permute.xlu1 %1560  ;;  %1664 = vst.msk [vmem:[#allocation3 + $0x98] sm:$0xff] %vm1644_vm8, %v1587_v31 }
 0x2bc   : > { %1606 = vrot.lane.b32.xlu0 %v1513_v21, %s2783_s13  ;;  %1651 = vst.msk [vmem:[#allocation3 + $0x30] sm:$0xff] %vm1644_vm8, %v1561_v4 }
 0x2be   : > { %v1754_v52 = vpop.permute.xlu0 %1753  ;;  %v2087_v43 = vld [vmem:[#allocation3 + $0xc0] sm:$0xff] }
 0x2bf   : > { %1844 = vst.msk [vmem:[#allocation3 + $0x30] sm:$0xff] %vm1837_vm9, %v1754_v52  ;;  %2710 = vmatmul.msk.f32.vlgmr.msra.gmra.mxu3 %vm2104_vm11, %v2087_v43 }
 0x2c0   : > { %1978 = vrot.lane.b32.xlu2 %v1892_v27, %s2784_s14 }
 0x2c1   : > { %1787 = vrot.lane.b32.xlu1 %v1700_v63, %s2785_s15 }
 0x2c2   : > { %v1959_v16 = vpop.permute.xlu2 %1958 }
 0x2c3   : > { %v1766_v26 = vpop.permute.xlu1 %1765 }
 0x2c4   : > { %1980 = vrot.lane.b32.xlu0 %v1893_v56, %s2784_s14  ;;  %1850 = vst.msk [vmem:[#allocation3 + $0x60] sm:$0xff] %vm1837_vm9, %v1766_v26 }
 0x2c5   : > { %2043 = vst.msk [vmem:[#allocation3 + $0x60] sm:$0xff] %vm2030_vm10, %v1959_v16 }
 0x2c6   : > { %v1599_v9 = vpop.permute.xlu0 %1598 }
 0x2c7   : > { %1670 = vst.msk [vmem:[#allocation3 + $0xc8] sm:$0xff] %vm1644_vm8, %v1599_v9 }
 0x2c8   : > { %1594 = vrot.lane.b32.xlu2 %v1507_v58, %s2783_s13 }
 0x2c9   : > { %1992 = vrot.lane.b32.xlu1 %v1899_v0, %s2784_s14 }
 0x2ca   : > { %v1973_v5 = vpop.permute.xlu2 %1972 }
 0x2cb   : > { %v1947_v37 = vpop.permute.xlu1 %1946 }
 0x2cc   : > { %1608 = vrot.lane.b32.xlu0 %v1514_v1, %s2783_s13  ;;  %2037 = vst.msk [vmem:[#allocation3 + $0x30] sm:$0xff] %vm2030_vm10, %v1947_v37  ;;  %v2075_v47 = vld [vmem:[#allocation3 + $0x60] sm:$0xff] }
 0x2cd   : > { %2698 = vmatmul.msk.f32.gmra.mxu1 %vm2104_vm11, %v2075_v47 }
 0x2ce   : > { %v1780_v17 = vpop.permute.xlu0 %1779 }
 0x2cf   : > { %1857 = vst.msk [vmem:[#allocation3 + $0x98] sm:$0xff] %vm1837_vm9, %v1780_v17 }
 0x2d0   : > { %2050 = vst.msk [vmem:[#allocation3 + $0x98] sm:$0xff] %vm2030_vm10, %v1973_v5  ;;  %1799 = vrot.lane.b32.xlu2 %v1706_v12, %s2785_s15 }
 0x2d1   : > { %1801 = vrot.lane.b32.xlu1 %v1707_v42, %s2785_s15 }
 0x2d2   : > { %v1575_v41 = vpop.permute.xlu2 %1574 }
 0x2d3   : > { %v1792_v53 = vpop.permute.xlu1 %1791  ;;  %v2069_v13 = vld [vmem:[#allocation3 + $0x30] sm:$0xff]  ;;  %1658 = vst.msk [vmem:[#allocation3 + $0x68] sm:$0xff] %vm1644_vm8, %v1575_v41 }
 0x2d4   : > { %1416 = vrot.lane.b32.xlu0 %v1899_v0, %s2782_s12  ;;  %v2218_v38 = vpop.f32.mrf.mxu0  ;;  %1863 = vst.msk [vmem:[#allocation3 + $0xc8] sm:$0xff] %vm1837_vm9, %v1792_v53  ;;  %2692 = vmatmul.msk.f32.gmra.mxu0 %vm2104_vm11, %v2069_v13 }
 0x2d5   : > { %v2318_v45 = vmul.f32 %v3995_v36, %v2218_v38 }
 0x2d6   : > { %v1985_v6 = vpop.permute.xlu0 %1984 }
 0x2d7   : > { %2350 = vst.msk [vmem:[%s4003_s23] sm:$0xff] %vm343_vm0, %v2318_v45  ;;  %v2082_v50 = vld [vmem:[#allocation3 + $0x98] sm:$0xff]  ;;  %v2451_v29 = vmul.f32 %v2318_v45, %v2318_v45  ;;  %v2382_v49 = vsel %vm343_vm0, %v2318_v45, 0.0 }
 0x2d8   : > { %2056 = vst.msk [vmem:[#allocation3 + $0xc8] sm:$0xff] %vm2030_vm10, %v1985_v6  ;;  %2705 = vmatmul.msk.f32.gmra.mxu2 %vm2104_vm11, %v2082_v50  ;;  %1414 = vrot.lane.b32.xlu2 %v3961_v62, %s2782_s12 }
 0x2d9   : > { %1610 = vrot.lane.b32.xlu1 %v1515_v24, %s2783_s13  ;;  %v2483_v22 = vsel %vm343_vm0, %v2451_v29, 0.0 }
 0x2da   : > { %v1589_v34 = vpop.permute.xlu2 %1588 }
 0x2db   : > { %v1563_v32 = vpop.permute.xlu1 %1562  ;;  %1665 = vst.msk [vmem:[#allocation3 + $0xa0] sm:$0xff] %vm1644_vm8, %v1589_v34 }
 0x2dc   : > { %1996 = vrot.lane.b32.xlu0 %v1901_v2, %s2784_s14  ;;  %v2221_v7 = vpop.f32.mrf.mxu0  ;;  %1652 = vst.msk [vmem:[#allocation3 + $0x38] sm:$0xff] %vm1644_vm8, %v1563_v32 }
 0x2dd   : > { %v2319_v14 = vmul.f32 %v3995_v36, %v2221_v7 }
 0x2de   : > { %v1756_v10 = vpop.permute.xlu0 %1755 }
 0x2df   : > { %2351 = vst.msk [vmem:[%s4003_s23 + $0x8] sm:$0xff] %vm343_vm0, %v2319_v14  ;;  %v2383_v59 = vsel %vm343_vm0, %v2319_v14, 0.0  ;;  %v2452_v20 = vmul.f32 %v2319_v14, %v2319_v14  ;;  %v2088_v19 = vld [vmem:[#allocation3 + $0xc8] sm:$0xff] }
 0x2e0   : > { %v2384_v40 = vadd.f32 %v2383_v59, %v2382_v49  ;;  %1845 = vst.msk [vmem:[#allocation3 + $0x38] sm:$0xff] %vm1837_vm9, %v1756_v10  ;;  %2711 = vmatmul.msk.f32.gmra.mxu3 %vm2104_vm11, %v2088_v19  ;;  %1994 = vrot.lane.b32.xlu2 %v1900_v46, %s2784_s14  ;;  %s274_s14 = scalar_lea.vmem %s4320_s6, %s2685_s24 }
 0x2e1   : > { %v2484_v57 = vsel %vm343_vm0, %v2452_v20, 0.0 }
 0x2e2   : > { %v2485_v48 = vadd.f32 %v2484_v57, %v2483_v22  ;;  %v1961_v30 = vpop.permute.xlu2 %1960 }
 0x2e3   : > { %v1768_v33 = vpop.permute.xlu1 %1767 }
 0x2e4   : > { %1851 = vst.msk [vmem:[#allocation3 + $0x68] sm:$0xff] %vm1837_vm9, %v1768_v33 }
 0x2e5   : > { %v2224_v60 = vpop.f32.mrf.mxu0  ;;  %2044 = vst.msk [vmem:[#allocation3 + $0x68] sm:$0xff] %vm2030_vm10, %v1961_v30 }
 0x2e6   : > { %v2320_v44 = vmul.f32 %v3995_v36, %v2224_v60  ;;  %v1601_v8 = vpop.permute.xlu0 %1600 }
 0x2e7   : > { %1671 = vst.msk [vmem:[#allocation3 + $0xd0] sm:$0xff] %vm1644_vm8, %v1601_v8 }
 0x2e8   : > { %2352 = vst.msk [vmem:[%s4003_s23 + $0x10] sm:$0xff] %vm343_vm0, %v2320_v44  ;;  %v2385_v39 = vsel %vm343_vm0, %v2320_v44, 0.0  ;;  %v2453_v55 = vmul.f32 %v2320_v44, %v2320_v44  ;;  %1803 = vrot.lane.b32.xlu2 %v1708_v54, %s2785_s15 }
 0x2e9   : > { %v2386_v18 = vadd.f32 %v2385_v39, %v2384_v40 }
 0x2ea   : > { %v2486_v51 = vsel %vm343_vm0, %v2453_v55, 0.0  ;;  %v1975_v3 = vpop.permute.xlu2 %1974 }
 0x2eb   : > { %v2487_v25 = vadd.f32 %v2486_v51, %v2485_v48  ;;  %v1949_v62 = vpop.permute.xlu1 %1948 }
 0x2ec   : > { %v2242_v15 = vpop.f32.mrf.mxu1  ;;  %2038 = vst.msk [vmem:[#allocation3 + $0x38] sm:$0xff] %vm2030_vm10, %v1949_v62  ;;  %v2076_v28 = vld [vmem:[#allocation3 + $0x68] sm:$0xff] }
 0x2ed   : > { %v4039_v61 = vmul.f32 %v3995_v36, %v2242_v15  ;;  %2699 = vmatmul.msk.f32.gmra.mxu1 %vm2104_vm11, %v2076_v28 }
 0x2ee   : > { %v1782_v11 = vpop.permute.xlu0 %1781 }
 0x2ef   : > { %2358 = vst.msk [vmem:[%s4003_s23 + $0x40] sm:$0xff] %vm343_vm0, %v4039_v61 }
 0x2f0   : > { %1858 = vst.msk [vmem:[#allocation3 + $0xa0] sm:$0xff] %vm1837_vm9, %v1782_v11 }
 0x2f1   : > { %2051 = vst.msk [vmem:[#allocation3 + $0xa0] sm:$0xff] %vm2030_vm10, %v1975_v3 }
 0x2f2   : > { %v1770_v23 = vpop.permute.xlu2 %1769 }
 0x2f3   : > { %v1794_v35 = vpop.permute.xlu1 %1793  ;;  %v2070_v21 = vld [vmem:[#allocation3 + $0x38] sm:$0xff] }
 0x2f4   : > { %1864 = vst.msk [vmem:[#allocation3 + $0xd0] sm:$0xff] %vm1837_vm9, %v1794_v35  ;;  %2693 = vmatmul.msk.f32.gmra.mxu0 %vm2104_vm11, %v2070_v21 }
 0x2f6   : > { %v1987_v31 = vpop.permute.xlu0 %1986 }
 0x2f7   : > { %2057 = vst.msk [vmem:[#allocation3 + $0xd0] sm:$0xff] %vm2030_vm10, %v1987_v31 }
 0x2f8   : > { %v2083_v4 = vld [vmem:[#allocation3 + $0xa0] sm:$0xff] }
 0x2f9   : > { %2706 = vmatmul.msk.f32.gmra.mxu2 %vm2104_vm11, %v2083_v4 }
 0x2fa   : > { %v1963_v27 = vpop.permute.xlu2 %1962 }
 0x2fb   : > { %v1577_v52 = vpop.permute.xlu1 %1576 }
 0x2fc   : > { %1659 = vst.msk [vmem:[#allocation3 + $0x70] sm:$0xff] %vm1644_vm8, %v1577_v52  ;;  %v2227_v43 = vpop.f32.mrf.mxu0 }
 0x2fd   : > { %1852 = vst.msk [vmem:[#allocation3 + $0x70] sm:$0xff] %vm1837_vm9, %v1770_v23  ;;  %v2321_v63 = vmul.f32 %v3995_v36, %v2227_v43 }
 0x2fe   : > { %v1591_v56 = vpop.permute.xlu0 %1590  ;;  %2045 = vst.msk [vmem:[#allocation3 + $0x70] sm:$0xff] %vm2030_vm10, %v1963_v27  ;;  %v2089_v16 = vld [vmem:[#allocation3 + $0xd0] sm:$0xff] }
 0x2ff   : > { %2353 = vst.msk [vmem:[%s4003_s23 + $0x18] sm:$0xff] %vm343_vm0, %v2321_v63  ;;  %v2387_v26 = vsel %vm343_vm0, %v2321_v63, 0.0  ;;  %v2454_v58 = vmul.f32 %v2321_v63, %v2321_v63  ;;  %2712 = vmatmul.msk.f32.gmra.mxu3 %vm2104_vm11, %v2089_v16 }
 0x300   : > { %v2388_v9 = vadd.f32 %v2387_v26, %v2386_v18  ;;  %1666 = vst.msk [vmem:[#allocation3 + $0xa8] sm:$0xff] %vm1644_vm8, %v1591_v56 }
 0x301   : > { %v2488_v0 = vsel %vm343_vm0, %v2454_v58, 0.0  ;;  %v2245_v1 = vpop.f32.mrf.mxu1 }
 0x302   : > { %v2489_v5 = vadd.f32 %v2488_v0, %v2487_v25  ;;  %v4062_v37 = vmul.f32 %v3995_v36, %v2245_v1  ;;  %v1977_v47 = vpop.permute.xlu2 %1976 }
 0x303   : > { %v1603_v12 = vpop.permute.xlu1 %1602 }
 0x304   : > { %2359 = vst.msk [vmem:[%s4003_s23 + $0x48] sm:$0xff] %vm343_vm0, %v4062_v37 }
 0x305   : > { %1672 = vst.msk [vmem:[#allocation3 + $0xd8] sm:$0xff] %vm1644_vm8, %v1603_v12  ;;  %v2077_v17 = vld [vmem:[#allocation3 + $0x70] sm:$0xff] }
 0x306   : > { %v1784_v42 = vpop.permute.xlu0 %1783  ;;  %2700 = vmatmul.msk.f32.gmra.mxu1 %vm2104_vm11, %v2077_v17 }
 0x307   : > { %1859 = vst.msk [vmem:[#allocation3 + $0xa8] sm:$0xff] %vm1837_vm9, %v1784_v42 }
 0x308   : > { %2052 = vst.msk [vmem:[#allocation3 + $0xa8] sm:$0xff] %vm2030_vm10, %v1977_v47 }
 0x30a   : > { %v2266_v41 = vpop.f32.mrf.mxu2  ;;  %v1772_v53 = vpop.permute.xlu2 %1771 }
 0x30b   : > { %v4072_v13 = vmul.f32 %v3995_v36, %v2266_v41  ;;  %v1796_v38 = vpop.permute.xlu1 %1795 }
 0x30c   : > { %1865 = vst.msk [vmem:[#allocation3 + $0xd8] sm:$0xff] %vm1837_vm9, %v1796_v38 }
 0x30d   : > { %2366 = vst.msk [vmem:[%s4003_s23 + $0x80] sm:$0xff] %vm343_vm0, %v4072_v13 }
 0x30e   : > { %v1989_v45 = vpop.permute.xlu0 %1988 }
 0x30f   : > { %2058 = vst.msk [vmem:[#allocation3 + $0xd8] sm:$0xff] %vm2030_vm10, %v1989_v45  ;;  %v2084_v6 = vld [vmem:[#allocation3 + $0xa8] sm:$0xff] }
 0x310   : > { %2707 = vmatmul.msk.f32.gmra.mxu2 %vm2104_vm11, %v2084_v6 }
 0x312   : > { %v1965_v24 = vpop.permute.xlu2 %1964 }
 0x313   : > { %v1579_v50 = vpop.permute.xlu1 %1578 }
 0x314   : > { %1660 = vst.msk [vmem:[#allocation3 + $0x78] sm:$0xff] %vm1644_vm8, %v1579_v50  ;;  %v2230_v2 = vpop.f32.mrf.mxu0 }
 0x315   : > { %1853 = vst.msk [vmem:[#allocation3 + $0x78] sm:$0xff] %vm1837_vm9, %v1772_v53  ;;  %v2322_v34 = vmul.f32 %v3995_v36, %v2230_v2 }
 0x316   : > { %v1593_v32 = vpop.permute.xlu0 %1592  ;;  %2046 = vst.msk [vmem:[#allocation3 + $0x78] sm:$0xff] %vm2030_vm10, %v1965_v24  ;;  %v2090_v7 = vld [vmem:[#allocation3 + $0xd8] sm:$0xff] }
 0x317   : > { %2354 = vst.msk [vmem:[%s4003_s23 + $0x20] sm:$0xff] %vm343_vm0, %v2322_v34  ;;  %v2389_v29 = vsel %vm343_vm0, %v2322_v34, 0.0  ;;  %v2455_v14 = vmul.f32 %v2322_v34, %v2322_v34  ;;  %2713 = vmatmul.msk.f32.gmra.mxu3 %vm2104_vm11, %v2090_v7 }
 0x318   : > { %v2390_v46 = vadd.f32 %v2389_v29, %v2388_v9  ;;  %1667 = vst.msk [vmem:[#allocation3 + $0xb0] sm:$0xff] %vm1644_vm8, %v1593_v32 }
 0x319   : > { %v2490_v10 = vsel %vm343_vm0, %v2455_v14, 0.0  ;;  %v2248_v49 = vpop.f32.mrf.mxu1 }
 0x31a   : > { %v2491_v59 = vadd.f32 %v2490_v10, %v2489_v5  ;;  %v4091_v20 = vmul.f32 %v3995_v36, %v2248_v49  ;;  %v1979_v19 = vpop.permute.xlu2 %1978 }
 0x31b   : > { %v1605_v40 = vpop.permute.xlu1 %1604 }
 0x31c   : > { %2360 = vst.msk [vmem:[%s4003_s23 + $0x50] sm:$0xff] %vm343_vm0, %v4091_v20 }
 0x31d   : > { %1673 = vst.msk [vmem:[#allocation3 + $0xe0] sm:$0xff] %vm1644_vm8, %v1605_v40  ;;  %v2078_v22 = vld [vmem:[#allocation3 + $0x78] sm:$0xff] }
 0x31e   : > { %v1786_v57 = vpop.permute.xlu0 %1785  ;;  %2701 = vmatmul.msk.f32.gmra.mxu1 %vm2104_vm11, %v2078_v22 }
 0x31f   : > { %1860 = vst.msk [vmem:[#allocation3 + $0xb0] sm:$0xff] %vm1837_vm9, %v1786_v57 }
 0x320   : > { %2053 = vst.msk [vmem:[#allocation3 + $0xb0] sm:$0xff] %vm2030_vm10, %v1979_v19  ;;  %v2459_v19 = vmul.f32 %v4039_v61, %v4039_v61 }
 0x322   : > { %v2269_v48 = vpop.f32.mrf.mxu2  ;;  %v1595_v30 = vpop.permute.xlu2 %1594 }
 0x323   : > { %v4101_v33 = vmul.f32 %v3995_v36, %v2269_v48  ;;  %v1798_v60 = vpop.permute.xlu1 %1797  ;;  %1668 = vst.msk [vmem:[#allocation3 + $0xb8] sm:$0xff] %vm1644_vm8, %v1595_v30  ;;  %v2397_v48 = vsel %vm343_vm0, %v4039_v61, 0.0  ;;  %v2460_v30 = vmul.f32 %v4062_v37, %v4062_v37  ;;  %v2401_v61 = vsel %vm343_vm0, %v4091_v20, 0.0 }
 0x324   : > { %1866 = vst.msk [vmem:[#allocation3 + $0xe0] sm:$0xff] %vm1837_vm9, %v1798_v60 }
 0x325   : > { %2367 = vst.msk [vmem:[%s4003_s23 + $0x88] sm:$0xff] %vm343_vm0, %v4101_v33 }
 0x326   : > { %v1991_v54 = vpop.permute.xlu0 %1990 }
 0x327   : > { %2059 = vst.msk [vmem:[#allocation3 + $0xe0] sm:$0xff] %vm2030_vm10, %v1991_v54  ;;  %v2085_v44 = vld [vmem:[#allocation3 + $0xb0] sm:$0xff] }
 0x328   : > { %2708 = vmatmul.msk.f32.gmra.mxu2 %vm2104_vm11, %v2085_v44 }
 0x32a   : > { %v2251_v8 = vpop.f32.mrf.mxu1  ;;  %v1800_v39 = vpop.permute.xlu2 %1799 }
 0x32b   : > { %v1413_v55 = vpop.permute.xlu1 %1412  ;;  %v4111_v18 = vmul.f32 %v3995_v36, %v2251_v8  ;;  %v2498_v8 = vsel %vm343_vm0, %v2459_v19, 0.0  ;;  %v2468_v19 = vmul.f32 %v4101_v33, %v4101_v33 }
 0x32c   : > { %1480 = vst.msk [vmem:[#allocation3 + $0xe8] sm:$0xff] %vm1450_vm7, %v1413_v55  ;;  %v2461_v55 = vmul.f32 %v4091_v20, %v4091_v20 }
 0x32d   : > { %2361 = vst.msk [vmem:[%s4003_s23 + $0x58] sm:$0xff] %vm343_vm0, %v4111_v18 }
 0x32e   : > { %v1607_v51 = vpop.permute.xlu0 %1606  ;;  %v2091_v3 = vld [vmem:[#allocation3 + $0xe0] sm:$0xff] }
 0x32f   : > { %1674 = vst.msk [vmem:[#allocation3 + $0xe8] sm:$0xff] %vm1644_vm8, %v1607_v51  ;;  %2714 = vmatmul.msk.f32.gmra.mxu3 %vm2104_vm11, %v2091_v3 }
 0x330   : > { %1867 = vst.msk [vmem:[#allocation3 + $0xe8] sm:$0xff] %vm1837_vm9, %v1800_v39  ;;  %v2399_v39 = vsel %vm343_vm0, %v4062_v37, 0.0  ;;  %v2403_v37 = vsel %vm343_vm0, %v4111_v18, 0.0 }
 0x331   : > { %v2233_v25 = vpop.f32.mrf.mxu0 }
 0x332   : > { %v2323_v62 = vmul.f32 %v3995_v36, %v2233_v25  ;;  %v1415_v15 = vpop.permute.xlu2 %1414  ;;  %v2500_v25 = vsel %vm343_vm0, %v2460_v30, 0.0  ;;  %v2415_v30 = vsel %vm343_vm0, %v4101_v33, 0.0 }
 0x333   : > { %v1788_v28 = vpop.permute.xlu1 %1787  ;;  %1481 = vst.msk [vmem:[#allocation3 + $0xf0] sm:$0xff] %vm1450_vm7, %v1415_v15 }
 0x334   : > { %2355 = vst.msk [vmem:[%s4003_s23 + $0x28] sm:$0xff] %vm343_vm0, %v2323_v62  ;;  %v2391_v11 = vsel %vm343_vm0, %v2323_v62, 0.0  ;;  %v2456_v23 = vmul.f32 %v2323_v62, %v2323_v62  ;;  %v2462_v62 = vmul.f32 %v4111_v18, %v4111_v18 }
 0x335   : > { %v2392_v35 = vadd.f32 %v2391_v11, %v2390_v46  ;;  %1861 = vst.msk [vmem:[#allocation3 + $0xb8] sm:$0xff] %vm1837_vm9, %v1788_v28  ;;  %v2502_v11 = vsel %vm343_vm0, %v2461_v55, 0.0 }
 0x336   : > { %v2492_v21 = vsel %vm343_vm0, %v2456_v23, 0.0  ;;  %v1981_v31 = vpop.permute.xlu0 %1980 }
 0x337   : > { %v2493_v4 = vadd.f32 %v2492_v21, %v2491_v59  ;;  %2054 = vst.msk [vmem:[#allocation3 + $0xb8] sm:$0xff] %vm2030_vm10, %v1981_v31 }
 0x33a   : > { %v1995_v16 = vpop.permute.xlu2 %1994 }
 0x33b   : > { %v1993_v27 = vpop.permute.xlu1 %1992  ;;  %v2272_v52 = vpop.f32.mrf.mxu2 }
 0x33c   : > { %2060 = vst.msk [vmem:[#allocation3 + $0xe8] sm:$0xff] %vm2030_vm10, %v1993_v27  ;;  %v4130_v43 = vmul.f32 %v3995_v36, %v2272_v52  ;;  %v2504_v27 = vsel %vm343_vm0, %v2462_v62, 0.0 }
 0x33e   : > { %v1609_v63 = vpop.permute.xlu0 %1608  ;;  %v2086_v56 = vld [vmem:[#allocation3 + $0xb8] sm:$0xff]  ;;  %2368 = vst.msk [vmem:[%s4003_s23 + $0x90] sm:$0xff] %vm343_vm0, %v4130_v43 }
 0x33f   : > { %1675 = vst.msk [vmem:[#allocation3 + $0xf0] sm:$0xff] %vm1644_vm8, %v1609_v63  ;;  %2709 = vmatmul.msk.f32.gmra.mxu2 %vm2104_vm11, %v2086_v56 }
 0x342   : > { %v2290_v26 = vpop.f32.mrf.mxu3  ;;  %v1804_v5 = vpop.permute.xlu2 %1803 }
 0x343   : > { %v4138_v58 = vmul.f32 %v3995_v36, %v2290_v26  ;;  %v1802_v9 = vpop.permute.xlu1 %1801  ;;  %v2092_v0 = vld [vmem:[#allocation3 + $0xe8] sm:$0xff] }
 0x344   : > { %1868 = vst.msk [vmem:[#allocation3 + $0xf0] sm:$0xff] %vm1837_vm9, %v1802_v9  ;;  %2715 = vmatmul.msk.f32.gmra.mxu3 %vm2104_vm11, %v2092_v0 }
 0x345   : > { %2374 = vst.msk [vmem:[%s4003_s23 + $0xc0] sm:$0xff] %vm343_vm0, %v4138_v58 }
 0x346   : > { %2061 = vst.msk [vmem:[#allocation3 + $0xf0] sm:$0xff] %vm2030_vm10, %v1995_v16  ;;  %v1417_v1 = vpop.permute.xlu0 %1416 }
 0x347   : > { %1482 = vst.msk [vmem:[#allocation3 + $0xf8] sm:$0xff] %vm1450_vm7, %v1417_v1 }
 0x34a   : > { %v2254_v47 = vpop.f32.mrf.mxu1 }
 0x34b   : > { %v1611_v12 = vpop.permute.xlu1 %1610  ;;  %v2330_v17 = vmul.f32 %v3995_v36, %v2254_v47 }
 0x34c   : > { %1676 = vst.msk [vmem:[#allocation3 + $0xf8] sm:$0xff] %vm1644_vm8, %v1611_v12 }
 0x34d   : > { %1869 = vst.msk [vmem:[#allocation3 + $0xf8] sm:$0xff] %vm1837_vm9, %v1804_v5  ;;  %v2093_v42 = vld [vmem:[#allocation3 + $0xf0] sm:$0xff]  ;;  %v2463_v23 = vmul.f32 %v2330_v17, %v2330_v17  ;;  %v2405_v20 = vsel %vm343_vm0, %v2330_v17, 0.0 }
 0x34e   : > { %v1997_v41 = vpop.permute.xlu0 %1996  ;;  %2716 = vmatmul.msk.f32.gmra.mxu3 %vm2104_vm11, %v2093_v42  ;;  %2362 = vst.msk [vmem:[%s4003_s23 + $0x60] sm:$0xff] %vm343_vm0, %v2330_v17 }
 0x34f   : > { %2062 = vst.msk [vmem:[#allocation3 + $0xf8] sm:$0xff] %vm2030_vm10, %v1997_v41  ;;  %v2506_v18 = vsel %vm343_vm0, %v2463_v23, 0.0 }
 0x351   : > { %v2236_v53 = vpop.f32.mrf.mxu0 }
 0x352   : > { %v2324_v38 = vmul.f32 %v3995_v36, %v2236_v53 }
 0x354   : > { %2356 = vst.msk [vmem:[%s4003_s23 + $0x30] sm:$0xff] %vm343_vm0, %v2324_v38  ;;  %v2393_v45 = vsel %vm343_vm0, %v2324_v38, 0.0  ;;  %v2457_v6 = vmul.f32 %v2324_v38, %v2324_v38 }
 0x355   : > { %v2394_v24 = vadd.f32 %v2393_v45, %v2392_v35 }
 0x356   : > { %v2494_v50 = vsel %vm343_vm0, %v2457_v6, 0.0  ;;  %v2094_v2 = vld [vmem:[#allocation3 + $0xf8] sm:$0xff] }
 0x357   : > { %v2495_v34 = vadd.f32 %v2494_v50, %v2493_v4  ;;  %2717 = vmatmul.msk.f32.gmra.mxu3 %vm2104_vm11, %v2094_v2 }
 0x35b   : > { %v2275_v32 = vpop.f32.mrf.mxu2 }
 0x35c   : > { %v4161_v7 = vmul.f32 %v3995_v36, %v2275_v32  ;;  %v2467_v32 = vmul.f32 %v4072_v13, %v4072_v13 }
 0x35e   : > { %2369 = vst.msk [vmem:[%s4003_s23 + $0x98] sm:$0xff] %vm343_vm0, %v4161_v7  ;;  %v2419_v33 = vsel %vm343_vm0, %v4161_v7, 0.0 }
 0x363   : > { %v2293_v29 = vpop.f32.mrf.mxu3 }
 0x364   : > { %v4167_v14 = vmul.f32 %v3995_v36, %v2293_v29 }
 0x366   : > { %2375 = vst.msk [vmem:[%s4003_s23 + $0xc8] sm:$0xff] %vm343_vm0, %v4167_v14 }
 0x36a   : > { %v2257_v46 = vpop.f32.mrf.mxu1 }
 0x36b   : > { %v2331_v10 = vmul.f32 %v3995_v36, %v2257_v46 }
 0x36d   : > { %2363 = vst.msk [vmem:[%s4003_s23 + $0x68] sm:$0xff] %vm343_vm0, %v2331_v10  ;;  %v2464_v52 = vmul.f32 %v2331_v10, %v2331_v10  ;;  %v2407_v16 = vsel %vm343_vm0, %v2331_v10, 0.0 }
 0x36f   : > { %v2508_v0 = vsel %vm343_vm0, %v2464_v52, 0.0 }
 0x371   : > { %v2239_v49 = vpop.f32.mrf.mxu0 }
 0x372   : > { %v2325_v59 = vmul.f32 %v3995_v36, %v2239_v49 }
 0x374   : > { %2357 = vst.msk [vmem:[%s4003_s23 + $0x38] sm:$0xff] %vm343_vm0, %v2325_v59  ;;  %v2395_v40 = vsel %vm343_vm0, %v2325_v59, 0.0  ;;  %v2458_v22 = vmul.f32 %v2325_v59, %v2325_v59  ;;  %v2413_v59 = vsel %vm343_vm0, %v4072_v13, 0.0  ;;  %v2417_v13 = vsel %vm343_vm0, %v4130_v43, 0.0 }
 0x375   : > { %v2396_v57 = vadd.f32 %v2395_v40, %v2394_v24 }
 0x376   : > { %v2496_v60 = vsel %vm343_vm0, %v2458_v22, 0.0 }
 0x377   : > { %v2398_v54 = vadd.f32 %v2397_v48, %v2396_v57  ;;  %v2497_v44 = vadd.f32 %v2496_v60, %v2495_v34  ;;  %v2514_v48 = vsel %vm343_vm0, %v2467_v32, 0.0  ;;  %v2469_v60 = vmul.f32 %v4130_v43, %v4130_v43 }
 0x378   : > { %v2431_v32 = vsel %vm343_vm0, %v4167_v14, 0.0 }
 0x379   : > { %v2400_v51 = vadd.f32 %v2399_v39, %v2398_v54  ;;  %v2499_v3 = vadd.f32 %v2498_v8, %v2497_v44  ;;  %v2516_v8 = vsel %vm343_vm0, %v2468_v19, 0.0  ;;  %v2470_v39 = vmul.f32 %v4161_v7, %v4161_v7 }
 0x37b   : > { %v2501_v15 = vadd.f32 %v2500_v25, %v2499_v3  ;;  %v2402_v28 = vadd.f32 %v2401_v61, %v2400_v51  ;;  %v2518_v3 = vsel %vm343_vm0, %v2469_v60, 0.0 }
 0x37c   : > { %v2278_v35 = vpop.f32.mrf.mxu2 }
 0x37d   : > { %v2404_v21 = vadd.f32 %v2403_v37, %v2402_v28  ;;  %v2503_v31 = vadd.f32 %v2502_v11, %v2501_v15  ;;  %v2338_v4 = vmul.f32 %v3995_v36, %v2278_v35  ;;  %v2520_v15 = vsel %vm343_vm0, %v2470_v39, 0.0 }
 0x37f   : > { %v2406_v63 = vadd.f32 %v2405_v20, %v2404_v21  ;;  %v2505_v56 = vadd.f32 %v2504_v27, %v2503_v31  ;;  %2370 = vst.msk [vmem:[%s4003_s23 + $0xa0] sm:$0xff] %vm343_vm0, %v2338_v4  ;;  %v2471_v25 = vmul.f32 %v2338_v4, %v2338_v4  ;;  %v2421_v28 = vsel %vm343_vm0, %v2338_v4, 0.0 }
 0x381   : > { %v2408_v26 = vadd.f32 %v2407_v16, %v2406_v63  ;;  %v2507_v9 = vadd.f32 %v2506_v18, %v2505_v56  ;;  %v2522_v37 = vsel %vm343_vm0, %v2471_v25, 0.0 }
 0x382   : > { %v2296_v1 = vpop.f32.mrf.mxu3 }
 0x383   : > { %v2509_v5 = vadd.f32 %v2508_v0, %v2507_v9  ;;  %v4208_v47 = vmul.f32 %v3995_v36, %v2296_v1  ;;  %v2260_v12 = vpop.f32.mrf.mxu1  ;;  %v2475_v1 = vmul.f32 %v4138_v58, %v4138_v58 }
 0x384   : > { %v2332_v17 = vmul.f32 %v3995_v36, %v2260_v12 }
 0x385   : > { %2376 = vst.msk [vmem:[%s4003_s23 + $0xd0] sm:$0xff] %vm343_vm0, %v4208_v47 }
 0x386   : > { %2364 = vst.msk [vmem:[%s4003_s23 + $0x70] sm:$0xff] %vm343_vm0, %v2332_v17  ;;  %v2465_v53 = vmul.f32 %v2332_v17, %v2332_v17  ;;  %v2409_v38 = vsel %vm343_vm0, %v2332_v17, 0.0 }
 0x387   : > { %v2410_v34 = vadd.f32 %v2409_v38, %v2408_v26 }
 0x388   : > { %v2510_v50 = vsel %vm343_vm0, %v2465_v53, 0.0  ;;  %v2476_v53 = vmul.f32 %v4167_v14, %v4167_v14 }
 0x389   : > { %v2511_v10 = vadd.f32 %v2510_v50, %v2509_v5 }
 0x393   : > { %v2281_v42 = vpop.f32.mrf.mxu2 }
 0x394   : > { %v2339_v41 = vmul.f32 %v3995_v36, %v2281_v42 }
 0x396   : > { %2371 = vst.msk [vmem:[%s4003_s23 + $0xa8] sm:$0xff] %vm343_vm0, %v2339_v41  ;;  %v2472_v27 = vmul.f32 %v2339_v41, %v2339_v41  ;;  %v2423_v20 = vsel %vm343_vm0, %v2339_v41, 0.0  ;;  %v2429_v41 = vsel %vm343_vm0, %v4138_v58, 0.0 }
 0x398   : > { %v2524_v63 = vsel %vm343_vm0, %v2472_v27, 0.0 }
 0x39a   : > { %v2299_v45 = vpop.f32.mrf.mxu3 }
 0x39b   : > { %v4221_v6 = vmul.f32 %v3995_v36, %v2299_v45  ;;  %v2263_v24 = vpop.f32.mrf.mxu1 }
 0x39c   : > { %v2333_v2 = vmul.f32 %v3995_v36, %v2263_v24 }
 0x39d   : > { %2377 = vst.msk [vmem:[%s4003_s23 + $0xd8] sm:$0xff] %vm343_vm0, %v4221_v6  ;;  %v2478_v14 = vmul.f32 %v4221_v6, %v4221_v6 }
 0x39e   : > { %2365 = vst.msk [vmem:[%s4003_s23 + $0x78] sm:$0xff] %vm343_vm0, %v2333_v2  ;;  %v2411_v29 = vsel %vm343_vm0, %v2333_v2, 0.0  ;;  %v2466_v46 = vmul.f32 %v2333_v2, %v2333_v2 }
 0x39f   : > { %v2412_v49 = vadd.f32 %v2411_v29, %v2410_v34  ;;  %v2530_v34 = vsel %vm343_vm0, %v2475_v1, 0.0  ;;  %v2477_v29 = vmul.f32 %v4208_v47, %v4208_v47 }
 0x3a0   : > { %v2512_v40 = vsel %vm343_vm0, %v2466_v46, 0.0 }
 0x3a1   : > { %v2414_v22 = vadd.f32 %v2413_v59, %v2412_v49  ;;  %v2513_v57 = vadd.f32 %v2512_v40, %v2511_v10  ;;  %v2532_v10 = vsel %vm343_vm0, %v2476_v53, 0.0  ;;  %v2433_v49 = vsel %vm343_vm0, %v4208_v47, 0.0 }
 0x3a2   : > { %v2534_v40 = vsel %vm343_vm0, %v2477_v29, 0.0 }
 0x3a3   : > { %v2416_v54 = vadd.f32 %v2415_v30, %v2414_v22  ;;  %v2515_v44 = vadd.f32 %v2514_v48, %v2513_v57  ;;  %v2435_v57 = vsel %vm343_vm0, %v4221_v6, 0.0  ;;  %v2536_v30 = vsel %vm343_vm0, %v2478_v14, 0.0 }
 0x3a5   : > { %v2418_v55 = vadd.f32 %v2417_v13, %v2416_v54  ;;  %v2517_v51 = vadd.f32 %v2516_v8, %v2515_v44 }
 0x3a7   : > { %v2519_v61 = vadd.f32 %v2518_v3, %v2517_v51  ;;  %v2420_v62 = vadd.f32 %v2419_v33, %v2418_v55 }
 0x3a9   : > { %v2422_v43 = vadd.f32 %v2421_v28, %v2420_v62  ;;  %v2521_v11 = vadd.f32 %v2520_v15, %v2519_v61 }
 0x3ab   : > { %v2284_v23 = vpop.f32.mrf.mxu2  ;;  %v2523_v35 = vadd.f32 %v2522_v37, %v2521_v11  ;;  %v2424_v52 = vadd.f32 %v2423_v20, %v2422_v43 }
 0x3ac   : > { %v2340_v21 = vmul.f32 %v3995_v36, %v2284_v23 }
 0x3ad   : > { %v2525_v18 = vadd.f32 %v2524_v63, %v2523_v35 }
 0x3ae   : > { %2372 = vst.msk [vmem:[%s4003_s23 + $0xb0] sm:$0xff] %vm343_vm0, %v2340_v21  ;;  %v2473_v4 = vmul.f32 %v2340_v21, %v2340_v21  ;;  %v2425_v56 = vsel %vm343_vm0, %v2340_v21, 0.0 }
 0x3af   : > { %v2426_v0 = vadd.f32 %v2425_v56, %v2424_v52 }
 0x3b0   : > { %v2526_v26 = vsel %vm343_vm0, %v2473_v4, 0.0 }
 0x3b1   : > { %v2527_v17 = vadd.f32 %v2526_v26, %v2525_v18 }
 0x3b2   : > { %v2302_v31 = vpop.f32.mrf.mxu3 }
 0x3b3   : > { %v2346_v7 = vmul.f32 %v3995_v36, %v2302_v31 }
 0x3b5   : > { %2378 = vst.msk [vmem:[%s4003_s23 + $0xe0] sm:$0xff] %vm343_vm0, %v2346_v7  ;;  %v2479_v60 = vmul.f32 %v2346_v7, %v2346_v7  ;;  %v2437_v47 = vsel %vm343_vm0, %v2346_v7, 0.0 }
 0x3b7   : > { %v2538_v39 = vsel %vm343_vm0, %v2479_v60, 0.0 }
 0x3c2   : > { %v2287_v16 = vpop.f32.mrf.mxu2 }
 0x3c3   : > { %v2341_v9 = vmul.f32 %v3995_v36, %v2287_v16 }
 0x3c5   : > { %2373 = vst.msk [vmem:[%s4003_s23 + $0xb8] sm:$0xff] %vm343_vm0, %v2341_v9  ;;  %v2427_v5 = vsel %vm343_vm0, %v2341_v9, 0.0  ;;  %v2474_v12 = vmul.f32 %v2341_v9, %v2341_v9 }
 0x3c6   : > { %v2428_v42 = vadd.f32 %v2427_v5, %v2426_v0 }
 0x3c7   : > { %v2528_v38 = vsel %vm343_vm0, %v2474_v12, 0.0  ;;  %v2305_v45 = vpop.f32.mrf.mxu3 }
 0x3c8   : > { %v2430_v24 = vadd.f32 %v2429_v41, %v2428_v42  ;;  %v2529_v50 = vadd.f32 %v2528_v38, %v2527_v17  ;;  %v2347_v2 = vmul.f32 %v3995_v36, %v2305_v45 }
 0x3ca   : > { %v2432_v46 = vadd.f32 %v2431_v32, %v2430_v24  ;;  %v2531_v58 = vadd.f32 %v2530_v34, %v2529_v50  ;;  %2379 = vst.msk [vmem:[%s4003_s23 + $0xe8] sm:$0xff] %vm343_vm0, %v2347_v2  ;;  %v2480_v55 = vmul.f32 %v2347_v2, %v2347_v2  ;;  %v2439_v6 = vsel %vm343_vm0, %v2347_v2, 0.0 }
 0x3cc   : > { %v2533_v59 = vadd.f32 %v2532_v10, %v2531_v58  ;;  %v2434_v19 = vadd.f32 %v2433_v49, %v2432_v46  ;;  %v2540_v25 = vsel %vm343_vm0, %v2480_v55, 0.0 }
 0x3ce   : > { %v2535_v22 = vadd.f32 %v2534_v40, %v2533_v59  ;;  %v2436_v48 = vadd.f32 %v2435_v57, %v2434_v19 }
 0x3d0   : > { %v2537_v44 = vadd.f32 %v2536_v30, %v2535_v22  ;;  %v2438_v13 = vadd.f32 %v2437_v47, %v2436_v48 }
 0x3d1   : > { %v2308_v54 = vpop.f32.mrf.mxu3 }
 0x3d2   : > { %v2348_v8 = vmul.f32 %v3995_v36, %v2308_v54  ;;  %v2539_v51 = vadd.f32 %v2538_v39, %v2537_v44  ;;  %v2440_v33 = vadd.f32 %v2439_v6, %v2438_v13 }
 0x3d4   : > { %2380 = vst.msk [vmem:[%s4003_s23 + $0xf0] sm:$0xff] %vm343_vm0, %v2348_v8  ;;  %v2481_v3 = vmul.f32 %v2348_v8, %v2348_v8  ;;  %v2441_v61 = vsel %vm343_vm0, %v2348_v8, 0.0  ;;  %v2541_v62 = vadd.f32 %v2540_v25, %v2539_v51 }
 0x3d5   : > { %v2442_v11 = vadd.f32 %v2441_v61, %v2440_v33 }
 0x3d6   : > { %v2542_v28 = vsel %vm343_vm0, %v2481_v3, 0.0 }
 0x3d7   : > { %v2543_v35 = vadd.f32 %v2542_v28, %v2541_v62 }
 0x3da   : > { %v2311_v15 = vpop.f32.mrf.mxu3 }
 0x3db   : > { %v2349_v43 = vmul.f32 %v3995_v36, %v2311_v15 }
 0x3dd   : > { %2381 = vst.msk [vmem:[%s4003_s23 + $0xf8] sm:$0xff] %vm343_vm0, %v2349_v43  ;;  %v2443_v37 = vsel %vm343_vm0, %v2349_v43, 0.0  ;;  %v2482_v23 = vmul.f32 %v2349_v43, %v2349_v43 }
 0x3de   : > { %v2444_v21 = vadd.f32 %v2443_v37, %v2442_v11 }
 0x3df   : > { %v2544_v31 = vsel %vm343_vm0, %v2482_v23, 0.0 }
 0x3e0   : > { %v2445_v7 = vrot.slane %v2444_v21, 4  ;;  %v2545_v27 = vadd.f32 %v2544_v31, %v2543_v35 }
 0x3e2   : > { %v2446_v20 = vadd.f32 %v2445_v7, %v2444_v21  ;;  %v2546_v4 = vrot.slane %v2545_v27, 4 }
 0x3e4   : > { %v2447_v52 = vrot.slane %v2446_v20, 2  ;;  %v2547_v63 = vadd.f32 %v2546_v4, %v2545_v27 }
 0x3e6   : > { %v2448_v56 = vadd.f32 %v2447_v52, %v2446_v20  ;;  %v2548_v18 = vrot.slane %v2547_v63, 2 }
 0x3e8   : > { %v2449_v36 = vrot.slane %v2448_v56, 1  ;;  %v2549_v16 = vadd.f32 %v2548_v18, %v2547_v63 }
 0x3ea   : > { %v2550_v26 = vrot.slane %v2549_v16, 1  ;;  %v2450_v9 = vadd.f32 %v2449_v36, %v2448_v56 }
 0x3ec   : > { %v2551_v0 = vadd.f32 %v2550_v26, %v2549_v16 }
 0x3ee   : > { %v2553_v1 = vsel %vm2552_vm12, %v2450_v9, %v2551_v0 }
 0x3ef   : > { %2554 = vst.msk [vmem:[%s274_s14] sm:$0x3] %vm378_vm2, %v2553_v1 }
 0x3f0 PF: > { %s17_s21 = sadd.s32 1, %s2775_s21  }
 0x3f1   : > { %p14_p4 = scmp.ge.s32.totalorder %s17_s21, 4  }
 0x3f3   :  { %16 = sbr.rel (!%p14_p4) target bundleno = 1 (0x1), region = 93 }

// kernel: basic_block_forward.4
= control target key start
LH: loop header
LB: loop body
LE: loop exit
PB: predicated region body
PF: predicated region fallthrough
CT: control target
= control target key end

     0   :  { %s2958_s21 = smov 0   ;;  %s4552_s0 = inlined_call_operand.vmem [shape: f32[2,256,8], index: 0, kind: input, shape index: {}]   ;;  %s4553_s1 = inlined_call_operand.vmem [shape: f32[72,8], index: 1, kind: input, shape index: {}]   ;;  %s4554_s2 = inlined_call_operand.vmem [shape: f32[2,8], index: 2, kind: input, shape index: {}]   ;;  %s4555_s3 = inlined_call_operand.vmem [shape: f32[3,8], index: 3, kind: input, shape index: {}]   ;;  %s4556_s4 = inlined_call_operand.vmem [shape: f32[2,256,8], index: 4, kind: output, shape index: {0}]   ;;  %s4557_s5 = inlined_call_operand.vmem [shape: f32[2,256,8], index: 5, kind: output, shape index: {1}]   ;;  %s4558_s6 = inlined_call_operand.vmem [shape: f32[2,2,8], index: 6, kind: output, shape index: {2}]  }
   0x1 LB: > { %s2804_s22 = sadd.s32 4294967295, %s2912_s21   ;;  %p2808_p0 = scmp.ge.s32.totalorder %s2912_s21, 1  ;;  %s2912_s21 = sphi %s2958_s21, %s17_s21  }
   0x2   : > { %p217_p1 = scmp.lt.s32.totalorder %s2912_s21, 3 }
   0x4   : > { %p218_p2 = pnand %p2808_p0, %p217_p1 }
   0x6   : > { %221 = sbr.rel (%p218_p2) target bundleno = 1011 (0x3f3), region = 36 }
   0xb   : > { %vm476_vm0 = vcmask 64512   ;;  %v2914_v0 = vmov 0.0   ;;  %vm517_vm1 = vcmask 57344   ;;  %p256_p3 = scmp.lt.s32.totalorder %s2804_s22, 1  ;;  %s2915_s23 = smov 8   ;;  %vm511_vm2 = vcmask 58368  }
   0xc   : > { %509 = vst.msk [vmem:[#allocation2] sm:$0xff] %vm476_vm0, %v2914_v0  ;;  %v3017_v2 = vld [vmem:[%s4554_s2] ss:$0 sm:$0xff]  ;;  %v3032_v5 = vld [vmem:[%s4554_s2 + $0x1] ss:$0 sm:$0xff]  ;;  %vm811_vm3 = vcmask 130112  }
   0xd   : > { %510 = vst.msk [vmem:[#allocation2 + $0x8] sm:$0xff] %vm476_vm0, %v2914_v0  ;;  %s4590_s22 = smov (!%p256_p3, %s2804_s22), 1  ;;  %v3049_v10 = vld [vmem:[%s4555_s3] ss:$0 sm:$0xff]  ;;  %v3083_v25 = vld [vmem:[%s4555_s3 + $0x1] ss:$0 sm:$0xff] }
   0xe   : > { %518 = vst.msk [vmem:[#allocation2] sm:$0x1] %vm517_vm1, %v2914_v0  ;;  %s2996_s24 = sshll.u32 %s4590_s22, 8  ;;  %s2916_s15 = smov 16   ;;  %vm1004_vm4 = vcmask 195712   ;;  %vm1197_vm5 = vcmask 261312  }
   0xf   : > { %514 = vst.msk [vmem:[#allocation2 + $0x198] sm:$0xff] %vm476_vm0, %v2914_v0  ;;  %s3008_s27 = scalar_lea.vmem %s4552_s0, %s2996_s24  ;;  %s3112_s14 = scalar_lea.vmem %s4556_s4, %s2996_s24  ;;  %vm1390_vm6 = vcmask 326912   ;;  %vm1583_vm7 = vcmask 392512   ;;  %vm1777_vm8 = vcmask 458112   ;;  %vm1970_vm9 = vcmask 523712  }
  0x10   : > { %515 = vst.msk [vmem:[#allocation2 + $0x1a0] sm:$0xff] %vm476_vm0, %v2914_v0  ;;  %v278_v3 = vld [vmem:[%s3008_s27] sm:$0xff]  ;;  %v279_v8 = vld [vmem:[%s3008_s27 + $0x8] sm:$0xff]  ;;  %v285_v11 = vld [vmem:[%s3008_s27 + $0x38] sm:$0xff]  ;;  %s2917_s16 = smov 24   ;;  %s2919_s29 = smov 40  }
  0x11   : > { %519 = vst.msk [vmem:[#allocation2 + $0x18] sm:$0x1] %vm517_vm1, %v2914_v0  ;;  %v312_v4 = vmul.f32 %v3017_v2, %v278_v3  ;;  %v282_v6 = vld [vmem:[%s3008_s27 + $0x20] sm:$0xff]  ;;  %v313_v12 = vmul.f32 %v3017_v2, %v279_v8  ;;  %v319_v14 = vmul.f32 %v3017_v2, %v285_v11  ;;  %v283_v15 = vld [vmem:[%s3008_s27 + $0x28] sm:$0xff]  ;;  %v288_v17 = vld [vmem:[%s3008_s27 + $0x50] sm:$0xff]  ;;  %s2920_s30 = smov 64  }
  0x12   : > { %520 = vst.msk [vmem:[#allocation2 + $0x30] sm:$0x1] %vm517_vm1, %v2914_v0  ;;  %v316_v7 = vmul.f32 %v3017_v2, %v282_v6  ;;  %v317_v19 = vmul.f32 %v3017_v2, %v283_v15  ;;  %v280_v20 = vld [vmem:[%s3008_s27 + $0x10] sm:$0xff]  ;;  %v322_v23 = vmul.f32 %v3017_v2, %v288_v17  ;;  %v286_v27 = vld [vmem:[%s3008_s27 + $0x40] sm:$0xff]  ;;  %v291_v33 = vld [vmem:[%s3008_s27 + $0x68] sm:$0xff]  ;;  %s2921_s7 = smov 48  }
  0x13   : > { %521 = vst.msk [vmem:[#allocation2 + $0x48] sm:$0x1] %vm517_vm1, %v2914_v0  ;;  %v346_v9 = vadd.f32 %v3032_v5, %v312_v4  ;;  %v347_v18 = vadd.f32 %v3032_v5, %v313_v12  ;;  %v353_v22 = vadd.f32 %v3032_v5, %v319_v14  ;;  %v314_v26 = vmul.f32 %v3017_v2, %v280_v20  ;;  %v281_v37 = vld [vmem:[%s3008_s27 + $0x18] sm:$0xff]  ;;  %v294_v48 = vld [vmem:[%s3008_s27 + $0x80] sm:$0xff]  ;;  %v284_v53 = vld [vmem:[%s3008_s27 + $0x30] sm:$0xff]  ;;  %s2922_s8 = smov 56  }
  0x14   : > { %v651_v1 = vld [vmem:[#allocation2 + $0x1] sm:$0xff]  ;;  %522 = vst.msk [vmem:[#allocation2 + $0x60] sm:$0x1] %vm517_vm1, %v2914_v0  ;;  %v350_v13 = vadd.f32 %v3032_v5, %v316_v7  ;;  %v351_v29 = vadd.f32 %v3032_v5, %v317_v19  ;;  %v356_v32 = vadd.f32 %v3032_v5, %v322_v23  ;;  %v320_v35 = vmul.f32 %v3017_v2, %v286_v27  ;;  %v289_v44 = vld [vmem:[%s3008_s27 + $0x58] sm:$0xff]  ;;  %v292_v62 = vld [vmem:[%s3008_s27 + $0x70] sm:$0xff] }
  0x15   : > { %715 = vrot.lane.b32.xlu0 %v651_v1, %s2915_s23  ;;  %523 = vst.msk [vmem:[#allocation2 + $0x78] sm:$0x1] %vm517_vm1, %v2914_v0  ;;  %v379_v16 = vmul.f32 %v3049_v10, %v346_v9  ;;  %v380_v28 = vmul.f32 %v3049_v10, %v347_v18  ;;  %v386_v31 = vmul.f32 %v3049_v10, %v353_v22  ;;  %v297_v6 = vld [vmem:[%s3008_s27 + $0x98] sm:$0xff]  ;;  %v287_v12 = vld [vmem:[%s3008_s27 + $0x48] sm:$0xff]  ;;  %vm2163_vm10 = vcmask 589312  }
  0x16   : > { %524 = vst.msk [vmem:[#allocation2 + $0x90] sm:$0x1] %vm517_vm1, %v2914_v0  ;;  %v383_v21 = vmul.f32 %v3049_v10, %v350_v13  ;;  %v348_v36 = vadd.f32 %v3032_v5, %v314_v26  ;;  %v384_v39 = vmul.f32 %v3049_v10, %v351_v29  ;;  %v325_v40 = vmul.f32 %v3017_v2, %v291_v33  ;;  %v295_v20 = vld [vmem:[%s3008_s27 + $0x88] sm:$0xff]  ;;  %v300_v26 = vld [vmem:[%s3008_s27 + $0xb0] sm:$0xff] }
  0x17   : > { %525 = vst.msk [vmem:[#allocation2 + $0xa8] sm:$0x1] %vm517_vm1, %v2914_v0  ;;  %v411_v24 = vmax.f32 %v379_v16, 0.0  ;;  %v412_v38 = vmax.f32 %v380_v28, 0.0  ;;  %v418_v42 = vmax.f32 %v386_v31, 0.0  ;;  %v389_v43 = vmul.f32 %v3049_v10, %v356_v32 }
  0x18   : > { %526 = vst.msk [vmem:[#allocation2 + $0xc0] sm:$0x1] %vm517_vm1, %v2914_v0  ;;  %v415_v30 = vmax.f32 %v383_v21, 0.0  ;;  %v354_v45 = vadd.f32 %v3032_v5, %v320_v35  ;;  %v315_v46 = vmul.f32 %v3017_v2, %v281_v37  ;;  %v381_v47 = vmul.f32 %v3049_v10, %v348_v36  ;;  %v290_v35 = vld [vmem:[%s3008_s27 + $0x60] sm:$0xff] }
  0x19   : > { %527 = vst.msk [vmem:[#allocation2 + $0xd8] sm:$0x1] %vm517_vm1, %v2914_v0  ;;  %v444_v34 = vmul.f32 %v3083_v25, %v411_v24  ;;  %v445_v49 = vmul.f32 %v3083_v25, %v412_v38  ;;  %v416_v50 = vmax.f32 %v384_v39, 0.0  ;;  %v359_v51 = vadd.f32 %v3032_v5, %v325_v40 }
  0x1a   : > { %528 = vst.msk [vmem:[#allocation2 + $0xf0] sm:$0x1] %vm517_vm1, %v2914_v0  ;;  %v448_v41 = vmul.f32 %v3083_v25, %v415_v30  ;;  %v323_v52 = vmul.f32 %v3017_v2, %v289_v44  ;;  %v451_v55 = vmul.f32 %v3083_v25, %v418_v42  ;;  %v421_v56 = vmax.f32 %v389_v43, 0.0 }
  0x1b   : > { %529 = vst.msk [vmem:[#allocation2 + $0x108] sm:$0x1] %vm517_vm1, %v2914_v0  ;;  %v387_v57 = vmul.f32 %v3049_v10, %v354_v45  ;;  %v349_v58 = vadd.f32 %v3032_v5, %v315_v46  ;;  %v328_v59 = vmul.f32 %v3017_v2, %v294_v48  ;;  %v413_v60 = vmax.f32 %v381_v47, 0.0  ;;  %v303_v48 = vld [vmem:[%s3008_s27 + $0xc8] sm:$0xff] }
  0x1c   : > { %530 = vst.msk [vmem:[#allocation2 + $0x120] sm:$0x1] %vm517_vm1, %v2914_v0  ;;  %v318_v61 = vmul.f32 %v3017_v2, %v284_v53  ;;  %v449_v63 = vmul.f32 %v3083_v25, %v416_v50  ;;  %v357_v1 = vadd.f32 %v3032_v5, %v323_v52  ;;  %v454_v4 = vmul.f32 %v3083_v25, %v421_v56 }
  0x1d   : > { %531 = vst.msk [vmem:[#allocation2 + $0x138] sm:$0x1] %vm517_vm1, %v2914_v0  ;;  %v419_v7 = vmax.f32 %v387_v57, 0.0  ;;  %v382_v8 = vmul.f32 %v3049_v10, %v349_v58  ;;  %v362_v9 = vadd.f32 %v3032_v5, %v328_v59  ;;  %v326_v11 = vmul.f32 %v3017_v2, %v292_v62  ;;  %v301_v62 = vld [vmem:[%s3008_s27 + $0xb8] sm:$0xff] }
  0x1e   : > { %532 = vst.msk [vmem:[#allocation2 + $0x150] sm:$0x1] %vm517_vm1, %v2914_v0  ;;  %v446_v13 = vmul.f32 %v3083_v25, %v413_v60  ;;  %v352_v14 = vadd.f32 %v3032_v5, %v318_v61  ;;  %v390_v17 = vmul.f32 %v3049_v10, %v357_v1  ;;  %v331_v18 = vmul.f32 %v3017_v2, %v297_v6  ;;  %v306_v6 = vld [vmem:[%s3008_s27 + $0xe0] sm:$0xff] }
  0x1f   : > { %533 = vst.msk [vmem:[#allocation2 + $0x168] sm:$0x1] %vm517_vm1, %v2914_v0  ;;  %v321_v19 = vmul.f32 %v3017_v2, %v287_v12  ;;  %v452_v21 = vmul.f32 %v3083_v25, %v419_v7  ;;  %v414_v22 = vmax.f32 %v382_v8, 0.0  ;;  %v395_v23 = vmul.f32 %v3049_v10, %v362_v9 }
  0x20   : > { %534 = vst.msk [vmem:[#allocation2 + $0x180] sm:$0x1] %vm517_vm1, %v2914_v0  ;;  %v360_v24 = vadd.f32 %v3032_v5, %v326_v11  ;;  %v385_v28 = vmul.f32 %v3049_v10, %v352_v14  ;;  %v422_v30 = vmax.f32 %v390_v17, 0.0  ;;  %v365_v31 = vadd.f32 %v3032_v5, %v331_v18 }
  0x21   : > { %537 = vst.msk [vmem:[#allocation2 + $0x29] sm:$0x1] %vm517_vm1, %v2914_v0  ;;  %v329_v32 = vmul.f32 %v3017_v2, %v295_v20  ;;  %v355_v33 = vadd.f32 %v3032_v5, %v321_v19  ;;  %v447_v36 = vmul.f32 %v3083_v25, %v414_v22  ;;  %v427_v37 = vmax.f32 %v395_v23, 0.0 }
  0x22   : > { %538 = vst.msk [vmem:[#allocation2 + $0x41] sm:$0x1] %vm517_vm1, %v2914_v0  ;;  %v393_v38 = vmul.f32 %v3049_v10, %v360_v24  ;;  %v417_v40 = vmax.f32 %v385_v28, 0.0  ;;  %v455_v42 = vmul.f32 %v3083_v25, %v422_v30  ;;  %v398_v43 = vmul.f32 %v3049_v10, %v365_v31 }
  0x23   : > { %539 = vst.msk [vmem:[#allocation2 + $0x59] sm:$0x1] %vm517_vm1, %v2914_v0  ;;  %v363_v44 = vadd.f32 %v3032_v5, %v329_v32  ;;  %v324_v45 = vmul.f32 %v3017_v2, %v290_v35  ;;  %v388_v46 = vmul.f32 %v3049_v10, %v355_v33  ;;  %v460_v50 = vmul.f32 %v3083_v25, %v427_v37 }
  0x24   : > { %540 = vst.msk [vmem:[#allocation2 + $0x71] sm:$0x1] %vm517_vm1, %v2914_v0  ;;  %v430_v56 = vmax.f32 %v398_v43, 0.0  ;;  %v337_v59 = vmul.f32 %v3017_v2, %v303_v48  ;;  %v340_v18 = vmul.f32 %v3017_v2, %v306_v6  ;;  %vm2237_vm11 = vcmask 588800  }
  0x25   : > { %541 = vst.msk [vmem:[#allocation2 + $0x89] sm:$0x1] %vm517_vm1, %v2914_v0  ;;  %v396_v57 = vmul.f32 %v3049_v10, %v363_v44  ;;  %v358_v58 = vadd.f32 %v3032_v5, %v324_v45  ;;  %v420_v60 = vmax.f32 %v388_v46, 0.0  ;;  %vm2682_vm12 = vcmask 1040384  }
  0x26   : > { %542 = vst.msk [vmem:[#allocation2 + $0xa1] sm:$0x1] %vm517_vm1, %v2914_v0  ;;  %v463_v7 = vmul.f32 %v3083_v25, %v430_v56  ;;  %v371_v11 = vadd.f32 %v3032_v5, %v337_v59  ;;  %v374_v30 = vadd.f32 %v3032_v5, %v340_v18  ;;  %v302_v56 = vld [vmem:[%s3008_s27 + $0xc0] sm:$0xff] }
  0x27   : > { %543 = vst.msk [vmem:[#allocation2 + $0xb9] sm:$0x1] %vm517_vm1, %v2914_v0  ;;  %v428_v8 = vmax.f32 %v396_v57, 0.0  ;;  %v391_v9 = vmul.f32 %v3049_v10, %v358_v58 }
  0x28   : > { %544 = vst.msk [vmem:[#allocation2 + $0xd1] sm:$0x1] %vm517_vm1, %v2914_v0  ;;  %v404_v23 = vmul.f32 %v3049_v10, %v371_v11 }
  0x29   : > { %545 = vst.msk [vmem:[#allocation2 + $0xe9] sm:$0x1] %vm517_vm1, %v2914_v0  ;;  %v423_v22 = vmax.f32 %v391_v9, 0.0 }
  0x2a   : > { %546 = vst.msk [vmem:[#allocation2 + $0x101] sm:$0x1] %vm517_vm1, %v2914_v0  ;;  %v436_v37 = vmax.f32 %v404_v23, 0.0 }
  0x2b   : > { %547 = vst.msk [vmem:[#allocation2 + $0x119] sm:$0x1] %vm517_vm1, %v2914_v0 }
  0x2c   : > { %548 = vst.msk [vmem:[#allocation2 + $0x131] sm:$0x1] %vm517_vm1, %v2914_v0  ;;  %v469_v46 = vmul.f32 %v3083_v25, %v436_v37 }
  0x2d   : > { %549 = vst.msk [vmem:[#allocation2 + $0x149] sm:$0x1] %vm517_vm1, %v2914_v0 }
  0x2e   : > { %550 = vst.msk [vmem:[#allocation2 + $0x161] sm:$0x1] %vm517_vm1, %v2914_v0 }
  0x2f   : > { %551 = vst.msk [vmem:[#allocation2 + $0x179] sm:$0x1] %vm517_vm1, %v2914_v0 }
  0x30   : > { %552 = vst.msk [vmem:[#allocation2 + $0x191] sm:$0x1] %vm517_vm1, %v2914_v0 }
  0x31   : > { %512 = vst.msk [vmem:[#allocation2 + $0x10] sm:$0x3] %vm511_vm2, %v2914_v0 }
  0x32   : > { %516 = vst.msk [vmem:[#allocation2 + $0x1a8] sm:$0x3] %vm511_vm2, %v2914_v0 }
  0x33   : > { %535 = vst.msk [vmem:[#allocation2 + $0x198] sm:$0x1] %vm517_vm1, %v2914_v0 }
  0x34   : > { %536 = vst.msk [vmem:[#allocation2 + $0x11] sm:$0x1] %vm517_vm1, %v2914_v0 }
  0x35   : > { %555 = vst.msk [vmem:[#allocation2 + $0x19] sm:$0xff] %vm476_vm0, %v444_v34 }
  0x36   : > { %477 = vst.msk [vmem:[%s3112_s14] sm:$0xff] %vm476_vm0, %v444_v34  ;;  %v334_v34 = vmul.f32 %v3017_v2, %v300_v26 }
  0x37   : > { %553 = vst.msk [vmem:[#allocation2 + $0x1a9] sm:$0x1] %vm517_vm1, %v2914_v0  ;;  %v392_v0 = vmul.f32 %v3049_v10, %v359_v51  ;;  %v425_v51 = vmax.f32 %v393_v38, 0.0 }
  0x38   : > { %v652_v54 = vld [vmem:[#allocation2 + $0x9] sm:$0xff]  ;;  %559 = vst.msk [vmem:[#allocation2 + $0x49] sm:$0xff] %vm476_vm0, %v448_v41  ;;  %v368_v47 = vadd.f32 %v3032_v5, %v334_v34 }
  0x39   : > { %717 = vrot.lane.b32.xlu0 %v652_v54, %s2915_s23  ;;  %481 = vst.msk [vmem:[%s3112_s14 + $0x20] sm:$0xff] %vm476_vm0, %v448_v41  ;;  %v424_v16 = vmax.f32 %v392_v0, 0.0  ;;  %v298_v41 = vld [vmem:[%s3008_s27 + $0xa0] sm:$0xff]  ;;  %v450_v54 = vmul.f32 %v3083_v25, %v417_v40  ;;  %v299_v34 = vld [vmem:[%s3008_s27 + $0xa8] sm:$0xff] }
  0x3a   : > { %478 = vst.msk [vmem:[%s3112_s14 + $0x8] sm:$0xff] %vm476_vm0, %v445_v49  ;;  %v332_v52 = vmul.f32 %v3017_v2, %v298_v41  ;;  %v401_v61 = vmul.f32 %v3049_v10, %v368_v47 }
  0x3b   : > { %556 = vst.msk [vmem:[#allocation2 + $0x21] sm:$0xff] %vm476_vm0, %v445_v49  ;;  %v457_v29 = vmul.f32 %v3083_v25, %v424_v16 }
  0x3c   : > { %v653_v3 = vld [vmem:[#allocation2 + $0x19] sm:$0xff]  ;;  %484 = vst.msk [vmem:[%s3112_s14 + $0x38] sm:$0xff] %vm476_vm0, %v451_v55  ;;  %v366_v0 = vadd.f32 %v3032_v5, %v332_v52  ;;  %v433_v14 = vmax.f32 %v401_v61, 0.0  ;;  %v336_v61 = vmul.f32 %v3017_v2, %v302_v56 }
  0x3d   : > { %719 = vrot.lane.b32.xlu1 %v653_v3, %s2915_s23  ;;  %562 = vst.msk [vmem:[#allocation2 + $0x69] sm:$0xff] %vm476_vm0, %v451_v55  ;;  %v293_v55 = vld [vmem:[%s3008_s27 + $0x78] sm:$0xff] }
  0x3e   : > { %482 = vst.msk [vmem:[%s3112_s14 + $0x28] sm:$0xff] %vm476_vm0, %v449_v63  ;;  %v327_v1 = vmul.f32 %v3017_v2, %v293_v55  ;;  %v399_v16 = vmul.f32 %v3049_v10, %v366_v0  ;;  %v466_v26 = vmul.f32 %v3083_v25, %v433_v14 }
  0x3f   : > { %v657_v15 = vld [vmem:[#allocation2 + $0x49] sm:$0xff]  ;;  %560 = vst.msk [vmem:[#allocation2 + $0x51] sm:$0xff] %vm476_vm0, %v449_v63  ;;  %v458_v63 = vmul.f32 %v3083_v25, %v425_v51 }
  0x40   : > { %487 = vst.msk [vmem:[%s3112_s14 + $0x50] sm:$0xff] %vm476_vm0, %v454_v4  ;;  %v361_v17 = vadd.f32 %v3032_v5, %v327_v1  ;;  %v431_v28 = vmax.f32 %v399_v16, 0.0  ;;  %v370_v1 = vadd.f32 %v3032_v5, %v336_v61 }
  0x41   : > { %727 = vrot.lane.b32.xlu0 %v657_v15, %s2915_s23  ;;  %565 = vst.msk [vmem:[#allocation2 + $0x91] sm:$0xff] %vm476_vm0, %v454_v4  ;;  %v335_v4 = vmul.f32 %v3017_v2, %v301_v62  ;;  %v296_v15 = vld [vmem:[%s3008_s27 + $0x90] sm:$0xff] }
  0x42   : > { %v654_v27 = vld [vmem:[#allocation2 + $0x21] sm:$0xff]  ;;  %557 = vst.msk [vmem:[#allocation2 + $0x31] sm:$0xff] %vm476_vm0, %v446_v13  ;;  %v330_v24 = vmul.f32 %v3017_v2, %v296_v15  ;;  %v464_v40 = vmul.f32 %v3083_v25, %v431_v28 }
  0x43   : > { %479 = vst.msk [vmem:[%s3112_s14 + $0x10] sm:$0xff] %vm476_vm0, %v446_v13  ;;  %v453_v13 = vmul.f32 %v3083_v25, %v420_v60  ;;  %v369_v20 = vadd.f32 %v3032_v5, %v335_v4 }
  0x44   : > { %485 = vst.msk [vmem:[%s3112_s14 + $0x40] sm:$0xff] %vm476_vm0, %v452_v21  ;;  %v660_v39 = vld [vmem:[#allocation2 + $0x69] sm:$0xff]  ;;  %v364_v38 = vadd.f32 %v3032_v5, %v330_v24 }
  0x45   : > { %721 = vrot.lane.b32.xlu1 %v654_v27, %s2915_s23  ;;  %563 = vst.msk [vmem:[#allocation2 + $0x79] sm:$0xff] %vm476_vm0, %v452_v21  ;;  %v461_v21 = vmul.f32 %v3083_v25, %v428_v8  ;;  %v304_v27 = vld [vmem:[%s3008_s27 + $0xd0] sm:$0xff]  ;;  %v402_v33 = vmul.f32 %v3049_v10, %v369_v20 }
  0x46   : > { %490 = vst.msk [vmem:[%s3112_s14 + $0x68] sm:$0xff] %vm476_vm0, %v457_v29  ;;  %v658_v53 = vld [vmem:[#allocation2 + $0x51] sm:$0xff]  ;;  %v338_v31 = vmul.f32 %v3017_v2, %v304_v27  ;;  %v397_v47 = vmul.f32 %v3049_v10, %v364_v38 }
  0x47   : > { %568 = vst.msk [vmem:[#allocation2 + $0xb1] sm:$0xff] %vm476_vm0, %v457_v29  ;;  %v394_v29 = vmul.f32 %v3049_v10, %v361_v17  ;;  %v434_v45 = vmax.f32 %v402_v33, 0.0 }
  0x48   : > { %480 = vst.msk [vmem:[%s3112_s14 + $0x18] sm:$0xff] %vm476_vm0, %v447_v36  ;;  %v663_v3 = vld [vmem:[#allocation2 + $0x91] sm:$0xff]  ;;  %v372_v43 = vadd.f32 %v3032_v5, %v338_v31  ;;  %v429_v58 = vmax.f32 %v397_v47, 0.0  ;;  %v3425_v47 = vld [vmem:[#allocation2 + $0x20] sm:$0xff] }
  0x49   : > { %733 = vrot.lane.b32.xlu0 %v660_v39, %s2915_s23  ;;  %v655_v49 = vld [vmem:[#allocation2 + $0x31] sm:$0xff]  ;;  %558 = vst.msk [vmem:[#allocation2 + $0x39] sm:$0xff] %vm476_vm0, %v447_v36  ;;  %v456_v36 = vmul.f32 %v3083_v25, %v423_v22  ;;  %v333_v39 = vmul.f32 %v3017_v2, %v299_v34  ;;  %v426_v41 = vmax.f32 %v394_v29, 0.0  ;;  %v467_v55 = vmul.f32 %v3083_v25, %v434_v45 }
  0x4a   : > { %723 = vrot.lane.b32.xlu2 %v655_v49, %s2915_s23  ;;  %488 = vst.msk [vmem:[%s3112_s14 + $0x58] sm:$0xff] %vm476_vm0, %v455_v42  ;;  %v307_v49 = vld [vmem:[%s3008_s27 + $0xe8] sm:$0xff]  ;;  %v405_v52 = vmul.f32 %v3049_v10, %v372_v43  ;;  %v462_v4 = vmul.f32 %v3083_v25, %v429_v58  ;;  %v3393_v38 = vld [vmem:[#allocation2 + $0x30] sm:$0xff] }
  0x4b   : > { %566 = vst.msk [vmem:[#allocation2 + $0x99] sm:$0xff] %vm476_vm0, %v455_v42  ;;  %v407_v42 = vmul.f32 %v3049_v10, %v374_v30  ;;  %v367_v48 = vadd.f32 %v3032_v5, %v333_v39  ;;  %v587_v30 = vld [vmem:[#allocation2] sm:$0xff]  ;;  %v3413_v43 = vld [vmem:[#allocation2 + $0x48] sm:$0xff]  ;;  %v3423_v45 = vld [vmem:[#allocation2 + $0x52] sm:$0xff] }
  0x4c   : > { %493 = vst.msk [vmem:[%s3112_s14 + $0x80] sm:$0xff] %vm476_vm0, %v460_v50  ;;  %v661_v19 = vld [vmem:[#allocation2 + $0x79] sm:$0xff] }
  0x4d   : > { %729 = vrot.lane.b32.xlu1 %v658_v53, %s2915_s23  ;;  %571 = vst.msk [vmem:[#allocation2 + $0xd9] sm:$0xff] %vm476_vm0, %v460_v50  ;;  %v459_v50 = vmul.f32 %v3083_v25, %v426_v41  ;;  %v439_v51 = vmax.f32 %v407_v42, 0.0  ;;  %v341_v53 = vmul.f32 %v3017_v2, %v307_v49  ;;  %v400_v59 = vmul.f32 %v3049_v10, %v367_v48  ;;  %v3403_v41 = vld [vmem:[#allocation2 + $0x18] sm:$0xff] }
  0x4e   : > { %483 = vst.msk [vmem:[%s3112_s14 + $0x30] sm:$0xff] %vm476_vm0, %v450_v54  ;;  %v666_v32 = vld [vmem:[#allocation2 + $0xb1] sm:$0xff]  ;;  %v3409_v42 = vld [vmem:[#allocation2 + $0x1a] sm:$0xff] }
  0x4f   : > { %561 = vst.msk [vmem:[#allocation2 + $0x61] sm:$0xff] %vm476_vm0, %v450_v54  ;;  %v375_v60 = vadd.f32 %v3032_v5, %v341_v53  ;;  %v472_v62 = vmul.f32 %v3083_v25, %v439_v51  ;;  %v432_v6 = vmax.f32 %v400_v59, 0.0  ;;  %v3448_v53 = vld [vmem:[#allocation2 + $0x50] sm:$0xff]  ;;  %v3473_v61 = vld [vmem:[#allocation2 + $0x78] sm:$0xff] }
  0x50   : > { %v3236_v12 = vld [vmem:[#allocation2 + $0x39] sm:$0xff]  ;;  %491 = vst.msk [vmem:[%s3112_s14 + $0x70] sm:$0xff] %vm476_vm0, %v458_v63 }
  0x51   : > { %739 = vrot.lane.b32.xlu0 %v663_v3, %s2915_s23  ;;  %569 = vst.msk [vmem:[#allocation2 + $0xc1] sm:$0xff] %vm476_vm0, %v458_v63  ;;  %v437_v63 = vmax.f32 %v405_v52, 0.0  ;;  %v408_v0 = vmul.f32 %v3049_v10, %v375_v60  ;;  %v465_v15 = vmul.f32 %v3083_v25, %v432_v6  ;;  %v3399_v39 = vld [vmem:[#allocation2 + $0x32] sm:$0xff]  ;;  %v3433_v49 = vld [vmem:[#allocation2 + $0x3a] sm:$0xff]  ;;  %v3446_v52 = vld [vmem:[#allocation2 + $0x22] sm:$0xff] }
  0x52   : > { %725 = vrot.lane.b32.xlu2 %v3236_v12, %s2915_s23  ;;  %496 = vst.msk [vmem:[%s3112_s14 + $0x98] sm:$0xff] %vm476_vm0, %v463_v7  ;;  %v664_v44 = vld [vmem:[#allocation2 + $0x99] sm:$0xff]  ;;  %v3471_v60 = vld [vmem:[#allocation2 + $0x4a] sm:$0xff] }
  0x53   : > { %574 = vst.msk [vmem:[#allocation2 + $0xf9] sm:$0xff] %vm476_vm0, %v463_v7  ;;  %v403_v7 = vmul.f32 %v3049_v10, %v370_v1  ;;  %v470_v8 = vmul.f32 %v3083_v25, %v437_v63  ;;  %v440_v9 = vmax.f32 %v408_v0, 0.0  ;;  %v3467_v59 = vld [vmem:[#allocation2 + $0x9a] sm:$0xff] }
  0x54   : > { %486 = vst.msk [vmem:[%s3112_s14 + $0x48] sm:$0xff] %vm476_vm0, %v453_v13  ;;  %v669_v54 = vld [vmem:[#allocation2 + $0xd9] sm:$0xff] }
  0x55   : > { %735 = vrot.lane.b32.xlu1 %v661_v19, %s2915_s23  ;;  %564 = vst.msk [vmem:[#allocation2 + $0x81] sm:$0xff] %vm476_vm0, %v453_v13  ;;  %v305_v13 = vld [vmem:[%s3008_s27 + $0xd8] sm:$0xff]  ;;  %v435_v16 = vmax.f32 %v403_v7, 0.0  ;;  %v473_v18 = vmul.f32 %v3083_v25, %v440_v9  ;;  %v3497_v7 = vld [vmem:[#allocation2 + $0x6a] sm:$0xff] }
  0x56   : > { %494 = vst.msk [vmem:[%s3112_s14 + $0x88] sm:$0xff] %vm476_vm0, %v461_v21  ;;  %v3269_v35 = vld [vmem:[#allocation2 + $0x61] sm:$0xff]  ;;  %v339_v17 = vmul.f32 %v3017_v2, %v305_v13  ;;  %v3506_v9 = vld [vmem:[#allocation2 + $0xd8] sm:$0xff] }
  0x57   : > { %572 = vst.msk [vmem:[#allocation2 + $0xe1] sm:$0xff] %vm476_vm0, %v461_v21  ;;  %v468_v2 = vmul.f32 %v3083_v25, %v435_v16  ;;  %v3431_v48 = vld [vmem:[#allocation2 + $0x68] sm:$0xff] }
  0x58   : > { %499 = vst.msk [vmem:[%s3112_s14 + $0xb0] sm:$0xff] %vm476_vm0, %v466_v26  ;;  %v667_v3 = vld [vmem:[#allocation2 + $0xc1] sm:$0xff]  ;;  %v373_v19 = vadd.f32 %v3032_v5, %v339_v17 }
  0x59   : > { %745 = vrot.lane.b32.xlu0 %v666_v32, %s2915_s23  ;;  %577 = vst.msk [vmem:[#allocation2 + $0x121] sm:$0xff] %vm476_vm0, %v466_v26  ;;  %v845_v32 = vld [vmem:[#allocation2 + $0xa] sm:$0xff] }
  0x5a   : > { %731 = vrot.lane.b32.xlu2 %v3269_v35, %s2915_s23  ;;  %489 = vst.msk [vmem:[%s3112_s14 + $0x60] sm:$0xff] %vm476_vm0, %v456_v36  ;;  %v672_v11 = vld [vmem:[#allocation2 + $0xf9] sm:$0xff]  ;;  %v406_v21 = vmul.f32 %v3049_v10, %v373_v19 }
  0x5b   : > { %567 = vst.msk [vmem:[#allocation2 + $0xa9] sm:$0xff] %vm476_vm0, %v456_v36  ;;  %v588_v36 = vld [vmem:[#allocation2 + $0x8] sm:$0xff]  ;;  %v3524_v19 = vld [vmem:[#allocation2 + $0x92] sm:$0xff] }
  0x5c   : > { %497 = vst.msk [vmem:[%s3112_s14 + $0xa0] sm:$0xff] %vm476_vm0, %v464_v40  ;;  %v3302_v57 = vld [vmem:[#allocation2 + $0x81] sm:$0xff]  ;;  %v438_v5 = vmax.f32 %v406_v21, 0.0 }
  0x5d   : > { %741 = vrot.lane.b32.xlu1 %v664_v44, %s2915_s23  ;;  %575 = vst.msk [vmem:[#allocation2 + $0x109] sm:$0xff] %vm476_vm0, %v464_v40  ;;  %v3417_v44 = vld [vmem:[#allocation2 + $0x38] sm:$0xff]  ;;  %v3462_v58 = vld [vmem:[#allocation2 + $0x80] sm:$0xff] }
  0x5e   : > { %502 = vst.msk [vmem:[%s3112_s14 + $0xc8] sm:$0xff] %vm476_vm0, %v469_v46  ;;  %v670_v20 = vld [vmem:[#allocation2 + $0xe1] sm:$0xff]  ;;  %v471_v24 = vmul.f32 %v3083_v25, %v438_v5 }
  0x5f   : > { %580 = vst.msk [vmem:[#allocation2 + $0x141] sm:$0xff] %vm476_vm0, %v469_v46  ;;  %v844_v46 = vld [vmem:[#allocation2 + $0x2] sm:$0xff]  ;;  %v3444_v51 = vld [vmem:[#allocation2 + $0x7a] sm:$0xff] }
  0x60   : > { %492 = vst.msk [vmem:[%s3112_s14 + $0x78] sm:$0xff] %vm476_vm0, %v459_v50  ;;  %v675_v22 = vld [vmem:[#allocation2 + $0x121] sm:$0xff] }
  0x61   : > { %751 = vrot.lane.b32.xlu0 %v669_v54, %s2915_s23  ;;  %570 = vst.msk [vmem:[#allocation2 + $0xc9] sm:$0xff] %vm476_vm0, %v459_v50  ;;  %v3438_v50 = vld [vmem:[#allocation2 + $0x60] sm:$0xff]  ;;  %v3454_v54 = vld [vmem:[#allocation2 + $0x90] sm:$0xff] }
  0x62   : > { %737 = vrot.lane.b32.xlu2 %v3302_v57, %s2915_s23  ;;  %500 = vst.msk [vmem:[%s3112_s14 + $0xb8] sm:$0xff] %vm476_vm0, %v467_v55  ;;  %v3330_v14 = vld [vmem:[#allocation2 + $0xa9] sm:$0xff] }
  0x63   : > { %578 = vst.msk [vmem:[#allocation2 + $0x129] sm:$0xff] %vm476_vm0, %v467_v55  ;;  %v3456_v55 = vld [vmem:[#allocation2 + $0x62] sm:$0xff] }
  0x64   : > { %505 = vst.msk [vmem:[%s3112_s14 + $0xe0] sm:$0xff] %vm476_vm0, %v472_v62  ;;  %v673_v10 = vld [vmem:[#allocation2 + $0x109] sm:$0xff] }
  0x65   : > { %747 = vrot.lane.b32.xlu1 %v667_v3, %s2915_s23  ;;  %583 = vst.msk [vmem:[#allocation2 + $0x169] sm:$0xff] %vm476_vm0, %v472_v62  ;;  %v3479_v62 = vld [vmem:[#allocation2 + $0xb0] sm:$0xff]  ;;  %v3481_v63 = vld [vmem:[#allocation2 + $0x82] sm:$0xff] }
  0x66   : > { %495 = vst.msk [vmem:[%s3112_s14 + $0x90] sm:$0xff] %vm476_vm0, %v462_v4  ;;  %v678_v26 = vld [vmem:[#allocation2 + $0x141] sm:$0xff] }
  0x67   : > { %573 = vst.msk [vmem:[#allocation2 + $0xf1] sm:$0xff] %vm476_vm0, %v462_v4  ;;  %v3488_v3 = vld [vmem:[#allocation2 + $0xa8] sm:$0xff] }
  0x68   : > { %503 = vst.msk [vmem:[%s3112_s14 + $0xd0] sm:$0xff] %vm476_vm0, %v470_v8  ;;  %v3354_v23 = vld [vmem:[#allocation2 + $0xc9] sm:$0xff] }
  0x69   : > { %757 = vrot.lane.b32.xlu0 %v672_v11, %s2915_s23  ;;  %581 = vst.msk [vmem:[#allocation2 + $0x151] sm:$0xff] %vm476_vm0, %v470_v8  ;;  %v3493_v4 = vld [vmem:[#allocation2 + $0xc2] sm:$0xff]  ;;  %v3500_v8 = vld [vmem:[#allocation2 + $0x98] sm:$0xff]  ;;  %v3508_v11 = vld [vmem:[#allocation2 + $0xaa] sm:$0xff] }
  0x6a   : > { %743 = vrot.lane.b32.xlu2 %v3330_v14, %s2915_s23  ;;  %498 = vst.msk [vmem:[%s3112_s14 + $0xa8] sm:$0xff] %vm476_vm0, %v465_v15  ;;  %v676_v28 = vld [vmem:[#allocation2 + $0x129] sm:$0xff] }
  0x6b   : > { %576 = vst.msk [vmem:[#allocation2 + $0x111] sm:$0xff] %vm476_vm0, %v465_v15  ;;  %v3515_v16 = vld [vmem:[#allocation2 + $0xc8] sm:$0xff] }
  0x6c   : > { %506 = vst.msk [vmem:[%s3112_s14 + $0xe8] sm:$0xff] %vm476_vm0, %v473_v18  ;;  %v3371_v25 = vld [vmem:[#allocation2 + $0x169] sm:$0xff] }
  0x6d   : > { %753 = vrot.lane.b32.xlu1 %v670_v20, %s2915_s23  ;;  %584 = vst.msk [vmem:[#allocation2 + $0x171] sm:$0xff] %vm476_vm0, %v473_v18  ;;  %v3520_v17 = vld [vmem:[#allocation2 + $0xe2] sm:$0xff]  ;;  %v3535_v21 = vld [vmem:[#allocation2 + $0xca] sm:$0xff] }
  0x6e   : > { %501 = vst.msk [vmem:[%s3112_s14 + $0xc0] sm:$0xff] %vm476_vm0, %v468_v2  ;;  %v3365_v27 = vld [vmem:[#allocation2 + $0xf1] sm:$0xff]  ;;  %v3527_v20 = vld [vmem:[#allocation2 + $0xc0] sm:$0xff] }
  0x6f   : > { %579 = vst.msk [vmem:[#allocation2 + $0x139] sm:$0xff] %vm476_vm0, %v468_v2  ;;  %v3533_v2 = vld [vmem:[#allocation2 + $0xf8] sm:$0xff] }
  0x70   : > { %504 = vst.msk [vmem:[%s3112_s14 + $0xd8] sm:$0xff] %vm476_vm0, %v471_v24  ;;  %v3377_v31 = vld [vmem:[#allocation2 + $0x151] sm:$0xff] }
  0x71   : > { %763 = vrot.lane.b32.xlu0 %v675_v22, %s2915_s23  ;;  %582 = vst.msk [vmem:[#allocation2 + $0x159] sm:$0xff] %vm476_vm0, %v471_v24  ;;  %v3542_v24 = vld [vmem:[#allocation2 + $0xf0] sm:$0xff] }
  0x72   : > { %749 = vrot.lane.b32.xlu2 %v3354_v23, %s2915_s23  ;;  %v3373_v29 = vld [vmem:[#allocation2 + $0x111] sm:$0xff]  ;;  %619 = vst.msk [vmem:[#allocation3] sm:$0xff] %vm476_vm0, %v587_v30  ;;  %v3554_v30 = vld [vmem:[#allocation2 + $0xe0] sm:$0xff] }
  0x73   : > { %620 = vst.msk [vmem:[#allocation3 + $0x8] sm:$0xff] %vm476_vm0, %v588_v36 }
  0x74   : > { %v3388_v37 = vld [vmem:[#allocation2 + $0x171] sm:$0xff]  ;;  %623 = vst.msk [vmem:[#allocation3 + $0x20] sm:$0xff] %vm476_vm0, %v3393_v38 }
  0x75   : > { %759 = vrot.lane.b32.xlu1 %v673_v10, %s2915_s23  ;;  %621 = vst.msk [vmem:[#allocation3 + $0x10] sm:$0xff] %vm476_vm0, %v3403_v41  ;;  %v3547_v10 = vld [vmem:[#allocation2 + $0x10a] sm:$0xff] }
  0x76   : > { %v3384_v33 = vld [vmem:[#allocation2 + $0x139] sm:$0xff]  ;;  %625 = vst.msk [vmem:[#allocation3 + $0x30] sm:$0xff] %vm476_vm0, %v3413_v43 }
  0x77   : > { %624 = vst.msk [vmem:[#allocation3 + $0x28] sm:$0xff] %vm476_vm0, %v3417_v44 }
  0x78   : > { %v3401_v40 = vld [vmem:[#allocation2 + $0x159] sm:$0xff]  ;;  %622 = vst.msk [vmem:[#allocation3 + $0x18] sm:$0xff] %vm476_vm0, %v3425_v47 }
  0x79   : > { %769 = vrot.lane.b32.xlu0 %v678_v26, %s2915_s23  ;;  %628 = vst.msk [vmem:[#allocation3 + $0x48] sm:$0xff] %vm476_vm0, %v3431_v48 }
  0x7a   : > { %755 = vrot.lane.b32.xlu2 %v3365_v27, %s2915_s23  ;;  %627 = vst.msk [vmem:[#allocation3 + $0x40] sm:$0xff] %vm476_vm0, %v3438_v50 }
  0x7b   : > { %626 = vst.msk [vmem:[#allocation3 + $0x38] sm:$0xff] %vm476_vm0, %v3448_v53 }
  0x7c   : > { %631 = vst.msk [vmem:[#allocation3 + $0x60] sm:$0xff] %vm476_vm0, %v3454_v54 }
  0x7d   : > { %765 = vrot.lane.b32.xlu1 %v676_v28, %s2915_s23  ;;  %630 = vst.msk [vmem:[#allocation3 + $0x58] sm:$0xff] %vm476_vm0, %v3462_v58  ;;  %v3551_v28 = vld [vmem:[#allocation2 + $0xb2] sm:$0xff] }
  0x7e   : > { %629 = vst.msk [vmem:[#allocation3 + $0x50] sm:$0xff] %vm476_vm0, %v3473_v61 }
  0x7f   : > { %634 = vst.msk [vmem:[#allocation3 + $0x78] sm:$0xff] %vm476_vm0, %v3479_v62 }
  0x80   : > { %633 = vst.msk [vmem:[#allocation3 + $0x70] sm:$0xff] %vm476_vm0, %v3488_v3 }
  0x81   : > { %775 = vrot.lane.b32.xlu0 %v3371_v25, %s2915_s23  ;;  %632 = vst.msk [vmem:[#allocation3 + $0x68] sm:$0xff] %vm476_vm0, %v3500_v8 }
  0x82   : > { %761 = vrot.lane.b32.xlu2 %v3373_v29, %s2915_s23  ;;  %4569 = vst [vmem:[#allocation4_spill] sm:$0xff] %v3508_v11 }
  0x83   : > { %637 = vst.msk [vmem:[#allocation3 + $0x90] sm:$0xff] %vm476_vm0, %v3506_v9 }
  0x84   : > { %4570 = vst [vmem:[#allocation5_spill] sm:$0xff] %v3520_v17 }
  0x85   : > { %771 = vrot.lane.b32.xlu1 %v3377_v31, %s2915_s23  ;;  %636 = vst.msk [vmem:[#allocation3 + $0x88] sm:$0xff] %vm476_vm0, %v3515_v16 }
  0x86   : > { %635 = vst.msk [vmem:[#allocation3 + $0x80] sm:$0xff] %vm476_vm0, %v3527_v20 }
  0x87   : > { %v716_v34 = vpop.permute.xlu0 %715  ;;  %4571 = vst [vmem:[#allocation6_spill] sm:$0xff] %v3535_v21 }
  0x88   : > { %812 = vst.msk [vmem:[#allocation3] sm:$0xff] %vm811_vm3, %v716_v34  ;;  %v3562_v34 = vld [vmem:[#allocation2 + $0xf2] sm:$0xff] }
  0x89   : > { %910 = vrot.lane.b32.xlu0 %v845_v32, %s2916_s15  ;;  %640 = vst.msk [vmem:[#allocation3 + $0xa8] sm:$0xff] %vm476_vm0, %v3533_v2  ;;  %v3560_v32 = vld [vmem:[#allocation2 + $0x120] sm:$0xff] }
  0x8a   : > { %767 = vrot.lane.b32.xlu2 %v3384_v33, %s2915_s23  ;;  %4572 = vst [vmem:[#allocation7_spill] sm:$0xff] %v3547_v10 }
  0x8b   : > { %639 = vst.msk [vmem:[#allocation3 + $0xa0] sm:$0xff] %vm476_vm0, %v3542_v24 }
  0x8c   : > { %638 = vst.msk [vmem:[#allocation3 + $0x98] sm:$0xff] %vm476_vm0, %v3554_v30 }
  0x8d   : > { %777 = vrot.lane.b32.xlu1 %v3388_v37, %s2915_s23  ;;  %4573 = vst [vmem:[#allocation8_spill] sm:$0xff] %v3562_v34 }
  0x8e   : > { %643 = vst.msk [vmem:[#allocation3 + $0xc0] sm:$0xff] %vm476_vm0, %v3560_v32 }
  0x91   : > { %916 = vrot.lane.b32.xlu0 %v3399_v39, %s2916_s15 }
  0x92   : > { %773 = vrot.lane.b32.xlu2 %v3401_v40, %s2915_s23 }
  0x95   : > { %912 = vrot.lane.b32.xlu1 %v3409_v42, %s2916_s15 }
  0x99   : > { %922 = vrot.lane.b32.xlu0 %v3423_v45, %s2916_s15 }
  0x9a   : > { %908 = vrot.lane.b32.xlu2 %v844_v46, %s2916_s15 }
  0x9d   : > { %918 = vrot.lane.b32.xlu1 %v3433_v49, %s2916_s15 }
  0xa1   : > { %928 = vrot.lane.b32.xlu0 %v3444_v51, %s2916_s15 }
  0xa2   : > { %914 = vrot.lane.b32.xlu2 %v3446_v52, %s2916_s15 }
  0xa4   : > { %v724_v56 = vpop.permute.xlu2 %723 }
  0xa5   : > { %924 = vrot.lane.b32.xlu1 %v3456_v55, %s2916_s15  ;;  %816 = vst.msk [vmem:[#allocation3 + $0x20] sm:$0xff] %vm811_vm3, %v724_v56  ;;  %v3569_v56 = vld [vmem:[#allocation2 + $0x110] sm:$0xff] }
  0xa6   : > { %642 = vst.msk [vmem:[#allocation3 + $0xb8] sm:$0xff] %vm476_vm0, %v3569_v56 }
  0xa9   : > { %934 = vrot.lane.b32.xlu0 %v3467_v59, %s2916_s15 }
  0xaa   : > { %920 = vrot.lane.b32.xlu2 %v3471_v60, %s2916_s15 }
  0xab   : > { %v718_v0 = vpop.permute.xlu0 %717 }
  0xac   : > { %813 = vst.msk [vmem:[#allocation3 + $0x8] sm:$0xff] %vm811_vm3, %v718_v0  ;;  %v726_v1 = vpop.permute.xlu2 %725  ;;  %v3574_v0 = vld [vmem:[#allocation2 + $0x12a] sm:$0xff] }
  0xad   : > { %930 = vrot.lane.b32.xlu1 %v3481_v63, %s2916_s15  ;;  %817 = vst.msk [vmem:[#allocation3 + $0x28] sm:$0xff] %vm811_vm3, %v726_v1 }
  0xae   : > { %4574 = vst [vmem:[#allocation9_spill] sm:$0xff] %v3574_v0 }
  0xaf   : > { %v720_v6 = vpop.permute.xlu1 %719 }
  0xb0   : > { %814 = vst.msk [vmem:[#allocation3 + $0x10] sm:$0xff] %vm811_vm3, %v720_v6  ;;  %v3578_v6 = vld [vmem:[#allocation2 + $0xda] sm:$0xff] }
  0xb1   : > { %940 = vrot.lane.b32.xlu0 %v3493_v4, %s2916_s15 }
  0xb2   : > { %926 = vrot.lane.b32.xlu2 %v3497_v7, %s2916_s15 }
  0xb3   : > { %v728_v13 = vpop.permute.xlu0 %727 }
  0xb4   : > { %818 = vst.msk [vmem:[#allocation3 + $0x30] sm:$0xff] %vm811_vm3, %v728_v13  ;;  %v732_v15 = vpop.permute.xlu2 %731  ;;  %v3581_v13 = vld [vmem:[#allocation2 + $0x108] sm:$0xff] }
  0xb5   : > { %936 = vrot.lane.b32.xlu1 %v3508_v11, %s2916_s15  ;;  %820 = vst.msk [vmem:[#allocation3 + $0x40] sm:$0xff] %vm811_vm3, %v732_v15  ;;  %v3587_v15 = vld [vmem:[#allocation2 + $0x140] sm:$0xff] }
  0xb6   : > { %641 = vst.msk [vmem:[#allocation3 + $0xb0] sm:$0xff] %vm476_vm0, %v3581_v13  ;;  %v3646_v11 = vld [vmem:[#allocation2 + $0x142] sm:$0xff] }
  0xb7   : > { %v722_v18 = vpop.permute.xlu1 %721  ;;  %646 = vst.msk [vmem:[#allocation3 + $0xd8] sm:$0xff] %vm476_vm0, %v3587_v15 }
  0xb8   : > { %815 = vst.msk [vmem:[#allocation3 + $0x18] sm:$0xff] %vm811_vm3, %v722_v18  ;;  %v3589_v18 = vld [vmem:[#allocation2 + $0x112] sm:$0xff] }
  0xb9   : > { %946 = vrot.lane.b32.xlu0 %v3520_v17, %s2916_s15  ;;  %4575 = vst [vmem:[#allocation10_spill] sm:$0xff] %v3589_v18  ;;  %v3633_v17 = vld [vmem:[#allocation2 + $0x150] sm:$0xff] }
  0xba   : > { %932 = vrot.lane.b32.xlu2 %v3524_v19, %s2916_s15  ;;  %647 = vst.msk [vmem:[#allocation3 + $0xe0] sm:$0xff] %vm476_vm0, %v3633_v17 }
  0xbb   : > { %v734_v5 = vpop.permute.xlu0 %733 }
  0xbc   : > { %821 = vst.msk [vmem:[#allocation3 + $0x48] sm:$0xff] %vm811_vm3, %v734_v5  ;;  %v738_v22 = vpop.permute.xlu2 %737 }
  0xbd   : > { %942 = vrot.lane.b32.xlu1 %v3535_v21, %s2916_s15  ;;  %823 = vst.msk [vmem:[#allocation3 + $0x58] sm:$0xff] %vm811_vm3, %v738_v22  ;;  %v3630_v21 = vld [vmem:[#allocation2 + $0x122] sm:$0xff] }
  0xbf   : > { %v730_v26 = vpop.permute.xlu1 %729 }
  0xc0   : > { %819 = vst.msk [vmem:[#allocation3 + $0x38] sm:$0xff] %vm811_vm3, %v730_v26  ;;  %v3596_v26 = vld [vmem:[#allocation2 + $0x138] sm:$0xff] }
  0xc1   : > { %952 = vrot.lane.b32.xlu0 %v3547_v10, %s2916_s15  ;;  %645 = vst.msk [vmem:[#allocation3 + $0xd0] sm:$0xff] %vm476_vm0, %v3596_v26 }
  0xc2   : > { %938 = vrot.lane.b32.xlu2 %v3551_v28, %s2916_s15 }
  0xc3   : > { %v740_v36 = vpop.permute.xlu0 %739 }
  0xc4   : > { %824 = vst.msk [vmem:[#allocation3 + $0x60] sm:$0xff] %vm811_vm3, %v740_v36  ;;  %v744_v46 = vpop.permute.xlu2 %743  ;;  %v3601_v36 = vld [vmem:[#allocation2 + $0x152] sm:$0xff] }
  0xc5   : > { %948 = vrot.lane.b32.xlu1 %v3562_v34, %s2916_s15  ;;  %826 = vst.msk [vmem:[#allocation3 + $0x70] sm:$0xff] %vm811_vm3, %v744_v46  ;;  %v3623_v34 = vld [vmem:[#allocation2 + $0x158] sm:$0xff] }
  0xc6   : > { %4576 = vst [vmem:[#allocation11_spill] sm:$0xff] %v3601_v36 }
  0xc7   : > { %v736_v1 = vpop.permute.xlu1 %735  ;;  %648 = vst.msk [vmem:[#allocation3 + $0xe8] sm:$0xff] %vm476_vm0, %v3623_v34 }
  0xc8   : > { %822 = vst.msk [vmem:[#allocation3 + $0x50] sm:$0xff] %vm811_vm3, %v736_v1  ;;  %v3605_v1 = vld [vmem:[#allocation2 + $0xfa] sm:$0xff] }
  0xc9   : > { %958 = vrot.lane.b32.xlu0 %v3574_v0, %s2916_s15  ;;  %v3608_v0 = vld [vmem:[#allocation2 + $0x128] sm:$0xff] }
  0xca   : > { %944 = vrot.lane.b32.xlu2 %v3578_v6, %s2916_s15  ;;  %644 = vst.msk [vmem:[#allocation3 + $0xc8] sm:$0xff] %vm476_vm0, %v3608_v0 }
  0xcb   : > { %v746_v5 = vpop.permute.xlu0 %745 }
  0xcc   : > { %827 = vst.msk [vmem:[#allocation3 + $0x78] sm:$0xff] %vm811_vm3, %v746_v5  ;;  %v750_v22 = vpop.permute.xlu2 %749  ;;  %v3614_v5 = vld [vmem:[#allocation2 + $0x168] sm:$0xff] }
  0xcd   : > { %954 = vrot.lane.b32.xlu1 %v3589_v18, %s2916_s15  ;;  %829 = vst.msk [vmem:[#allocation3 + $0x88] sm:$0xff] %vm811_vm3, %v750_v22  ;;  %v3616_v22 = vld [vmem:[#allocation2 + $0x13a] sm:$0xff] }
  0xce   : > { %4577 = vst [vmem:[#allocation12_spill] sm:$0xff] %v3616_v22 }
  0xcf   : > { %v742_v46 = vpop.permute.xlu1 %741  ;;  %649 = vst.msk [vmem:[#allocation3 + $0xf0] sm:$0xff] %vm476_vm0, %v3614_v5 }
  0xd0   : > { %825 = vst.msk [vmem:[#allocation3 + $0x68] sm:$0xff] %vm811_vm3, %v742_v46 }
  0xd1   : > { %964 = vrot.lane.b32.xlu0 %v3601_v36, %s2916_s15  ;;  %v875_v36 = vld [vmem:[#allocation2 + $0x172] sm:$0xff] }
  0xd2   : > { %950 = vrot.lane.b32.xlu2 %v3605_v1, %s2916_s15 }
  0xd3   : > { %v752_v18 = vpop.permute.xlu0 %751 }
  0xd4   : > { %830 = vst.msk [vmem:[#allocation3 + $0x90] sm:$0xff] %vm811_vm3, %v752_v18  ;;  %v756_v46 = vpop.permute.xlu2 %755  ;;  %v3638_v18 = vld [vmem:[#allocation2 + $0x15a] sm:$0xff] }
  0xd5   : > { %960 = vrot.lane.b32.xlu1 %v3616_v22, %s2916_s15  ;;  %832 = vst.msk [vmem:[#allocation3 + $0xa0] sm:$0xff] %vm811_vm3, %v756_v46 }
  0xd6   : > { %4578 = vst [vmem:[#allocation13_spill] sm:$0xff] %v3638_v18 }
  0xd7   : > { %v748_v10 = vpop.permute.xlu1 %747 }
  0xd8   : > { %828 = vst.msk [vmem:[#allocation3 + $0x80] sm:$0xff] %vm811_vm3, %v748_v10 }
  0xd9   : > { %970 = vrot.lane.b32.xlu0 %v875_v36, %s2916_s15  ;;  %v3649_v36 = vld [vmem:[#allocation2 + $0x170] sm:$0xff] }
  0xda   : > { %956 = vrot.lane.b32.xlu2 %v3630_v21, %s2916_s15  ;;  %650 = vst.msk [vmem:[#allocation3 + $0xf8] sm:$0xff] %vm476_vm0, %v3649_v36 }
  0xdb   : > { %v758_v46 = vpop.permute.xlu0 %757 }
  0xdc   : > { %833 = vst.msk [vmem:[#allocation3 + $0xa8] sm:$0xff] %vm811_vm3, %v758_v46  ;;  %v762_v22 = vpop.permute.xlu2 %761 }
  0xdd   : > { %966 = vrot.lane.b32.xlu1 %v3638_v18, %s2916_s15  ;;  %835 = vst.msk [vmem:[#allocation3 + $0xb8] sm:$0xff] %vm811_vm3, %v762_v22  ;;  %v3661_v18 = vld [vmem:[#allocation2 + $0x16a] sm:$0xff] }
  0xdf   : > { %v754_v10 = vpop.permute.xlu1 %753 }
  0xe0   : > { %831 = vst.msk [vmem:[#allocation3 + $0x98] sm:$0xff] %vm811_vm3, %v754_v10 }
  0xe1   : > { %1105 = vrot.lane.b32.xlu0 %v3393_v38, %s2917_s16 }
  0xe2   : > { %962 = vrot.lane.b32.xlu2 %v3646_v11, %s2916_s15 }
  0xe3   : > { %v764_v46 = vpop.permute.xlu0 %763 }
  0xe4   : > { %836 = vst.msk [vmem:[#allocation3 + $0xc0] sm:$0xff] %vm811_vm3, %v764_v46  ;;  %v768_v22 = vpop.permute.xlu2 %767 }
  0xe5   : > { %1101 = vrot.lane.b32.xlu1 %v3403_v41, %s2917_s16  ;;  %838 = vst.msk [vmem:[#allocation3 + $0xd0] sm:$0xff] %vm811_vm3, %v768_v22 }
  0xe7   : > { %v760_v10 = vpop.permute.xlu1 %759 }
  0xe8   : > { %834 = vst.msk [vmem:[#allocation3 + $0xb0] sm:$0xff] %vm811_vm3, %v760_v10  ;;  %v308_v10 = vld [vmem:[%s3008_s27 + $0xf0] sm:$0xff] }
  0xe9   : > { %1111 = vrot.lane.b32.xlu0 %v3448_v53, %s2917_s16 }
  0xea   : > { %968 = vrot.lane.b32.xlu2 %v3661_v18, %s2916_s15 }
  0xeb   : > { %v770_v38 = vpop.permute.xlu0 %769 }
  0xec   : > { %839 = vst.msk [vmem:[#allocation3 + $0xd8] sm:$0xff] %vm811_vm3, %v770_v38  ;;  %v774_v46 = vpop.permute.xlu2 %773 }
  0xed   : > { %1107 = vrot.lane.b32.xlu1 %v3417_v44, %s2917_s16  ;;  %841 = vst.msk [vmem:[#allocation3 + $0xe8] sm:$0xff] %vm811_vm3, %v774_v46 }
  0xef   : > { %v766_v41 = vpop.permute.xlu1 %765 }
  0xf0   : > { %837 = vst.msk [vmem:[#allocation3 + $0xc8] sm:$0xff] %vm811_vm3, %v766_v41 }
  0xf1   : > { %1117 = vrot.lane.b32.xlu0 %v3473_v61, %s2917_s16 }
  0xf2   : > { %1103 = vrot.lane.b32.xlu2 %v3425_v47, %s2917_s16 }
  0xf3   : > { %v776_v53 = vpop.permute.xlu0 %775 }
  0xf4   : > { %842 = vst.msk [vmem:[#allocation3 + $0xf0] sm:$0xff] %vm811_vm3, %v776_v53  ;;  %v909_v22 = vpop.permute.xlu2 %908 }
  0xf5   : > { %1113 = vrot.lane.b32.xlu1 %v3438_v50, %s2917_s16  ;;  %1005 = vst.msk [vmem:[#allocation3] sm:$0xff] %vm1004_vm4, %v909_v22 }
  0xf7   : > { %v772_v44 = vpop.permute.xlu1 %771 }
  0xf8   : > { %840 = vst.msk [vmem:[#allocation3 + $0xe0] sm:$0xff] %vm811_vm3, %v772_v44 }
  0xf9   : > { %1123 = vrot.lane.b32.xlu0 %v3500_v8, %s2917_s16 }
  0xfa   : > { %1109 = vrot.lane.b32.xlu2 %v3413_v43, %s2917_s16 }
  0xfb   : > { %v911_v47 = vpop.permute.xlu0 %910 }
  0xfc   : > { %1006 = vst.msk [vmem:[#allocation3 + $0x8] sm:$0xff] %vm1004_vm4, %v911_v47  ;;  %v915_v61 = vpop.permute.xlu2 %914 }
  0xfd   : > { %1119 = vrot.lane.b32.xlu1 %v3462_v58, %s2917_s16  ;;  %1008 = vst.msk [vmem:[#allocation3 + $0x18] sm:$0xff] %vm1004_vm4, %v915_v61  ;;  %v2902_v58 = vld [vmem:[%s4554_s2] ss:$0 sm:$0xff] }
  0xfe   : > { %v342_v38 = vmul.f32 %v2902_v58, %v308_v10 }
  0xff   : > { %v778_v50 = vpop.permute.xlu1 %777 }
 0x100   : > { %843 = vst.msk [vmem:[#allocation3 + $0xf8] sm:$0xff] %vm811_vm3, %v778_v50  ;;  %v309_v50 = vld [vmem:[%s3008_s27 + $0xf8] sm:$0xff]  ;;  %s2918_s27 = smov 32  }
 0x101   : > { %1129 = vrot.lane.b32.xlu0 %v3527_v20, %s2917_s16 }
 0x102   : > { %1115 = vrot.lane.b32.xlu2 %v3431_v48, %s2917_s16  ;;  %v2903_v48 = vld [vmem:[%s4554_s2 + $0x1] ss:$0 sm:$0xff] }
 0x103   : > { %v917_v8 = vpop.permute.xlu0 %916  ;;  %v376_v20 = vadd.f32 %v2903_v48, %v342_v38 }
 0x104   : > { %1009 = vst.msk [vmem:[#allocation3 + $0x20] sm:$0xff] %vm1004_vm4, %v917_v8  ;;  %v921_v43 = vpop.permute.xlu2 %920 }
 0x105   : > { %1125 = vrot.lane.b32.xlu1 %v3488_v3, %s2917_s16  ;;  %1011 = vst.msk [vmem:[#allocation3 + $0x30] sm:$0xff] %vm1004_vm4, %v921_v43  ;;  %v2904_v3 = vld [vmem:[%s4555_s3] ss:$0 sm:$0xff]  ;;  %v343_v43 = vmul.f32 %v2902_v58, %v309_v50 }
 0x106   : > { %v409_v41 = vmul.f32 %v2904_v3, %v376_v20 }
 0x107   : > { %v913_v46 = vpop.permute.xlu1 %912 }
 0x108   : > { %1007 = vst.msk [vmem:[#allocation3 + $0x10] sm:$0xff] %vm1004_vm4, %v913_v46  ;;  %v441_v22 = vmax.f32 %v409_v41, 0.0  ;;  %v1231_v41 = vld [vmem:[#allocation2 + $0x21] sm:$0xff] }
 0x109   : > { %1135 = vrot.lane.b32.xlu0 %v3554_v30, %s2917_s16  ;;  %v2905_v30 = vld [vmem:[%s4555_s3 + $0x1] ss:$0 sm:$0xff] }
 0x10a   : > { %1121 = vrot.lane.b32.xlu2 %v3454_v54, %s2917_s16  ;;  %v474_v47 = vmul.f32 %v2905_v30, %v441_v22 }
 0x10b   : > { %v923_v53 = vpop.permute.xlu0 %922 }
 0x10c   : > { %1012 = vst.msk [vmem:[#allocation3 + $0x38] sm:$0xff] %vm1004_vm4, %v923_v53  ;;  %v927_v44 = vpop.permute.xlu2 %926 }
 0x10d   : > { %1131 = vrot.lane.b32.xlu1 %v3515_v16, %s2917_s16  ;;  %1014 = vst.msk [vmem:[#allocation3 + $0x48] sm:$0xff] %vm1004_vm4, %v927_v44 }
 0x10e   : > { %507 = vst.msk [vmem:[%s3112_s14 + $0xf0] sm:$0xff] %vm476_vm0, %v474_v47 }
 0x10f   : > { %v919_v61 = vpop.permute.xlu1 %918  ;;  %585 = vst.msk [vmem:[#allocation2 + $0x181] sm:$0xff] %vm476_vm0, %v474_v47 }
 0x110   : > { %1010 = vst.msk [vmem:[#allocation3 + $0x28] sm:$0xff] %vm1004_vm4, %v919_v61  ;;  %v3789_v61 = vld [vmem:[#allocation2 + $0x31] sm:$0xff] }
 0x111   : > { %1141 = vrot.lane.b32.xlu0 %v3581_v13, %s2917_s16  ;;  %v377_v13 = vadd.f32 %v2903_v48, %v343_v43 }
 0x112   : > { %1127 = vrot.lane.b32.xlu2 %v3479_v62, %s2917_s16 }
 0x113   : > { %v929_v54 = vpop.permute.xlu0 %928  ;;  %v410_v10 = vmul.f32 %v2904_v3, %v377_v13 }
 0x114   : > { %1015 = vst.msk [vmem:[#allocation3 + $0x50] sm:$0xff] %vm1004_vm4, %v929_v54  ;;  %v933_v16 = vpop.permute.xlu2 %932 }
 0x115   : > { %1137 = vrot.lane.b32.xlu1 %v3542_v24, %s2917_s16  ;;  %1017 = vst.msk [vmem:[#allocation3 + $0x60] sm:$0xff] %vm1004_vm4, %v933_v16  ;;  %v442_v58 = vmax.f32 %v410_v10, 0.0  ;;  %v3815_v10 = vld [vmem:[#allocation2 + $0x79] sm:$0xff] }
 0x117   : > { %v925_v8 = vpop.permute.xlu1 %924  ;;  %v475_v46 = vmul.f32 %v2905_v30, %v442_v58 }
 0x118   : > { %1013 = vst.msk [vmem:[#allocation3 + $0x40] sm:$0xff] %vm1004_vm4, %v925_v8  ;;  %v3802_v8 = vld [vmem:[#allocation2 + $0x51] sm:$0xff] }
 0x119   : > { %1147 = vrot.lane.b32.xlu0 %v3608_v0, %s2917_s16  ;;  %508 = vst.msk [vmem:[%s3112_s14 + $0xf8] sm:$0xff] %vm476_vm0, %v475_v46  ;;  %s4236_s14 = scalar_lea.vmem %s4557_s5, %s2996_s24  ;;  %s2815_s24 = sshll.u32 %s4590_s22, 1 }
 0x11a   : > { %1133 = vrot.lane.b32.xlu2 %v3506_v9, %s2917_s16  ;;  %586 = vst.msk [vmem:[#allocation2 + $0x189] sm:$0xff] %vm476_vm0, %v475_v46  ;;  %v3828_v46 = vld [vmem:[#allocation2 + $0x99] sm:$0xff] }
 0x11b   : > { %v935_v62 = vpop.permute.xlu0 %934 }
 0x11c   : > { %1018 = vst.msk [vmem:[#allocation3 + $0x68] sm:$0xff] %vm1004_vm4, %v935_v62  ;;  %v939_v24 = vpop.permute.xlu2 %938 }
 0x11d   : > { %1143 = vrot.lane.b32.xlu1 %v3569_v56, %s2917_s16  ;;  %1020 = vst.msk [vmem:[#allocation3 + $0x78] sm:$0xff] %vm1004_vm4, %v939_v24 }
 0x11f   : > { %v931_v38 = vpop.permute.xlu1 %930 }
 0x120   : > { %1016 = vst.msk [vmem:[#allocation3 + $0x58] sm:$0xff] %vm1004_vm4, %v931_v38 }
 0x121   : > { %1153 = vrot.lane.b32.xlu0 %v3633_v17, %s2917_s16  ;;  %v1068_v44 = vld [vmem:[#allocation2 + $0x188] sm:$0xff] }
 0x122   : > { %1139 = vrot.lane.b32.xlu2 %v3533_v2, %s2917_s16 }
 0x123   : > { %v941_v9 = vpop.permute.xlu0 %940 }
 0x124   : > { %1021 = vst.msk [vmem:[#allocation3 + $0x80] sm:$0xff] %vm1004_vm4, %v941_v9  ;;  %v945_v56 = vpop.permute.xlu2 %944 }
 0x125   : > { %1149 = vrot.lane.b32.xlu1 %v3596_v26, %s2917_s16  ;;  %1023 = vst.msk [vmem:[#allocation3 + $0x90] sm:$0xff] %vm1004_vm4, %v945_v56  ;;  %v1230_v26 = vld [vmem:[#allocation2 + $0x19] sm:$0xff] }
 0x127   : > { %v937_v0 = vpop.permute.xlu1 %936 }
 0x128   : > { %1019 = vst.msk [vmem:[#allocation3 + $0x70] sm:$0xff] %vm1004_vm4, %v937_v0 }
 0x129   : > { %1159 = vrot.lane.b32.xlu0 %v3649_v36, %s2917_s16  ;;  %v1067_v36 = vld [vmem:[#allocation2 + $0x180] sm:$0xff] }
 0x12a   : > { %1145 = vrot.lane.b32.xlu2 %v3560_v32, %s2917_s16 }
 0x12b   : > { %v947_v2 = vpop.permute.xlu0 %946 }
 0x12c   : > { %1024 = vst.msk [vmem:[#allocation3 + $0x98] sm:$0xff] %vm1004_vm4, %v947_v2  ;;  %v951_v48 = vpop.permute.xlu2 %950  ;;  %v3838_v2 = vld [vmem:[#allocation2 + $0xc1] sm:$0xff] }
 0x12d   : > { %1155 = vrot.lane.b32.xlu1 %v3623_v34, %s2917_s16  ;;  %1026 = vst.msk [vmem:[#allocation3 + $0xa8] sm:$0xff] %vm1004_vm4, %v951_v48 }
 0x12f   : > { %v943_v20 = vpop.permute.xlu1 %942 }
 0x130   : > { %1022 = vst.msk [vmem:[#allocation3 + $0x88] sm:$0xff] %vm1004_vm4, %v943_v20 }
 0x131   : > { %1294 = vrot.lane.b32.xlu0 %v1230_v26, %s2918_s27 }
 0x132   : > { %1151 = vrot.lane.b32.xlu2 %v3587_v15, %s2917_s16 }
 0x133   : > { %v953_v32 = vpop.permute.xlu0 %952 }
 0x134   : > { %1027 = vst.msk [vmem:[#allocation3 + $0xb0] sm:$0xff] %vm1004_vm4, %v953_v32  ;;  %v957_v3 = vpop.permute.xlu2 %956 }
 0x135   : > { %1161 = vrot.lane.b32.xlu1 %v1067_v36, %s2917_s16  ;;  %1029 = vst.msk [vmem:[#allocation3 + $0xc0] sm:$0xff] %vm1004_vm4, %v957_v3  ;;  %v1247_v36 = vld [vmem:[#allocation2 + $0xe1] sm:$0xff] }
 0x137   : > { %v949_v34 = vpop.permute.xlu1 %948 }
 0x138   : > { %1025 = vst.msk [vmem:[#allocation3 + $0xa0] sm:$0xff] %vm1004_vm4, %v949_v34 }
 0x139   : > { %1300 = vrot.lane.b32.xlu0 %v3236_v12, %s2918_s27  ;;  %v3782_v12 = vld [vmem:[#allocation2 + $0x49] sm:$0xff] }
 0x13a   : > { %1157 = vrot.lane.b32.xlu2 %v3614_v5, %s2917_s16 }
 0x13b   : > { %v959_v53 = vpop.permute.xlu0 %958 }
 0x13c   : > { %1030 = vst.msk [vmem:[#allocation3 + $0xc8] sm:$0xff] %vm1004_vm4, %v959_v53  ;;  %v963_v15 = vpop.permute.xlu2 %962 }
 0x13d   : > { %1296 = vrot.lane.b32.xlu1 %v1231_v41, %s2918_s27  ;;  %1032 = vst.msk [vmem:[#allocation3 + $0xd8] sm:$0xff] %vm1004_vm4, %v963_v15  ;;  %v3861_v41 = vld [vmem:[#allocation2 + $0x109] sm:$0xff] }
 0x13f   : > { %v955_v22 = vpop.permute.xlu1 %954 }
 0x140   : > { %1028 = vst.msk [vmem:[#allocation3 + $0xb8] sm:$0xff] %vm1004_vm4, %v955_v22  ;;  %v1260_v22 = vld [vmem:[#allocation2 + $0x181] sm:$0xff] }
 0x141   : > { %1306 = vrot.lane.b32.xlu0 %v3269_v35, %s2918_s27  ;;  %v3794_v35 = vld [vmem:[#allocation2 + $0x69] sm:$0xff] }
 0x142   : > { %1163 = vrot.lane.b32.xlu2 %v1068_v44, %s2917_s16 }
 0x143   : > { %v965_v5 = vpop.permute.xlu0 %964 }
 0x144   : > { %1033 = vst.msk [vmem:[#allocation3 + $0xe0] sm:$0xff] %vm1004_vm4, %v965_v5  ;;  %v969_v30 = vpop.permute.xlu2 %968  ;;  %v3871_v5 = vld [vmem:[#allocation2 + $0x129] sm:$0xff] }
 0x145   : > { %1302 = vrot.lane.b32.xlu1 %v3782_v12, %s2918_s27  ;;  %1035 = vst.msk [vmem:[#allocation3 + $0xf0] sm:$0xff] %vm1004_vm4, %v969_v30 }
 0x147   : > { %v961_v47 = vpop.permute.xlu1 %960 }
 0x148   : > { %1031 = vst.msk [vmem:[#allocation3 + $0xd0] sm:$0xff] %vm1004_vm4, %v961_v47 }
 0x149   : > { %1312 = vrot.lane.b32.xlu0 %v3302_v57, %s2918_s27  ;;  %v3807_v57 = vld [vmem:[#allocation2 + $0x91] sm:$0xff] }
 0x14a   : > { %1298 = vrot.lane.b32.xlu2 %v3789_v61, %s2918_s27 }
 0x14b   : > { %v971_v54 = vpop.permute.xlu0 %970 }
 0x14c   : > { %1036 = vst.msk [vmem:[#allocation3 + $0xf8] sm:$0xff] %vm1004_vm4, %v971_v54  ;;  %v1104_v16 = vpop.permute.xlu2 %1103  ;;  %v1261_v54 = vld [vmem:[#allocation2 + $0x189] sm:$0xff] }
 0x14d   : > { %1308 = vrot.lane.b32.xlu1 %v3794_v35, %s2918_s27  ;;  %1199 = vst.msk [vmem:[#allocation3 + $0x8] sm:$0xff] %vm1197_vm5, %v1104_v16 }
 0x14f   : > { %v967_v50 = vpop.permute.xlu1 %966 }
 0x150   : > { %1034 = vst.msk [vmem:[#allocation3 + $0xe8] sm:$0xff] %vm1004_vm4, %v967_v50 }
 0x151   : > { %1318 = vrot.lane.b32.xlu0 %v3330_v14, %s2918_s27  ;;  %v3820_v14 = vld [vmem:[#allocation2 + $0xb1] sm:$0xff] }
 0x152   : > { %1304 = vrot.lane.b32.xlu2 %v3802_v8, %s2918_s27 }
 0x153   : > { %v1106_v43 = vpop.permute.xlu0 %1105 }
 0x154   : > { %1200 = vst.msk [vmem:[#allocation3 + $0x10] sm:$0xff] %vm1197_vm5, %v1106_v43  ;;  %v1110_v13 = vpop.permute.xlu2 %1109 }
 0x155   : > { %1314 = vrot.lane.b32.xlu1 %v3807_v57, %s2918_s27  ;;  %1202 = vst.msk [vmem:[#allocation3 + $0x20] sm:$0xff] %vm1197_vm5, %v1110_v13 }
 0x157   : > { %v1102_v62 = vpop.permute.xlu1 %1101 }
 0x158   : > { %1198 = vst.msk [vmem:[#allocation3] sm:$0xff] %vm1197_vm5, %v1102_v62  ;;  %v4580_v62 = vld [vmem:[#allocation5_spill] sm:$0xff] }
 0x159   : > { %1324 = vrot.lane.b32.xlu0 %v3354_v23, %s2918_s27  ;;  %v1246_v23 = vld [vmem:[#allocation2 + $0xd9] sm:$0xff] }
 0x15a   : > { %1310 = vrot.lane.b32.xlu2 %v3815_v10, %s2918_s27 }
 0x15b   : > { %v1112_v24 = vpop.permute.xlu0 %1111 }
 0x15c   : > { %1203 = vst.msk [vmem:[#allocation3 + $0x28] sm:$0xff] %vm1197_vm5, %v1112_v24  ;;  %v1116_v58 = vpop.permute.xlu2 %1115 }
 0x15d   : > { %1320 = vrot.lane.b32.xlu1 %v3820_v14, %s2918_s27  ;;  %1205 = vst.msk [vmem:[#allocation3 + $0x38] sm:$0xff] %vm1197_vm5, %v1116_v58 }
 0x15f   : > { %v1108_v38 = vpop.permute.xlu1 %1107 }
 0x160   : > { %1201 = vst.msk [vmem:[#allocation3 + $0x18] sm:$0xff] %vm1197_vm5, %v1108_v38  ;;  %v4582_v38 = vld [vmem:[#allocation7_spill] sm:$0xff] }
 0x161   : > { %1330 = vrot.lane.b32.xlu0 %v3365_v27, %s2918_s27  ;;  %v3843_v27 = vld [vmem:[#allocation2 + $0xf9] sm:$0xff] }
 0x162   : > { %1316 = vrot.lane.b32.xlu2 %v3828_v46, %s2918_s27 }
 0x163   : > { %v1118_v9 = vpop.permute.xlu0 %1117 }
 0x164   : > { %1206 = vst.msk [vmem:[#allocation3 + $0x40] sm:$0xff] %vm1197_vm5, %v1118_v9  ;;  %v1122_v56 = vpop.permute.xlu2 %1121 }
 0x165   : > { %1326 = vrot.lane.b32.xlu1 %v1246_v23, %s2918_s27  ;;  %1208 = vst.msk [vmem:[#allocation3 + $0x50] sm:$0xff] %vm1197_vm5, %v1122_v56 }
 0x167   : > { %v1114_v0 = vpop.permute.xlu1 %1113 }
 0x168   : > { %1204 = vst.msk [vmem:[#allocation3 + $0x30] sm:$0xff] %vm1197_vm5, %v1114_v0  ;;  %v4584_v0 = vld [vmem:[#allocation9_spill] sm:$0xff] }
 0x169   : > { %1336 = vrot.lane.b32.xlu0 %v3373_v29, %s2918_s27  ;;  %v3854_v29 = vld [vmem:[#allocation2 + $0x121] sm:$0xff] }
 0x16a   : > { %1322 = vrot.lane.b32.xlu2 %v3838_v2, %s2918_s27 }
 0x16b   : > { %v1124_v48 = vpop.permute.xlu0 %1123 }
 0x16c   : > { %1209 = vst.msk [vmem:[#allocation3 + $0x58] sm:$0xff] %vm1197_vm5, %v1124_v48  ;;  %v1128_v26 = vpop.permute.xlu2 %1127 }
 0x16d   : > { %1332 = vrot.lane.b32.xlu1 %v3843_v27, %s2918_s27  ;;  %1211 = vst.msk [vmem:[#allocation3 + $0x68] sm:$0xff] %vm1197_vm5, %v1128_v26 }
 0x16f   : > { %v1120_v20 = vpop.permute.xlu1 %1119 }
 0x170   : > { %1207 = vst.msk [vmem:[#allocation3 + $0x48] sm:$0xff] %vm1197_vm5, %v1120_v20 }
 0x171   : > { %1342 = vrot.lane.b32.xlu0 %v3384_v33, %s2918_s27  ;;  %v1255_v33 = vld [vmem:[#allocation2 + $0x141] sm:$0xff] }
 0x172   : > { %1328 = vrot.lane.b32.xlu2 %v1247_v36, %s2918_s27  ;;  %v4586_v36 = vld [vmem:[#allocation11_spill] sm:$0xff] }
 0x173   : > { %v1130_v32 = vpop.permute.xlu0 %1129 }
 0x174   : > { %1212 = vst.msk [vmem:[#allocation3 + $0x70] sm:$0xff] %vm1197_vm5, %v1130_v32  ;;  %v1134_v3 = vpop.permute.xlu2 %1133  ;;  %v2003_v32 = vld [vmem:[#allocation2 + $0x32] sm:$0xff] }
 0x175   : > { %1338 = vrot.lane.b32.xlu1 %v3854_v29, %s2918_s27  ;;  %1214 = vst.msk [vmem:[#allocation3 + $0x80] sm:$0xff] %vm1197_vm5, %v1134_v3 }
 0x177   : > { %v1126_v34 = vpop.permute.xlu1 %1125 }
 0x178   : > { %1210 = vst.msk [vmem:[#allocation3 + $0x60] sm:$0xff] %vm1197_vm5, %v1126_v34  ;;  %v4587_v34 = vld [vmem:[#allocation12_spill] sm:$0xff] }
 0x179   : > { %1348 = vrot.lane.b32.xlu0 %v3401_v40, %s2918_s27 }
 0x17a   : > { %1334 = vrot.lane.b32.xlu2 %v3861_v41, %s2918_s27 }
 0x17b   : > { %v1136_v53 = vpop.permute.xlu0 %1135 }
 0x17c   : > { %1215 = vst.msk [vmem:[#allocation3 + $0x88] sm:$0xff] %vm1197_vm5, %v1136_v53  ;;  %v1140_v15 = vpop.permute.xlu2 %1139 }
 0x17d   : > { %1344 = vrot.lane.b32.xlu1 %v1255_v33, %s2918_s27  ;;  %1217 = vst.msk [vmem:[#allocation3 + $0x98] sm:$0xff] %vm1197_vm5, %v1140_v15  ;;  %v2004_v15 = vld [vmem:[#allocation2 + $0x3a] sm:$0xff] }
 0x17f   : > { %v1132_v44 = vpop.permute.xlu1 %1131 }
 0x180   : > { %1213 = vst.msk [vmem:[#allocation3 + $0x78] sm:$0xff] %vm1197_vm5, %v1132_v44  ;;  %v1618_v44 = vld [vmem:[#allocation2 + $0x38] sm:$0xff] }
 0x181   : > { %1354 = vrot.lane.b32.xlu0 %v1260_v22, %s2918_s27 }
 0x182   : > { %1340 = vrot.lane.b32.xlu2 %v3871_v5, %s2918_s27 }
 0x183   : > { %v1142_v40 = vpop.permute.xlu0 %1141 }
 0x184   : > { %1218 = vst.msk [vmem:[#allocation3 + $0xa0] sm:$0xff] %vm1197_vm5, %v1142_v40  ;;  %v1146_v30 = vpop.permute.xlu2 %1145  ;;  %v4588_v40 = vld [vmem:[#allocation13_spill] sm:$0xff] }
 0x185   : > { %1350 = vrot.lane.b32.xlu1 %v3371_v25, %s2918_s27  ;;  %1220 = vst.msk [vmem:[#allocation3 + $0xb0] sm:$0xff] %vm1197_vm5, %v1146_v30 }
 0x187   : > { %v1138_v47 = vpop.permute.xlu1 %1137 }
 0x188   : > { %1216 = vst.msk [vmem:[#allocation3 + $0x90] sm:$0xff] %vm1197_vm5, %v1138_v47 }
 0x189   : > { %1489 = vrot.lane.b32.xlu0 %v3446_v52, %s2919_s29 }
 0x18a   : > { %1346 = vrot.lane.b32.xlu2 %v3377_v31, %s2918_s27 }
 0x18b   : > { %v1148_v16 = vpop.permute.xlu0 %1147 }
 0x18c   : > { %1221 = vst.msk [vmem:[#allocation3 + $0xb8] sm:$0xff] %vm1197_vm5, %v1148_v16  ;;  %v1152_v50 = vpop.permute.xlu2 %1151  ;;  %v1619_v16 = vld [vmem:[#allocation2 + $0x48] sm:$0xff] }
 0x18d   : > { %1356 = vrot.lane.b32.xlu1 %v1261_v54, %s2918_s27  ;;  %1223 = vst.msk [vmem:[#allocation3 + $0xc8] sm:$0xff] %vm1197_vm5, %v1152_v50 }
 0x18f   : > { %v1144_v25 = vpop.permute.xlu1 %1143 }
 0x190   : > { %1219 = vst.msk [vmem:[#allocation3 + $0xa8] sm:$0xff] %vm1197_vm5, %v1144_v25 }
 0x191   : > { %1495 = vrot.lane.b32.xlu0 %v3471_v60, %s2919_s29 }
 0x192   : > { %1352 = vrot.lane.b32.xlu2 %v3388_v37, %s2918_s27 }
 0x193   : > { %v1154_v52 = vpop.permute.xlu0 %1153 }
 0x194   : > { %1224 = vst.msk [vmem:[#allocation3 + $0xd0] sm:$0xff] %vm1197_vm5, %v1154_v52  ;;  %v1158_v31 = vpop.permute.xlu2 %1157  ;;  %v2011_v52 = vld [vmem:[#allocation2 + $0x92] sm:$0xff] }
 0x195   : > { %1491 = vrot.lane.b32.xlu1 %v3399_v39, %s2919_s29  ;;  %1226 = vst.msk [vmem:[#allocation3 + $0xe0] sm:$0xff] %vm1197_vm5, %v1158_v31 }
 0x197   : > { %v1150_v43 = vpop.permute.xlu1 %1149 }
 0x198   : > { %1222 = vst.msk [vmem:[#allocation3 + $0xc0] sm:$0xff] %vm1197_vm5, %v1150_v43  ;;  %v1811_v43 = vld [vmem:[#allocation2 + $0x39] sm:$0xff] }
 0x199   : > { %1501 = vrot.lane.b32.xlu0 %v3497_v7, %s2919_s29 }
 0x19a   : > { %1487 = vrot.lane.b32.xlu2 %v3409_v42, %s2919_s29 }
 0x19b   : > { %v1160_v60 = vpop.permute.xlu0 %1159 }
 0x19c   : > { %1227 = vst.msk [vmem:[#allocation3 + $0xe8] sm:$0xff] %vm1197_vm5, %v1160_v60  ;;  %v1164_v37 = vpop.permute.xlu2 %1163 }
 0x19d   : > { %1497 = vrot.lane.b32.xlu1 %v3423_v45, %s2919_s29  ;;  %1229 = vst.msk [vmem:[#allocation3 + $0xf8] sm:$0xff] %vm1197_vm5, %v1164_v37  ;;  %v1625_v37 = vld [vmem:[#allocation2 + $0x90] sm:$0xff] }
 0x19f   : > { %v1156_v39 = vpop.permute.xlu1 %1155 }
 0x1a0   : > { %1225 = vst.msk [vmem:[#allocation3 + $0xd8] sm:$0xff] %vm1197_vm5, %v1156_v39  ;;  %v1620_v39 = vld [vmem:[#allocation2 + $0x50] sm:$0xff] }
 0x1a1   : > { %1507 = vrot.lane.b32.xlu0 %v3524_v19, %s2919_s29 }
 0x1a2   : > { %1493 = vrot.lane.b32.xlu2 %v3433_v49, %s2919_s29 }
 0x1a3   : > { %v1295_v42 = vpop.permute.xlu0 %1294 }
 0x1a4   : > { %1391 = vst.msk [vmem:[#allocation3] sm:$0xff] %vm1390_vm6, %v1295_v42  ;;  %v1299_v7 = vpop.permute.xlu2 %1298 }
 0x1a5   : > { %1503 = vrot.lane.b32.xlu1 %v3444_v51, %s2919_s29  ;;  %1393 = vst.msk [vmem:[#allocation3 + $0x10] sm:$0xff] %vm1390_vm6, %v1299_v7 }
 0x1a7   : > { %v1162_v45 = vpop.permute.xlu1 %1161 }
 0x1a8   : > { %1228 = vst.msk [vmem:[#allocation3 + $0xf0] sm:$0xff] %vm1197_vm5, %v1162_v45 }
 0x1a9   : > { %1513 = vrot.lane.b32.xlu0 %v3551_v28, %s2919_s29 }
 0x1aa   : > { %1499 = vrot.lane.b32.xlu2 %v3456_v55, %s2919_s29 }
 0x1ab   : > { %v1301_v19 = vpop.permute.xlu0 %1300 }
 0x1ac   : > { %1394 = vst.msk [vmem:[#allocation3 + $0x18] sm:$0xff] %vm1390_vm6, %v1301_v19  ;;  %v1305_v49 = vpop.permute.xlu2 %1304  ;;  %v2005_v19 = vld [vmem:[#allocation2 + $0x4a] sm:$0xff] }
 0x1ad   : > { %1509 = vrot.lane.b32.xlu1 %v3467_v59, %s2919_s29  ;;  %1396 = vst.msk [vmem:[#allocation3 + $0x28] sm:$0xff] %vm1390_vm6, %v1305_v49 }
 0x1af   : > { %v1297_v51 = vpop.permute.xlu1 %1296 }
 0x1b0   : > { %1392 = vst.msk [vmem:[#allocation3 + $0x8] sm:$0xff] %vm1390_vm6, %v1297_v51  ;;  %v2019_v51 = vld [vmem:[#allocation2 + $0xf2] sm:$0xff] }
 0x1b1   : > { %1519 = vrot.lane.b32.xlu0 %v3578_v6, %s2919_s29  ;;  %v4579_v6 = vld [vmem:[#allocation4_spill] sm:$0xff] }
 0x1b2   : > { %1505 = vrot.lane.b32.xlu2 %v3481_v63, %s2919_s29 }
 0x1b3   : > { %v1307_v28 = vpop.permute.xlu0 %1306 }
 0x1b4   : > { %1397 = vst.msk [vmem:[#allocation3 + $0x30] sm:$0xff] %vm1390_vm6, %v1307_v28  ;;  %v1311_v55 = vpop.permute.xlu2 %1310 }
 0x1b5   : > { %1515 = vrot.lane.b32.xlu1 %v3493_v4, %s2919_s29  ;;  %1399 = vst.msk [vmem:[#allocation3 + $0x40] sm:$0xff] %vm1390_vm6, %v1311_v55  ;;  %v1626_v55 = vld [vmem:[#allocation2 + $0x98] sm:$0xff] }
 0x1b7   : > { %v1303_v59 = vpop.permute.xlu1 %1302 }
 0x1b8   : > { %1395 = vst.msk [vmem:[#allocation3 + $0x20] sm:$0xff] %vm1390_vm6, %v1303_v59  ;;  %v2012_v59 = vld [vmem:[#allocation2 + $0x9a] sm:$0xff] }
 0x1b9   : > { %1525 = vrot.lane.b32.xlu0 %v3605_v1, %s2919_s29  ;;  %v4581_v1 = vld [vmem:[#allocation6_spill] sm:$0xff] }
 0x1ba   : > { %1511 = vrot.lane.b32.xlu2 %v4579_v6, %s2919_s29 }
 0x1bb   : > { %v1313_v13 = vpop.permute.xlu0 %1312 }
 0x1bc   : > { %1400 = vst.msk [vmem:[#allocation3 + $0x48] sm:$0xff] %vm1390_vm6, %v1313_v13  ;;  %v1317_v63 = vpop.permute.xlu2 %1316 }
 0x1bd   : > { %1521 = vrot.lane.b32.xlu1 %v4580_v62, %s2919_s29  ;;  %1402 = vst.msk [vmem:[#allocation3 + $0x58] sm:$0xff] %vm1390_vm6, %v1317_v63  ;;  %v1633_v62 = vld [vmem:[#allocation2 + $0xf0] sm:$0xff] }
 0x1bf   : > { %v1309_v4 = vpop.permute.xlu1 %1308 }
 0x1c0   : > { %1398 = vst.msk [vmem:[#allocation3 + $0x38] sm:$0xff] %vm1390_vm6, %v1309_v4  ;;  %v1621_v4 = vld [vmem:[#allocation2 + $0x60] sm:$0xff] }
 0x1c1   : > { %1531 = vrot.lane.b32.xlu0 %v3630_v21, %s2919_s29  ;;  %v4583_v21 = vld [vmem:[#allocation8_spill] sm:$0xff] }
 0x1c2   : > { %1517 = vrot.lane.b32.xlu2 %v4581_v1, %s2919_s29 }
 0x1c3   : > { %v1319_v24 = vpop.permute.xlu0 %1318 }
 0x1c4   : > { %1403 = vst.msk [vmem:[#allocation3 + $0x60] sm:$0xff] %vm1390_vm6, %v1319_v24  ;;  %v1323_v58 = vpop.permute.xlu2 %1322 }
 0x1c5   : > { %1527 = vrot.lane.b32.xlu1 %v4582_v38, %s2919_s29  ;;  %1405 = vst.msk [vmem:[#allocation3 + $0x70] sm:$0xff] %vm1390_vm6, %v1323_v58  ;;  %v2007_v58 = vld [vmem:[#allocation2 + $0x62] sm:$0xff] }
 0x1c7   : > { %v1315_v23 = vpop.permute.xlu1 %1314 }
 0x1c8   : > { %1401 = vst.msk [vmem:[#allocation3 + $0x50] sm:$0xff] %vm1390_vm6, %v1315_v23  ;;  %v1826_v23 = vld [vmem:[#allocation2 + $0xf1] sm:$0xff] }
 0x1c9   : > { %1537 = vrot.lane.b32.xlu0 %v3646_v11, %s2919_s29  ;;  %v4585_v11 = vld [vmem:[#allocation10_spill] sm:$0xff] }
 0x1ca   : > { %1523 = vrot.lane.b32.xlu2 %v4583_v21, %s2919_s29  ;;  %v1820_v21 = vld [vmem:[#allocation2 + $0xa9] sm:$0xff] }
 0x1cb   : > { %v1325_v9 = vpop.permute.xlu0 %1324 }
 0x1cc   : > { %1406 = vst.msk [vmem:[#allocation3 + $0x78] sm:$0xff] %vm1390_vm6, %v1325_v9  ;;  %v1329_v56 = vpop.permute.xlu2 %1328 }
 0x1cd   : > { %1533 = vrot.lane.b32.xlu1 %v4584_v0, %s2919_s29  ;;  %1408 = vst.msk [vmem:[#allocation3 + $0x88] sm:$0xff] %vm1390_vm6, %v1329_v56  ;;  %v2020_v0 = vld [vmem:[#allocation2 + $0xfa] sm:$0xff] }
 0x1cf   : > { %v1321_v48 = vpop.permute.xlu1 %1320 }
 0x1d0   : > { %1404 = vst.msk [vmem:[#allocation3 + $0x68] sm:$0xff] %vm1390_vm6, %v1321_v48 }
 0x1d1   : > { %1543 = vrot.lane.b32.xlu0 %v3661_v18, %s2919_s29  ;;  %v1617_v18 = vld [vmem:[#allocation2 + $0x30] sm:$0xff] }
 0x1d2   : > { %1529 = vrot.lane.b32.xlu2 %v4585_v11, %s2919_s29  ;;  %v1627_v11 = vld [vmem:[#allocation2 + $0xa8] sm:$0xff] }
 0x1d3   : > { %v1331_v26 = vpop.permute.xlu0 %1330 }
 0x1d4   : > { %1409 = vst.msk [vmem:[#allocation3 + $0x90] sm:$0xff] %vm1390_vm6, %v1331_v26  ;;  %v1335_v20 = vpop.permute.xlu2 %1334  ;;  %v2013_v26 = vld [vmem:[#allocation2 + $0xaa] sm:$0xff] }
 0x1d5   : > { %1539 = vrot.lane.b32.xlu1 %v4586_v36, %s2919_s29  ;;  %1411 = vst.msk [vmem:[#allocation3 + $0xa0] sm:$0xff] %vm1390_vm6, %v1335_v20 }
 0x1d7   : > { %v1327_v3 = vpop.permute.xlu1 %1326 }
 0x1d8   : > { %1407 = vst.msk [vmem:[#allocation3 + $0x80] sm:$0xff] %vm1390_vm6, %v1327_v3  ;;  %v1634_v3 = vld [vmem:[#allocation2 + $0xf8] sm:$0xff] }
 0x1d9   : > { %2067 = vrot.lane.b32.xlu0 %v2003_v32, %s2920_s30 }
 0x1da   : > { %1535 = vrot.lane.b32.xlu2 %v4587_v34, %s2919_s29  ;;  %v1622_v34 = vld [vmem:[#allocation2 + $0x68] sm:$0xff] }
 0x1db   : > { %v1337_v33 = vpop.permute.xlu0 %1336 }
 0x1dc   : > { %1412 = vst.msk [vmem:[#allocation3 + $0xa8] sm:$0xff] %vm1390_vm6, %v1337_v33  ;;  %v1341_v53 = vpop.permute.xlu2 %1340 }
 0x1dd   : > { %1681 = vrot.lane.b32.xlu1 %v1617_v18, %s2921_s7  ;;  %1414 = vst.msk [vmem:[#allocation3 + $0xb8] sm:$0xff] %vm1390_vm6, %v1341_v53  ;;  %v2236_v18 = vld [vmem:[%s4553_s1 + $0x40] sm:$0xff]  ;;  %v2235_v53 = vld [vmem:[%s4553_s1 + $0x38] sm:$0xff] }
 0x1de   : > { %2341 = vmatpush.msra.mxu0 %v2236_v18  ;;  %2853 = vmatpush.msra.mxu1 %v2236_v18 }
 0x1df   : > { %v1333_v22 = vpop.permute.xlu1 %1332  ;;  %2854 = vmatpush.msra.mxu2 %v2236_v18  ;;  %2855 = vmatpush.msra.mxu3 %v2236_v18 }
 0x1e0   : > { %1410 = vst.msk [vmem:[#allocation3 + $0x98] sm:$0xff] %vm1390_vm6, %v1333_v22  ;;  %2342 = vmatpush.msra.mxu0 %v2235_v53  ;;  %2856 = vmatpush.msra.mxu1 %v2235_v53 }
 0x1e1   : > { %2069 = vrot.lane.b32.xlu0 %v2004_v15, %s2920_s30  ;;  %v2234_v15 = vld [vmem:[%s4553_s1 + $0x30] sm:$0xff]  ;;  %2857 = vmatpush.msra.mxu2 %v2235_v53 }
 0x1e2   : > { %1541 = vrot.lane.b32.xlu2 %v4588_v40, %s2919_s29  ;;  %2343 = vmatpush.msra.mxu0 %v2234_v15  ;;  %v2232_v40 = vld [vmem:[%s4553_s1 + $0x20] sm:$0xff] }
 0x1e3   : > { %v1343_v30 = vpop.permute.xlu0 %1342  ;;  %2859 = vmatpush.msra.mxu1 %v2234_v15  ;;  %2860 = vmatpush.msra.mxu2 %v2234_v15 }
 0x1e4   : > { %1415 = vst.msk [vmem:[#allocation3 + $0xc0] sm:$0xff] %vm1390_vm6, %v1343_v30  ;;  %v1347_v47 = vpop.permute.xlu2 %1346  ;;  %2858 = vmatpush.msra.mxu3 %v2235_v53  ;;  %v1630_v53 = vld [vmem:[#allocation2 + $0xc8] sm:$0xff] }
 0x1e5   : > { %1683 = vrot.lane.b32.xlu1 %v1618_v44, %s2921_s7  ;;  %1417 = vst.msk [vmem:[#allocation3 + $0xd0] sm:$0xff] %vm1390_vm6, %v1347_v47  ;;  %v2231_v47 = vld [vmem:[%s4553_s1 + $0x18] sm:$0xff] }
 0x1e6   : > { %2861 = vmatpush.msra.mxu3 %v2234_v15  ;;  %v2010_v15 = vld [vmem:[#allocation2 + $0x82] sm:$0xff] }
 0x1e7   : > { %v1339_v54 = vpop.permute.xlu1 %1338 }
 0x1e8   : > { %1413 = vst.msk [vmem:[#allocation3 + $0xb0] sm:$0xff] %vm1390_vm6, %v1339_v54 }
 0x1e9   : > { %1878 = vrot.lane.b32.xlu0 %v3782_v12, %s2922_s8 }
 0x1ea   : > { %1874 = vrot.lane.b32.xlu2 %v3789_v61, %s2922_s8 }
 0x1eb   : > { %v1349_v50 = vpop.permute.xlu0 %1348 }
 0x1ec   : > { %1418 = vst.msk [vmem:[#allocation3 + $0xd8] sm:$0xff] %vm1390_vm6, %v1349_v50  ;;  %v1353_v25 = vpop.permute.xlu2 %1352  ;;  %v1628_v50 = vld [vmem:[#allocation2 + $0xb0] sm:$0xff] }
 0x1ed   : > { %1685 = vrot.lane.b32.xlu1 %v1619_v16, %s2921_s7  ;;  %1420 = vst.msk [vmem:[#allocation3 + $0xe8] sm:$0xff] %vm1390_vm6, %v1353_v25  ;;  %v2228_v25 = vld [vmem:[%s4553_s1] sm:$0xff] }
 0x1ef   : > { %v1345_v31 = vpop.permute.xlu1 %1344 }
 0x1f0   : > { %1416 = vst.msk [vmem:[#allocation3 + $0xc8] sm:$0xff] %vm1390_vm6, %v1345_v31 }
 0x1f1   : > { %2083 = vrot.lane.b32.xlu0 %v2011_v52, %s2920_s30 }
 0x1f2   : > { %1876 = vrot.lane.b32.xlu2 %v1811_v43, %s2922_s8 }
 0x1f3   : > { %v1355_v12 = vpop.permute.xlu0 %1354 }
 0x1f4   : > { %1421 = vst.msk [vmem:[#allocation3 + $0xf0] sm:$0xff] %vm1390_vm6, %v1355_v12  ;;  %v1488_v61 = vpop.permute.xlu2 %1487  ;;  %v1635_v12 = vld [vmem:[#allocation2 + $0x108] sm:$0xff] }
 0x1f5   : > { %1890 = vrot.lane.b32.xlu1 %v3807_v57, %s2922_s8  ;;  %1584 = vst.msk [vmem:[#allocation3] sm:$0xff] %vm1583_vm7, %v1488_v61  ;;  %v2006_v57 = vld [vmem:[#allocation2 + $0x52] sm:$0xff] }
 0x1f6   : > { %v1834_v61 = vld [vmem:[#allocation2 + $0x151] sm:$0xff] }
 0x1f7   : > { %v1351_v60 = vpop.permute.xlu1 %1350 }
 0x1f8   : > { %1419 = vst.msk [vmem:[#allocation3 + $0xe0] sm:$0xff] %vm1390_vm6, %v1351_v60 }
 0x1f9   : > { %1880 = vrot.lane.b32.xlu0 %v3802_v8, %s2922_s8 }
 0x1fa   : > { %1697 = vrot.lane.b32.xlu2 %v1625_v37, %s2921_s7 }
 0x1fb   : > { %v1490_v42 = vpop.permute.xlu0 %1489 }
 0x1fc   : > { %1585 = vst.msk [vmem:[#allocation3 + $0x8] sm:$0xff] %vm1583_vm7, %v1490_v42  ;;  %v1494_v7 = vpop.permute.xlu2 %1493  ;;  %v2014_v42 = vld [vmem:[#allocation2 + $0xb2] sm:$0xff] }
 0x1fd   : > { %1687 = vrot.lane.b32.xlu1 %v1620_v39, %s2921_s7  ;;  %1587 = vst.msk [vmem:[#allocation3 + $0x18] sm:$0xff] %vm1583_vm7, %v1494_v7  ;;  %v1623_v7 = vld [vmem:[#allocation2 + $0x78] sm:$0xff] }
 0x1ff   : > { %v1357_v45 = vpop.permute.xlu1 %1356 }
 0x200   : > { %1422 = vst.msk [vmem:[#allocation3 + $0xf8] sm:$0xff] %vm1390_vm6, %v1357_v45 }
 0x201   : > { %2073 = vrot.lane.b32.xlu0 %v2006_v57, %s2920_s30 }
 0x202   : > { %2071 = vrot.lane.b32.xlu2 %v2005_v19, %s2920_s30  ;;  %v1642_v19 = vld [vmem:[#allocation2 + $0x158] sm:$0xff] }
 0x203   : > { %v1496_v8 = vpop.permute.xlu0 %1495 }
 0x204   : > { %1588 = vst.msk [vmem:[#allocation3 + $0x20] sm:$0xff] %vm1583_vm7, %v1496_v8  ;;  %v1500_v49 = vpop.permute.xlu2 %1499 }
 0x205   : > { %1892 = vrot.lane.b32.xlu1 %v3828_v46, %s2922_s8  ;;  %1590 = vst.msk [vmem:[#allocation3 + $0x30] sm:$0xff] %vm1583_vm7, %v1500_v49  ;;  %v1814_v46 = vld [vmem:[#allocation2 + $0x61] sm:$0xff]  ;;  %v2021_v49 = vld [vmem:[#allocation2 + $0x10a] sm:$0xff] }
 0x207   : > { %v1492_v28 = vpop.permute.xlu1 %1491 }
 0x208   : > { %1586 = vst.msk [vmem:[#allocation3 + $0x10] sm:$0xff] %vm1583_vm7, %v1492_v28  ;;  %v1829_v28 = vld [vmem:[#allocation2 + $0x111] sm:$0xff] }
 0x209   : > { %2099 = vrot.lane.b32.xlu0 %v2019_v51, %s2920_s30 }
 0x20a   : > { %1699 = vrot.lane.b32.xlu2 %v1626_v55, %s2921_s7 }
 0x20b   : > { %v1502_v6 = vpop.permute.xlu0 %1501 }
 0x20c   : > { %1591 = vst.msk [vmem:[#allocation3 + $0x38] sm:$0xff] %vm1583_vm7, %v1502_v6  ;;  %v1506_v13 = vpop.permute.xlu2 %1505 }
 0x20d   : > { %2085 = vrot.lane.b32.xlu1 %v2012_v59, %s2920_s30  ;;  %1593 = vst.msk [vmem:[#allocation3 + $0x48] sm:$0xff] %vm1583_vm7, %v1506_v13  ;;  %v1629_v59 = vld [vmem:[#allocation2 + $0xc0] sm:$0xff] }
 0x20e   : > { %v2009_v13 = vld [vmem:[#allocation2 + $0x7a] sm:$0xff] }
 0x20f   : > { %v1498_v63 = vpop.permute.xlu1 %1497 }
 0x210   : > { %1589 = vst.msk [vmem:[#allocation3 + $0x28] sm:$0xff] %vm1583_vm7, %v1498_v63  ;;  %v2028_v63 = vld [vmem:[#allocation2 + $0x15a] sm:$0xff] }
 0x211   : > { %1882 = vrot.lane.b32.xlu0 %v1814_v46, %s2922_s8 }
 0x212   : > { %1713 = vrot.lane.b32.xlu2 %v1633_v62, %s2921_s7 }
 0x213   : > { %v1508_v1 = vpop.permute.xlu0 %1507 }
 0x214   : > { %1594 = vst.msk [vmem:[#allocation3 + $0x50] sm:$0xff] %vm1583_vm7, %v1508_v1  ;;  %v1512_v24 = vpop.permute.xlu2 %1511 }
 0x215   : > { %1689 = vrot.lane.b32.xlu1 %v1621_v4, %s2921_s7  ;;  %1596 = vst.msk [vmem:[#allocation3 + $0x60] sm:$0xff] %vm1583_vm7, %v1512_v24  ;;  %v1636_v4 = vld [vmem:[#allocation2 + $0x110] sm:$0xff]  ;;  %v1835_v24 = vld [vmem:[#allocation2 + $0x159] sm:$0xff] }
 0x217   : > { %v1504_v38 = vpop.permute.xlu1 %1503 }
 0x218   : > { %1592 = vst.msk [vmem:[#allocation3 + $0x40] sm:$0xff] %vm1583_vm7, %v1504_v38 }
 0x219   : > { %2075 = vrot.lane.b32.xlu0 %v2007_v58, %s2920_s30 }
 0x21a   : > { %1906 = vrot.lane.b32.xlu2 %v1826_v23, %s2922_s8  ;;  %v1817_v23 = vld [vmem:[#allocation2 + $0x81] sm:$0xff] }
 0x21b   : > { %v1514_v9 = vpop.permute.xlu0 %1513 }
 0x21c   : > { %1597 = vst.msk [vmem:[#allocation3 + $0x68] sm:$0xff] %vm1583_vm7, %v1514_v9  ;;  %v1518_v56 = vpop.permute.xlu2 %1517  ;;  %v2015_v9 = vld [vmem:[#allocation2 + $0xc2] sm:$0xff] }
 0x21d   : > { %1894 = vrot.lane.b32.xlu1 %v1820_v21, %s2922_s8  ;;  %1599 = vst.msk [vmem:[#allocation3 + $0x78] sm:$0xff] %vm1583_vm7, %v1518_v56 }
 0x21f   : > { %v1510_v48 = vpop.permute.xlu1 %1509 }
 0x220   : > { %1595 = vst.msk [vmem:[#allocation3 + $0x58] sm:$0xff] %vm1583_vm7, %v1510_v48 }
 0x221   : > { %2101 = vrot.lane.b32.xlu0 %v2020_v0, %s2920_s30  ;;  %v1624_v0 = vld [vmem:[#allocation2 + $0x80] sm:$0xff] }
 0x222   : > { %1701 = vrot.lane.b32.xlu2 %v1627_v11, %s2921_s7 }
 0x223   : > { %v1520_v20 = vpop.permute.xlu0 %1519 }
 0x224   : > { %1600 = vst.msk [vmem:[#allocation3 + $0x80] sm:$0xff] %vm1583_vm7, %v1520_v20  ;;  %v1524_v36 = vpop.permute.xlu2 %1523 }
 0x225   : > { %2087 = vrot.lane.b32.xlu1 %v2013_v26, %s2920_s30  ;;  %1602 = vst.msk [vmem:[#allocation3 + $0x90] sm:$0xff] %vm1583_vm7, %v1524_v36  ;;  %v1643_v26 = vld [vmem:[#allocation2 + $0x168] sm:$0xff]  ;;  %v2022_v36 = vld [vmem:[#allocation2 + $0x112] sm:$0xff] }
 0x227   : > { %v1516_v32 = vpop.permute.xlu1 %1515 }
 0x228   : > { %1598 = vst.msk [vmem:[#allocation3 + $0x70] sm:$0xff] %vm1583_vm7, %v1516_v32 }
 0x229   : > { %1884 = vrot.lane.b32.xlu0 %v3794_v35, %s2922_s8  ;;  %v2233_v35 = vld [vmem:[%s4553_s1 + $0x28] sm:$0xff] }
 0x22a   : > { %1715 = vrot.lane.b32.xlu2 %v1634_v3, %s2921_s7  ;;  %2344 = vmatpush.msra.mxu0 %v2233_v35  ;;  %v1823_v3 = vld [vmem:[#allocation2 + $0xc9] sm:$0xff] }
 0x22b   : > { %v1526_v33 = vpop.permute.xlu0 %1525  ;;  %2862 = vmatpush.msra.mxu1 %v2233_v35  ;;  %2863 = vmatpush.msra.mxu2 %v2233_v35 }
 0x22c   : > { %1603 = vst.msk [vmem:[#allocation3 + $0x98] sm:$0xff] %vm1583_vm7, %v1526_v33  ;;  %v1530_v22 = vpop.permute.xlu2 %1529  ;;  %2345 = vmatpush.msra.mxu0 %v2232_v40  ;;  %2864 = vmatpush.msra.mxu3 %v2233_v35 }
 0x22d   : > { %1691 = vrot.lane.b32.xlu1 %v1622_v34, %s2921_s7  ;;  %1605 = vst.msk [vmem:[#allocation3 + $0xa8] sm:$0xff] %vm1583_vm7, %v1530_v22  ;;  %2865 = vmatpush.msra.mxu1 %v2232_v40 }
 0x22e   : > { %2866 = vmatpush.msra.mxu2 %v2232_v40  ;;  %2346 = vmatpush.msra.mxu0 %v2231_v47 }
 0x22f   : > { %v1522_v44 = vpop.permute.xlu1 %1521  ;;  %2868 = vmatpush.msra.mxu1 %v2231_v47  ;;  %2867 = vmatpush.msra.mxu3 %v2232_v40  ;;  %v2029_v40 = vld [vmem:[#allocation2 + $0x16a] sm:$0xff] }
 0x230   : > { %1601 = vst.msk [vmem:[#allocation3 + $0x88] sm:$0xff] %vm1583_vm7, %v1522_v44  ;;  %2869 = vmatpush.msra.mxu2 %v2231_v47 }
 0x231   : > { %1729 = vrot.lane.b32.xlu0 %v3633_v17, %s2921_s7  ;;  %v2230_v17 = vld [vmem:[%s4553_s1 + $0x10] sm:$0xff]  ;;  %2870 = vmatpush.msra.mxu3 %v2231_v47  ;;  %v1637_v47 = vld [vmem:[#allocation2 + $0x120] sm:$0xff] }
 0x232   : > { %1908 = vrot.lane.b32.xlu2 %v3843_v27, %s2922_s8  ;;  %v2229_v27 = vld [vmem:[%s4553_s1 + $0x8] sm:$0xff]  ;;  %2347 = vmatpush.msra.mxu0 %v2230_v17 }
 0x233   : > { %v1532_v30 = vpop.permute.xlu0 %1531  ;;  %2871 = vmatpush.msra.mxu1 %v2230_v17  ;;  %2872 = vmatpush.msra.mxu2 %v2230_v17 }
 0x234   : > { %1606 = vst.msk [vmem:[#allocation3 + $0xb0] sm:$0xff] %vm1583_vm7, %v1532_v30  ;;  %v1536_v54 = vpop.permute.xlu2 %1535  ;;  %2348 = vmatpush.msra.mxu0 %v2229_v27  ;;  %2873 = vmatpush.msra.mxu3 %v2230_v17 }
 0x235   : > { %1896 = vrot.lane.b32.xlu1 %v3820_v14, %s2922_s8  ;;  %1608 = vst.msk [vmem:[#allocation3 + $0xc0] sm:$0xff] %vm1583_vm7, %v1536_v54  ;;  %v2008_v14 = vld [vmem:[#allocation2 + $0x6a] sm:$0xff]  ;;  %2874 = vmatpush.msra.mxu1 %v2229_v27 }
 0x236   : > { %2349 = vmatpush.msra.mxu0 %v2228_v25  ;;  %2875 = vmatpush.msra.mxu2 %v2229_v27 }
 0x237   : > { %v1528_v16 = vpop.permute.xlu1 %1527  ;;  %2877 = vmatpush.msra.mxu1 %v2228_v25  ;;  %2876 = vmatpush.msra.mxu3 %v2229_v27 }
 0x238   : > { %1604 = vst.msk [vmem:[#allocation3 + $0xa0] sm:$0xff] %vm1583_vm7, %v1528_v16  ;;  %2878 = vmatpush.msra.mxu2 %v2228_v25  ;;  %v1638_v16 = vld [vmem:[#allocation2 + $0x128] sm:$0xff] }
 0x239   : > { %1910 = vrot.lane.b32.xlu0 %v3861_v41, %s2922_s8  ;;  %v2027_v41 = vld [vmem:[#allocation2 + $0x152] sm:$0xff]  ;;  %2879 = vmatpush.msra.mxu3 %v2228_v25  ;;  %v2016_v25 = vld [vmem:[#allocation2 + $0xca] sm:$0xff] }
 0x23a   : > { %1703 = vrot.lane.b32.xlu2 %v1628_v50, %s2921_s7 }
 0x23b   : > { %v1538_v52 = vpop.permute.xlu0 %1537 }
 0x23c   : > { %1609 = vst.msk [vmem:[#allocation3 + $0xc8] sm:$0xff] %vm1583_vm7, %v1538_v52  ;;  %v1542_v31 = vpop.permute.xlu2 %1541  ;;  %v1631_v52 = vld [vmem:[#allocation2 + $0xd8] sm:$0xff] }
 0x23d   : > { %2077 = vrot.lane.b32.xlu1 %v2008_v14, %s2920_s30  ;;  %1611 = vst.msk [vmem:[#allocation3 + $0xd8] sm:$0xff] %vm1583_vm7, %v1542_v31 }
 0x23f   : > { %v1534_v43 = vpop.permute.xlu1 %1533 }
 0x240   : > { %1607 = vst.msk [vmem:[#allocation3 + $0xb8] sm:$0xff] %vm1583_vm7, %v1534_v43 }
 0x241   : > { %2115 = vrot.lane.b32.xlu0 %v2027_v41, %s2920_s30 }
 0x242   : > { %1717 = vrot.lane.b32.xlu2 %v1635_v12, %s2921_s7  ;;  %v2023_v12 = vld [vmem:[#allocation2 + $0x122] sm:$0xff] }
 0x243   : > { %v1544_v60 = vpop.permute.xlu0 %1543 }
 0x244   : > { %1612 = vst.msk [vmem:[#allocation3 + $0xe0] sm:$0xff] %vm1583_vm7, %v1544_v60  ;;  %v1875_v37 = vpop.permute.xlu2 %1874 }
 0x245   : > { %1922 = vrot.lane.b32.xlu1 %v1834_v61, %s2922_s8  ;;  %v1644_v61 = vld [vmem:[#allocation2 + $0x170] sm:$0xff] }
 0x247   : > { %v1540_v39 = vpop.permute.xlu1 %1539 }
 0x248   : > { %1610 = vst.msk [vmem:[#allocation3 + $0xd0] sm:$0xff] %vm1583_vm7, %v1540_v39 }
 0x249   : > { %1886 = vrot.lane.b32.xlu0 %v3815_v10, %s2922_s8 }
 0x24a   : > { %2089 = vrot.lane.b32.xlu2 %v2014_v42, %s2920_s30  ;;  %v4165_v42 = vld [vmem:[#allocation2 + $0x172] sm:$0xff] }
 0x24b   : > { %v2068_v57 = vpop.permute.xlu0 %2067 }
 0x24c   : > { %v1877_v45 = vpop.permute.xlu2 %1876 }
 0x24d   : > { %1693 = vrot.lane.b32.xlu1 %v1623_v7, %s2921_s7 }
 0x24f   : > { %v1682_v8 = vpop.permute.xlu1 %1681 }
 0x250   : > { %1778 = vst.msk [vmem:[#allocation3] sm:$0xff] %vm1777_vm8, %v1682_v8 }
 0x251   : > { %1971 = vst.msk [vmem:[#allocation3] sm:$0xff] %vm1970_vm9, %v1875_v37  ;;  %1731 = vrot.lane.b32.xlu0 %v1642_v19, %s2921_s7 }
 0x252   : > { %2164 = vst.msk [vmem:[#allocation3] sm:$0xff] %vm2163_vm10, %v2068_v57  ;;  %2103 = vrot.lane.b32.xlu2 %v2021_v49, %s2920_s30  ;;  %v1824_v57 = vld [vmem:[#allocation2 + $0xd9] sm:$0xff] }
 0x253   : > { %v2070_v10 = vpop.permute.xlu0 %2069  ;;  %v1639_v49 = vld [vmem:[#allocation2 + $0x138] sm:$0xff] }
 0x254   : > { %v1698_v51 = vpop.permute.xlu2 %1697 }
 0x255   : > { %1898 = vrot.lane.b32.xlu1 %v3838_v2, %s2922_s8  ;;  %1786 = vst.msk [vmem:[#allocation3 + $0x40] sm:$0xff] %vm1777_vm8, %v1698_v51 }
 0x257   : > { %v1684_v55 = vpop.permute.xlu1 %1683 }
 0x258   : > { %1779 = vst.msk [vmem:[#allocation3 + $0x8] sm:$0xff] %vm1777_vm8, %v1684_v55  ;;  %v1632_v55 = vld [vmem:[#allocation2 + $0xe0] sm:$0xff] }
 0x259   : > { %1972 = vst.msk [vmem:[#allocation3 + $0x8] sm:$0xff] %vm1970_vm9, %v1877_v45  ;;  %v2196_v6 = vld [vmem:[#allocation3] sm:$0xff]  ;;  %1912 = vrot.lane.b32.xlu0 %v1829_v28, %s2922_s8  ;;  %v2017_v28 = vld [vmem:[#allocation2 + $0xda] sm:$0xff] }
 0x25a   : > { %2165 = vst.msk [vmem:[#allocation3 + $0x8] sm:$0xff] %vm2163_vm10, %v2070_v10  ;;  %2816 = vmatmul.msk.f32.vlgmr.msra.gmra.mxu0 %vm2237_vm11, %v2196_v6  ;;  %1705 = vrot.lane.b32.xlu2 %v1629_v59, %s2921_s7 }
 0x25b   : > { %v1879_v2 = vpop.permute.xlu0 %1878 }
 0x25c   : > { %v2072_v46 = vpop.permute.xlu2 %2071 }
 0x25d   : > { %2079 = vrot.lane.b32.xlu1 %v2009_v13, %s2920_s30  ;;  %v1832_v13 = vld [vmem:[#allocation2 + $0x139] sm:$0xff] }
 0x25f   : > { %v1686_v62 = vpop.permute.xlu1 %1685 }
 0x260   : > { %1780 = vst.msk [vmem:[#allocation3 + $0x10] sm:$0xff] %vm1777_vm8, %v1686_v62 }
 0x261   : > { %1973 = vst.msk [vmem:[#allocation3 + $0x10] sm:$0xff] %vm1970_vm9, %v1879_v2  ;;  %v2197_v1 = vld [vmem:[#allocation3 + $0x8] sm:$0xff]  ;;  %2117 = vrot.lane.b32.xlu0 %v2028_v63, %s2920_s30  ;;  %v1645_v63 = vld [vmem:[#allocation2 + $0x180] sm:$0xff] }
 0x262   : > { %2166 = vst.msk [vmem:[#allocation3 + $0x10] sm:$0xff] %vm2163_vm10, %v2072_v46  ;;  %2817 = vmatmul.msk.f32.gmra.mxu0 %vm2237_vm11, %v2197_v1  ;;  %1719 = vrot.lane.b32.xlu2 %v1636_v4, %s2921_s7  ;;  %v2024_v46 = vld [vmem:[#allocation2 + $0x12a] sm:$0xff]  ;;  %v4188_v1 = vld [vmem:[#allocation2 + $0x182] sm:$0xff] }
 0x263   : > { %v2084_v58 = vpop.permute.xlu0 %2083 }
 0x264   : > { %v1700_v38 = vpop.permute.xlu2 %1699 }
 0x265   : > { %1924 = vrot.lane.b32.xlu1 %v1835_v24, %s2922_s8  ;;  %1787 = vst.msk [vmem:[#allocation3 + $0x48] sm:$0xff] %vm1777_vm8, %v1700_v38 }
 0x267   : > { %v1891_v21 = vpop.permute.xlu1 %1890 }
 0x268   : > { %1979 = vst.msk [vmem:[#allocation3 + $0x40] sm:$0xff] %vm1970_vm9, %v1891_v21 }
 0x269   : > { %2172 = vst.msk [vmem:[#allocation3 + $0x40] sm:$0xff] %vm2163_vm10, %v2084_v58  ;;  %v2198_v56 = vld [vmem:[#allocation3 + $0x10] sm:$0xff]  ;;  %1888 = vrot.lane.b32.xlu0 %v1817_v23, %s2922_s8 }
 0x26a   : > { %2818 = vmatmul.msk.f32.gmra.mxu0 %vm2237_vm11, %v2198_v56  ;;  %2091 = vrot.lane.b32.xlu2 %v2015_v9, %s2920_s30  ;;  %v1825_v58 = vld [vmem:[#allocation2 + $0xe1] sm:$0xff] }
 0x26b   : > { %v1881_v48 = vpop.permute.xlu0 %1880  ;;  %v1838_v23 = vld [vmem:[#allocation2 + $0x181] sm:$0xff] }
 0x26c   : > { %v1714_v11 = vpop.permute.xlu2 %1713 }
 0x26d   : > { %1695 = vrot.lane.b32.xlu1 %v1624_v0, %s2921_s7  ;;  %1794 = vst.msk [vmem:[#allocation3 + $0x80] sm:$0xff] %vm1777_vm8, %v1714_v11  ;;  %v1646_v0 = vld [vmem:[#allocation2 + $0x188] sm:$0xff] }
 0x26f   : > { %v1688_v20 = vpop.permute.xlu1 %1687 }
 0x270   : > { %1781 = vst.msk [vmem:[#allocation3 + $0x18] sm:$0xff] %vm1777_vm8, %v1688_v20  ;;  %v2204_v32 = vld [vmem:[#allocation3 + $0x40] sm:$0xff] }
 0x271   : > { %1974 = vst.msk [vmem:[#allocation3 + $0x18] sm:$0xff] %vm1970_vm9, %v1881_v48  ;;  %2824 = vmatmul.msk.f32.vlgmr.msra.gmra.mxu1 %vm2237_vm11, %v2204_v32  ;;  %1733 = vrot.lane.b32.xlu0 %v1643_v26, %s2921_s7  ;;  %v2018_v26 = vld [vmem:[#allocation2 + $0xe2] sm:$0xff] }
 0x272   : > { %2105 = vrot.lane.b32.xlu2 %v2022_v36, %s2920_s30  ;;  %v2026_v32 = vld [vmem:[#allocation2 + $0x142] sm:$0xff] }
 0x273   : > { %v2074_v18 = vpop.permute.xlu0 %2073 }
 0x274   : > { %2167 = vst.msk [vmem:[#allocation3 + $0x18] sm:$0xff] %vm2163_vm10, %v2074_v18  ;;  %v1907_v34 = vpop.permute.xlu2 %1906  ;;  %v2025_v18 = vld [vmem:[#allocation2 + $0x13a] sm:$0xff] }
 0x275   : > { %1900 = vrot.lane.b32.xlu1 %v1823_v3, %s2922_s8  ;;  %1987 = vst.msk [vmem:[#allocation3 + $0x80] sm:$0xff] %vm1970_vm9, %v1907_v34 }
 0x277   : > { %v1893_v33 = vpop.permute.xlu1 %1892 }
 0x278   : > { %1980 = vst.msk [vmem:[#allocation3 + $0x48] sm:$0xff] %vm1970_vm9, %v1893_v33  ;;  %v1833_v33 = vld [vmem:[#allocation2 + $0x141] sm:$0xff] }
 0x279   : > { %1914 = vrot.lane.b32.xlu0 %v3854_v29, %s2922_s8  ;;  %v1836_v29 = vld [vmem:[#allocation2 + $0x169] sm:$0xff] }
 0x27a   : > { %1707 = vrot.lane.b32.xlu2 %v1630_v53, %s2921_s7 }
 0x27b   : > { %v2100_v22 = vpop.permute.xlu0 %2099  ;;  %v2199_v35 = vld [vmem:[#allocation3 + $0x18] sm:$0xff] }
 0x27c   : > { %2180 = vst.msk [vmem:[#allocation3 + $0x80] sm:$0xff] %vm2163_vm10, %v2100_v22  ;;  %2819 = vmatmul.msk.f32.gmra.mxu0 %vm2237_vm11, %v2199_v35  ;;  %v1702_v44 = vpop.permute.xlu2 %1701  ;;  %v1647_v22 = vld [vmem:[#allocation2 + $0x198] sm:$0xff] }
 0x27d   : > { %2081 = vrot.lane.b32.xlu1 %v2010_v15, %s2920_s30  ;;  %1788 = vst.msk [vmem:[#allocation3 + $0x50] sm:$0xff] %vm1777_vm8, %v1702_v44  ;;  %v1640_v44 = vld [vmem:[#allocation2 + $0x140] sm:$0xff] }
 0x27f   : > { %v2086_v30 = vpop.permute.xlu1 %2085 }
 0x280   : > { %2173 = vst.msk [vmem:[#allocation3 + $0x48] sm:$0xff] %vm2163_vm10, %v2086_v30 }
 0x281   : > { %2119 = vrot.lane.b32.xlu0 %v2029_v40, %s2920_s30  ;;  %v2032_v40 = vld [vmem:[#allocation2 + $0x18a] sm:$0xff] }
 0x282   : > { %1721 = vrot.lane.b32.xlu2 %v1637_v47, %s2921_s7 }
 0x283   : > { %v1883_v54 = vpop.permute.xlu0 %1882  ;;  %v2212_v17 = vld [vmem:[#allocation3 + $0x80] sm:$0xff] }
 0x284   : > { %v1716_v27 = vpop.permute.xlu2 %1715  ;;  %2832 = vmatmul.msk.f32.vlgmr.msra.gmra.mxu2 %vm2237_vm11, %v2212_v17 }
 0x285   : > { %1926 = vrot.lane.b32.xlu1 %v1836_v29, %s2922_s8  ;;  %1795 = vst.msk [vmem:[#allocation3 + $0x88] sm:$0xff] %vm1777_vm8, %v1716_v27  ;;  %v1840_v27 = vld [vmem:[#allocation2 + $0x199] sm:$0xff] }
 0x287   : > { %v1690_v50 = vpop.permute.xlu1 %1689  ;;  %v2205_v14 = vld [vmem:[#allocation3 + $0x48] sm:$0xff] }
 0x288   : > { %1782 = vst.msk [vmem:[#allocation3 + $0x20] sm:$0xff] %vm1777_vm8, %v1690_v50  ;;  %2825 = vmatmul.msk.f32.gmra.mxu1 %vm2237_vm11, %v2205_v14  ;;  %v4227_v50 = vld [vmem:[%s4555_s3 + $0x2] ss:$0 sm:$0xff] }
 0x289   : > { %1975 = vst.msk [vmem:[#allocation3 + $0x20] sm:$0xff] %vm1970_vm9, %v1883_v54  ;;  %1723 = vrot.lane.b32.xlu0 %v1638_v16, %s2921_s7  ;;  %v1839_v54 = vld [vmem:[#allocation2 + $0x189] sm:$0xff] }
 0x28a   : > { %2093 = vrot.lane.b32.xlu2 %v2016_v25, %s2920_s30 }
 0x28b   : > { %v2076_v31 = vpop.permute.xlu0 %2075 }
 0x28c   : > { %2168 = vst.msk [vmem:[#allocation3 + $0x20] sm:$0xff] %vm2163_vm10, %v2076_v31  ;;  %v1909_v41 = vpop.permute.xlu2 %1908 }
 0x28d   : > { %1709 = vrot.lane.b32.xlu1 %v1631_v52, %s2921_s7  ;;  %1988 = vst.msk [vmem:[#allocation3 + $0x88] sm:$0xff] %vm1970_vm9, %v1909_v41  ;;  %v2034_v52 = vld [vmem:[#allocation2 + $0x1a2] sm:$0xff] }
 0x28f   : > { %v1895_v43 = vpop.permute.xlu1 %1894 }
 0x290   : > { %1981 = vst.msk [vmem:[#allocation3 + $0x50] sm:$0xff] %vm1970_vm9, %v1895_v43 }
 0x291   : > { %1916 = vrot.lane.b32.xlu0 %v3871_v5, %s2922_s8  ;;  %v1837_v5 = vld [vmem:[#allocation2 + $0x171] sm:$0xff] }
 0x292   : > { %2107 = vrot.lane.b32.xlu2 %v2023_v12, %s2920_s30 }
 0x293   : > { %v2200_v60 = vld [vmem:[#allocation3 + $0x20] sm:$0xff]  ;;  %v2102_v37 = vpop.permute.xlu0 %2101 }
 0x294   : > { %2820 = vmatmul.msk.f32.gmra.mxu0 %vm2237_vm11, %v2200_v60  ;;  %2181 = vst.msk [vmem:[#allocation3 + $0x88] sm:$0xff] %vm2163_vm10, %v2102_v37  ;;  %v1704_v39 = vpop.permute.xlu2 %1703 }
 0x295   : > { %1735 = vrot.lane.b32.xlu1 %v1644_v61, %s2921_s7  ;;  %1789 = vst.msk [vmem:[#allocation3 + $0x58] sm:$0xff] %vm1777_vm8, %v1704_v39  ;;  %v1648_v61 = vld [vmem:[#allocation2 + $0x1a0] sm:$0xff] }
 0x297   : > { %v2088_v7 = vpop.permute.xlu1 %2087 }
 0x298   : > { %2174 = vst.msk [vmem:[#allocation3 + $0x50] sm:$0xff] %vm2163_vm10, %v2088_v7  ;;  %v2033_v7 = vld [vmem:[#allocation2 + $0x19a] sm:$0xff] }
 0x299   : > { %2121 = vrot.lane.b32.xlu0 %v4165_v42, %s2920_s30 }
 0x29a   : > { %1902 = vrot.lane.b32.xlu2 %v1824_v57, %s2922_s8 }
 0x29b   : > { %v1885_v45 = vpop.permute.xlu0 %1884  ;;  %v2213_v19 = vld [vmem:[#allocation3 + $0x88] sm:$0xff] }
 0x29c   : > { %v1718_v8 = vpop.permute.xlu2 %1717  ;;  %2833 = vmatmul.msk.f32.gmra.mxu2 %vm2237_vm11, %v2213_v19 }
 0x29d   : > { %1928 = vrot.lane.b32.xlu1 %v1837_v5, %s2922_s8  ;;  %1796 = vst.msk [vmem:[#allocation3 + $0x90] sm:$0xff] %vm1777_vm8, %v1718_v8 }
 0x29f   : > { %v1692_v10 = vpop.permute.xlu1 %1691  ;;  %v2206_v51 = vld [vmem:[#allocation3 + $0x50] sm:$0xff] }
 0x2a0   : > { %1783 = vst.msk [vmem:[#allocation3 + $0x28] sm:$0xff] %vm1777_vm8, %v1692_v10  ;;  %2826 = vmatmul.msk.f32.gmra.mxu1 %vm2237_vm11, %v2206_v51 }
 0x2a1   : > { %1976 = vst.msk [vmem:[#allocation3 + $0x28] sm:$0xff] %vm1970_vm9, %v1885_v45  ;;  %1725 = vrot.lane.b32.xlu0 %v1639_v49, %s2921_s7 }
 0x2a2   : > { %2095 = vrot.lane.b32.xlu2 %v2017_v28, %s2920_s30 }
 0x2a3   : > { %v1730_v59 = vpop.permute.xlu0 %1729 }
 0x2a4   : > { %1802 = vst.msk [vmem:[#allocation3 + $0xc0] sm:$0xff] %vm1777_vm8, %v1730_v59  ;;  %v2090_v6 = vpop.permute.xlu2 %2089 }
 0x2a5   : > { %1711 = vrot.lane.b32.xlu1 %v1632_v55, %s2921_s7 }
 0x2a7   : > { %v1897_v2 = vpop.permute.xlu1 %1896 }
 0x2a8   : > { %1982 = vst.msk [vmem:[#allocation3 + $0x58] sm:$0xff] %vm1970_vm9, %v1897_v2 }
 0x2a9   : > { %2175 = vst.msk [vmem:[#allocation3 + $0x58] sm:$0xff] %vm2163_vm10, %v2090_v6  ;;  %1918 = vrot.lane.b32.xlu0 %v1832_v13, %s2922_s8 }
 0x2aa   : > { %2109 = vrot.lane.b32.xlu2 %v2024_v46, %s2920_s30  ;;  %v1841_v46 = vld [vmem:[#allocation2 + $0x1a1] sm:$0xff] }
 0x2ab   : > { %v1911_v62 = vpop.permute.xlu0 %1910 }
 0x2ac   : > { %1989 = vst.msk [vmem:[#allocation3 + $0x90] sm:$0xff] %vm1970_vm9, %v1911_v62  ;;  %v2104_v4 = vpop.permute.xlu2 %2103 }
 0x2ad   : > { %1737 = vrot.lane.b32.xlu1 %v1645_v63, %s2921_s7  ;;  %2182 = vst.msk [vmem:[#allocation3 + $0x90] sm:$0xff] %vm2163_vm10, %v2104_v4 }
 0x2af   : > { %v2078_v24 = vpop.permute.xlu1 %2077 }
 0x2b0   : > { %2169 = vst.msk [vmem:[#allocation3 + $0x28] sm:$0xff] %vm2163_vm10, %v2078_v24  ;;  %v2207_v38 = vld [vmem:[#allocation3 + $0x58] sm:$0xff] }
 0x2b1   : > { %2123 = vrot.lane.b32.xlu0 %v4188_v1, %s2920_s30  ;;  %2827 = vmatmul.msk.f32.gmra.mxu1 %vm2237_vm11, %v2207_v38 }
 0x2b2   : > { %1904 = vrot.lane.b32.xlu2 %v1825_v58, %s2922_s8 }
 0x2b3   : > { %v2116_v21 = vpop.permute.xlu0 %2115 }
 0x2b4   : > { %v1706_v9 = vpop.permute.xlu2 %1705  ;;  %v2214_v56 = vld [vmem:[#allocation3 + $0x90] sm:$0xff] }
 0x2b5   : > { %1930 = vrot.lane.b32.xlu1 %v1838_v23, %s2922_s8  ;;  %1790 = vst.msk [vmem:[#allocation3 + $0x60] sm:$0xff] %vm1777_vm8, %v1706_v9  ;;  %2834 = vmatmul.msk.f32.gmra.mxu2 %vm2237_vm11, %v2214_v56 }
 0x2b7   : > { %v1923_v48 = vpop.permute.xlu1 %1922  ;;  %v2201_v11 = vld [vmem:[#allocation3 + $0x28] sm:$0xff] }
 0x2b8   : > { %1995 = vst.msk [vmem:[#allocation3 + $0xc0] sm:$0xff] %vm1970_vm9, %v1923_v48  ;;  %2821 = vmatmul.msk.f32.gmra.mxu0 %vm2237_vm11, %v2201_v11 }
 0x2b9   : > { %2188 = vst.msk [vmem:[#allocation3 + $0xc0] sm:$0xff] %vm2163_vm10, %v2116_v21  ;;  %1739 = vrot.lane.b32.xlu0 %v1646_v0, %s2921_s7 }
 0x2ba   : > { %2097 = vrot.lane.b32.xlu2 %v2018_v26, %s2920_s30 }
 0x2bb   : > { %v1887_v20 = vpop.permute.xlu0 %1886 }
 0x2bc   : > { %v1720_v36 = vpop.permute.xlu2 %1719 }
 0x2bd   : > { %1545 = vrot.lane.b32.xlu1 %v4165_v42, %s2919_s29  ;;  %1797 = vst.msk [vmem:[#allocation3 + $0x98] sm:$0xff] %vm1777_vm8, %v1720_v36 }
 0x2bf   : > { %v1694_v3 = vpop.permute.xlu1 %1693 }
 0x2c0   : > { %1784 = vst.msk [vmem:[#allocation3 + $0x30] sm:$0xff] %vm1777_vm8, %v1694_v3  ;;  %v2220_v34 = vld [vmem:[#allocation3 + $0xc0] sm:$0xff] }
 0x2c1   : > { %1977 = vst.msk [vmem:[#allocation3 + $0x30] sm:$0xff] %vm1970_vm9, %v1887_v20  ;;  %2840 = vmatmul.msk.f32.vlgmr.msra.gmra.mxu3 %vm2237_vm11, %v2220_v34  ;;  %2113 = vrot.lane.b32.xlu0 %v2026_v32, %s2920_s30 }
 0x2c2   : > { %2111 = vrot.lane.b32.xlu2 %v2025_v18, %s2920_s30 }
 0x2c3   : > { %v1732_v53 = vpop.permute.xlu0 %1731 }
 0x2c4   : > { %1803 = vst.msk [vmem:[#allocation3 + $0xc8] sm:$0xff] %vm1777_vm8, %v1732_v53  ;;  %v2092_v15 = vpop.permute.xlu2 %2091 }
 0x2c5   : > { %1920 = vrot.lane.b32.xlu1 %v1833_v33, %s2922_s8 }
 0x2c7   : > { %v1899_v35 = vpop.permute.xlu1 %1898 }
 0x2c8   : > { %1983 = vst.msk [vmem:[#allocation3 + $0x60] sm:$0xff] %vm1970_vm9, %v1899_v35 }
 0x2c9   : > { %2176 = vst.msk [vmem:[#allocation3 + $0x60] sm:$0xff] %vm2163_vm10, %v2092_v15  ;;  %1741 = vrot.lane.b32.xlu0 %v1647_v22, %s2921_s7 }
 0x2ca   : > { %1727 = vrot.lane.b32.xlu2 %v1640_v44, %s2921_s7 }
 0x2cb   : > { %v1913_v30 = vpop.permute.xlu0 %1912 }
 0x2cc   : > { %1990 = vst.msk [vmem:[#allocation3 + $0x98] sm:$0xff] %vm1970_vm9, %v1913_v30  ;;  %v2106_v47 = vpop.permute.xlu2 %2105 }
 0x2cd   : > { %2125 = vrot.lane.b32.xlu1 %v2032_v40, %s2920_s30  ;;  %2183 = vst.msk [vmem:[#allocation3 + $0x98] sm:$0xff] %vm2163_vm10, %v2106_v47 }
 0x2cf   : > { %v2080_v29 = vpop.permute.xlu1 %2079 }
 0x2d0   : > { %2170 = vst.msk [vmem:[#allocation3 + $0x30] sm:$0xff] %vm2163_vm10, %v2080_v29  ;;  %v2208_v17 = vld [vmem:[#allocation3 + $0x60] sm:$0xff] }
 0x2d1   : > { %1549 = vrot.lane.b32.xlu0 %v2032_v40, %s2919_s29  ;;  %2828 = vmatmul.msk.f32.gmra.mxu1 %vm2237_vm11, %v2208_v17 }
 0x2d2   : > { %1932 = vrot.lane.b32.xlu2 %v1839_v54, %s2922_s8 }
 0x2d3   : > { %v2118_v16 = vpop.permute.xlu0 %2117 }
 0x2d4   : > { %v1708_v14 = vpop.permute.xlu2 %1707  ;;  %v2215_v25 = vld [vmem:[#allocation3 + $0x98] sm:$0xff] }
 0x2d5   : > { %1934 = vrot.lane.b32.xlu1 %v1840_v27, %s2922_s8  ;;  %1791 = vst.msk [vmem:[#allocation3 + $0x68] sm:$0xff] %vm1777_vm8, %v1708_v14  ;;  %2835 = vmatmul.msk.f32.gmra.mxu2 %vm2237_vm11, %v2215_v25 }
 0x2d7   : > { %v2351_v31 = vpop.f32.mrf.mxu0  ;;  %v1925_v41 = vpop.permute.xlu1 %1924  ;;  %v2202_v43 = vld [vmem:[#allocation3 + $0x30] sm:$0xff] }
 0x2d8   : > { %v2448_v12 = vmul.f32 %v4227_v50, %v2351_v31  ;;  %1996 = vst.msk [vmem:[#allocation3 + $0xc8] sm:$0xff] %vm1970_vm9, %v1925_v41  ;;  %2822 = vmatmul.msk.f32.gmra.mxu0 %vm2237_vm11, %v2202_v43 }
 0x2d9   : > { %2189 = vst.msk [vmem:[#allocation3 + $0xc8] sm:$0xff] %vm2163_vm10, %v2118_v16  ;;  %2129 = vrot.lane.b32.xlu0 %v2034_v52, %s2920_s30 }
 0x2da   : > { %2480 = vst.msk [vmem:[%s4236_s14] sm:$0xff] %vm476_vm0, %v2448_v12  ;;  %1547 = vrot.lane.b32.xlu2 %v4188_v1, %s2919_s29  ;;  %v2581_v57 = vmul.f32 %v2448_v12, %v2448_v12  ;;  %v2512_v19 = vsel %vm476_vm0, %v2448_v12, 0.0 }
 0x2db   : > { %v1889_v60 = vpop.permute.xlu0 %1888 }
 0x2dc   : > { %v1722_v37 = vpop.permute.xlu2 %1721  ;;  %v2613_v28 = vsel %vm476_vm0, %v2581_v57, 0.0 }
 0x2dd   : > { %1743 = vrot.lane.b32.xlu1 %v1648_v61, %s2921_s7  ;;  %1798 = vst.msk [vmem:[#allocation3 + $0xa0] sm:$0xff] %vm1777_vm8, %v1722_v37  ;;  %s274_s7 = scalar_lea.vmem %s4558_s6, %s2815_s24 }
 0x2df   : > { %v2354_v39 = vpop.f32.mrf.mxu0  ;;  %v1696_v42 = vpop.permute.xlu1 %1695 }
 0x2e0   : > { %v2449_v5 = vmul.f32 %v4227_v50, %v2354_v39  ;;  %1785 = vst.msk [vmem:[#allocation3 + $0x38] sm:$0xff] %vm1777_vm8, %v1696_v42  ;;  %v2221_v45 = vld [vmem:[#allocation3 + $0xc8] sm:$0xff] }
 0x2e1   : > { %1978 = vst.msk [vmem:[#allocation3 + $0x38] sm:$0xff] %vm1970_vm9, %v1889_v60  ;;  %2841 = vmatmul.msk.f32.gmra.mxu3 %vm2237_vm11, %v2221_v45 }
 0x2e2   : > { %2481 = vst.msk [vmem:[%s4236_s14 + $0x8] sm:$0xff] %vm476_vm0, %v2449_v5  ;;  %v2513_v8 = vsel %vm476_vm0, %v2449_v5, 0.0  ;;  %v2582_v49 = vmul.f32 %v2449_v5, %v2449_v5  ;;  %2127 = vrot.lane.b32.xlu2 %v2033_v7, %s2920_s30 }
 0x2e3   : > { %v2514_v10 = vadd.f32 %v2513_v8, %v2512_v19  ;;  %v1734_v51 = vpop.permute.xlu0 %1733 }
 0x2e4   : > { %v2614_v55 = vsel %vm476_vm0, %v2582_v49, 0.0  ;;  %1804 = vst.msk [vmem:[#allocation3 + $0xd0] sm:$0xff] %vm1777_vm8, %v1734_v51  ;;  %v2094_v59 = vpop.permute.xlu2 %2093 }
 0x2e5   : > { %v2615_v6 = vadd.f32 %v2614_v55, %v2613_v28 }
 0x2e7   : > { %v1901_v13 = vpop.permute.xlu1 %1900  ;;  %v2357_v2 = vpop.f32.mrf.mxu0 }
 0x2e8   : > { %1984 = vst.msk [vmem:[#allocation3 + $0x68] sm:$0xff] %vm1970_vm9, %v1901_v13  ;;  %v2450_v63 = vmul.f32 %v4227_v50, %v2357_v2 }
 0x2e9   : > { %2177 = vst.msk [vmem:[#allocation3 + $0x68] sm:$0xff] %vm2163_vm10, %v2094_v59 }
 0x2ea   : > { %2482 = vst.msk [vmem:[%s4236_s14 + $0x10] sm:$0xff] %vm476_vm0, %v2450_v63  ;;  %v2515_v62 = vsel %vm476_vm0, %v2450_v63, 0.0  ;;  %v2583_v4 = vmul.f32 %v2450_v63, %v2450_v63  ;;  %1936 = vrot.lane.b32.xlu2 %v1841_v46, %s2922_s8 }
 0x2eb   : > { %v2516_v1 = vadd.f32 %v2515_v62, %v2514_v10  ;;  %v1915_v24 = vpop.permute.xlu0 %1914 }
 0x2ec   : > { %v2616_v58 = vsel %vm476_vm0, %v2583_v4, 0.0  ;;  %1991 = vst.msk [vmem:[#allocation3 + $0xa0] sm:$0xff] %vm1970_vm9, %v1915_v24  ;;  %v2108_v38 = vpop.permute.xlu2 %2107 }
 0x2ed   : > { %v2617_v23 = vadd.f32 %v2616_v58, %v2615_v6  ;;  %2184 = vst.msk [vmem:[#allocation3 + $0xa0] sm:$0xff] %vm2163_vm10, %v2108_v38 }
 0x2ee   : > { %v2375_v21 = vpop.f32.mrf.mxu1 }
 0x2ef   : > { %v4272_v9 = vmul.f32 %v4227_v50, %v2375_v21  ;;  %v2082_v56 = vpop.permute.xlu1 %2081 }
 0x2f0   : > { %2171 = vst.msk [vmem:[#allocation3 + $0x38] sm:$0xff] %vm2163_vm10, %v2082_v56  ;;  %v2209_v0 = vld [vmem:[#allocation3 + $0x68] sm:$0xff] }
 0x2f1   : > { %2488 = vst.msk [vmem:[%s4236_s14 + $0x40] sm:$0xff] %vm476_vm0, %v4272_v9  ;;  %2829 = vmatmul.msk.f32.gmra.mxu1 %vm2237_vm11, %v2209_v0 }
 0x2f3   : > { %v2120_v48 = vpop.permute.xlu0 %2119 }
 0x2f4   : > { %v1903_v11 = vpop.permute.xlu2 %1902  ;;  %v2216_v26 = vld [vmem:[#allocation3 + $0xa0] sm:$0xff] }
 0x2f5   : > { %2836 = vmatmul.msk.f32.gmra.mxu2 %vm2237_vm11, %v2216_v26 }
 0x2f7   : > { %v1927_v20 = vpop.permute.xlu1 %1926  ;;  %v2203_v36 = vld [vmem:[#allocation3 + $0x38] sm:$0xff] }
 0x2f8   : > { %1997 = vst.msk [vmem:[#allocation3 + $0xd0] sm:$0xff] %vm1970_vm9, %v1927_v20  ;;  %2823 = vmatmul.msk.f32.gmra.mxu0 %vm2237_vm11, %v2203_v36 }
 0x2f9   : > { %v2360_v32 = vpop.f32.mrf.mxu0  ;;  %2190 = vst.msk [vmem:[#allocation3 + $0xd0] sm:$0xff] %vm2163_vm10, %v2120_v48 }
 0x2fa   : > { %v2451_v3 = vmul.f32 %v4227_v50, %v2360_v32 }
 0x2fb   : > { %v1724_v18 = vpop.permute.xlu0 %1723 }
 0x2fc   : > { %2483 = vst.msk [vmem:[%s4236_s14 + $0x18] sm:$0xff] %vm476_vm0, %v2451_v3  ;;  %v2517_v34 = vsel %vm476_vm0, %v2451_v3, 0.0  ;;  %v2584_v33 = vmul.f32 %v2451_v3, %v2451_v3  ;;  %v2096_v53 = vpop.permute.xlu2 %2095 }
 0x2fd   : > { %v2518_v15 = vadd.f32 %v2517_v34, %v2516_v1  ;;  %1799 = vst.msk [vmem:[#allocation3 + $0xa8] sm:$0xff] %vm1777_vm8, %v1724_v18 }
 0x2fe   : > { %v2618_v22 = vsel %vm476_vm0, %v2584_v33, 0.0 }
 0x2ff   : > { %v2619_v35 = vadd.f32 %v2618_v22, %v2617_v23  ;;  %v1710_v44 = vpop.permute.xlu1 %1709 }
 0x300   : > { %1792 = vst.msk [vmem:[#allocation3 + $0x70] sm:$0xff] %vm1777_vm8, %v1710_v44  ;;  %v2222_v40 = vld [vmem:[#allocation3 + $0xd0] sm:$0xff] }
 0x301   : > { %1985 = vst.msk [vmem:[#allocation3 + $0x70] sm:$0xff] %vm1970_vm9, %v1903_v11  ;;  %2842 = vmatmul.msk.f32.gmra.mxu3 %vm2237_vm11, %v2222_v40 }
 0x302   : > { %2178 = vst.msk [vmem:[#allocation3 + $0x70] sm:$0xff] %vm2163_vm10, %v2096_v53 }
 0x303   : > { %v1917_v30 = vpop.permute.xlu0 %1916 }
 0x304   : > { %1992 = vst.msk [vmem:[#allocation3 + $0xa8] sm:$0xff] %vm1970_vm9, %v1917_v30  ;;  %v2110_v47 = vpop.permute.xlu2 %2109 }
 0x305   : > { %v2378_v29 = vpop.f32.mrf.mxu1  ;;  %2185 = vst.msk [vmem:[#allocation3 + $0xa8] sm:$0xff] %vm2163_vm10, %v2110_v47 }
 0x306   : > { %v4296_v54 = vmul.f32 %v4227_v50, %v2378_v29 }
 0x307   : > { %v1736_v17 = vpop.permute.xlu1 %1735  ;;  %v2399_v27 = vpop.f32.mrf.mxu2 }
 0x308   : > { %2489 = vst.msk [vmem:[%s4236_s14 + $0x48] sm:$0xff] %vm476_vm0, %v4296_v54  ;;  %v4302_v16 = vmul.f32 %v4227_v50, %v2399_v27 }
 0x309   : > { %1805 = vst.msk [vmem:[#allocation3 + $0xd8] sm:$0xff] %vm1777_vm8, %v1736_v17  ;;  %v2210_v14 = vld [vmem:[#allocation3 + $0x70] sm:$0xff] }
 0x30a   : > { %2830 = vmatmul.msk.f32.gmra.mxu1 %vm2237_vm11, %v2210_v14  ;;  %2496 = vst.msk [vmem:[%s4236_s14 + $0x80] sm:$0xff] %vm476_vm0, %v4302_v16 }
 0x30b   : > { %v2122_v25 = vpop.permute.xlu0 %2121 }
 0x30c   : > { %v1905_v52 = vpop.permute.xlu2 %1904  ;;  %v2217_v31 = vld [vmem:[#allocation3 + $0xa8] sm:$0xff] }
 0x30d   : > { %2837 = vmatmul.msk.f32.gmra.mxu2 %vm2237_vm11, %v2217_v31 }
 0x30f   : > { %v1929_v41 = vpop.permute.xlu1 %1928 }
 0x310   : > { %1998 = vst.msk [vmem:[#allocation3 + $0xd8] sm:$0xff] %vm1970_vm9, %v1929_v41 }
 0x311   : > { %v2363_v43 = vpop.f32.mrf.mxu0  ;;  %2191 = vst.msk [vmem:[#allocation3 + $0xd8] sm:$0xff] %vm2163_vm10, %v2122_v25 }
 0x312   : > { %v2452_v12 = vmul.f32 %v4227_v50, %v2363_v43 }
 0x313   : > { %v1726_v61 = vpop.permute.xlu0 %1725 }
 0x314   : > { %2484 = vst.msk [vmem:[%s4236_s14 + $0x20] sm:$0xff] %vm476_vm0, %v2452_v12  ;;  %v2519_v60 = vsel %vm476_vm0, %v2452_v12, 0.0  ;;  %v2585_v37 = vmul.f32 %v2452_v12, %v2452_v12  ;;  %v2098_v39 = vpop.permute.xlu2 %2097 }
 0x315   : > { %v2520_v42 = vadd.f32 %v2519_v60, %v2518_v15  ;;  %1800 = vst.msk [vmem:[#allocation3 + $0xb0] sm:$0xff] %vm1777_vm8, %v1726_v61 }
 0x316   : > { %v2620_v7 = vsel %vm476_vm0, %v2585_v37, 0.0 }
 0x317   : > { %v2621_v57 = vadd.f32 %v2620_v7, %v2619_v35  ;;  %v1712_v5 = vpop.permute.xlu1 %1711 }
 0x318   : > { %1793 = vst.msk [vmem:[#allocation3 + $0x78] sm:$0xff] %vm1777_vm8, %v1712_v5  ;;  %v2223_v45 = vld [vmem:[#allocation3 + $0xd8] sm:$0xff] }
 0x319   : > { %1986 = vst.msk [vmem:[#allocation3 + $0x78] sm:$0xff] %vm1970_vm9, %v1905_v52  ;;  %2843 = vmatmul.msk.f32.gmra.mxu3 %vm2237_vm11, %v2223_v45 }
 0x31a   : > { %2179 = vst.msk [vmem:[#allocation3 + $0x78] sm:$0xff] %vm2163_vm10, %v2098_v39 }
 0x31b   : > { %v1919_v19 = vpop.permute.xlu0 %1918 }
 0x31c   : > { %1993 = vst.msk [vmem:[#allocation3 + $0xb0] sm:$0xff] %vm1970_vm9, %v1919_v19  ;;  %v2112_v8 = vpop.permute.xlu2 %2111 }
 0x31d   : > { %v2381_v49 = vpop.f32.mrf.mxu1  ;;  %2186 = vst.msk [vmem:[#allocation3 + $0xb0] sm:$0xff] %vm2163_vm10, %v2112_v8  ;;  %v2589_v8 = vmul.f32 %v4272_v9, %v4272_v9 }
 0x31e   : > { %v4325_v10 = vmul.f32 %v4227_v50, %v2381_v49 }
 0x31f   : > { %v1738_v51 = vpop.permute.xlu1 %1737  ;;  %v2402_v28 = vpop.f32.mrf.mxu2 }
 0x320   : > { %2490 = vst.msk [vmem:[%s4236_s14 + $0x50] sm:$0xff] %vm476_vm0, %v4325_v10  ;;  %v4331_v55 = vmul.f32 %v4227_v50, %v2402_v28 }
 0x321   : > { %1806 = vst.msk [vmem:[#allocation3 + $0xe0] sm:$0xff] %vm1777_vm8, %v1738_v51  ;;  %v2211_v59 = vld [vmem:[#allocation3 + $0x78] sm:$0xff] }
 0x322   : > { %2831 = vmatmul.msk.f32.gmra.mxu1 %vm2237_vm11, %v2211_v59  ;;  %2497 = vst.msk [vmem:[%s4236_s14 + $0x88] sm:$0xff] %vm476_vm0, %v4331_v55 }
 0x323   : > { %v2124_v6 = vpop.permute.xlu0 %2123 }
 0x324   : > { %v2218_v13 = vld [vmem:[#allocation3 + $0xb0] sm:$0xff]  ;;  %v1728_v2 = vpop.permute.xlu2 %1727 }
 0x325   : > { %2838 = vmatmul.msk.f32.gmra.mxu2 %vm2237_vm11, %v2218_v13  ;;  %1801 = vst.msk [vmem:[#allocation3 + $0xb8] sm:$0xff] %vm1777_vm8, %v1728_v2  ;;  %v2527_v13 = vsel %vm476_vm0, %v4272_v9, 0.0  ;;  %v2590_v2 = vmul.f32 %v4296_v54, %v4296_v54 }
 0x327   : > { %v1931_v46 = vpop.permute.xlu1 %1930 }
 0x328   : > { %1999 = vst.msk [vmem:[#allocation3 + $0xe0] sm:$0xff] %vm1970_vm9, %v1931_v46 }
 0x329   : > { %2192 = vst.msk [vmem:[#allocation3 + $0xe0] sm:$0xff] %vm2163_vm10, %v2124_v6 }
 0x32b   : > { %v1740_v63 = vpop.permute.xlu0 %1739 }
 0x32c   : > { %v1933_v62 = vpop.permute.xlu2 %1932 }
 0x32e   : > { %v2384_v4 = vpop.f32.mrf.mxu1 }
 0x32f   : > { %v1546_v1 = vpop.permute.xlu1 %1545  ;;  %v4343_v24 = vmul.f32 %v4227_v50, %v2384_v4  ;;  %v2628_v4 = vsel %vm476_vm0, %v2589_v8, 0.0  ;;  %v2598_v8 = vmul.f32 %v4331_v55, %v4331_v55 }
 0x330   : > { %1613 = vst.msk [vmem:[#allocation3 + $0xe8] sm:$0xff] %vm1583_vm7, %v1546_v1  ;;  %v2224_v58 = vld [vmem:[#allocation3 + $0xe0] sm:$0xff]  ;;  %v2529_v1 = vsel %vm476_vm0, %v4296_v54, 0.0 }
 0x331   : > { %1807 = vst.msk [vmem:[#allocation3 + $0xe8] sm:$0xff] %vm1777_vm8, %v1740_v63  ;;  %2844 = vmatmul.msk.f32.gmra.mxu3 %vm2237_vm11, %v2224_v58  ;;  %v2591_v58 = vmul.f32 %v4325_v10, %v4325_v10  ;;  %v2533_v54 = vsel %vm476_vm0, %v4343_v24, 0.0 }
 0x332   : > { %2491 = vst.msk [vmem:[%s4236_s14 + $0x58] sm:$0xff] %vm476_vm0, %v4343_v24 }
 0x333   : > { %v2114_v38 = vpop.permute.xlu0 %2113  ;;  %2000 = vst.msk [vmem:[#allocation3 + $0xe8] sm:$0xff] %vm1970_vm9, %v1933_v62 }
 0x334   : > { %v1548_v23 = vpop.permute.xlu2 %1547 }
 0x335   : > { %v2366_v21 = vpop.f32.mrf.mxu0  ;;  %1614 = vst.msk [vmem:[#allocation3 + $0xf0] sm:$0xff] %vm1583_vm7, %v1548_v23  ;;  %v2630_v23 = vsel %vm476_vm0, %v2590_v2, 0.0 }
 0x336   : > { %v2453_v56 = vmul.f32 %v4227_v50, %v2366_v21  ;;  %v2531_v21 = vsel %vm476_vm0, %v4325_v10, 0.0 }
 0x337   : > { %v1921_v0 = vpop.permute.xlu1 %1920 }
 0x338   : > { %2485 = vst.msk [vmem:[%s4236_s14 + $0x28] sm:$0xff] %vm476_vm0, %v2453_v56  ;;  %v2521_v48 = vsel %vm476_vm0, %v2453_v56, 0.0  ;;  %v2586_v11 = vmul.f32 %v2453_v56, %v2453_v56  ;;  %v2405_v26 = vpop.f32.mrf.mxu2  ;;  %v2592_v56 = vmul.f32 %v4343_v24, %v4343_v24 }
 0x339   : > { %v2522_v20 = vadd.f32 %v2521_v48, %v2520_v42  ;;  %1994 = vst.msk [vmem:[#allocation3 + $0xb8] sm:$0xff] %vm1970_vm9, %v1921_v0  ;;  %v4359_v36 = vmul.f32 %v4227_v50, %v2405_v26 }
 0x33a   : > { %v2622_v32 = vsel %vm476_vm0, %v2586_v11, 0.0  ;;  %2187 = vst.msk [vmem:[#allocation3 + $0xb8] sm:$0xff] %vm2163_vm10, %v2114_v38  ;;  %v2632_v11 = vsel %vm476_vm0, %v2591_v58, 0.0 }
 0x33b   : > { %v2623_v3 = vadd.f32 %v2622_v32, %v2621_v57  ;;  %v1742_v18 = vpop.permute.xlu0 %1741  ;;  %2498 = vst.msk [vmem:[%s4236_s14 + $0x90] sm:$0xff] %vm476_vm0, %v4359_v36  ;;  %v2599_v2 = vmul.f32 %v4359_v36, %v4359_v36 }
 0x33c   : > { %1808 = vst.msk [vmem:[#allocation3 + $0xf0] sm:$0xff] %vm1777_vm8, %v1742_v18  ;;  %v2128_v22 = vpop.permute.xlu2 %2127 }
 0x33f   : > { %v2126_v34 = vpop.permute.xlu1 %2125 }
 0x340   : > { %2193 = vst.msk [vmem:[#allocation3 + $0xe8] sm:$0xff] %vm2163_vm10, %v2126_v34 }
 0x341   : > { %v2219_v33 = vld [vmem:[#allocation3 + $0xb8] sm:$0xff] }
 0x342   : > { %2839 = vmatmul.msk.f32.gmra.mxu2 %vm2237_vm11, %v2219_v33 }
 0x343   : > { %v1550_v53 = vpop.permute.xlu0 %1549 }
 0x344   : > { %v2423_v15 = vpop.f32.mrf.mxu3  ;;  %1615 = vst.msk [vmem:[#allocation3 + $0xf8] sm:$0xff] %vm1583_vm7, %v1550_v53  ;;  %v1937_v30 = vpop.permute.xlu2 %1936 }
 0x345   : > { %v4371_v35 = vmul.f32 %v4227_v50, %v2423_v15 }
 0x347   : > { %2504 = vst.msk [vmem:[%s4236_s14 + $0xc0] sm:$0xff] %vm476_vm0, %v4371_v35  ;;  %v1935_v44 = vpop.permute.xlu1 %1934  ;;  %v2225_v40 = vld [vmem:[#allocation3 + $0xe8] sm:$0xff] }
 0x348   : > { %2001 = vst.msk [vmem:[#allocation3 + $0xf0] sm:$0xff] %vm1970_vm9, %v1935_v44  ;;  %2845 = vmatmul.msk.f32.gmra.mxu3 %vm2237_vm11, %v2225_v40 }
 0x349   : > { %2194 = vst.msk [vmem:[#allocation3 + $0xf0] sm:$0xff] %vm2163_vm10, %v2128_v22 }
 0x34b   : > { %v2130_v17 = vpop.permute.xlu0 %2129 }
 0x34e   : > { %v2387_v47 = vpop.f32.mrf.mxu1 }
 0x34f   : > { %v1744_v29 = vpop.permute.xlu1 %1743  ;;  %v2460_v27 = vmul.f32 %v4227_v50, %v2387_v47 }
 0x350   : > { %1809 = vst.msk [vmem:[#allocation3 + $0xf8] sm:$0xff] %vm1777_vm8, %v1744_v29  ;;  %v2226_v14 = vld [vmem:[#allocation3 + $0xf0] sm:$0xff] }
 0x351   : > { %2002 = vst.msk [vmem:[#allocation3 + $0xf8] sm:$0xff] %vm1970_vm9, %v1937_v30  ;;  %2846 = vmatmul.msk.f32.gmra.mxu3 %vm2237_vm11, %v2226_v14  ;;  %v2593_v26 = vmul.f32 %v2460_v27, %v2460_v27  ;;  %v2535_v18 = vsel %vm476_vm0, %v2460_v27, 0.0 }
 0x352   : > { %2195 = vst.msk [vmem:[#allocation3 + $0xf8] sm:$0xff] %vm2163_vm10, %v2130_v17 }
 0x353   : > { %2492 = vst.msk [vmem:[%s4236_s14 + $0x60] sm:$0xff] %vm476_vm0, %v2460_v27  ;;  %v2636_v53 = vsel %vm476_vm0, %v2593_v26, 0.0 }
 0x355   : > { %v2369_v25 = vpop.f32.mrf.mxu0 }
 0x356   : > { %v2454_v52 = vmul.f32 %v4227_v50, %v2369_v25 }
 0x358   : > { %2486 = vst.msk [vmem:[%s4236_s14 + $0x30] sm:$0xff] %vm476_vm0, %v2454_v52  ;;  %v2523_v31 = vsel %vm476_vm0, %v2454_v52, 0.0  ;;  %v2587_v41 = vmul.f32 %v2454_v52, %v2454_v52  ;;  %v2408_v43 = vpop.f32.mrf.mxu2 }
 0x359   : > { %v2524_v12 = vadd.f32 %v2523_v31, %v2522_v20  ;;  %v2227_v61 = vld [vmem:[#allocation3 + $0xf8] sm:$0xff]  ;;  %v4391_v60 = vmul.f32 %v4227_v50, %v2408_v43 }
 0x35a   : > { %v2624_v37 = vsel %vm476_vm0, %v2587_v41, 0.0  ;;  %2847 = vmatmul.msk.f32.gmra.mxu3 %vm2237_vm11, %v2227_v61 }
 0x35b   : > { %v2625_v39 = vadd.f32 %v2624_v37, %v2623_v3  ;;  %2499 = vst.msk [vmem:[%s4236_s14 + $0x98] sm:$0xff] %vm476_vm0, %v4391_v60  ;;  %v2634_v3 = vsel %vm476_vm0, %v2592_v56, 0.0 }
 0x364   : > { %v2426_v42 = vpop.f32.mrf.mxu3 }
 0x365   : > { %v4399_v7 = vmul.f32 %v4227_v50, %v2426_v42 }
 0x367   : > { %2505 = vst.msk [vmem:[%s4236_s14 + $0xc8] sm:$0xff] %vm476_vm0, %v4399_v7 }
 0x36e   : > { %v2390_v57 = vpop.f32.mrf.mxu1 }
 0x36f   : > { %v2461_v5 = vmul.f32 %v4227_v50, %v2390_v57 }
 0x371   : > { %2493 = vst.msk [vmem:[%s4236_s14 + $0x68] sm:$0xff] %vm476_vm0, %v2461_v5  ;;  %v2594_v10 = vmul.f32 %v2461_v5, %v2461_v5  ;;  %v2537_v15 = vsel %vm476_vm0, %v2461_v5, 0.0 }
 0x373   : > { %v2638_v30 = vsel %vm476_vm0, %v2594_v10, 0.0 }
 0x375   : > { %v2372_v45 = vpop.f32.mrf.mxu0 }
 0x376   : > { %v2455_v19 = vmul.f32 %v4227_v50, %v2372_v45 }
 0x378   : > { %2487 = vst.msk [vmem:[%s4236_s14 + $0x38] sm:$0xff] %vm476_vm0, %v2455_v19  ;;  %v2525_v49 = vsel %vm476_vm0, %v2455_v19, 0.0  ;;  %v2588_v51 = vmul.f32 %v2455_v19, %v2455_v19  ;;  %v2411_v28 = vpop.f32.mrf.mxu2  ;;  %v2543_v19 = vsel %vm476_vm0, %v4302_v16, 0.0 }
 0x379   : > { %v2526_v59 = vadd.f32 %v2525_v49, %v2524_v12  ;;  %v4414_v6 = vmul.f32 %v4227_v50, %v2411_v28 }
 0x37a   : > { %v2626_v46 = vsel %vm476_vm0, %v2588_v51, 0.0 }
 0x37b   : > { %v2528_v63 = vadd.f32 %v2527_v13, %v2526_v59  ;;  %v2627_v62 = vadd.f32 %v2626_v46, %v2625_v39  ;;  %2500 = vst.msk [vmem:[%s4236_s14 + $0xa0] sm:$0xff] %vm476_vm0, %v4414_v6  ;;  %v2597_v39 = vmul.f32 %v4302_v16, %v4302_v16  ;;  %v2545_v13 = vsel %vm476_vm0, %v4331_v55, 0.0 }
 0x37c   : > { %v2646_v16 = vsel %vm476_vm0, %v2598_v8, 0.0  ;;  %v2648_v55 = vsel %vm476_vm0, %v2599_v2, 0.0 }
 0x37d   : > { %v2530_v38 = vadd.f32 %v2529_v1, %v2528_v63  ;;  %v2629_v9 = vadd.f32 %v2628_v4, %v2627_v62  ;;  %v2644_v59 = vsel %vm476_vm0, %v2597_v39, 0.0  ;;  %v2547_v62 = vsel %vm476_vm0, %v4359_v36, 0.0 }
 0x37e   : > { %v2600_v4 = vmul.f32 %v4391_v60, %v4391_v60 }
 0x37f   : > { %v2631_v0 = vadd.f32 %v2630_v23, %v2629_v9  ;;  %v2532_v48 = vadd.f32 %v2531_v21, %v2530_v38  ;;  %v2549_v23 = vsel %vm476_vm0, %v4391_v60, 0.0  ;;  %v2601_v21 = vmul.f32 %v4414_v6, %v4414_v6 }
 0x381   : > { %v2534_v20 = vadd.f32 %v2533_v54, %v2532_v48  ;;  %v2633_v32 = vadd.f32 %v2632_v11, %v2631_v0  ;;  %v2650_v0 = vsel %vm476_vm0, %v2600_v4, 0.0  ;;  %v2551_v48 = vsel %vm476_vm0, %v4414_v6, 0.0 }
 0x382   : > { %v2652_v26 = vsel %vm476_vm0, %v2601_v21, 0.0 }
 0x383   : > { %v2536_v34 = vadd.f32 %v2535_v18, %v2534_v20  ;;  %v2635_v33 = vadd.f32 %v2634_v3, %v2633_v32 }
 0x384   : > { %v2429_v22 = vpop.f32.mrf.mxu3 }
 0x385   : > { %v2538_v44 = vadd.f32 %v2537_v15, %v2536_v34  ;;  %v2637_v24 = vadd.f32 %v2636_v53, %v2635_v33  ;;  %v4442_v40 = vmul.f32 %v4227_v50, %v2429_v22 }
 0x387   : > { %v2639_v47 = vadd.f32 %v2638_v30, %v2637_v24  ;;  %2506 = vst.msk [vmem:[%s4236_s14 + $0xd0] sm:$0xff] %vm476_vm0, %v4442_v40  ;;  %v2393_v29 = vpop.f32.mrf.mxu1  ;;  %v2605_v30 = vmul.f32 %v4371_v35, %v4371_v35  ;;  %v2607_v39 = vmul.f32 %v4442_v40, %v4442_v40 }
 0x388   : > { %v2462_v17 = vmul.f32 %v4227_v50, %v2393_v29 }
 0x38a   : > { %2494 = vst.msk [vmem:[%s4236_s14 + $0x70] sm:$0xff] %vm476_vm0, %v2462_v17  ;;  %v2595_v25 = vmul.f32 %v2462_v17, %v2462_v17  ;;  %v2539_v41 = vsel %vm476_vm0, %v2462_v17, 0.0 }
 0x38b   : > { %v2540_v37 = vadd.f32 %v2539_v41, %v2538_v44 }
 0x38c   : > { %v2640_v12 = vsel %vm476_vm0, %v2595_v25, 0.0  ;;  %v2606_v25 = vmul.f32 %v4399_v7, %v4399_v7 }
 0x38d   : > { %v2641_v5 = vadd.f32 %v2640_v12, %v2639_v47 }
 0x390   : > { %v2414_v27 = vpop.f32.mrf.mxu2 }
 0x391   : > { %v2469_v14 = vmul.f32 %v4227_v50, %v2414_v27 }
 0x393   : > { %2501 = vst.msk [vmem:[%s4236_s14 + $0xa8] sm:$0xff] %vm476_vm0, %v2469_v14  ;;  %v2602_v3 = vmul.f32 %v2469_v14, %v2469_v14  ;;  %v2553_v18 = vsel %vm476_vm0, %v2469_v14, 0.0  ;;  %v2559_v14 = vsel %vm476_vm0, %v4371_v35, 0.0 }
 0x395   : > { %v2654_v33 = vsel %vm476_vm0, %v2602_v3, 0.0 }
 0x39c   : > { %v2432_v52 = vpop.f32.mrf.mxu3 }
 0x39d   : > { %v4455_v31 = vmul.f32 %v4227_v50, %v2432_v52 }
 0x39f   : > { %2507 = vst.msk [vmem:[%s4236_s14 + $0xd8] sm:$0xff] %vm476_vm0, %v4455_v31  ;;  %v2396_v43 = vpop.f32.mrf.mxu1 }
 0x3a0   : > { %v2463_v61 = vmul.f32 %v4227_v50, %v2396_v43 }
 0x3a2   : > { %2495 = vst.msk [vmem:[%s4236_s14 + $0x78] sm:$0xff] %vm476_vm0, %v2463_v61  ;;  %v2541_v42 = vsel %vm476_vm0, %v2463_v61, 0.0  ;;  %v2596_v57 = vmul.f32 %v2463_v61, %v2463_v61  ;;  %v2660_v61 = vsel %vm476_vm0, %v2605_v30, 0.0 }
 0x3a3   : > { %v2542_v45 = vadd.f32 %v2541_v42, %v2540_v37  ;;  %v2561_v37 = vsel %vm476_vm0, %v4399_v7, 0.0 }
 0x3a4   : > { %v2642_v49 = vsel %vm476_vm0, %v2596_v57, 0.0 }
 0x3a5   : > { %v2544_v51 = vadd.f32 %v2543_v19, %v2542_v45  ;;  %v2643_v28 = vadd.f32 %v2642_v49, %v2641_v5  ;;  %v2662_v5 = vsel %vm476_vm0, %v2606_v25, 0.0  ;;  %v2563_v45 = vsel %vm476_vm0, %v4442_v40, 0.0 }
 0x3a6   : > { %v2664_v49 = vsel %vm476_vm0, %v2607_v39, 0.0 }
 0x3a7   : > { %v2546_v46 = vadd.f32 %v2545_v13, %v2544_v51  ;;  %v2645_v63 = vadd.f32 %v2644_v59, %v2643_v28  ;;  %v2608_v51 = vmul.f32 %v4455_v31, %v4455_v31  ;;  %v2565_v28 = vsel %vm476_vm0, %v4455_v31, 0.0 }
 0x3a8   : > { %v2417_v1 = vpop.f32.mrf.mxu2 }
 0x3a9   : > { %v2548_v58 = vadd.f32 %v2547_v62, %v2546_v46  ;;  %v2647_v38 = vadd.f32 %v2646_v16, %v2645_v63  ;;  %v2470_v9 = vmul.f32 %v4227_v50, %v2417_v1  ;;  %v2666_v46 = vsel %vm476_vm0, %v2608_v51, 0.0 }
 0x3ab   : > { %v2649_v56 = vadd.f32 %v2648_v55, %v2647_v38  ;;  %2502 = vst.msk [vmem:[%s4236_s14 + $0xb0] sm:$0xff] %vm476_vm0, %v2470_v9  ;;  %v2550_v36 = vadd.f32 %v2549_v23, %v2548_v58  ;;  %v2603_v10 = vmul.f32 %v2470_v9, %v2470_v9  ;;  %v2555_v6 = vsel %vm476_vm0, %v2470_v9, 0.0 }
 0x3ad   : > { %v2552_v11 = vadd.f32 %v2551_v48, %v2550_v36  ;;  %v2651_v54 = vadd.f32 %v2650_v0, %v2649_v56  ;;  %v2656_v22 = vsel %vm476_vm0, %v2603_v10, 0.0 }
 0x3af   : > { %v2653_v20 = vadd.f32 %v2652_v26, %v2651_v54  ;;  %v2554_v34 = vadd.f32 %v2553_v18, %v2552_v11 }
 0x3b1   : > { %v2655_v53 = vadd.f32 %v2654_v33, %v2653_v20  ;;  %v2556_v24 = vadd.f32 %v2555_v6, %v2554_v34 }
 0x3b3   : > { %v2657_v17 = vadd.f32 %v2656_v22, %v2655_v53 }
 0x3b4   : > { %v2435_v32 = vpop.f32.mrf.mxu3 }
 0x3b5   : > { %v2476_v60 = vmul.f32 %v4227_v50, %v2435_v32 }
 0x3b7   : > { %2508 = vst.msk [vmem:[%s4236_s14 + $0xe0] sm:$0xff] %vm476_vm0, %v2476_v60  ;;  %v2609_v40 = vmul.f32 %v2476_v60, %v2476_v60  ;;  %v2567_v16 = vsel %vm476_vm0, %v2476_v60, 0.0 }
 0x3b9   : > { %v2668_v4 = vsel %vm476_vm0, %v2609_v40, 0.0 }
 0x3c5   : > { %v2420_v15 = vpop.f32.mrf.mxu2 }
 0x3c6   : > { %v2471_v44 = vmul.f32 %v4227_v50, %v2420_v15 }
 0x3c8   : > { %2503 = vst.msk [vmem:[%s4236_s14 + $0xb8] sm:$0xff] %vm476_vm0, %v2471_v44  ;;  %v2557_v47 = vsel %vm476_vm0, %v2471_v44, 0.0  ;;  %v2604_v29 = vmul.f32 %v2471_v44, %v2471_v44 }
 0x3c9   : > { %v2558_v27 = vadd.f32 %v2557_v47, %v2556_v24 }
 0x3ca   : > { %v2658_v52 = vsel %vm476_vm0, %v2604_v29, 0.0 }
 0x3cb   : > { %v2560_v41 = vadd.f32 %v2559_v14, %v2558_v27  ;;  %v2659_v43 = vadd.f32 %v2658_v52, %v2657_v17  ;;  %v2438_v12 = vpop.f32.mrf.mxu3 }
 0x3cc   : > { %v2477_v42 = vmul.f32 %v4227_v50, %v2438_v12 }
 0x3cd   : > { %v2562_v57 = vadd.f32 %v2561_v37, %v2560_v41  ;;  %v2661_v35 = vadd.f32 %v2660_v61, %v2659_v43 }
 0x3ce   : > { %2509 = vst.msk [vmem:[%s4236_s14 + $0xe8] sm:$0xff] %vm476_vm0, %v2477_v42  ;;  %v2610_v1 = vmul.f32 %v2477_v42, %v2477_v42  ;;  %v2569_v31 = vsel %vm476_vm0, %v2477_v42, 0.0 }
 0x3cf   : > { %v2663_v19 = vadd.f32 %v2662_v5, %v2661_v35  ;;  %v2564_v8 = vadd.f32 %v2563_v45, %v2562_v57 }
 0x3d0   : > { %v2670_v21 = vsel %vm476_vm0, %v2610_v1, 0.0 }
 0x3d1   : > { %v2665_v7 = vadd.f32 %v2664_v49, %v2663_v19  ;;  %v2566_v13 = vadd.f32 %v2565_v28, %v2564_v8 }
 0x3d3   : > { %v2667_v63 = vadd.f32 %v2666_v46, %v2665_v7  ;;  %v2568_v62 = vadd.f32 %v2567_v16, %v2566_v13 }
 0x3d4   : > { %v2441_v59 = vpop.f32.mrf.mxu3 }
 0x3d5   : > { %v2478_v2 = vmul.f32 %v4227_v50, %v2441_v59  ;;  %v2669_v38 = vadd.f32 %v2668_v4, %v2667_v63  ;;  %v2570_v55 = vadd.f32 %v2569_v31, %v2568_v62 }
 0x3d7   : > { %2510 = vst.msk [vmem:[%s4236_s14 + $0xf0] sm:$0xff] %vm476_vm0, %v2478_v2  ;;  %v2611_v58 = vmul.f32 %v2478_v2, %v2478_v2  ;;  %v2571_v9 = vsel %vm476_vm0, %v2478_v2, 0.0  ;;  %v2671_v0 = vadd.f32 %v2670_v21, %v2669_v38 }
 0x3d8   : > { %v2572_v48 = vadd.f32 %v2571_v9, %v2570_v55 }
 0x3d9   : > { %v2672_v56 = vsel %vm476_vm0, %v2611_v58, 0.0 }
 0x3da   : > { %v2673_v26 = vadd.f32 %v2672_v56, %v2671_v0 }
 0x3dd   : > { %v2444_v23 = vpop.f32.mrf.mxu3 }
 0x3de   : > { %v2479_v36 = vmul.f32 %v4227_v50, %v2444_v23 }
 0x3e0   : > { %2511 = vst.msk [vmem:[%s4236_s14 + $0xf8] sm:$0xff] %vm476_vm0, %v2479_v36  ;;  %v2573_v11 = vsel %vm476_vm0, %v2479_v36, 0.0  ;;  %v2612_v54 = vmul.f32 %v2479_v36, %v2479_v36 }
 0x3e1   : > { %v2574_v20 = vadd.f32 %v2573_v11, %v2572_v48 }
 0x3e2   : > { %v2674_v32 = vsel %vm476_vm0, %v2612_v54, 0.0 }
 0x3e3   : > { %v2575_v60 = vrot.slane %v2574_v20, 4  ;;  %v2675_v3 = vadd.f32 %v2674_v32, %v2673_v26 }
 0x3e5   : > { %v2576_v18 = vadd.f32 %v2575_v60, %v2574_v20  ;;  %v2676_v10 = vrot.slane %v2675_v3, 4 }
 0x3e7   : > { %v2577_v34 = vrot.slane %v2576_v18, 2  ;;  %v2677_v33 = vadd.f32 %v2676_v10, %v2675_v3 }
 0x3e9   : > { %v2578_v6 = vadd.f32 %v2577_v34, %v2576_v18  ;;  %v2678_v50 = vrot.slane %v2677_v33, 2 }
 0x3eb   : > { %v2579_v53 = vrot.slane %v2578_v6, 1  ;;  %v2679_v15 = vadd.f32 %v2678_v50, %v2677_v33 }
 0x3ed   : > { %v2680_v22 = vrot.slane %v2679_v15, 1  ;;  %v2580_v44 = vadd.f32 %v2579_v53, %v2578_v6 }
 0x3ef   : > { %v2681_v24 = vadd.f32 %v2680_v22, %v2679_v15 }
 0x3f1   : > { %v2683_v30 = vsel %vm2682_vm12, %v2580_v44, %v2681_v24 }
 0x3f2   : > { %2684 = vst.msk [vmem:[%s274_s7] sm:$0x3] %vm511_vm2, %v2683_v30 }
 0x3f3 PF: > { %s17_s21 = sadd.s32 1, %s2912_s21  }
 0x3f4   : > { %p14_p4 = scmp.ge.s32.totalorder %s17_s21, 4  }
 0x3f6   :  { %16 = sbr.rel (!%p14_p4) target bundleno = 1 (0x1), region = 93 }

</bundles_post_ra>
